<compile_context>
chip_gen: v5e
topology: v5e:2x2
jax: 0.10.0
libtpu: 0.0.40
codegen_flags: <defaults>
</compile_context>

<pallas_src>
import functools

import jax
import jax.numpy as jnp
from jax.experimental import pallas as pl
from jax.experimental.pallas import tpu as pltpu

BN_EPS = 1e-5
STAGE_STRIDES = (1, 2, 2, 2)


def _round_up(a, b):
    return (a + b - 1) // b * b


def _pick_tk(kp, cap=512):
    """Largest multiple of 128 that divides kp and is <= cap (kp % 128 == 0)."""
    best = 128
    for t in range(128, cap + 1, 128):
        if kp % t == 0:
            best = t
    return best


def _maybe_pad2d(x, mp, np_):
    m, n = x.shape
    if m == mp and n == np_:
        return x
    return jnp.pad(x, ((0, mp - m), (0, np_ - n)))


# ----------------------------------------------------------------------------
# Pallas kernel: fused matmul + bias (+ residual) (+ ReLU), f32 accumulation
# ----------------------------------------------------------------------------
def _mm_epilogue_kernel(*refs, relu, has_residual):
    if has_residual:
        x_ref, w_ref, b_ref, r_ref, o_ref, acc_ref = refs
    else:
        x_ref, w_ref, b_ref, o_ref, acc_ref = refs
        r_ref = None

    @pl.when(pl.program_id(2) == 0)
    def _():
        acc_ref[...] = jnp.zeros_like(acc_ref)

    acc_ref[...] += jnp.dot(x_ref[...], w_ref[...],
                            preferred_element_type=jnp.float32)

    @pl.when(pl.program_id(2) == pl.num_programs(2) - 1)
    def _():
        y = acc_ref[...] + b_ref[...]
        if has_residual:
            y = y + r_ref[...].astype(jnp.float32)
        if relu:
            y = jnp.maximum(y, 0.0)
        o_ref[...] = y.astype(o_ref.dtype)


def matmul_bias(x, w, bias, *, relu=False, residual=None,
                out_dtype=jnp.bfloat16):
    """out = maybe_relu((x @ w) + bias [+ residual]); bf16 operands, f32 acc."""
    M, K = x.shape
    K2, N = w.shape
    assert K == K2

    tm = min(256, _round_up(M, 8))
    tn = min(256, _round_up(N, 128))
    Kp = _round_up(K, 128)
    tk = _pick_tk(Kp, cap=512)
    Mp = _round_up(M, tm)
    Np = _round_up(N, tn)

    xp = _maybe_pad2d(x.astype(jnp.bfloat16), Mp, Kp)
    wp = _maybe_pad2d(w.astype(jnp.bfloat16), Kp, Np)
    bp = _maybe_pad2d(bias.astype(jnp.float32).reshape(1, N), 1, Np)

    in_specs = [
        pl.BlockSpec((tm, tk), lambda i, j, k: (i, k)),
        pl.BlockSpec((tk, tn), lambda i, j, k: (k, j)),
        pl.BlockSpec((1, tn), lambda i, j, k: (0, j)),
    ]
    args = [xp, wp, bp]
    has_residual = residual is not None
    if has_residual:
        rp = _maybe_pad2d(residual.astype(jnp.bfloat16), Mp, Np)
        in_specs.append(pl.BlockSpec((tm, tn), lambda i, j, k: (i, j)))
        args.append(rp)

    grid = (Mp // tm, Np // tn, Kp // tk)
    out = pl.pallas_call(
        functools.partial(_mm_epilogue_kernel, relu=relu,
                          has_residual=has_residual),
        out_shape=jax.ShapeDtypeStruct((Mp, Np), out_dtype),
        grid_spec=pltpu.PrefetchScalarGridSpec(
            num_scalar_prefetch=0,
            grid=grid,
            in_specs=in_specs,
            out_specs=pl.BlockSpec((tm, tn), lambda i, j, k: (i, j)),
            scratch_shapes=[pltpu.VMEM((tm, tn), jnp.float32)],
        ),
        compiler_params=pltpu.CompilerParams(
            dimension_semantics=("parallel", "parallel", "arbitrary")),
    )(*args)
    if Mp == M and Np == N:
        return out
    return out[:M, :N]


# ----------------------------------------------------------------------------
# Conv = im2col (bf16 glue) + fused Pallas matmul / bias / residual / ReLU.
# Activations carry channel dims padded to multiples of 128 (padded channels
# are exactly zero throughout the network), so kernel outputs stay lane-dense
# and no per-layer slice / re-pad of HBM activations is needed.
# ----------------------------------------------------------------------------
def _im2col_nhwc(x, kh, kw, stride, pad):
    N, H, W, C = x.shape
    x = x.astype(jnp.bfloat16)
    xp = jnp.pad(x, ((0, 0), (pad, pad), (pad, pad), (0, 0)))
    Ho = (H + 2 * pad - kh) // stride + 1
    Wo = (W + 2 * pad - kw) // stride + 1
    pats = [xp[:, i:i + stride * Ho:stride, j:j + stride * Wo:stride, :]
            for i in range(kh) for j in range(kw)]
    cols = jnp.stack(pats, axis=3)                  # (N, Ho, Wo, kh*kw, C)
    cols = cols.reshape(N * Ho * Wo, kh * kw * C)   # feature order (i, j, c)
    return cols, Ho, Wo


def conv_bn(x, p, stride, pad, relu, residual=None, out_dtype=jnp.bfloat16):
    """x: NHWC with (possibly) channel-padded C >= w's cin. Returns NHWC with
    output channels padded up to a multiple of 128 (padding lanes are zero)."""
    w, scale, bias = p["w"], p["scale"], p["bias"]
    cout, cin, kh, kw = w.shape
    cpad_in = x.shape[-1]
    cpad_out = _round_up(cout, 128)

    cols, Ho, Wo = _im2col_nhwc(x, kh, kw, stride, pad)

    # (Cout, Cin, Kh, Kw) -> (Kh, Kw, Cin, Cout); fold BN scale; pad Cin/Cout.
    wm = jnp.transpose(w, (2, 3, 1, 0)).astype(jnp.float32)
    wm = wm * scale[None, None, None, :].astype(jnp.float32)
    if cpad_in != cin or cpad_out != cout:
        wm = jnp.pad(wm, ((0, 0), (0, 0),
                          (0, cpad_in - cin), (0, cpad_out - cout)))
    wm = wm.reshape(kh * kw * cpad_in, cpad_out)
    bp = bias.astype(jnp.float32)
    if cpad_out != cout:
        bp = jnp.pad(bp, (0, cpad_out - cout))

    res2 = residual.reshape(-1, cpad_out) if residual is not None else None
    y = matmul_bias(cols, wm, bp, relu=relu, residual=res2,
                    out_dtype=out_dtype)
    return y.reshape(x.shape[0], Ho, Wo, cpad_out)


# ----------------------------------------------------------------------------
# MaxPool2d(kernel=3, stride=2, padding=1): plain-JAX 9-way max tree
# (memory-bound; XLA fuses this — avoids materializing a 9x-duplicated tensor)
# ----------------------------------------------------------------------------
def maxpool2d_3x3_s2_p1(x):
    N, H, W, C = x.shape
    k, s, p = 3, 2, 1
    Ho = (H + 2 * p - k) // s + 1
    Wo = (W + 2 * p - k) // s + 1
    xp = jnp.pad(x, ((0, 0), (p, p), (p, p), (0, 0)),
                 constant_values=-jnp.inf)
    out = None
    for i in range(k):
        for j in range(k):
            win = xp[:, i:i + s * Ho:s, j:j + s * Wo:s, :]
            out = win if out is None else jnp.maximum(out, win)
    return out


# ----------------------------------------------------------------------------
# Parameters (deterministic synthetic init; ResNet-18 shapes)
# ----------------------------------------------------------------------------
def _conv_bn_params(key, cin, cout, k):
    kw_, kg, kb, km, kv = jax.random.split(key, 5)
    fan_in = cin * k * k
    w = jax.random.normal(kw_, (cout, cin, k, k), jnp.float32) * (2.0 / fan_in) ** 0.5
    gamma = 1.0 + 0.1 * jax.random.normal(kg, (cout,), jnp.float32)
    beta = 0.1 * jax.random.normal(kb, (cout,), jnp.float32)
    mean = 0.1 * jax.random.normal(km, (cout,), jnp.float32)
    var = 0.5 + jax.random.uniform(kv, (cout,), jnp.float32)
    scale = gamma / jnp.sqrt(var + BN_EPS)
    bias = beta - mean * scale
    return {"w": w, "scale": scale, "bias": bias}


def init_params(key, input_channels=3, num_classes=13, latent_dim=16):
    it = iter(jax.random.split(key, 40))
    params = {"conv1": _conv_bn_params(next(it), input_channels, 64, 7)}
    cfg = [(64, 64, 1), (64, 128, 2), (128, 256, 2), (256, 512, 2)]
    layers = []
    for cin, cout, stride in cfg:
        b1 = {"conv1": _conv_bn_params(next(it), cin, cout, 3),
              "conv2": _conv_bn_params(next(it), cout, cout, 3)}
        if stride != 1 or cin != cout:
            b1["down"] = _conv_bn_params(next(it), cin, cout, 1)
        b2 = {"conv1": _conv_bn_params(next(it), cout, cout, 3),
              "conv2": _conv_bn_params(next(it), cout, cout, 3)}
        layers.append([b1, b2])
    params["layers"] = layers
    kl1, kl2, kc1, kc2 = jax.random.split(next(it), 4)
    params["latent_w"] = jax.random.normal(kl1, (512, latent_dim), jnp.float32) * (1.0 / 512) ** 0.5
    params["latent_b"] = 0.1 * jax.random.normal(kl2, (latent_dim,), jnp.float32)
    params["cls_w"] = jax.random.normal(kc1, (latent_dim, num_classes), jnp.float32) * (1.0 / latent_dim) ** 0.5
    params["cls_b"] = 0.1 * jax.random.normal(kc2, (num_classes,), jnp.float32)
    return params


# ----------------------------------------------------------------------------
# Forward pass (matches ResNetCustom.forward semantics)
# ----------------------------------------------------------------------------
def resnet_custom_forward(params, x_nchw):
    x = jnp.transpose(x_nchw, (0, 2, 3, 1)).astype(jnp.bfloat16)  # NCHW -> NHWC
    # stem: conv7x7 s2 p3 + BN + ReLU + maxpool3x3 s2 p1
    x = conv_bn(x, params["conv1"], stride=2, pad=3, relu=True)
    x = maxpool2d_3x3_s2_p1(x)
    # 4 stages of 2 BasicBlocks (residual add + ReLU fused into conv2 epilogue)
    for stage_idx, blocks in enumerate(params["layers"]):
        for b_idx, blk in enumerate(blocks):
            stride = STAGE_STRIDES[stage_idx] if b_idx == 0 else 1
            identity = x
            if "down" in blk:
                identity = conv_bn(x, blk["down"], stride=stride, pad=0,
                                   relu=False)
            out = conv_bn(x, blk["conv1"], stride=stride, pad=1, relu=True)
            x = conv_bn(out, blk["conv2"], stride=1, pad=1, relu=True,
                        residual=identity)
    # adaptive avg-pool to (1,1) + flatten -> (N, 512)  (512 is already lane-aligned)
    feat = jnp.mean(x.astype(jnp.float32), axis=(1, 2))
    latent = matmul_bias(feat, params["latent_w"], params["latent_b"],
                         relu=False, out_dtype=jnp.float32)
    cls = matmul_bias(latent, params["cls_w"], params["cls_b"],
                      relu=False, out_dtype=jnp.float32)
    return cls, latent


if __name__ == "__main__":
    key = jax.random.PRNGKey(0)
    kp, kx = jax.random.split(key)
    params = init_params(kp, input_channels=3, num_classes=13, latent_dim=16)
    x = jax.random.normal(kx, (2, 3, 32, 32), jnp.float32)   # NCHW like PyTorch

    forward = jax.jit(resnet_custom_forward)
    cls_out, latent_out = forward(params, x)
    jax.block_until_ready((cls_out, latent_out))

    assert cls_out.shape == (2, 13) and latent_out.shape == (2, 16)
    assert bool(jnp.all(jnp.isfinite(cls_out))) and bool(jnp.all(jnp.isfinite(latent_out)))
    print("KERNEL_OK")
</pallas_src>

<mosaic_0001>
module attributes {stable_mosaic.version = 11 : i64} {
  func.func @_mm_epilogue_kernel(%arg0: i32, %arg1: i32, %arg2: i32, %arg3: memref<256x256xbf16, #tpu.memory_space<vmem>>, %arg4: memref<256x128xbf16, #tpu.memory_space<vmem>>, %arg5: memref<1x128xf32, #tpu.memory_space<vmem>>, %arg6: memref<256x128xbf16, #tpu.memory_space<vmem>>, %arg7: memref<256x128xf32, #tpu.memory_space<vmem>>) attributes {dimension_semantics = [#tpu.dimension_semantics<parallel>, #tpu.dimension_semantics<parallel>, #tpu.dimension_semantics<arbitrary>], iteration_bounds = array<i64: 2, 1, 1>, scalar_prefetch = 0 : i64, scratch_operands = 1 : i64, tpu.core_type = #tpu.core_type<tc>, window_params = [{transform_indices = @transform_0, window_bounds = array<i64: 256, 256>}, {transform_indices = @transform_1, window_bounds = array<i64: 256, 128>}, {transform_indices = @transform_2, window_bounds = array<i64: 1, 128>}, {transform_indices = @transform_3, window_bounds = array<i64: 256, 128>}]} {
    %c0_i32 = arith.constant 0 : i32
    %0 = arith.cmpi eq, %arg2, %c0_i32 : i32
    %1 = arith.extui %0 : i1 to i32
    %c0_i32_0 = arith.constant 0 : i32
    %2 = arith.cmpi ne, %1, %c0_i32_0 : i32
    scf.if %2 {
      %cst_10 = arith.constant 0.000000e+00 : f32
      %12 = vector.broadcast %cst_10 : f32 to vector<256x128xf32>
      %c0_11 = arith.constant 0 : index
      %c0_12 = arith.constant 0 : index
      %13 = vector.load %arg7[%c0_11, %c0_12] : memref<256x128xf32, #tpu.memory_space<vmem>>, vector<256x128xf32>
      tpu.vector_store %arg7[%c0_11, %c0_12], %12 {strides = array<i32>} : memref<256x128xf32, #tpu.memory_space<vmem>>, vector<256x128xf32>,
    } else {
    }
    %c0 = arith.constant 0 : index
    %c0_1 = arith.constant 0 : index
    %3 = vector.load %arg7[%c0, %c0_1] : memref<256x128xf32, #tpu.memory_space<vmem>>, vector<256x128xf32>
    %c0_2 = arith.constant 0 : index
    %c0_3 = arith.constant 0 : index
    %4 = vector.load %arg3[%c0_2, %c0_3] : memref<256x256xbf16, #tpu.memory_space<vmem>>, vector<256x256xbf16>
    %c0_4 = arith.constant 0 : index
    %c0_5 = arith.constant 0 : index
    %5 = vector.load %arg4[%c0_4, %c0_5] : memref<256x128xbf16, #tpu.memory_space<vmem>>, vector<256x128xbf16>
    %cst = arith.constant dense<0.000000e+00> : vector<256x128xf32>
    %6 = tpu.matmul %4, %5, %cst {dimension_numbers = #tpu.dot_dimension_numbers<[1], [0], [0], [1], [0, 0, 1, 1], [], []>} : vector<256x256xbf16>, vector<256x128xbf16>, vector<256x128xf32> -> vector<256x128xf32>
    %7 = arith.addf %3, %6 : vector<256x128xf32>
    %c0_6 = arith.constant 0 : index
    %c0_7 = arith.constant 0 : index
    %8 = vector.load %arg7[%c0_6, %c0_7] : memref<256x128xf32, #tpu.memory_space<vmem>>, vector<256x128xf32>
    tpu.vector_store %arg7[%c0_6, %c0_7], %7 {strides = array<i32>} : memref<256x128xf32, #tpu.memory_space<vmem>>, vector<256x128xf32>,
    %c0_i32_8 = arith.constant 0 : i32
    %9 = arith.cmpi eq, %arg2, %c0_i32_8 : i32
    %10 = arith.extui %9 : i1 to i32
    %c0_i32_9 = arith.constant 0 : i32
    %11 = arith.cmpi ne, %10, %c0_i32_9 : i32
    scf.if %11 {
      %c0_10 = arith.constant 0 : index
      %c0_11 = arith.constant 0 : index
      %12 = vector.load %arg7[%c0_10, %c0_11] : memref<256x128xf32, #tpu.memory_space<vmem>>, vector<256x128xf32>
      %c0_12 = arith.constant 0 : index
      %c0_13 = arith.constant 0 : index
      %13 = vector.load %arg5[%c0_12, %c0_13] : memref<1x128xf32, #tpu.memory_space<vmem>>, vector<1x128xf32>
      %14 = vector.broadcast %13 : vector<1x128xf32> to vector<256x128xf32>
      %15 = arith.addf %12, %14 : vector<256x128xf32>
      %cst_14 = arith.constant 0.000000e+00 : f32
      %16 = vector.broadcast %cst_14 : f32 to vector<256x128xf32>
      %17 = arith.maximumf %15, %16 : vector<256x128xf32>
      %18 = arith.truncf %17 : vector<256x128xf32> to vector<256x128xbf16>
      %c0_15 = arith.constant 0 : index
      %c0_16 = arith.constant 0 : index
      %19 = vector.load %arg6[%c0_15, %c0_16] : memref<256x128xbf16, #tpu.memory_space<vmem>>, vector<256x128xbf16>
      tpu.vector_store %arg6[%c0_15, %c0_16], %18 {strides = array<i32>} : memref<256x128xbf16, #tpu.memory_space<vmem>>, vector<256x128xbf16>,
    } else {
    }
    return
  }
  func.func @transform_0(%arg0: i32, %arg1: i32, %arg2: i32) -> (i32, i32) {
    %c0_i32 = arith.constant 0 : i32
    return %arg0, %arg2 : i32, i32
  }
  func.func @transform_1(%arg0: i32, %arg1: i32, %arg2: i32) -> (i32, i32) {
    %c0_i32 = arith.constant 0 : i32
    return %arg2, %arg1 : i32, i32
  }
  func.func @transform_2(%arg0: i32, %arg1: i32, %arg2: i32) -> (i32, i32) {
    %c0_i32 = arith.constant 0 : i32
    %c0_i32_0 = arith.constant 0 : i32
    return %c0_i32, %arg1 : i32, i32
  }
  func.func @transform_3(%arg0: i32, %arg1: i32, %arg2: i32) -> (i32, i32) {
    %c0_i32 = arith.constant 0 : i32
    return %arg0, %arg1 : i32, i32
  }
}

module attributes {stable_mosaic.version = 11 : i64} {
  func.func @_mm_epilogue_kernel(%arg0: i32, %arg1: i32, %arg2: i32, %arg3: memref<128x384xbf16, #tpu.memory_space<vmem>>, %arg4: memref<384x128xbf16, #tpu.memory_space<vmem>>, %arg5: memref<1x128xf32, #tpu.memory_space<vmem>>, %arg6: memref<128x128xbf16, #tpu.memory_space<vmem>>, %arg7: memref<128x128xf32, #tpu.memory_space<vmem>>) attributes {dimension_semantics = [#tpu.dimension_semantics<parallel>, #tpu.dimension_semantics<parallel>, #tpu.dimension_semantics<arbitrary>], iteration_bounds = array<i64: 1, 1, 3>, scalar_prefetch = 0 : i64, scratch_operands = 1 : i64, tpu.core_type = #tpu.core_type<tc>, window_params = [{transform_indices = @transform_0, window_bounds = array<i64: 128, 384>}, {transform_indices = @transform_1, window_bounds = array<i64: 384, 128>}, {transform_indices = @transform_2, window_bounds = array<i64: 1, 128>}, {transform_indices = @transform_3, window_bounds = array<i64: 128, 128>}]} {
    %c0_i32 = arith.constant 0 : i32
    %0 = arith.cmpi eq, %arg2, %c0_i32 : i32
    %1 = arith.extui %0 : i1 to i32
    %c0_i32_0 = arith.constant 0 : i32
    %2 = arith.cmpi ne, %1, %c0_i32_0 : i32
    scf.if %2 {
      %cst_9 = arith.constant 0.000000e+00 : f32
      %12 = vector.broadcast %cst_9 : f32 to vector<128x128xf32>
      %c0_10 = arith.constant 0 : index
      %c0_11 = arith.constant 0 : index
      %13 = vector.load %arg7[%c0_10, %c0_11] : memref<128x128xf32, #tpu.memory_space<vmem>>, vector<128x128xf32>
      tpu.vector_store %arg7[%c0_10, %c0_11], %12 {strides = array<i32>} : memref<128x128xf32, #tpu.memory_space<vmem>>, vector<128x128xf32>,
    } else {
    }
    %c0 = arith.constant 0 : index
    %c0_1 = arith.constant 0 : index
    %3 = vector.load %arg7[%c0, %c0_1] : memref<128x128xf32, #tpu.memory_space<vmem>>, vector<128x128xf32>
    %c0_2 = arith.constant 0 : index
    %c0_3 = arith.constant 0 : index
    %4 = vector.load %arg3[%c0_2, %c0_3] : memref<128x384xbf16, #tpu.memory_space<vmem>>, vector<128x384xbf16>
    %c0_4 = arith.constant 0 : index
    %c0_5 = arith.constant 0 : index
    %5 = vector.load %arg4[%c0_4, %c0_5] : memref<384x128xbf16, #tpu.memory_space<vmem>>, vector<384x128xbf16>
    %cst = arith.constant dense<0.000000e+00> : vector<128x128xf32>
    %6 = tpu.matmul %4, %5, %cst {dimension_numbers = #tpu.dot_dimension_numbers<[1], [0], [0], [1], [0, 0, 1, 1], [], []>} : vector<128x384xbf16>, vector<384x128xbf16>, vector<128x128xf32> -> vector<128x128xf32>
    %7 = arith.addf %3, %6 : vector<128x128xf32>
    %c0_6 = arith.constant 0 : index
    %c0_7 = arith.constant 0 : index
    %8 = vector.load %arg7[%c0_6, %c0_7] : memref<128x128xf32, #tpu.memory_space<vmem>>, vector<128x128xf32>
    tpu.vector_store %arg7[%c0_6, %c0_7], %7 {strides = array<i32>} : memref<128x128xf32, #tpu.memory_space<vmem>>, vector<128x128xf32>,
    %c2_i32 = arith.constant 2 : i32
    %9 = arith.cmpi eq, %arg2, %c2_i32 : i32
    %10 = arith.extui %9 : i1 to i32
    %c0_i32_8 = arith.constant 0 : i32
    %11 = arith.cmpi ne, %10, %c0_i32_8 : i32
    scf.if %11 {
      %c0_9 = arith.constant 0 : index
      %c0_10 = arith.constant 0 : index
      %12 = vector.load %arg7[%c0_9, %c0_10] : memref<128x128xf32, #tpu.memory_space<vmem>>, vector<128x128xf32>
      %c0_11 = arith.constant 0 : index
      %c0_12 = arith.constant 0 : index
      %13 = vector.load %arg5[%c0_11, %c0_12] : memref<1x128xf32, #tpu.memory_space<vmem>>, vector<1x128xf32>
      %14 = vector.broadcast %13 : vector<1x128xf32> to vector<128x128xf32>
      %15 = arith.addf %12, %14 : vector<128x128xf32>
      %cst_13 = arith.constant 0.000000e+00 : f32
      %16 = vector.broadcast %cst_13 : f32 to vector<128x128xf32>
      %17 = arith.maximumf %15, %16 : vector<128x128xf32>
      %18 = arith.truncf %17 : vector<128x128xf32> to vector<128x128xbf16>
      %c0_14 = arith.constant 0 : index
      %c0_15 = arith.constant 0 : index
      %19 = vector.load %arg6[%c0_14, %c0_15] : memref<128x128xbf16, #tpu.memory_space<vmem>>, vector<128x128xbf16>
      tpu.vector_store %arg6[%c0_14, %c0_15], %18 {strides = array<i32>} : memref<128x128xbf16, #tpu.memory_space<vmem>>, vector<128x128xbf16>,
    } else {
    }
    return
  }
  func.func @transform_0(%arg0: i32, %arg1: i32, %arg2: i32) -> (i32, i32) {
    %c0_i32 = arith.constant 0 : i32
    return %arg0, %arg2 : i32, i32
  }
  func.func @transform_1(%arg0: i32, %arg1: i32, %arg2: i32) -> (i32, i32) {
    %c0_i32 = arith.constant 0 : i32
    return %arg2, %arg1 : i32, i32
  }
  func.func @transform_2(%arg0: i32, %arg1: i32, %arg2: i32) -> (i32, i32) {
    %c0_i32 = arith.constant 0 : i32
    %c0_i32_0 = arith.constant 0 : i32
    return %c0_i32, %arg1 : i32, i32
  }
  func.func @transform_3(%arg0: i32, %arg1: i32, %arg2: i32) -> (i32, i32) {
    %c0_i32 = arith.constant 0 : i32
    return %arg0, %arg1 : i32, i32
  }
}

module attributes {stable_mosaic.version = 11 : i64} {
  func.func @_mm_epilogue_kernel(%arg0: i32, %arg1: i32, %arg2: i32, %arg3: memref<128x384xbf16, #tpu.memory_space<vmem>>, %arg4: memref<384x128xbf16, #tpu.memory_space<vmem>>, %arg5: memref<1x128xf32, #tpu.memory_space<vmem>>, %arg6: memref<128x128xbf16, #tpu.memory_space<vmem>>, %arg7: memref<128x128xbf16, #tpu.memory_space<vmem>>, %arg8: memref<128x128xf32, #tpu.memory_space<vmem>>) attributes {dimension_semantics = [#tpu.dimension_semantics<parallel>, #tpu.dimension_semantics<parallel>, #tpu.dimension_semantics<arbitrary>], iteration_bounds = array<i64: 1, 1, 3>, scalar_prefetch = 0 : i64, scratch_operands = 1 : i64, tpu.core_type = #tpu.core_type<tc>, window_params = [{transform_indices = @transform_0, window_bounds = array<i64: 128, 384>}, {transform_indices = @transform_1, window_bounds = array<i64: 384, 128>}, {transform_indices = @transform_2, window_bounds = array<i64: 1, 128>}, {transform_indices = @transform_3, window_bounds = array<i64: 128, 128>}, {transform_indices = @transform_4, window_bounds = array<i64: 128, 128>}]} {
    %c0_i32 = arith.constant 0 : i32
    %0 = arith.cmpi eq, %arg2, %c0_i32 : i32
    %1 = arith.extui %0 : i1 to i32
    %c0_i32_0 = arith.constant 0 : i32
    %2 = arith.cmpi ne, %1, %c0_i32_0 : i32
    scf.if %2 {
      %cst_9 = arith.constant 0.000000e+00 : f32
      %12 = vector.broadcast %cst_9 : f32 to vector<128x128xf32>
      %c0_10 = arith.constant 0 : index
      %c0_11 = arith.constant 0 : index
      %13 = vector.load %arg8[%c0_10, %c0_11] : memref<128x128xf32, #tpu.memory_space<vmem>>, vector<128x128xf32>
      tpu.vector_store %arg8[%c0_10, %c0_11], %12 {strides = array<i32>} : memref<128x128xf32, #tpu.memory_space<vmem>>, vector<128x128xf32>,
    } else {
    }
    %c0 = arith.constant 0 : index
    %c0_1 = arith.constant 0 : index
    %3 = vector.load %arg8[%c0, %c0_1] : memref<128x128xf32, #tpu.memory_space<vmem>>, vector<128x128xf32>
    %c0_2 = arith.constant 0 : index
    %c0_3 = arith.constant 0 : index
    %4 = vector.load %arg3[%c0_2, %c0_3] : memref<128x384xbf16, #tpu.memory_space<vmem>>, vector<128x384xbf16>
    %c0_4 = arith.constant 0 : index
    %c0_5 = arith.constant 0 : index
    %5 = vector.load %arg4[%c0_4, %c0_5] : memref<384x128xbf16, #tpu.memory_space<vmem>>, vector<384x128xbf16>
    %cst = arith.constant dense<0.000000e+00> : vector<128x128xf32>
    %6 = tpu.matmul %4, %5, %cst {dimension_numbers = #tpu.dot_dimension_numbers<[1], [0], [0], [1], [0, 0, 1, 1], [], []>} : vector<128x384xbf16>, vector<384x128xbf16>, vector<128x128xf32> -> vector<128x128xf32>
    %7 = arith.addf %3, %6 : vector<128x128xf32>
    %c0_6 = arith.constant 0 : index
    %c0_7 = arith.constant 0 : index
    %8 = vector.load %arg8[%c0_6, %c0_7] : memref<128x128xf32, #tpu.memory_space<vmem>>, vector<128x128xf32>
    tpu.vector_store %arg8[%c0_6, %c0_7], %7 {strides = array<i32>} : memref<128x128xf32, #tpu.memory_space<vmem>>, vector<128x128xf32>,
    %c2_i32 = arith.constant 2 : i32
    %9 = arith.cmpi eq, %arg2, %c2_i32 : i32
    %10 = arith.extui %9 : i1 to i32
    %c0_i32_8 = arith.constant 0 : i32
    %11 = arith.cmpi ne, %10, %c0_i32_8 : i32
    scf.if %11 {
      %c0_9 = arith.constant 0 : index
      %c0_10 = arith.constant 0 : index
      %12 = vector.load %arg8[%c0_9, %c0_10] : memref<128x128xf32, #tpu.memory_space<vmem>>, vector<128x128xf32>
      %c0_11 = arith.constant 0 : index
      %c0_12 = arith.constant 0 : index
      %13 = vector.load %arg5[%c0_11, %c0_12] : memref<1x128xf32, #tpu.memory_space<vmem>>, vector<1x128xf32>
      %14 = vector.broadcast %13 : vector<1x128xf32> to vector<128x128xf32>
      %15 = arith.addf %12, %14 : vector<128x128xf32>
      %c0_13 = arith.constant 0 : index
      %c0_14 = arith.constant 0 : index
      %16 = vector.load %arg6[%c0_13, %c0_14] : memref<128x128xbf16, #tpu.memory_space<vmem>>, vector<128x128xbf16>
      %17 = arith.extf %16 : vector<128x128xbf16> to vector<128x128xf32>
      %18 = arith.addf %15, %17 : vector<128x128xf32>
      %cst_15 = arith.constant 0.000000e+00 : f32
      %19 = vector.broadcast %cst_15 : f32 to vector<128x128xf32>
      %20 = arith.maximumf %18, %19 : vector<128x128xf32>
      %21 = arith.truncf %20 : vector<128x128xf32> to vector<128x128xbf16>
      %c0_16 = arith.constant 0 : index
      %c0_17 = arith.constant 0 : index
      %22 = vector.load %arg7[%c0_16, %c0_17] : memref<128x128xbf16, #tpu.memory_space<vmem>>, vector<128x128xbf16>
      tpu.vector_store %arg7[%c0_16, %c0_17], %21 {strides = array<i32>} : memref<128x128xbf16, #tpu.memory_space<vmem>>, vector<128x128xbf16>,
    } else {
    }
    return
  }
  func.func @transform_0(%arg0: i32, %arg1: i32, %arg2: i32) -> (i32, i32) {
    %c0_i32 = arith.constant 0 : i32
    return %arg0, %arg2 : i32, i32
  }
  func.func @transform_1(%arg0: i32, %arg1: i32, %arg2: i32) -> (i32, i32) {
    %c0_i32 = arith.constant 0 : i32
    return %arg2, %arg1 : i32, i32
  }
  func.func @transform_2(%arg0: i32, %arg1: i32, %arg2: i32) -> (i32, i32) {
    %c0_i32 = arith.constant 0 : i32
    %c0_i32_0 = arith.constant 0 : i32
    return %c0_i32, %arg1 : i32, i32
  }
  func.func @transform_3(%arg0: i32, %arg1: i32, %arg2: i32) -> (i32, i32) {
    %c0_i32 = arith.constant 0 : i32
    return %arg0, %arg1 : i32, i32
  }
  func.func @transform_4(%arg0: i32, %arg1: i32, %arg2: i32) -> (i32, i32) {
    %c0_i32 = arith.constant 0 : i32
    return %arg0, %arg1 : i32, i32
  }
}

module attributes {stable_mosaic.version = 11 : i64} {
  func.func @_mm_epilogue_kernel(%arg0: i32, %arg1: i32, %arg2: i32, %arg3: memref<32x384xbf16, #tpu.memory_space<vmem>>, %arg4: memref<384x128xbf16, #tpu.memory_space<vmem>>, %arg5: memref<1x128xf32, #tpu.memory_space<vmem>>, %arg6: memref<32x128xbf16, #tpu.memory_space<vmem>>, %arg7: memref<32x128xf32, #tpu.memory_space<vmem>>) attributes {dimension_semantics = [#tpu.dimension_semantics<parallel>, #tpu.dimension_semantics<parallel>, #tpu.dimension_semantics<arbitrary>], iteration_bounds = array<i64: 1, 1, 3>, scalar_prefetch = 0 : i64, scratch_operands = 1 : i64, tpu.core_type = #tpu.core_type<tc>, window_params = [{transform_indices = @transform_0, window_bounds = array<i64: 32, 384>}, {transform_indices = @transform_1, window_bounds = array<i64: 384, 128>}, {transform_indices = @transform_2, window_bounds = array<i64: 1, 128>}, {transform_indices = @transform_3, window_bounds = array<i64: 32, 128>}]} {
    %c0_i32 = arith.constant 0 : i32
    %0 = arith.cmpi eq, %arg2, %c0_i32 : i32
    %1 = arith.extui %0 : i1 to i32
    %c0_i32_0 = arith.constant 0 : i32
    %2 = arith.cmpi ne, %1, %c0_i32_0 : i32
    scf.if %2 {
      %cst_9 = arith.constant 0.000000e+00 : f32
      %12 = vector.broadcast %cst_9 : f32 to vector<32x128xf32>
      %c0_10 = arith.constant 0 : index
      %c0_11 = arith.constant 0 : index
      %13 = vector.load %arg7[%c0_10, %c0_11] : memref<32x128xf32, #tpu.memory_space<vmem>>, vector<32x128xf32>
      tpu.vector_store %arg7[%c0_10, %c0_11], %12 {strides = array<i32>} : memref<32x128xf32, #tpu.memory_space<vmem>>, vector<32x128xf32>,
    } else {
    }
    %c0 = arith.constant 0 : index
    %c0_1 = arith.constant 0 : index
    %3 = vector.load %arg7[%c0, %c0_1] : memref<32x128xf32, #tpu.memory_space<vmem>>, vector<32x128xf32>
    %c0_2 = arith.constant 0 : index
    %c0_3 = arith.constant 0 : index
    %4 = vector.load %arg3[%c0_2, %c0_3] : memref<32x384xbf16, #tpu.memory_space<vmem>>, vector<32x384xbf16>
    %c0_4 = arith.constant 0 : index
    %c0_5 = arith.constant 0 : index
    %5 = vector.load %arg4[%c0_4, %c0_5] : memref<384x128xbf16, #tpu.memory_space<vmem>>, vector<384x128xbf16>
    %cst = arith.constant dense<0.000000e+00> : vector<32x128xf32>
    %6 = tpu.matmul %4, %5, %cst {dimension_numbers = #tpu.dot_dimension_numbers<[1], [0], [0], [1], [0, 0, 1, 1], [], []>} : vector<32x384xbf16>, vector<384x128xbf16>, vector<32x128xf32> -> vector<32x128xf32>
    %7 = arith.addf %3, %6 : vector<32x128xf32>
    %c0_6 = arith.constant 0 : index
    %c0_7 = arith.constant 0 : index
    %8 = vector.load %arg7[%c0_6, %c0_7] : memref<32x128xf32, #tpu.memory_space<vmem>>, vector<32x128xf32>
    tpu.vector_store %arg7[%c0_6, %c0_7], %7 {strides = array<i32>} : memref<32x128xf32, #tpu.memory_space<vmem>>, vector<32x128xf32>,
    %c2_i32 = arith.constant 2 : i32
    %9 = arith.cmpi eq, %arg2, %c2_i32 : i32
    %10 = arith.extui %9 : i1 to i32
    %c0_i32_8 = arith.constant 0 : i32
    %11 = arith.cmpi ne, %10, %c0_i32_8 : i32
    scf.if %11 {
      %c0_9 = arith.constant 0 : index
      %c0_10 = arith.constant 0 : index
      %12 = vector.load %arg7[%c0_9, %c0_10] : memref<32x128xf32, #tpu.memory_space<vmem>>, vector<32x128xf32>
      %c0_11 = arith.constant 0 : index
      %c0_12 = arith.constant 0 : index
      %13 = vector.load %arg5[%c0_11, %c0_12] : memref<1x128xf32, #tpu.memory_space<vmem>>, vector<1x128xf32>
      %14 = vector.broadcast %13 : vector<1x128xf32> to vector<32x128xf32>
      %15 = arith.addf %12, %14 : vector<32x128xf32>
      %cst_13 = arith.constant 0.000000e+00 : f32
      %16 = vector.broadcast %cst_13 : f32 to vector<32x128xf32>
      %17 = arith.maximumf %15, %16 : vector<32x128xf32>
      %18 = arith.truncf %17 : vector<32x128xf32> to vector<32x128xbf16>
      %c0_14 = arith.constant 0 : index
      %c0_15 = arith.constant 0 : index
      %19 = vector.load %arg6[%c0_14, %c0_15] : memref<32x128xbf16, #tpu.memory_space<vmem>>, vector<32x128xbf16>
      tpu.vector_store %arg6[%c0_14, %c0_15], %18 {strides = array<i32>} : memref<32x128xbf16, #tpu.memory_space<vmem>>, vector<32x128xbf16>,
    } else {
    }
    return
  }
  func.func @transform_0(%arg0: i32, %arg1: i32, %arg2: i32) -> (i32, i32) {
    %c0_i32 = arith.constant 0 : i32
    return %arg0, %arg2 : i32, i32
  }
  func.func @transform_1(%arg0: i32, %arg1: i32, %arg2: i32) -> (i32, i32) {
    %c0_i32 = arith.constant 0 : i32
    return %arg2, %arg1 : i32, i32
  }
  func.func @transform_2(%arg0: i32, %arg1: i32, %arg2: i32) -> (i32, i32) {
    %c0_i32 = arith.constant 0 : i32
    %c0_i32_0 = arith.constant 0 : i32
    return %c0_i32, %arg1 : i32, i32
  }
  func.func @transform_3(%arg0: i32, %arg1: i32, %arg2: i32) -> (i32, i32) {
    %c0_i32 = arith.constant 0 : i32
    return %arg0, %arg1 : i32, i32
  }
}

module attributes {stable_mosaic.version = 11 : i64} {
  func.func @_mm_epilogue_kernel(%arg0: i32, %arg1: i32, %arg2: i32, %arg3: memref<32x128xbf16, #tpu.memory_space<vmem>>, %arg4: memref<128x128xbf16, #tpu.memory_space<vmem>>, %arg5: memref<1x128xf32, #tpu.memory_space<vmem>>, %arg6: memref<32x128xbf16, #tpu.memory_space<vmem>>, %arg7: memref<32x128xf32, #tpu.memory_space<vmem>>) attributes {dimension_semantics = [#tpu.dimension_semantics<parallel>, #tpu.dimension_semantics<parallel>, #tpu.dimension_semantics<arbitrary>], iteration_bounds = array<i64: 1, 1, 1>, scalar_prefetch = 0 : i64, scratch_operands = 1 : i64, tpu.core_type = #tpu.core_type<tc>, window_params = [{transform_indices = @transform_0, window_bounds = array<i64: 32, 128>}, {transform_indices = @transform_1, window_bounds = array<i64: 128, 128>}, {transform_indices = @transform_2, window_bounds = array<i64: 1, 128>}, {transform_indices = @transform_3, window_bounds = array<i64: 32, 128>}]} {
    %c0_i32 = arith.constant 0 : i32
    %0 = arith.cmpi eq, %arg2, %c0_i32 : i32
    %1 = arith.extui %0 : i1 to i32
    %c0_i32_0 = arith.constant 0 : i32
    %2 = arith.cmpi ne, %1, %c0_i32_0 : i32
    scf.if %2 {
      %cst_10 = arith.constant 0.000000e+00 : f32
      %12 = vector.broadcast %cst_10 : f32 to vector<32x128xf32>
      %c0_11 = arith.constant 0 : index
      %c0_12 = arith.constant 0 : index
      %13 = vector.load %arg7[%c0_11, %c0_12] : memref<32x128xf32, #tpu.memory_space<vmem>>, vector<32x128xf32>
      tpu.vector_store %arg7[%c0_11, %c0_12], %12 {strides = array<i32>} : memref<32x128xf32, #tpu.memory_space<vmem>>, vector<32x128xf32>,
    } else {
    }
    %c0 = arith.constant 0 : index
    %c0_1 = arith.constant 0 : index
    %3 = vector.load %arg7[%c0, %c0_1] : memref<32x128xf32, #tpu.memory_space<vmem>>, vector<32x128xf32>
    %c0_2 = arith.constant 0 : index
    %c0_3 = arith.constant 0 : index
    %4 = vector.load %arg3[%c0_2, %c0_3] : memref<32x128xbf16, #tpu.memory_space<vmem>>, vector<32x128xbf16>
    %c0_4 = arith.constant 0 : index
    %c0_5 = arith.constant 0 : index
    %5 = vector.load %arg4[%c0_4, %c0_5] : memref<128x128xbf16, #tpu.memory_space<vmem>>, vector<128x128xbf16>
    %cst = arith.constant dense<0.000000e+00> : vector<32x128xf32>
    %6 = tpu.matmul %4, %5, %cst {dimension_numbers = #tpu.dot_dimension_numbers<[1], [0], [0], [1], [0, 0, 1, 1], [], []>} : vector<32x128xbf16>, vector<128x128xbf16>, vector<32x128xf32> -> vector<32x128xf32>
    %7 = arith.addf %3, %6 : vector<32x128xf32>
    %c0_6 = arith.constant 0 : index
    %c0_7 = arith.constant 0 : index
    %8 = vector.load %arg7[%c0_6, %c0_7] : memref<32x128xf32, #tpu.memory_space<vmem>>, vector<32x128xf32>
    tpu.vector_store %arg7[%c0_6, %c0_7], %7 {strides = array<i32>} : memref<32x128xf32, #tpu.memory_space<vmem>>, vector<32x128xf32>,
    %c0_i32_8 = arith.constant 0 : i32
    %9 = arith.cmpi eq, %arg2, %c0_i32_8 : i32
    %10 = arith.extui %9 : i1 to i32
    %c0_i32_9 = arith.constant 0 : i32
    %11 = arith.cmpi ne, %10, %c0_i32_9 : i32
    scf.if %11 {
      %c0_10 = arith.constant 0 : index
      %c0_11 = arith.constant 0 : index
      %12 = vector.load %arg7[%c0_10, %c0_11] : memref<32x128xf32, #tpu.memory_space<vmem>>, vector<32x128xf32>
      %c0_12 = arith.constant 0 : index
      %c0_13 = arith.constant 0 : index
      %13 = vector.load %arg5[%c0_12, %c0_13] : memref<1x128xf32, #tpu.memory_space<vmem>>, vector<1x128xf32>
      %14 = vector.broadcast %13 : vector<1x128xf32> to vector<32x128xf32>
      %15 = arith.addf %12, %14 : vector<32x128xf32>
      %16 = arith.truncf %15 : vector<32x128xf32> to vector<32x128xbf16>
      %c0_14 = arith.constant 0 : index
      %c0_15 = arith.constant 0 : index
      %17 = vector.load %arg6[%c0_14, %c0_15] : memref<32x128xbf16, #tpu.memory_space<vmem>>, vector<32x128xbf16>
      tpu.vector_store %arg6[%c0_14, %c0_15], %16 {strides = array<i32>} : memref<32x128xbf16, #tpu.memory_space<vmem>>, vector<32x128xbf16>,
    } else {
    }
    return
  }
  func.func @transform_0(%arg0: i32, %arg1: i32, %arg2: i32) -> (i32, i32) {
    %c0_i32 = arith.constant 0 : i32
    return %arg0, %arg2 : i32, i32
  }
  func.func @transform_1(%arg0: i32, %arg1: i32, %arg2: i32) -> (i32, i32) {
    %c0_i32 = arith.constant 0 : i32
    return %arg2, %arg1 : i32, i32
  }
  func.func @transform_2(%arg0: i32, %arg1: i32, %arg2: i32) -> (i32, i32) {
    %c0_i32 = arith.constant 0 : i32
    %c0_i32_0 = arith.constant 0 : i32
    return %c0_i32, %arg1 : i32, i32
  }
  func.func @transform_3(%arg0: i32, %arg1: i32, %arg2: i32) -> (i32, i32) {
    %c0_i32 = arith.constant 0 : i32
    return %arg0, %arg1 : i32, i32
  }
}

module attributes {stable_mosaic.version = 11 : i64} {
  func.func @_mm_epilogue_kernel(%arg0: i32, %arg1: i32, %arg2: i32, %arg3: memref<32x384xbf16, #tpu.memory_space<vmem>>, %arg4: memref<384x128xbf16, #tpu.memory_space<vmem>>, %arg5: memref<1x128xf32, #tpu.memory_space<vmem>>, %arg6: memref<32x128xbf16, #tpu.memory_space<vmem>>, %arg7: memref<32x128xbf16, #tpu.memory_space<vmem>>, %arg8: memref<32x128xf32, #tpu.memory_space<vmem>>) attributes {dimension_semantics = [#tpu.dimension_semantics<parallel>, #tpu.dimension_semantics<parallel>, #tpu.dimension_semantics<arbitrary>], iteration_bounds = array<i64: 1, 1, 3>, scalar_prefetch = 0 : i64, scratch_operands = 1 : i64, tpu.core_type = #tpu.core_type<tc>, window_params = [{transform_indices = @transform_0, window_bounds = array<i64: 32, 384>}, {transform_indices = @transform_1, window_bounds = array<i64: 384, 128>}, {transform_indices = @transform_2, window_bounds = array<i64: 1, 128>}, {transform_indices = @transform_3, window_bounds = array<i64: 32, 128>}, {transform_indices = @transform_4, window_bounds = array<i64: 32, 128>}]} {
    %c0_i32 = arith.constant 0 : i32
    %0 = arith.cmpi eq, %arg2, %c0_i32 : i32
    %1 = arith.extui %0 : i1 to i32
    %c0_i32_0 = arith.constant 0 : i32
    %2 = arith.cmpi ne, %1, %c0_i32_0 : i32
    scf.if %2 {
      %cst_9 = arith.constant 0.000000e+00 : f32
      %12 = vector.broadcast %cst_9 : f32 to vector<32x128xf32>
      %c0_10 = arith.constant 0 : index
      %c0_11 = arith.constant 0 : index
      %13 = vector.load %arg8[%c0_10, %c0_11] : memref<32x128xf32, #tpu.memory_space<vmem>>, vector<32x128xf32>
      tpu.vector_store %arg8[%c0_10, %c0_11], %12 {strides = array<i32>} : memref<32x128xf32, #tpu.memory_space<vmem>>, vector<32x128xf32>,
    } else {
    }
    %c0 = arith.constant 0 : index
    %c0_1 = arith.constant 0 : index
    %3 = vector.load %arg8[%c0, %c0_1] : memref<32x128xf32, #tpu.memory_space<vmem>>, vector<32x128xf32>
    %c0_2 = arith.constant 0 : index
    %c0_3 = arith.constant 0 : index
    %4 = vector.load %arg3[%c0_2, %c0_3] : memref<32x384xbf16, #tpu.memory_space<vmem>>, vector<32x384xbf16>
    %c0_4 = arith.constant 0 : index
    %c0_5 = arith.constant 0 : index
    %5 = vector.load %arg4[%c0_4, %c0_5] : memref<384x128xbf16, #tpu.memory_space<vmem>>, vector<384x128xbf16>
    %cst = arith.constant dense<0.000000e+00> : vector<32x128xf32>
    %6 = tpu.matmul %4, %5, %cst {dimension_numbers = #tpu.dot_dimension_numbers<[1], [0], [0], [1], [0, 0, 1, 1], [], []>} : vector<32x384xbf16>, vector<384x128xbf16>, vector<32x128xf32> -> vector<32x128xf32>
    %7 = arith.addf %3, %6 : vector<32x128xf32>
    %c0_6 = arith.constant 0 : index
    %c0_7 = arith.constant 0 : index
    %8 = vector.load %arg8[%c0_6, %c0_7] : memref<32x128xf32, #tpu.memory_space<vmem>>, vector<32x128xf32>
    tpu.vector_store %arg8[%c0_6, %c0_7], %7 {strides = array<i32>} : memref<32x128xf32, #tpu.memory_space<vmem>>, vector<32x128xf32>,
    %c2_i32 = arith.constant 2 : i32
    %9 = arith.cmpi eq, %arg2, %c2_i32 : i32
    %10 = arith.extui %9 : i1 to i32
    %c0_i32_8 = arith.constant 0 : i32
    %11 = arith.cmpi ne, %10, %c0_i32_8 : i32
    scf.if %11 {
      %c0_9 = arith.constant 0 : index
      %c0_10 = arith.constant 0 : index
      %12 = vector.load %arg8[%c0_9, %c0_10] : memref<32x128xf32, #tpu.memory_space<vmem>>, vector<32x128xf32>
      %c0_11 = arith.constant 0 : index
      %c0_12 = arith.constant 0 : index
      %13 = vector.load %arg5[%c0_11, %c0_12] : memref<1x128xf32, #tpu.memory_space<vmem>>, vector<1x128xf32>
      %14 = vector.broadcast %13 : vector<1x128xf32> to vector<32x128xf32>
      %15 = arith.addf %12, %14 : vector<32x128xf32>
      %c0_13 = arith.constant 0 : index
      %c0_14 = arith.constant 0 : index
      %16 = vector.load %arg6[%c0_13, %c0_14] : memref<32x128xbf16, #tpu.memory_space<vmem>>, vector<32x128xbf16>
      %17 = arith.extf %16 : vector<32x128xbf16> to vector<32x128xf32>
      %18 = arith.addf %15, %17 : vector<32x128xf32>
      %cst_15 = arith.constant 0.000000e+00 : f32
      %19 = vector.broadcast %cst_15 : f32 to vector<32x128xf32>
      %20 = arith.maximumf %18, %19 : vector<32x128xf32>
      %21 = arith.truncf %20 : vector<32x128xf32> to vector<32x128xbf16>
      %c0_16 = arith.constant 0 : index
      %c0_17 = arith.constant 0 : index
      %22 = vector.load %arg7[%c0_16, %c0_17] : memref<32x128xbf16, #tpu.memory_space<vmem>>, vector<32x128xbf16>
      tpu.vector_store %arg7[%c0_16, %c0_17], %21 {strides = array<i32>} : memref<32x128xbf16, #tpu.memory_space<vmem>>, vector<32x128xbf16>,
    } else {
    }
    return
  }
  func.func @transform_0(%arg0: i32, %arg1: i32, %arg2: i32) -> (i32, i32) {
    %c0_i32 = arith.constant 0 : i32
    return %arg0, %arg2 : i32, i32
  }
  func.func @transform_1(%arg0: i32, %arg1: i32, %arg2: i32) -> (i32, i32) {
    %c0_i32 = arith.constant 0 : i32
    return %arg2, %arg1 : i32, i32
  }
  func.func @transform_2(%arg0: i32, %arg1: i32, %arg2: i32) -> (i32, i32) {
    %c0_i32 = arith.constant 0 : i32
    %c0_i32_0 = arith.constant 0 : i32
    return %c0_i32, %arg1 : i32, i32
  }
  func.func @transform_3(%arg0: i32, %arg1: i32, %arg2: i32) -> (i32, i32) {
    %c0_i32 = arith.constant 0 : i32
    return %arg0, %arg1 : i32, i32
  }
  func.func @transform_4(%arg0: i32, %arg1: i32, %arg2: i32) -> (i32, i32) {
    %c0_i32 = arith.constant 0 : i32
    return %arg0, %arg1 : i32, i32
  }
}

module attributes {stable_mosaic.version = 11 : i64} {
  func.func @_mm_epilogue_kernel(%arg0: i32, %arg1: i32, %arg2: i32, %arg3: memref<8x384xbf16, #tpu.memory_space<vmem>>, %arg4: memref<384x256xbf16, #tpu.memory_space<vmem>>, %arg5: memref<1x256xf32, #tpu.memory_space<vmem>>, %arg6: memref<8x256xbf16, #tpu.memory_space<vmem>>, %arg7: memref<8x256xf32, #tpu.memory_space<vmem>>) attributes {dimension_semantics = [#tpu.dimension_semantics<parallel>, #tpu.dimension_semantics<parallel>, #tpu.dimension_semantics<arbitrary>], iteration_bounds = array<i64: 1, 1, 3>, scalar_prefetch = 0 : i64, scratch_operands = 1 : i64, tpu.core_type = #tpu.core_type<tc>, window_params = [{transform_indices = @transform_0, window_bounds = array<i64: 8, 384>}, {transform_indices = @transform_1, window_bounds = array<i64: 384, 256>}, {transform_indices = @transform_2, window_bounds = array<i64: 1, 256>}, {transform_indices = @transform_3, window_bounds = array<i64: 8, 256>}]} {
    %c0_i32 = arith.constant 0 : i32
    %0 = arith.cmpi eq, %arg2, %c0_i32 : i32
    %1 = arith.extui %0 : i1 to i32
    %c0_i32_0 = arith.constant 0 : i32
    %2 = arith.cmpi ne, %1, %c0_i32_0 : i32
    scf.if %2 {
      %cst_9 = arith.constant 0.000000e+00 : f32
      %12 = vector.broadcast %cst_9 : f32 to vector<8x256xf32>
      %c0_10 = arith.constant 0 : index
      %c0_11 = arith.constant 0 : index
      %13 = vector.load %arg7[%c0_10, %c0_11] : memref<8x256xf32, #tpu.memory_space<vmem>>, vector<8x256xf32>
      tpu.vector_store %arg7[%c0_10, %c0_11], %12 {strides = array<i32>} : memref<8x256xf32, #tpu.memory_space<vmem>>, vector<8x256xf32>,
    } else {
    }
    %c0 = arith.constant 0 : index
    %c0_1 = arith.constant 0 : index
    %3 = vector.load %arg7[%c0, %c0_1] : memref<8x256xf32, #tpu.memory_space<vmem>>, vector<8x256xf32>
    %c0_2 = arith.constant 0 : index
    %c0_3 = arith.constant 0 : index
    %4 = vector.load %arg3[%c0_2, %c0_3] : memref<8x384xbf16, #tpu.memory_space<vmem>>, vector<8x384xbf16>
    %c0_4 = arith.constant 0 : index
    %c0_5 = arith.constant 0 : index
    %5 = vector.load %arg4[%c0_4, %c0_5] : memref<384x256xbf16, #tpu.memory_space<vmem>>, vector<384x256xbf16>
    %cst = arith.constant dense<0.000000e+00> : vector<8x256xf32>
    %6 = tpu.matmul %4, %5, %cst {dimension_numbers = #tpu.dot_dimension_numbers<[1], [0], [0], [1], [0, 0, 1, 1], [], []>} : vector<8x384xbf16>, vector<384x256xbf16>, vector<8x256xf32> -> vector<8x256xf32>
    %7 = arith.addf %3, %6 : vector<8x256xf32>
    %c0_6 = arith.constant 0 : index
    %c0_7 = arith.constant 0 : index
    %8 = vector.load %arg7[%c0_6, %c0_7] : memref<8x256xf32, #tpu.memory_space<vmem>>, vector<8x256xf32>
    tpu.vector_store %arg7[%c0_6, %c0_7], %7 {strides = array<i32>} : memref<8x256xf32, #tpu.memory_space<vmem>>, vector<8x256xf32>,
    %c2_i32 = arith.constant 2 : i32
    %9 = arith.cmpi eq, %arg2, %c2_i32 : i32
    %10 = arith.extui %9 : i1 to i32
    %c0_i32_8 = arith.constant 0 : i32
    %11 = arith.cmpi ne, %10, %c0_i32_8 : i32
    scf.if %11 {
      %c0_9 = arith.constant 0 : index
      %c0_10 = arith.constant 0 : index
      %12 = vector.load %arg7[%c0_9, %c0_10] : memref<8x256xf32, #tpu.memory_space<vmem>>, vector<8x256xf32>
      %c0_11 = arith.constant 0 : index
      %c0_12 = arith.constant 0 : index
      %13 = vector.load %arg5[%c0_11, %c0_12] : memref<1x256xf32, #tpu.memory_space<vmem>>, vector<1x256xf32>
      %14 = vector.broadcast %13 : vector<1x256xf32> to vector<8x256xf32>
      %15 = arith.addf %12, %14 : vector<8x256xf32>
      %cst_13 = arith.constant 0.000000e+00 : f32
      %16 = vector.broadcast %cst_13 : f32 to vector<8x256xf32>
      %17 = arith.maximumf %15, %16 : vector<8x256xf32>
      %18 = arith.truncf %17 : vector<8x256xf32> to vector<8x256xbf16>
      %c0_14 = arith.constant 0 : index
      %c0_15 = arith.constant 0 : index
      %19 = vector.load %arg6[%c0_14, %c0_15] : memref<8x256xbf16, #tpu.memory_space<vmem>>, vector<8x256xbf16>
      tpu.vector_store %arg6[%c0_14, %c0_15], %18 {strides = array<i32>} : memref<8x256xbf16, #tpu.memory_space<vmem>>, vector<8x256xbf16>,
    } else {
    }
    return
  }
  func.func @transform_0(%arg0: i32, %arg1: i32, %arg2: i32) -> (i32, i32) {
    %c0_i32 = arith.constant 0 : i32
    return %arg0, %arg2 : i32, i32
  }
  func.func @transform_1(%arg0: i32, %arg1: i32, %arg2: i32) -> (i32, i32) {
    %c0_i32 = arith.constant 0 : i32
    return %arg2, %arg1 : i32, i32
  }
  func.func @transform_2(%arg0: i32, %arg1: i32, %arg2: i32) -> (i32, i32) {
    %c0_i32 = arith.constant 0 : i32
    %c0_i32_0 = arith.constant 0 : i32
    return %c0_i32, %arg1 : i32, i32
  }
  func.func @transform_3(%arg0: i32, %arg1: i32, %arg2: i32) -> (i32, i32) {
    %c0_i32 = arith.constant 0 : i32
    return %arg0, %arg1 : i32, i32
  }
}

module attributes {stable_mosaic.version = 11 : i64} {
  func.func @_mm_epilogue_kernel(%arg0: i32, %arg1: i32, %arg2: i32, %arg3: memref<8x128xbf16, #tpu.memory_space<vmem>>, %arg4: memref<128x256xbf16, #tpu.memory_space<vmem>>, %arg5: memref<1x256xf32, #tpu.memory_space<vmem>>, %arg6: memref<8x256xbf16, #tpu.memory_space<vmem>>, %arg7: memref<8x256xf32, #tpu.memory_space<vmem>>) attributes {dimension_semantics = [#tpu.dimension_semantics<parallel>, #tpu.dimension_semantics<parallel>, #tpu.dimension_semantics<arbitrary>], iteration_bounds = array<i64: 1, 1, 1>, scalar_prefetch = 0 : i64, scratch_operands = 1 : i64, tpu.core_type = #tpu.core_type<tc>, window_params = [{transform_indices = @transform_0, window_bounds = array<i64: 8, 128>}, {transform_indices = @transform_1, window_bounds = array<i64: 128, 256>}, {transform_indices = @transform_2, window_bounds = array<i64: 1, 256>}, {transform_indices = @transform_3, window_bounds = array<i64: 8, 256>}]} {
    %c0_i32 = arith.constant 0 : i32
    %0 = arith.cmpi eq, %arg2, %c0_i32 : i32
    %1 = arith.extui %0 : i1 to i32
    %c0_i32_0 = arith.constant 0 : i32
    %2 = arith.cmpi ne, %1, %c0_i32_0 : i32
    scf.if %2 {
      %cst_10 = arith.constant 0.000000e+00 : f32
      %12 = vector.broadcast %cst_10 : f32 to vector<8x256xf32>
      %c0_11 = arith.constant 0 : index
      %c0_12 = arith.constant 0 : index
      %13 = vector.load %arg7[%c0_11, %c0_12] : memref<8x256xf32, #tpu.memory_space<vmem>>, vector<8x256xf32>
      tpu.vector_store %arg7[%c0_11, %c0_12], %12 {strides = array<i32>} : memref<8x256xf32, #tpu.memory_space<vmem>>, vector<8x256xf32>,
    } else {
    }
    %c0 = arith.constant 0 : index
    %c0_1 = arith.constant 0 : index
    %3 = vector.load %arg7[%c0, %c0_1] : memref<8x256xf32, #tpu.memory_space<vmem>>, vector<8x256xf32>
    %c0_2 = arith.constant 0 : index
    %c0_3 = arith.constant 0 : index
    %4 = vector.load %arg3[%c0_2, %c0_3] : memref<8x128xbf16, #tpu.memory_space<vmem>>, vector<8x128xbf16>
    %c0_4 = arith.constant 0 : index
    %c0_5 = arith.constant 0 : index
    %5 = vector.load %arg4[%c0_4, %c0_5] : memref<128x256xbf16, #tpu.memory_space<vmem>>, vector<128x256xbf16>
    %cst = arith.constant dense<0.000000e+00> : vector<8x256xf32>
    %6 = tpu.matmul %4, %5, %cst {dimension_numbers = #tpu.dot_dimension_numbers<[1], [0], [0], [1], [0, 0, 1, 1], [], []>} : vector<8x128xbf16>, vector<128x256xbf16>, vector<8x256xf32> -> vector<8x256xf32>
    %7 = arith.addf %3, %6 : vector<8x256xf32>
    %c0_6 = arith.constant 0 : index
    %c0_7 = arith.constant 0 : index
    %8 = vector.load %arg7[%c0_6, %c0_7] : memref<8x256xf32, #tpu.memory_space<vmem>>, vector<8x256xf32>
    tpu.vector_store %arg7[%c0_6, %c0_7], %7 {strides = array<i32>} : memref<8x256xf32, #tpu.memory_space<vmem>>, vector<8x256xf32>,
    %c0_i32_8 = arith.constant 0 : i32
    %9 = arith.cmpi eq, %arg2, %c0_i32_8 : i32
    %10 = arith.extui %9 : i1 to i32
    %c0_i32_9 = arith.constant 0 : i32
    %11 = arith.cmpi ne, %10, %c0_i32_9 : i32
    scf.if %11 {
      %c0_10 = arith.constant 0 : index
      %c0_11 = arith.constant 0 : index
      %12 = vector.load %arg7[%c0_10, %c0_11] : memref<8x256xf32, #tpu.memory_space<vmem>>, vector<8x256xf32>
      %c0_12 = arith.constant 0 : index
      %c0_13 = arith.constant 0 : index
      %13 = vector.load %arg5[%c0_12, %c0_13] : memref<1x256xf32, #tpu.memory_space<vmem>>, vector<1x256xf32>
      %14 = vector.broadcast %13 : vector<1x256xf32> to vector<8x256xf32>
      %15 = arith.addf %12, %14 : vector<8x256xf32>
      %16 = arith.truncf %15 : vector<8x256xf32> to vector<8x256xbf16>
      %c0_14 = arith.constant 0 : index
      %c0_15 = arith.constant 0 : index
      %17 = vector.load %arg6[%c0_14, %c0_15] : memref<8x256xbf16, #tpu.memory_space<vmem>>, vector<8x256xbf16>
      tpu.vector_store %arg6[%c0_14, %c0_15], %16 {strides = array<i32>} : memref<8x256xbf16, #tpu.memory_space<vmem>>, vector<8x256xbf16>,
    } else {
    }
    return
  }
  func.func @transform_0(%arg0: i32, %arg1: i32, %arg2: i32) -> (i32, i32) {
    %c0_i32 = arith.constant 0 : i32
    return %arg0, %arg2 : i32, i32
  }
  func.func @transform_1(%arg0: i32, %arg1: i32, %arg2: i32) -> (i32, i32) {
    %c0_i32 = arith.constant 0 : i32
    return %arg2, %arg1 : i32, i32
  }
  func.func @transform_2(%arg0: i32, %arg1: i32, %arg2: i32) -> (i32, i32) {
    %c0_i32 = arith.constant 0 : i32
    %c0_i32_0 = arith.constant 0 : i32
    return %c0_i32, %arg1 : i32, i32
  }
  func.func @transform_3(%arg0: i32, %arg1: i32, %arg2: i32) -> (i32, i32) {
    %c0_i32 = arith.constant 0 : i32
    return %arg0, %arg1 : i32, i32
  }
}

module attributes {stable_mosaic.version = 11 : i64} {
  func.func @_mm_epilogue_kernel(%arg0: i32, %arg1: i32, %arg2: i32, %arg3: memref<8x384xbf16, #tpu.memory_space<vmem>>, %arg4: memref<384x256xbf16, #tpu.memory_space<vmem>>, %arg5: memref<1x256xf32, #tpu.memory_space<vmem>>, %arg6: memref<8x256xbf16, #tpu.memory_space<vmem>>, %arg7: memref<8x256xbf16, #tpu.memory_space<vmem>>, %arg8: memref<8x256xf32, #tpu.memory_space<vmem>>) attributes {dimension_semantics = [#tpu.dimension_semantics<parallel>, #tpu.dimension_semantics<parallel>, #tpu.dimension_semantics<arbitrary>], iteration_bounds = array<i64: 1, 1, 6>, scalar_prefetch = 0 : i64, scratch_operands = 1 : i64, tpu.core_type = #tpu.core_type<tc>, window_params = [{transform_indices = @transform_0, window_bounds = array<i64: 8, 384>}, {transform_indices = @transform_1, window_bounds = array<i64: 384, 256>}, {transform_indices = @transform_2, window_bounds = array<i64: 1, 256>}, {transform_indices = @transform_3, window_bounds = array<i64: 8, 256>}, {transform_indices = @transform_4, window_bounds = array<i64: 8, 256>}]} {
    %c0_i32 = arith.constant 0 : i32
    %0 = arith.cmpi eq, %arg2, %c0_i32 : i32
    %1 = arith.extui %0 : i1 to i32
    %c0_i32_0 = arith.constant 0 : i32
    %2 = arith.cmpi ne, %1, %c0_i32_0 : i32
    scf.if %2 {
      %cst_9 = arith.constant 0.000000e+00 : f32
      %12 = vector.broadcast %cst_9 : f32 to vector<8x256xf32>
      %c0_10 = arith.constant 0 : index
      %c0_11 = arith.constant 0 : index
      %13 = vector.load %arg8[%c0_10, %c0_11] : memref<8x256xf32, #tpu.memory_space<vmem>>, vector<8x256xf32>
      tpu.vector_store %arg8[%c0_10, %c0_11], %12 {strides = array<i32>} : memref<8x256xf32, #tpu.memory_space<vmem>>, vector<8x256xf32>,
    } else {
    }
    %c0 = arith.constant 0 : index
    %c0_1 = arith.constant 0 : index
    %3 = vector.load %arg8[%c0, %c0_1] : memref<8x256xf32, #tpu.memory_space<vmem>>, vector<8x256xf32>
    %c0_2 = arith.constant 0 : index
    %c0_3 = arith.constant 0 : index
    %4 = vector.load %arg3[%c0_2, %c0_3] : memref<8x384xbf16, #tpu.memory_space<vmem>>, vector<8x384xbf16>
    %c0_4 = arith.constant 0 : index
    %c0_5 = arith.constant 0 : index
    %5 = vector.load %arg4[%c0_4, %c0_5] : memref<384x256xbf16, #tpu.memory_space<vmem>>, vector<384x256xbf16>
    %cst = arith.constant dense<0.000000e+00> : vector<8x256xf32>
    %6 = tpu.matmul %4, %5, %cst {dimension_numbers = #tpu.dot_dimension_numbers<[1], [0], [0], [1], [0, 0, 1, 1], [], []>} : vector<8x384xbf16>, vector<384x256xbf16>, vector<8x256xf32> -> vector<8x256xf32>
    %7 = arith.addf %3, %6 : vector<8x256xf32>
    %c0_6 = arith.constant 0 : index
    %c0_7 = arith.constant 0 : index
    %8 = vector.load %arg8[%c0_6, %c0_7] : memref<8x256xf32, #tpu.memory_space<vmem>>, vector<8x256xf32>
    tpu.vector_store %arg8[%c0_6, %c0_7], %7 {strides = array<i32>} : memref<8x256xf32, #tpu.memory_space<vmem>>, vector<8x256xf32>,
    %c5_i32 = arith.constant 5 : i32
    %9 = arith.cmpi eq, %arg2, %c5_i32 : i32
    %10 = arith.extui %9 : i1 to i32
    %c0_i32_8 = arith.constant 0 : i32
    %11 = arith.cmpi ne, %10, %c0_i32_8 : i32
    scf.if %11 {
      %c0_9 = arith.constant 0 : index
      %c0_10 = arith.constant 0 : index
      %12 = vector.load %arg8[%c0_9, %c0_10] : memref<8x256xf32, #tpu.memory_space<vmem>>, vector<8x256xf32>
      %c0_11 = arith.constant 0 : index
      %c0_12 = arith.constant 0 : index
      %13 = vector.load %arg5[%c0_11, %c0_12] : memref<1x256xf32, #tpu.memory_space<vmem>>, vector<1x256xf32>
      %14 = vector.broadcast %13 : vector<1x256xf32> to vector<8x256xf32>
      %15 = arith.addf %12, %14 : vector<8x256xf32>
      %c0_13 = arith.constant 0 : index
      %c0_14 = arith.constant 0 : index
      %16 = vector.load %arg6[%c0_13, %c0_14] : memref<8x256xbf16, #tpu.memory_space<vmem>>, vector<8x256xbf16>
      %17 = arith.extf %16 : vector<8x256xbf16> to vector<8x256xf32>
      %18 = arith.addf %15, %17 : vector<8x256xf32>
      %cst_15 = arith.constant 0.000000e+00 : f32
      %19 = vector.broadcast %cst_15 : f32 to vector<8x256xf32>
      %20 = arith.maximumf %18, %19 : vector<8x256xf32>
      %21 = arith.truncf %20 : vector<8x256xf32> to vector<8x256xbf16>
      %c0_16 = arith.constant 0 : index
      %c0_17 = arith.constant 0 : index
      %22 = vector.load %arg7[%c0_16, %c0_17] : memref<8x256xbf16, #tpu.memory_space<vmem>>, vector<8x256xbf16>
      tpu.vector_store %arg7[%c0_16, %c0_17], %21 {strides = array<i32>} : memref<8x256xbf16, #tpu.memory_space<vmem>>, vector<8x256xbf16>,
    } else {
    }
    return
  }
  func.func @transform_0(%arg0: i32, %arg1: i32, %arg2: i32) -> (i32, i32) {
    %c0_i32 = arith.constant 0 : i32
    return %arg0, %arg2 : i32, i32
  }
  func.func @transform_1(%arg0: i32, %arg1: i32, %arg2: i32) -> (i32, i32) {
    %c0_i32 = arith.constant 0 : i32
    return %arg2, %arg1 : i32, i32
  }
  func.func @transform_2(%arg0: i32, %arg1: i32, %arg2: i32) -> (i32, i32) {
    %c0_i32 = arith.constant 0 : i32
    %c0_i32_0 = arith.constant 0 : i32
    return %c0_i32, %arg1 : i32, i32
  }
  func.func @transform_3(%arg0: i32, %arg1: i32, %arg2: i32) -> (i32, i32) {
    %c0_i32 = arith.constant 0 : i32
    return %arg0, %arg1 : i32, i32
  }
  func.func @transform_4(%arg0: i32, %arg1: i32, %arg2: i32) -> (i32, i32) {
    %c0_i32 = arith.constant 0 : i32
    return %arg0, %arg1 : i32, i32
  }
}

module attributes {stable_mosaic.version = 11 : i64} {
  func.func @_mm_epilogue_kernel(%arg0: i32, %arg1: i32, %arg2: i32, %arg3: memref<8x384xbf16, #tpu.memory_space<vmem>>, %arg4: memref<384x256xbf16, #tpu.memory_space<vmem>>, %arg5: memref<1x256xf32, #tpu.memory_space<vmem>>, %arg6: memref<8x256xbf16, #tpu.memory_space<vmem>>, %arg7: memref<8x256xf32, #tpu.memory_space<vmem>>) attributes {dimension_semantics = [#tpu.dimension_semantics<parallel>, #tpu.dimension_semantics<parallel>, #tpu.dimension_semantics<arbitrary>], iteration_bounds = array<i64: 1, 1, 6>, scalar_prefetch = 0 : i64, scratch_operands = 1 : i64, tpu.core_type = #tpu.core_type<tc>, window_params = [{transform_indices = @transform_0, window_bounds = array<i64: 8, 384>}, {transform_indices = @transform_1, window_bounds = array<i64: 384, 256>}, {transform_indices = @transform_2, window_bounds = array<i64: 1, 256>}, {transform_indices = @transform_3, window_bounds = array<i64: 8, 256>}]} {
    %c0_i32 = arith.constant 0 : i32
    %0 = arith.cmpi eq, %arg2, %c0_i32 : i32
    %1 = arith.extui %0 : i1 to i32
    %c0_i32_0 = arith.constant 0 : i32
    %2 = arith.cmpi ne, %1, %c0_i32_0 : i32
    scf.if %2 {
      %cst_9 = arith.constant 0.000000e+00 : f32
      %12 = vector.broadcast %cst_9 : f32 to vector<8x256xf32>
      %c0_10 = arith.constant 0 : index
      %c0_11 = arith.constant 0 : index
      %13 = vector.load %arg7[%c0_10, %c0_11] : memref<8x256xf32, #tpu.memory_space<vmem>>, vector<8x256xf32>
      tpu.vector_store %arg7[%c0_10, %c0_11], %12 {strides = array<i32>} : memref<8x256xf32, #tpu.memory_space<vmem>>, vector<8x256xf32>,
    } else {
    }
    %c0 = arith.constant 0 : index
    %c0_1 = arith.constant 0 : index
    %3 = vector.load %arg7[%c0, %c0_1] : memref<8x256xf32, #tpu.memory_space<vmem>>, vector<8x256xf32>
    %c0_2 = arith.constant 0 : index
    %c0_3 = arith.constant 0 : index
    %4 = vector.load %arg3[%c0_2, %c0_3] : memref<8x384xbf16, #tpu.memory_space<vmem>>, vector<8x384xbf16>
    %c0_4 = arith.constant 0 : index
    %c0_5 = arith.constant 0 : index
    %5 = vector.load %arg4[%c0_4, %c0_5] : memref<384x256xbf16, #tpu.memory_space<vmem>>, vector<384x256xbf16>
    %cst = arith.constant dense<0.000000e+00> : vector<8x256xf32>
    %6 = tpu.matmul %4, %5, %cst {dimension_numbers = #tpu.dot_dimension_numbers<[1], [0], [0], [1], [0, 0, 1, 1], [], []>} : vector<8x384xbf16>, vector<384x256xbf16>, vector<8x256xf32> -> vector<8x256xf32>
    %7 = arith.addf %3, %6 : vector<8x256xf32>
    %c0_6 = arith.constant 0 : index
    %c0_7 = arith.constant 0 : index
    %8 = vector.load %arg7[%c0_6, %c0_7] : memref<8x256xf32, #tpu.memory_space<vmem>>, vector<8x256xf32>
    tpu.vector_store %arg7[%c0_6, %c0_7], %7 {strides = array<i32>} : memref<8x256xf32, #tpu.memory_space<vmem>>, vector<8x256xf32>,
    %c5_i32 = arith.constant 5 : i32
    %9 = arith.cmpi eq, %arg2, %c5_i32 : i32
    %10 = arith.extui %9 : i1 to i32
    %c0_i32_8 = arith.constant 0 : i32
    %11 = arith.cmpi ne, %10, %c0_i32_8 : i32
    scf.if %11 {
      %c0_9 = arith.constant 0 : index
      %c0_10 = arith.constant 0 : index
      %12 = vector.load %arg7[%c0_9, %c0_10] : memref<8x256xf32, #tpu.memory_space<vmem>>, vector<8x256xf32>
      %c0_11 = arith.constant 0 : index
      %c0_12 = arith.constant 0 : index
      %13 = vector.load %arg5[%c0_11, %c0_12] : memref<1x256xf32, #tpu.memory_space<vmem>>, vector<1x256xf32>
      %14 = vector.broadcast %13 : vector<1x256xf32> to vector<8x256xf32>
      %15 = arith.addf %12, %14 : vector<8x256xf32>
      %cst_13 = arith.constant 0.000000e+00 : f32
      %16 = vector.broadcast %cst_13 : f32 to vector<8x256xf32>
      %17 = arith.maximumf %15, %16 : vector<8x256xf32>
      %18 = arith.truncf %17 : vector<8x256xf32> to vector<8x256xbf16>
      %c0_14 = arith.constant 0 : index
      %c0_15 = arith.constant 0 : index
      %19 = vector.load %arg6[%c0_14, %c0_15] : memref<8x256xbf16, #tpu.memory_space<vmem>>, vector<8x256xbf16>
      tpu.vector_store %arg6[%c0_14, %c0_15], %18 {strides = array<i32>} : memref<8x256xbf16, #tpu.memory_space<vmem>>, vector<8x256xbf16>,
    } else {
    }
    return
  }
  func.func @transform_0(%arg0: i32, %arg1: i32, %arg2: i32) -> (i32, i32) {
    %c0_i32 = arith.constant 0 : i32
    return %arg0, %arg2 : i32, i32
  }
  func.func @transform_1(%arg0: i32, %arg1: i32, %arg2: i32) -> (i32, i32) {
    %c0_i32 = arith.constant 0 : i32
    return %arg2, %arg1 : i32, i32
  }
  func.func @transform_2(%arg0: i32, %arg1: i32, %arg2: i32) -> (i32, i32) {
    %c0_i32 = arith.constant 0 : i32
    %c0_i32_0 = arith.constant 0 : i32
    return %c0_i32, %arg1 : i32, i32
  }
  func.func @transform_3(%arg0: i32, %arg1: i32, %arg2: i32) -> (i32, i32) {
    %c0_i32 = arith.constant 0 : i32
    return %arg0, %arg1 : i32, i32
  }
}

module attributes {stable_mosaic.version = 11 : i64} {
  func.func @_mm_epilogue_kernel(%arg0: i32, %arg1: i32, %arg2: i32, %arg3: memref<8x384xbf16, #tpu.memory_space<vmem>>, %arg4: memref<384x256xbf16, #tpu.memory_space<vmem>>, %arg5: memref<1x256xf32, #tpu.memory_space<vmem>>, %arg6: memref<8x256xbf16, #tpu.memory_space<vmem>>, %arg7: memref<8x256xf32, #tpu.memory_space<vmem>>) attributes {dimension_semantics = [#tpu.dimension_semantics<parallel>, #tpu.dimension_semantics<parallel>, #tpu.dimension_semantics<arbitrary>], iteration_bounds = array<i64: 1, 2, 6>, scalar_prefetch = 0 : i64, scratch_operands = 1 : i64, tpu.core_type = #tpu.core_type<tc>, window_params = [{transform_indices = @transform_0, window_bounds = array<i64: 8, 384>}, {transform_indices = @transform_1, window_bounds = array<i64: 384, 256>}, {transform_indices = @transform_2, window_bounds = array<i64: 1, 256>}, {transform_indices = @transform_3, window_bounds = array<i64: 8, 256>}]} {
    %c0_i32 = arith.constant 0 : i32
    %0 = arith.cmpi eq, %arg2, %c0_i32 : i32
    %1 = arith.extui %0 : i1 to i32
    %c0_i32_0 = arith.constant 0 : i32
    %2 = arith.cmpi ne, %1, %c0_i32_0 : i32
    scf.if %2 {
      %cst_9 = arith.constant 0.000000e+00 : f32
      %12 = vector.broadcast %cst_9 : f32 to vector<8x256xf32>
      %c0_10 = arith.constant 0 : index
      %c0_11 = arith.constant 0 : index
      %13 = vector.load %arg7[%c0_10, %c0_11] : memref<8x256xf32, #tpu.memory_space<vmem>>, vector<8x256xf32>
      tpu.vector_store %arg7[%c0_10, %c0_11], %12 {strides = array<i32>} : memref<8x256xf32, #tpu.memory_space<vmem>>, vector<8x256xf32>,
    } else {
    }
    %c0 = arith.constant 0 : index
    %c0_1 = arith.constant 0 : index
    %3 = vector.load %arg7[%c0, %c0_1] : memref<8x256xf32, #tpu.memory_space<vmem>>, vector<8x256xf32>
    %c0_2 = arith.constant 0 : index
    %c0_3 = arith.constant 0 : index
    %4 = vector.load %arg3[%c0_2, %c0_3] : memref<8x384xbf16, #tpu.memory_space<vmem>>, vector<8x384xbf16>
    %c0_4 = arith.constant 0 : index
    %c0_5 = arith.constant 0 : index
    %5 = vector.load %arg4[%c0_4, %c0_5] : memref<384x256xbf16, #tpu.memory_space<vmem>>, vector<384x256xbf16>
    %cst = arith.constant dense<0.000000e+00> : vector<8x256xf32>
    %6 = tpu.matmul %4, %5, %cst {dimension_numbers = #tpu.dot_dimension_numbers<[1], [0], [0], [1], [0, 0, 1, 1], [], []>} : vector<8x384xbf16>, vector<384x256xbf16>, vector<8x256xf32> -> vector<8x256xf32>
    %7 = arith.addf %3, %6 : vector<8x256xf32>
    %c0_6 = arith.constant 0 : index
    %c0_7 = arith.constant 0 : index
    %8 = vector.load %arg7[%c0_6, %c0_7] : memref<8x256xf32, #tpu.memory_space<vmem>>, vector<8x256xf32>
    tpu.vector_store %arg7[%c0_6, %c0_7], %7 {strides = array<i32>} : memref<8x256xf32, #tpu.memory_space<vmem>>, vector<8x256xf32>,
    %c5_i32 = arith.constant 5 : i32
    %9 = arith.cmpi eq, %arg2, %c5_i32 : i32
    %10 = arith.extui %9 : i1 to i32
    %c0_i32_8 = arith.constant 0 : i32
    %11 = arith.cmpi ne, %10, %c0_i32_8 : i32
    scf.if %11 {
      %c0_9 = arith.constant 0 : index
      %c0_10 = arith.constant 0 : index
      %12 = vector.load %arg7[%c0_9, %c0_10] : memref<8x256xf32, #tpu.memory_space<vmem>>, vector<8x256xf32>
      %c0_11 = arith.constant 0 : index
      %c0_12 = arith.constant 0 : index
      %13 = vector.load %arg5[%c0_11, %c0_12] : memref<1x256xf32, #tpu.memory_space<vmem>>, vector<1x256xf32>
      %14 = vector.broadcast %13 : vector<1x256xf32> to vector<8x256xf32>
      %15 = arith.addf %12, %14 : vector<8x256xf32>
      %cst_13 = arith.constant 0.000000e+00 : f32
      %16 = vector.broadcast %cst_13 : f32 to vector<8x256xf32>
      %17 = arith.maximumf %15, %16 : vector<8x256xf32>
      %18 = arith.truncf %17 : vector<8x256xf32> to vector<8x256xbf16>
      %c0_14 = arith.constant 0 : index
      %c0_15 = arith.constant 0 : index
      %19 = vector.load %arg6[%c0_14, %c0_15] : memref<8x256xbf16, #tpu.memory_space<vmem>>, vector<8x256xbf16>
      tpu.vector_store %arg6[%c0_14, %c0_15], %18 {strides = array<i32>} : memref<8x256xbf16, #tpu.memory_space<vmem>>, vector<8x256xbf16>,
    } else {
    }
    return
  }
  func.func @transform_0(%arg0: i32, %arg1: i32, %arg2: i32) -> (i32, i32) {
    %c0_i32 = arith.constant 0 : i32
    return %arg0, %arg2 : i32, i32
  }
  func.func @transform_1(%arg0: i32, %arg1: i32, %arg2: i32) -> (i32, i32) {
    %c0_i32 = arith.constant 0 : i32
    return %arg2, %arg1 : i32, i32
  }
  func.func @transform_2(%arg0: i32, %arg1: i32, %arg2: i32) -> (i32, i32) {
    %c0_i32 = arith.constant 0 : i32
    %c0_i32_0 = arith.constant 0 : i32
    return %c0_i32, %arg1 : i32, i32
  }
  func.func @transform_3(%arg0: i32, %arg1: i32, %arg2: i32) -> (i32, i32) {
    %c0_i32 = arith.constant 0 : i32
    return %arg0, %arg1 : i32, i32
  }
}

module attributes {stable_mosaic.version = 11 : i64} {
  func.func @_mm_epilogue_kernel(%arg0: i32, %arg1: i32, %arg2: i32, %arg3: memref<8x256xbf16, #tpu.memory_space<vmem>>, %arg4: memref<256x256xbf16, #tpu.memory_space<vmem>>, %arg5: memref<1x256xf32, #tpu.memory_space<vmem>>, %arg6: memref<8x256xbf16, #tpu.memory_space<vmem>>, %arg7: memref<8x256xf32, #tpu.memory_space<vmem>>) attributes {dimension_semantics = [#tpu.dimension_semantics<parallel>, #tpu.dimension_semantics<parallel>, #tpu.dimension_semantics<arbitrary>], iteration_bounds = array<i64: 1, 2, 1>, scalar_prefetch = 0 : i64, scratch_operands = 1 : i64, tpu.core_type = #tpu.core_type<tc>, window_params = [{transform_indices = @transform_0, window_bounds = array<i64: 8, 256>}, {transform_indices = @transform_1, window_bounds = array<i64: 256, 256>}, {transform_indices = @transform_2, window_bounds = array<i64: 1, 256>}, {transform_indices = @transform_3, window_bounds = array<i64: 8, 256>}]} {
    %c0_i32 = arith.constant 0 : i32
    %0 = arith.cmpi eq, %arg2, %c0_i32 : i32
    %1 = arith.extui %0 : i1 to i32
    %c0_i32_0 = arith.constant 0 : i32
    %2 = arith.cmpi ne, %1, %c0_i32_0 : i32
    scf.if %2 {
      %cst_10 = arith.constant 0.000000e+00 : f32
      %12 = vector.broadcast %cst_10 : f32 to vector<8x256xf32>
      %c0_11 = arith.constant 0 : index
      %c0_12 = arith.constant 0 : index
      %13 = vector.load %arg7[%c0_11, %c0_12] : memref<8x256xf32, #tpu.memory_space<vmem>>, vector<8x256xf32>
      tpu.vector_store %arg7[%c0_11, %c0_12], %12 {strides = array<i32>} : memref<8x256xf32, #tpu.memory_space<vmem>>, vector<8x256xf32>,
    } else {
    }
    %c0 = arith.constant 0 : index
    %c0_1 = arith.constant 0 : index
    %3 = vector.load %arg7[%c0, %c0_1] : memref<8x256xf32, #tpu.memory_space<vmem>>, vector<8x256xf32>
    %c0_2 = arith.constant 0 : index
    %c0_3 = arith.constant 0 : index
    %4 = vector.load %arg3[%c0_2, %c0_3] : memref<8x256xbf16, #tpu.memory_space<vmem>>, vector<8x256xbf16>
    %c0_4 = arith.constant 0 : index
    %c0_5 = arith.constant 0 : index
    %5 = vector.load %arg4[%c0_4, %c0_5] : memref<256x256xbf16, #tpu.memory_space<vmem>>, vector<256x256xbf16>
    %cst = arith.constant dense<0.000000e+00> : vector<8x256xf32>
    %6 = tpu.matmul %4, %5, %cst {dimension_numbers = #tpu.dot_dimension_numbers<[1], [0], [0], [1], [0, 0, 1, 1], [], []>} : vector<8x256xbf16>, vector<256x256xbf16>, vector<8x256xf32> -> vector<8x256xf32>
    %7 = arith.addf %3, %6 : vector<8x256xf32>
    %c0_6 = arith.constant 0 : index
    %c0_7 = arith.constant 0 : index
    %8 = vector.load %arg7[%c0_6, %c0_7] : memref<8x256xf32, #tpu.memory_space<vmem>>, vector<8x256xf32>
    tpu.vector_store %arg7[%c0_6, %c0_7], %7 {strides = array<i32>} : memref<8x256xf32, #tpu.memory_space<vmem>>, vector<8x256xf32>,
    %c0_i32_8 = arith.constant 0 : i32
    %9 = arith.cmpi eq, %arg2, %c0_i32_8 : i32
    %10 = arith.extui %9 : i1 to i32
    %c0_i32_9 = arith.constant 0 : i32
    %11 = arith.cmpi ne, %10, %c0_i32_9 : i32
    scf.if %11 {
      %c0_10 = arith.constant 0 : index
      %c0_11 = arith.constant 0 : index
      %12 = vector.load %arg7[%c0_10, %c0_11] : memref<8x256xf32, #tpu.memory_space<vmem>>, vector<8x256xf32>
      %c0_12 = arith.constant 0 : index
      %c0_13 = arith.constant 0 : index
      %13 = vector.load %arg5[%c0_12, %c0_13] : memref<1x256xf32, #tpu.memory_space<vmem>>, vector<1x256xf32>
      %14 = vector.broadcast %13 : vector<1x256xf32> to vector<8x256xf32>
      %15 = arith.addf %12, %14 : vector<8x256xf32>
      %16 = arith.truncf %15 : vector<8x256xf32> to vector<8x256xbf16>
      %c0_14 = arith.constant 0 : index
      %c0_15 = arith.constant 0 : index
      %17 = vector.load %arg6[%c0_14, %c0_15] : memref<8x256xbf16, #tpu.memory_space<vmem>>, vector<8x256xbf16>
      tpu.vector_store %arg6[%c0_14, %c0_15], %16 {strides = array<i32>} : memref<8x256xbf16, #tpu.memory_space<vmem>>, vector<8x256xbf16>,
    } else {
    }
    return
  }
  func.func @transform_0(%arg0: i32, %arg1: i32, %arg2: i32) -> (i32, i32) {
    %c0_i32 = arith.constant 0 : i32
    return %arg0, %arg2 : i32, i32
  }
  func.func @transform_1(%arg0: i32, %arg1: i32, %arg2: i32) -> (i32, i32) {
    %c0_i32 = arith.constant 0 : i32
    return %arg2, %arg1 : i32, i32
  }
  func.func @transform_2(%arg0: i32, %arg1: i32, %arg2: i32) -> (i32, i32) {
    %c0_i32 = arith.constant 0 : i32
    %c0_i32_0 = arith.constant 0 : i32
    return %c0_i32, %arg1 : i32, i32
  }
  func.func @transform_3(%arg0: i32, %arg1: i32, %arg2: i32) -> (i32, i32) {
    %c0_i32 = arith.constant 0 : i32
    return %arg0, %arg1 : i32, i32
  }
}

module attributes {stable_mosaic.version = 11 : i64} {
  func.func @_mm_epilogue_kernel(%arg0: i32, %arg1: i32, %arg2: i32, %arg3: memref<8x512xbf16, #tpu.memory_space<vmem>>, %arg4: memref<512x256xbf16, #tpu.memory_space<vmem>>, %arg5: memref<1x256xf32, #tpu.memory_space<vmem>>, %arg6: memref<8x256xbf16, #tpu.memory_space<vmem>>, %arg7: memref<8x256xbf16, #tpu.memory_space<vmem>>, %arg8: memref<8x256xf32, #tpu.memory_space<vmem>>) attributes {dimension_semantics = [#tpu.dimension_semantics<parallel>, #tpu.dimension_semantics<parallel>, #tpu.dimension_semantics<arbitrary>], iteration_bounds = array<i64: 1, 2, 9>, scalar_prefetch = 0 : i64, scratch_operands = 1 : i64, tpu.core_type = #tpu.core_type<tc>, window_params = [{transform_indices = @transform_0, window_bounds = array<i64: 8, 512>}, {transform_indices = @transform_1, window_bounds = array<i64: 512, 256>}, {transform_indices = @transform_2, window_bounds = array<i64: 1, 256>}, {transform_indices = @transform_3, window_bounds = array<i64: 8, 256>}, {transform_indices = @transform_4, window_bounds = array<i64: 8, 256>}]} {
    %c0_i32 = arith.constant 0 : i32
    %0 = arith.cmpi eq, %arg2, %c0_i32 : i32
    %1 = arith.extui %0 : i1 to i32
    %c0_i32_0 = arith.constant 0 : i32
    %2 = arith.cmpi ne, %1, %c0_i32_0 : i32
    scf.if %2 {
      %cst_9 = arith.constant 0.000000e+00 : f32
      %12 = vector.broadcast %cst_9 : f32 to vector<8x256xf32>
      %c0_10 = arith.constant 0 : index
      %c0_11 = arith.constant 0 : index
      %13 = vector.load %arg8[%c0_10, %c0_11] : memref<8x256xf32, #tpu.memory_space<vmem>>, vector<8x256xf32>
      tpu.vector_store %arg8[%c0_10, %c0_11], %12 {strides = array<i32>} : memref<8x256xf32, #tpu.memory_space<vmem>>, vector<8x256xf32>,
    } else {
    }
    %c0 = arith.constant 0 : index
    %c0_1 = arith.constant 0 : index
    %3 = vector.load %arg8[%c0, %c0_1] : memref<8x256xf32, #tpu.memory_space<vmem>>, vector<8x256xf32>
    %c0_2 = arith.constant 0 : index
    %c0_3 = arith.constant 0 : index
    %4 = vector.load %arg3[%c0_2, %c0_3] : memref<8x512xbf16, #tpu.memory_space<vmem>>, vector<8x512xbf16>
    %c0_4 = arith.constant 0 : index
    %c0_5 = arith.constant 0 : index
    %5 = vector.load %arg4[%c0_4, %c0_5] : memref<512x256xbf16, #tpu.memory_space<vmem>>, vector<512x256xbf16>
    %cst = arith.constant dense<0.000000e+00> : vector<8x256xf32>
    %6 = tpu.matmul %4, %5, %cst {dimension_numbers = #tpu.dot_dimension_numbers<[1], [0], [0], [1], [0, 0, 1, 1], [], []>} : vector<8x512xbf16>, vector<512x256xbf16>, vector<8x256xf32> -> vector<8x256xf32>
    %7 = arith.addf %3, %6 : vector<8x256xf32>
    %c0_6 = arith.constant 0 : index
    %c0_7 = arith.constant 0 : index
    %8 = vector.load %arg8[%c0_6, %c0_7] : memref<8x256xf32, #tpu.memory_space<vmem>>, vector<8x256xf32>
    tpu.vector_store %arg8[%c0_6, %c0_7], %7 {strides = array<i32>} : memref<8x256xf32, #tpu.memory_space<vmem>>, vector<8x256xf32>,
    %c8_i32 = arith.constant 8 : i32
    %9 = arith.cmpi eq, %arg2, %c8_i32 : i32
    %10 = arith.extui %9 : i1 to i32
    %c0_i32_8 = arith.constant 0 : i32
    %11 = arith.cmpi ne, %10, %c0_i32_8 : i32
    scf.if %11 {
      %c0_9 = arith.constant 0 : index
      %c0_10 = arith.constant 0 : index
      %12 = vector.load %arg8[%c0_9, %c0_10] : memref<8x256xf32, #tpu.memory_space<vmem>>, vector<8x256xf32>
      %c0_11 = arith.constant 0 : index
      %c0_12 = arith.constant 0 : index
      %13 = vector.load %arg5[%c0_11, %c0_12] : memref<1x256xf32, #tpu.memory_space<vmem>>, vector<1x256xf32>
      %14 = vector.broadcast %13 : vector<1x256xf32> to vector<8x256xf32>
      %15 = arith.addf %12, %14 : vector<8x256xf32>
      %c0_13 = arith.constant 0 : index
      %c0_14 = arith.constant 0 : index
      %16 = vector.load %arg6[%c0_13, %c0_14] : memref<8x256xbf16, #tpu.memory_space<vmem>>, vector<8x256xbf16>
      %17 = arith.extf %16 : vector<8x256xbf16> to vector<8x256xf32>
      %18 = arith.addf %15, %17 : vector<8x256xf32>
      %cst_15 = arith.constant 0.000000e+00 : f32
      %19 = vector.broadcast %cst_15 : f32 to vector<8x256xf32>
      %20 = arith.maximumf %18, %19 : vector<8x256xf32>
      %21 = arith.truncf %20 : vector<8x256xf32> to vector<8x256xbf16>
      %c0_16 = arith.constant 0 : index
      %c0_17 = arith.constant 0 : index
      %22 = vector.load %arg7[%c0_16, %c0_17] : memref<8x256xbf16, #tpu.memory_space<vmem>>, vector<8x256xbf16>
      tpu.vector_store %arg7[%c0_16, %c0_17], %21 {strides = array<i32>} : memref<8x256xbf16, #tpu.memory_space<vmem>>, vector<8x256xbf16>,
    } else {
    }
    return
  }
  func.func @transform_0(%arg0: i32, %arg1: i32, %arg2: i32) -> (i32, i32) {
    %c0_i32 = arith.constant 0 : i32
    return %arg0, %arg2 : i32, i32
  }
  func.func @transform_1(%arg0: i32, %arg1: i32, %arg2: i32) -> (i32, i32) {
    %c0_i32 = arith.constant 0 : i32
    return %arg2, %arg1 : i32, i32
  }
  func.func @transform_2(%arg0: i32, %arg1: i32, %arg2: i32) -> (i32, i32) {
    %c0_i32 = arith.constant 0 : i32
    %c0_i32_0 = arith.constant 0 : i32
    return %c0_i32, %arg1 : i32, i32
  }
  func.func @transform_3(%arg0: i32, %arg1: i32, %arg2: i32) -> (i32, i32) {
    %c0_i32 = arith.constant 0 : i32
    return %arg0, %arg1 : i32, i32
  }
  func.func @transform_4(%arg0: i32, %arg1: i32, %arg2: i32) -> (i32, i32) {
    %c0_i32 = arith.constant 0 : i32
    return %arg0, %arg1 : i32, i32
  }
}

module attributes {stable_mosaic.version = 11 : i64} {
  func.func @_mm_epilogue_kernel(%arg0: i32, %arg1: i32, %arg2: i32, %arg3: memref<8x512xbf16, #tpu.memory_space<vmem>>, %arg4: memref<512x256xbf16, #tpu.memory_space<vmem>>, %arg5: memref<1x256xf32, #tpu.memory_space<vmem>>, %arg6: memref<8x256xbf16, #tpu.memory_space<vmem>>, %arg7: memref<8x256xf32, #tpu.memory_space<vmem>>) attributes {dimension_semantics = [#tpu.dimension_semantics<parallel>, #tpu.dimension_semantics<parallel>, #tpu.dimension_semantics<arbitrary>], iteration_bounds = array<i64: 1, 2, 9>, scalar_prefetch = 0 : i64, scratch_operands = 1 : i64, tpu.core_type = #tpu.core_type<tc>, window_params = [{transform_indices = @transform_0, window_bounds = array<i64: 8, 512>}, {transform_indices = @transform_1, window_bounds = array<i64: 512, 256>}, {transform_indices = @transform_2, window_bounds = array<i64: 1, 256>}, {transform_indices = @transform_3, window_bounds = array<i64: 8, 256>}]} {
    %c0_i32 = arith.constant 0 : i32
    %0 = arith.cmpi eq, %arg2, %c0_i32 : i32
    %1 = arith.extui %0 : i1 to i32
    %c0_i32_0 = arith.constant 0 : i32
    %2 = arith.cmpi ne, %1, %c0_i32_0 : i32
    scf.if %2 {
      %cst_9 = arith.constant 0.000000e+00 : f32
      %12 = vector.broadcast %cst_9 : f32 to vector<8x256xf32>
      %c0_10 = arith.constant 0 : index
      %c0_11 = arith.constant 0 : index
      %13 = vector.load %arg7[%c0_10, %c0_11] : memref<8x256xf32, #tpu.memory_space<vmem>>, vector<8x256xf32>
      tpu.vector_store %arg7[%c0_10, %c0_11], %12 {strides = array<i32>} : memref<8x256xf32, #tpu.memory_space<vmem>>, vector<8x256xf32>,
    } else {
    }
    %c0 = arith.constant 0 : index
    %c0_1 = arith.constant 0 : index
    %3 = vector.load %arg7[%c0, %c0_1] : memref<8x256xf32, #tpu.memory_space<vmem>>, vector<8x256xf32>
    %c0_2 = arith.constant 0 : index
    %c0_3 = arith.constant 0 : index
    %4 = vector.load %arg3[%c0_2, %c0_3] : memref<8x512xbf16, #tpu.memory_space<vmem>>, vector<8x512xbf16>
    %c0_4 = arith.constant 0 : index
    %c0_5 = arith.constant 0 : index
    %5 = vector.load %arg4[%c0_4, %c0_5] : memref<512x256xbf16, #tpu.memory_space<vmem>>, vector<512x256xbf16>
    %cst = arith.constant dense<0.000000e+00> : vector<8x256xf32>
    %6 = tpu.matmul %4, %5, %cst {dimension_numbers = #tpu.dot_dimension_numbers<[1], [0], [0], [1], [0, 0, 1, 1], [], []>} : vector<8x512xbf16>, vector<512x256xbf16>, vector<8x256xf32> -> vector<8x256xf32>
    %7 = arith.addf %3, %6 : vector<8x256xf32>
    %c0_6 = arith.constant 0 : index
    %c0_7 = arith.constant 0 : index
    %8 = vector.load %arg7[%c0_6, %c0_7] : memref<8x256xf32, #tpu.memory_space<vmem>>, vector<8x256xf32>
    tpu.vector_store %arg7[%c0_6, %c0_7], %7 {strides = array<i32>} : memref<8x256xf32, #tpu.memory_space<vmem>>, vector<8x256xf32>,
    %c8_i32 = arith.constant 8 : i32
    %9 = arith.cmpi eq, %arg2, %c8_i32 : i32
    %10 = arith.extui %9 : i1 to i32
    %c0_i32_8 = arith.constant 0 : i32
    %11 = arith.cmpi ne, %10, %c0_i32_8 : i32
    scf.if %11 {
      %c0_9 = arith.constant 0 : index
      %c0_10 = arith.constant 0 : index
      %12 = vector.load %arg7[%c0_9, %c0_10] : memref<8x256xf32, #tpu.memory_space<vmem>>, vector<8x256xf32>
      %c0_11 = arith.constant 0 : index
      %c0_12 = arith.constant 0 : index
      %13 = vector.load %arg5[%c0_11, %c0_12] : memref<1x256xf32, #tpu.memory_space<vmem>>, vector<1x256xf32>
      %14 = vector.broadcast %13 : vector<1x256xf32> to vector<8x256xf32>
      %15 = arith.addf %12, %14 : vector<8x256xf32>
      %cst_13 = arith.constant 0.000000e+00 : f32
      %16 = vector.broadcast %cst_13 : f32 to vector<8x256xf32>
      %17 = arith.maximumf %15, %16 : vector<8x256xf32>
      %18 = arith.truncf %17 : vector<8x256xf32> to vector<8x256xbf16>
      %c0_14 = arith.constant 0 : index
      %c0_15 = arith.constant 0 : index
      %19 = vector.load %arg6[%c0_14, %c0_15] : memref<8x256xbf16, #tpu.memory_space<vmem>>, vector<8x256xbf16>
      tpu.vector_store %arg6[%c0_14, %c0_15], %18 {strides = array<i32>} : memref<8x256xbf16, #tpu.memory_space<vmem>>, vector<8x256xbf16>,
    } else {
    }
    return
  }
  func.func @transform_0(%arg0: i32, %arg1: i32, %arg2: i32) -> (i32, i32) {
    %c0_i32 = arith.constant 0 : i32
    return %arg0, %arg2 : i32, i32
  }
  func.func @transform_1(%arg0: i32, %arg1: i32, %arg2: i32) -> (i32, i32) {
    %c0_i32 = arith.constant 0 : i32
    return %arg2, %arg1 : i32, i32
  }
  func.func @transform_2(%arg0: i32, %arg1: i32, %arg2: i32) -> (i32, i32) {
    %c0_i32 = arith.constant 0 : i32
    %c0_i32_0 = arith.constant 0 : i32
    return %c0_i32, %arg1 : i32, i32
  }
  func.func @transform_3(%arg0: i32, %arg1: i32, %arg2: i32) -> (i32, i32) {
    %c0_i32 = arith.constant 0 : i32
    return %arg0, %arg1 : i32, i32
  }
}

module attributes {stable_mosaic.version = 11 : i64} {
  func.func @_mm_epilogue_kernel(%arg0: i32, %arg1: i32, %arg2: i32, %arg3: memref<8x512xbf16, #tpu.memory_space<vmem>>, %arg4: memref<512x128xbf16, #tpu.memory_space<vmem>>, %arg5: memref<1x128xf32, #tpu.memory_space<vmem>>, %arg6: memref<8x128xf32, #tpu.memory_space<vmem>>, %arg7: memref<8x128xf32, #tpu.memory_space<vmem>>) attributes {dimension_semantics = [#tpu.dimension_semantics<parallel>, #tpu.dimension_semantics<parallel>, #tpu.dimension_semantics<arbitrary>], iteration_bounds = array<i64: 1, 1, 1>, scalar_prefetch = 0 : i64, scratch_operands = 1 : i64, tpu.core_type = #tpu.core_type<tc>, window_params = [{transform_indices = @transform_0, window_bounds = array<i64: 8, 512>}, {transform_indices = @transform_1, window_bounds = array<i64: 512, 128>}, {transform_indices = @transform_2, window_bounds = array<i64: 1, 128>}, {transform_indices = @transform_3, window_bounds = array<i64: 8, 128>}]} {
    %c0_i32 = arith.constant 0 : i32
    %0 = arith.cmpi eq, %arg2, %c0_i32 : i32
    %1 = arith.extui %0 : i1 to i32
    %c0_i32_0 = arith.constant 0 : i32
    %2 = arith.cmpi ne, %1, %c0_i32_0 : i32
    scf.if %2 {
      %cst_10 = arith.constant 0.000000e+00 : f32
      %12 = vector.broadcast %cst_10 : f32 to vector<8x128xf32>
      %c0_11 = arith.constant 0 : index
      %c0_12 = arith.constant 0 : index
      %13 = vector.load %arg7[%c0_11, %c0_12] : memref<8x128xf32, #tpu.memory_space<vmem>>, vector<8x128xf32>
      tpu.vector_store %arg7[%c0_11, %c0_12], %12 {strides = array<i32>} : memref<8x128xf32, #tpu.memory_space<vmem>>, vector<8x128xf32>,
    } else {
    }
    %c0 = arith.constant 0 : index
    %c0_1 = arith.constant 0 : index
    %3 = vector.load %arg7[%c0, %c0_1] : memref<8x128xf32, #tpu.memory_space<vmem>>, vector<8x128xf32>
    %c0_2 = arith.constant 0 : index
    %c0_3 = arith.constant 0 : index
    %4 = vector.load %arg3[%c0_2, %c0_3] : memref<8x512xbf16, #tpu.memory_space<vmem>>, vector<8x512xbf16>
    %c0_4 = arith.constant 0 : index
    %c0_5 = arith.constant 0 : index
    %5 = vector.load %arg4[%c0_4, %c0_5] : memref<512x128xbf16, #tpu.memory_space<vmem>>, vector<512x128xbf16>
    %cst = arith.constant dense<0.000000e+00> : vector<8x128xf32>
    %6 = tpu.matmul %4, %5, %cst {dimension_numbers = #tpu.dot_dimension_numbers<[1], [0], [0], [1], [0, 0, 1, 1], [], []>} : vector<8x512xbf16>, vector<512x128xbf16>, vector<8x128xf32> -> vector<8x128xf32>
    %7 = arith.addf %3, %6 : vector<8x128xf32>
    %c0_6 = arith.constant 0 : index
    %c0_7 = arith.constant 0 : index
    %8 = vector.load %arg7[%c0_6, %c0_7] : memref<8x128xf32, #tpu.memory_space<vmem>>, vector<8x128xf32>
    tpu.vector_store %arg7[%c0_6, %c0_7], %7 {strides = array<i32>} : memref<8x128xf32, #tpu.memory_space<vmem>>, vector<8x128xf32>,
    %c0_i32_8 = arith.constant 0 : i32
    %9 = arith.cmpi eq, %arg2, %c0_i32_8 : i32
    %10 = arith.extui %9 : i1 to i32
    %c0_i32_9 = arith.constant 0 : i32
    %11 = arith.cmpi ne, %10, %c0_i32_9 : i32
    scf.if %11 {
      %c0_10 = arith.constant 0 : index
      %c0_11 = arith.constant 0 : index
      %12 = vector.load %arg7[%c0_10, %c0_11] : memref<8x128xf32, #tpu.memory_space<vmem>>, vector<8x128xf32>
      %c0_12 = arith.constant 0 : index
      %c0_13 = arith.constant 0 : index
      %13 = vector.load %arg5[%c0_12, %c0_13] : memref<1x128xf32, #tpu.memory_space<vmem>>, vector<1x128xf32>
      %14 = vector.broadcast %13 : vector<1x128xf32> to vector<8x128xf32>
      %15 = arith.addf %12, %14 : vector<8x128xf32>
      %c0_14 = arith.constant 0 : index
      %c0_15 = arith.constant 0 : index
      %16 = vector.load %arg6[%c0_14, %c0_15] : memref<8x128xf32, #tpu.memory_space<vmem>>, vector<8x128xf32>
      tpu.vector_store %arg6[%c0_14, %c0_15], %15 {strides = array<i32>} : memref<8x128xf32, #tpu.memory_space<vmem>>, vector<8x128xf32>,
    } else {
    }
    return
  }
  func.func @transform_0(%arg0: i32, %arg1: i32, %arg2: i32) -> (i32, i32) {
    %c0_i32 = arith.constant 0 : i32
    return %arg0, %arg2 : i32, i32
  }
  func.func @transform_1(%arg0: i32, %arg1: i32, %arg2: i32) -> (i32, i32) {
    %c0_i32 = arith.constant 0 : i32
    return %arg2, %arg1 : i32, i32
  }
  func.func @transform_2(%arg0: i32, %arg1: i32, %arg2: i32) -> (i32, i32) {
    %c0_i32 = arith.constant 0 : i32
    %c0_i32_0 = arith.constant 0 : i32
    return %c0_i32, %arg1 : i32, i32
  }
  func.func @transform_3(%arg0: i32, %arg1: i32, %arg2: i32) -> (i32, i32) {
    %c0_i32 = arith.constant 0 : i32
    return %arg0, %arg1 : i32, i32
  }
}

module attributes {stable_mosaic.version = 11 : i64} {
  func.func @_mm_epilogue_kernel(%arg0: i32, %arg1: i32, %arg2: i32, %arg3: memref<8x128xbf16, #tpu.memory_space<vmem>>, %arg4: memref<128x128xbf16, #tpu.memory_space<vmem>>, %arg5: memref<1x128xf32, #tpu.memory_space<vmem>>, %arg6: memref<8x128xf32, #tpu.memory_space<vmem>>, %arg7: memref<8x128xf32, #tpu.memory_space<vmem>>) attributes {dimension_semantics = [#tpu.dimension_semantics<parallel>, #tpu.dimension_semantics<parallel>, #tpu.dimension_semantics<arbitrary>], iteration_bounds = array<i64: 1, 1, 1>, scalar_prefetch = 0 : i64, scratch_operands = 1 : i64, tpu.core_type = #tpu.core_type<tc>, window_params = [{transform_indices = @transform_0, window_bounds = array<i64: 8, 128>}, {transform_indices = @transform_1, window_bounds = array<i64: 128, 128>}, {transform_indices = @transform_2, window_bounds = array<i64: 1, 128>}, {transform_indices = @transform_3, window_bounds = array<i64: 8, 128>}]} {
    %c0_i32 = arith.constant 0 : i32
    %0 = arith.cmpi eq, %arg2, %c0_i32 : i32
    %1 = arith.extui %0 : i1 to i32
    %c0_i32_0 = arith.constant 0 : i32
    %2 = arith.cmpi ne, %1, %c0_i32_0 : i32
    scf.if %2 {
      %cst_10 = arith.constant 0.000000e+00 : f32
      %12 = vector.broadcast %cst_10 : f32 to vector<8x128xf32>
      %c0_11 = arith.constant 0 : index
      %c0_12 = arith.constant 0 : index
      %13 = vector.load %arg7[%c0_11, %c0_12] : memref<8x128xf32, #tpu.memory_space<vmem>>, vector<8x128xf32>
      tpu.vector_store %arg7[%c0_11, %c0_12], %12 {strides = array<i32>} : memref<8x128xf32, #tpu.memory_space<vmem>>, vector<8x128xf32>,
    } else {
    }
    %c0 = arith.constant 0 : index
    %c0_1 = arith.constant 0 : index
    %3 = vector.load %arg7[%c0, %c0_1] : memref<8x128xf32, #tpu.memory_space<vmem>>, vector<8x128xf32>
    %c0_2 = arith.constant 0 : index
    %c0_3 = arith.constant 0 : index
    %4 = vector.load %arg3[%c0_2, %c0_3] : memref<8x128xbf16, #tpu.memory_space<vmem>>, vector<8x128xbf16>
    %c0_4 = arith.constant 0 : index
    %c0_5 = arith.constant 0 : index
    %5 = vector.load %arg4[%c0_4, %c0_5] : memref<128x128xbf16, #tpu.memory_space<vmem>>, vector<128x128xbf16>
    %cst = arith.constant dense<0.000000e+00> : vector<8x128xf32>
    %6 = tpu.matmul %4, %5, %cst {dimension_numbers = #tpu.dot_dimension_numbers<[1], [0], [0], [1], [0, 0, 1, 1], [], []>} : vector<8x128xbf16>, vector<128x128xbf16>, vector<8x128xf32> -> vector<8x128xf32>
    %7 = arith.addf %3, %6 : vector<8x128xf32>
    %c0_6 = arith.constant 0 : index
    %c0_7 = arith.constant 0 : index
    %8 = vector.load %arg7[%c0_6, %c0_7] : memref<8x128xf32, #tpu.memory_space<vmem>>, vector<8x128xf32>
    tpu.vector_store %arg7[%c0_6, %c0_7], %7 {strides = array<i32>} : memref<8x128xf32, #tpu.memory_space<vmem>>, vector<8x128xf32>,
    %c0_i32_8 = arith.constant 0 : i32
    %9 = arith.cmpi eq, %arg2, %c0_i32_8 : i32
    %10 = arith.extui %9 : i1 to i32
    %c0_i32_9 = arith.constant 0 : i32
    %11 = arith.cmpi ne, %10, %c0_i32_9 : i32
    scf.if %11 {
      %c0_10 = arith.constant 0 : index
      %c0_11 = arith.constant 0 : index
      %12 = vector.load %arg7[%c0_10, %c0_11] : memref<8x128xf32, #tpu.memory_space<vmem>>, vector<8x128xf32>
      %c0_12 = arith.constant 0 : index
      %c0_13 = arith.constant 0 : index
      %13 = vector.load %arg5[%c0_12, %c0_13] : memref<1x128xf32, #tpu.memory_space<vmem>>, vector<1x128xf32>
      %14 = vector.broadcast %13 : vector<1x128xf32> to vector<8x128xf32>
      %15 = arith.addf %12, %14 : vector<8x128xf32>
      %c0_14 = arith.constant 0 : index
      %c0_15 = arith.constant 0 : index
      %16 = vector.load %arg6[%c0_14, %c0_15] : memref<8x128xf32, #tpu.memory_space<vmem>>, vector<8x128xf32>
      tpu.vector_store %arg6[%c0_14, %c0_15], %15 {strides = array<i32>} : memref<8x128xf32, #tpu.memory_space<vmem>>, vector<8x128xf32>,
    } else {
    }
    return
  }
  func.func @transform_0(%arg0: i32, %arg1: i32, %arg2: i32) -> (i32, i32) {
    %c0_i32 = arith.constant 0 : i32
    return %arg0, %arg2 : i32, i32
  }
  func.func @transform_1(%arg0: i32, %arg1: i32, %arg2: i32) -> (i32, i32) {
    %c0_i32 = arith.constant 0 : i32
    return %arg2, %arg1 : i32, i32
  }
  func.func @transform_2(%arg0: i32, %arg1: i32, %arg2: i32) -> (i32, i32) {
    %c0_i32 = arith.constant 0 : i32
    %c0_i32_0 = arith.constant 0 : i32
    return %c0_i32, %arg1 : i32, i32
  }
  func.func @transform_3(%arg0: i32, %arg1: i32, %arg2: i32) -> (i32, i32) {
    %c0_i32 = arith.constant 0 : i32
    return %arg0, %arg1 : i32, i32
  }
}

</mosaic_0001>

<bundles_post_ra>
// kernel: resnet_custom_forward.22
= control target key start
LH: loop header
LB: loop body
LE: loop exit
PB: predicated region body
PF: predicated region fallthrough
CT: control target
= control target key end

     0   :  { %s1613_s12 = smov 0   ;;  %s1615_s13 = smov 0   ;;  %s1822_s0 = inlined_call_operand.vmem [shape: bf16[512,256], index: 0, kind: input, shape index: {}]   ;;  %s1823_s1 = inlined_call_operand.vmem [shape: bf16[256,128], index: 1, kind: input, shape index: {}]   ;;  %s1824_s2 = inlined_call_operand.vmem [shape: f32[1,128], index: 2, kind: input, shape index: {}]   ;;  %s1825_s3 = inlined_call_operand.vmem [shape: bf16[512,128], index: 3, kind: output, shape index: {}]  }
   0x1   :  { %s1617_s14 = smov 0  }
   0x2 LB: > { %s32_s15 = sadd.s32 1, %s1587_s13  ;;  %p1184_p0 = scmp.ge.s32.totalorder %s1591_s14, 1  ;;  %s1591_s14 = sphi %s1617_s14, %s13_s14   ;;  %s1587_s13 = sphi %s1615_s13, %s1827_s13   ;;  %s1583_s12 = sphi %s1613_s12, %s1826_s12  }
   0x3   : > { %p34_p1 = scmp.ge.s32.totalorder %s32_s15, 2  ;;  %p191_p2 = scmp.lt.s32.totalorder %s1591_s14, 3 }
   0x5   : > { %s1829_s15 = smov (%p34_p1, %s32_s15), 0  ;;  %p192_p3 = pnand %p1184_p0, %p191_p2 }
   0x6   : > { %s1185_s28 = sshll.u32 (!%p192_p3), %s1583_s12, 5 }
   0x7   : > { %195 = sbr.rel (%p192_p3) target bundleno = 306 (0x132), region = 32  ;;  %p236_p4 = scmp.lt.s32.totalorder (!%p192_p3), %s1185_s28, 63 }
   0xc   : > { %v1424_v0 = vld [vmem:[%s1823_s1 + $0x38] sm:$0xff]  ;;  %v1423_v2 = vld [vmem:[%s1823_s1 + $0x30] sm:$0xff]  ;;  %v1422_v4 = vld [vmem:[%s1823_s1 + $0x28] sm:$0xff]  ;;  %s1831_s28 = smov (!%p236_p4, %s1185_s28), 63 }
   0xd   : > { %v1432_v1 = vld [vmem:[%s1823_s1 + $0x78] sm:$0xff]  ;;  %655 = vmatpush.bf16.msra.mxu0 %v1424_v0  ;;  %1528 = vmatpush.bf16.msra.mxu2 %v1424_v0  ;;  %v1431_v3 = vld [vmem:[%s1823_s1 + $0x70] sm:$0xff]  ;;  %v1430_v5 = vld [vmem:[%s1823_s1 + $0x68] sm:$0xff]  ;;  %s1384_s17 = sshll.u32 %s1831_s28, 3  ;;  %s1189_s5 = sshll.u32 %s1831_s28, 2 }
   0xe   : > { %744 = vmatpush.bf16.msra.mxu1 %v1432_v1  ;;  %1536 = vmatpush.bf16.msra.mxu3 %v1432_v1  ;;  %v1421_v6 = vld [vmem:[%s1823_s1 + $0x20] sm:$0xff]  ;;  %v1420_v8 = vld [vmem:[%s1823_s1 + $0x18] sm:$0xff]  ;;  %v1419_v10 = vld [vmem:[%s1823_s1 + $0x10] sm:$0xff]  ;;  %s1679_s22 = scalar_lea.vmem %s1822_s0, %s1384_s17  ;;  %s1765_s8 = scalar_lea.vmem %s1825_s3, %s1189_s5 }
   0xf   : > { %v1429_v7 = vld [vmem:[%s1823_s1 + $0x60] sm:$0xff]  ;;  %v1428_v9 = vld [vmem:[%s1823_s1 + $0x58] sm:$0xff]  ;;  %v1427_v11 = vld [vmem:[%s1823_s1 + $0x50] sm:$0xff] }
  0x10   : > { %v1418_v12 = vld [vmem:[%s1823_s1 + $0x8] sm:$0xff]  ;;  %v1417_v14 = vld [vmem:[%s1823_s1] sm:$0xff]  ;;  %v1200_v28 = vld [vmem:[%s1679_s22 + $0x10] sm:$0xf] }
  0x11   : > { %656 = vmatpush.bf16.msra.mxu0 %v1423_v2  ;;  %1529 = vmatpush.bf16.msra.mxu2 %v1423_v2  ;;  %v1426_v13 = vld [vmem:[%s1823_s1 + $0x48] sm:$0xff]  ;;  %v1425_v15 = vld [vmem:[%s1823_s1 + $0x40] sm:$0xff]  ;;  %v1388_v29 = vld [vmem:[%s1679_s22 + $0x14] sm:$0xf0] }
  0x12   : > { %745 = vmatpush.bf16.msra.mxu1 %v1431_v3  ;;  %1537 = vmatpush.bf16.msra.mxu3 %v1431_v3  ;;  %v1192_v16 = vld [vmem:[%s1679_s22] sm:$0xf]  ;;  %v1386_v17 = vld [vmem:[%s1679_s22 + $0x4] sm:$0xf0]  ;;  %v1385_v20 = vld [vmem:[%s1679_s22 + $0x4] sm:$0xf]  ;;  %v1201_v36 = vor.u32 %v1388_v29, %v1200_v28 }
  0x13   : > { %v1256_v18 = vld [vmem:[%s1679_s22 + $0x80] sm:$0xf]  ;;  %v1402_v19 = vld [vmem:[%s1679_s22 + $0x84] sm:$0xf0]  ;;  %v1194_v21 = vld [vmem:[%s1679_s22 + $0x8] sm:$0xf0]  ;;  %v1193_v24 = vor.u32 %v1386_v17, %v1192_v16 }
  0x14   : > { %v1401_v22 = vld [vmem:[%s1679_s22 + $0x84] sm:$0xf]  ;;  %v1258_v23 = vld [vmem:[%s1679_s22 + $0x88] sm:$0xf0]  ;;  %v1257_v25 = vor.u32 %v1402_v19, %v1256_v18  ;;  %v1197_v26 = vor.u32 %v1385_v20, %v1194_v21  ;;  %v1264_v30 = vld [vmem:[%s1679_s22 + $0x90] sm:$0xf] }
  0x15   : > { %657 = vmatpush.bf16.msra.mxu0 %v1422_v4  ;;  %1530 = vmatpush.bf16.msra.mxu2 %v1422_v4  ;;  %v1261_v27 = vor.u32 %v1401_v22, %v1258_v23  ;;  %v1404_v31 = vld [vmem:[%s1679_s22 + $0x94] sm:$0xf0]  ;;  %v1387_v32 = vld [vmem:[%s1679_s22 + $0x14] sm:$0xf]  ;;  %v1202_v33 = vld [vmem:[%s1679_s22 + $0x18] sm:$0xf0] }
  0x16   : > { %746 = vmatpush.bf16.msra.mxu1 %v1430_v5  ;;  %1538 = vmatpush.bf16.msra.mxu3 %v1430_v5  ;;  %v1403_v34 = vld [vmem:[%s1679_s22 + $0x94] sm:$0xf]  ;;  %v1266_v35 = vld [vmem:[%s1679_s22 + $0x98] sm:$0xf0]  ;;  %v1265_v37 = vor.u32 %v1404_v31, %v1264_v30  ;;  %v1205_v38 = vor.u32 %v1387_v32, %v1202_v33  ;;  %v1208_v40 = vld [vmem:[%s1679_s22 + $0x20] sm:$0xf] }
  0x17   : > { %v1269_v39 = vor.u32 %v1403_v34, %v1266_v35  ;;  %v1390_v41 = vld [vmem:[%s1679_s22 + $0x24] sm:$0xf0]  ;;  %v1272_v42 = vld [vmem:[%s1679_s22 + $0xa0] sm:$0xf]  ;;  %v1389_v44 = vld [vmem:[%s1679_s22 + $0x24] sm:$0xf] }
  0x18   : > { %v1406_v43 = vld [vmem:[%s1679_s22 + $0xa4] sm:$0xf0]  ;;  %v1210_v45 = vld [vmem:[%s1679_s22 + $0x28] sm:$0xf0]  ;;  %v1405_v46 = vld [vmem:[%s1679_s22 + $0xa4] sm:$0xf]  ;;  %v1209_v48 = vor.u32 %v1390_v41, %v1208_v40 }
  0x19   : > { %658 = vmatpush.bf16.msra.mxu0 %v1421_v6  ;;  %1531 = vmatpush.bf16.msra.mxu2 %v1421_v6  ;;  %v1274_v47 = vld [vmem:[%s1679_s22 + $0xa8] sm:$0xf0]  ;;  %v1273_v49 = vor.u32 %v1406_v43, %v1272_v42  ;;  %v1213_v50 = vor.u32 %v1389_v44, %v1210_v45  ;;  %v1216_v52 = vld [vmem:[%s1679_s22 + $0x30] sm:$0xf]  ;;  %v1392_v53 = vld [vmem:[%s1679_s22 + $0x34] sm:$0xf0] }
  0x1a   : > { %747 = vmatpush.bf16.msra.mxu1 %v1429_v7  ;;  %1539 = vmatpush.bf16.msra.mxu3 %v1429_v7  ;;  %v1277_v51 = vor.u32 %v1405_v46, %v1274_v47  ;;  %v1280_v54 = vld [vmem:[%s1679_s22 + $0xb0] sm:$0xf]  ;;  %v1408_v55 = vld [vmem:[%s1679_s22 + $0xb4] sm:$0xf0]  ;;  %v1391_v56 = vld [vmem:[%s1679_s22 + $0x34] sm:$0xf]  ;;  %v1217_v60 = vor.u32 %v1392_v53, %v1216_v52 }
  0x1b   : > { %v1218_v57 = vld [vmem:[%s1679_s22 + $0x38] sm:$0xf0]  ;;  %v1407_v58 = vld [vmem:[%s1679_s22 + $0xb4] sm:$0xf]  ;;  %v1281_v61 = vor.u32 %v1408_v55, %v1280_v54  ;;  %v1224_v0 = vld [vmem:[%s1679_s22 + $0x40] sm:$0xf] }
  0x1c   : > { %v1282_v59 = vld [vmem:[%s1679_s22 + $0xb8] sm:$0xf0]  ;;  %v1221_v62 = vor.u32 %v1391_v56, %v1218_v57  ;;  %v1394_v1 = vld [vmem:[%s1679_s22 + $0x44] sm:$0xf0]  ;;  %v1288_v2 = vld [vmem:[%s1679_s22 + $0xc0] sm:$0xf] }
  0x1d   : > { %659 = vmatpush.bf16.msra.mxu0 %v1420_v8  ;;  %1532 = vmatpush.bf16.msra.mxu2 %v1420_v8  ;;  %v1285_v63 = vor.u32 %v1407_v58, %v1282_v59  ;;  %v1410_v3 = vld [vmem:[%s1679_s22 + $0xc4] sm:$0xf0]  ;;  %v1393_v4 = vld [vmem:[%s1679_s22 + $0x44] sm:$0xf]  ;;  %v1226_v5 = vld [vmem:[%s1679_s22 + $0x48] sm:$0xf0]  ;;  %v1225_v8 = vor.u32 %v1394_v1, %v1224_v0 }
  0x1e   : > { %748 = vmatpush.bf16.msra.mxu1 %v1428_v9  ;;  %1540 = vmatpush.bf16.msra.mxu3 %v1428_v9  ;;  %v1409_v6 = vld [vmem:[%s1679_s22 + $0xc4] sm:$0xf]  ;;  %v1290_v7 = vld [vmem:[%s1679_s22 + $0xc8] sm:$0xf0]  ;;  %v1289_v9 = vor.u32 %v1410_v3, %v1288_v2  ;;  %v1395_v16 = vld [vmem:[%s1679_s22 + $0x54] sm:$0xf] }
  0x1f   : > { %v1234_v17 = vld [vmem:[%s1679_s22 + $0x58] sm:$0xf0]  ;;  %v1411_v18 = vld [vmem:[%s1679_s22 + $0xd4] sm:$0xf]  ;;  %v1397_v28 = vld [vmem:[%s1679_s22 + $0x64] sm:$0xf] }
  0x20   : > { %v1298_v19 = vld [vmem:[%s1679_s22 + $0xd8] sm:$0xf0]  ;;  %v1237_v22 = vor.u32 %v1395_v16, %v1234_v17  ;;  %v1242_v29 = vld [vmem:[%s1679_s22 + $0x68] sm:$0xf0]  ;;  %v1413_v30 = vld [vmem:[%s1679_s22 + $0xe4] sm:$0xf] }
  0x21   : > { %660 = vmatpush.bf16.msra.mxu0 %v1419_v10  ;;  %1533 = vmatpush.bf16.msra.mxu2 %v1419_v10  ;;  %v1229_v10 = vor.u32 %v1393_v4, %v1226_v5  ;;  %v1301_v23 = vor.u32 %v1411_v18, %v1298_v19  ;;  %v1306_v31 = vld [vmem:[%s1679_s22 + $0xe8] sm:$0xf0]  ;;  %v1245_v34 = vor.u32 %v1397_v28, %v1242_v29  ;;  %v1399_v40 = vld [vmem:[%s1679_s22 + $0x74] sm:$0xf]  ;;  %v1250_v41 = vld [vmem:[%s1679_s22 + $0x78] sm:$0xf0] }
  0x22   : > { %749 = vmatpush.bf16.msra.mxu1 %v1427_v11  ;;  %1541 = vmatpush.bf16.msra.mxu3 %v1427_v11  ;;  %v1293_v11 = vor.u32 %v1409_v6, %v1290_v7  ;;  %v1309_v35 = vor.u32 %v1413_v30, %v1306_v31  ;;  %v1415_v42 = vld [vmem:[%s1679_s22 + $0xf4] sm:$0xf]  ;;  %v1314_v43 = vld [vmem:[%s1679_s22 + $0xf8] sm:$0xf0]  ;;  %v1253_v46 = vor.u32 %v1399_v40, %v1250_v41 }
  0x23   : > { %v1317_v47 = vor.u32 %v1415_v42, %v1314_v43 }
  0x25   : > { %661 = vmatpush.bf16.msra.mxu0 %v1418_v12  ;;  %1534 = vmatpush.bf16.msra.mxu2 %v1418_v12  ;;  %v1232_v12 = vld [vmem:[%s1679_s22 + $0x50] sm:$0xf] }
  0x26   : > { %750 = vmatpush.bf16.msra.mxu1 %v1426_v13  ;;  %1542 = vmatpush.bf16.msra.mxu3 %v1426_v13  ;;  %v1396_v13 = vld [vmem:[%s1679_s22 + $0x54] sm:$0xf0] }
  0x27   : > { %v1233_v20 = vor.u32 %v1396_v13, %v1232_v12 }
  0x29   : > { %662 = vmatpush.bf16.msra.mxu0 %v1417_v14  ;;  %1535 = vmatpush.bf16.msra.mxu2 %v1417_v14  ;;  %v1296_v14 = vld [vmem:[%s1679_s22 + $0xd0] sm:$0xf] }
  0x2a   : > { %751 = vmatpush.bf16.msra.mxu1 %v1425_v15  ;;  %1543 = vmatpush.bf16.msra.mxu3 %v1425_v15  ;;  %v1412_v15 = vld [vmem:[%s1679_s22 + $0xd4] sm:$0xf0] }
  0x2b   : > { %v1297_v21 = vor.u32 %v1412_v15, %v1296_v14 }
  0x2c   : > { %663 = vmatmul.bf16.vlgmr.msra.gmra.mxu0 %v1193_v24  ;;  %703 = vmatmul.bf16.vlgmr.msra.gmra.mxu2 %v1257_v25  ;;  %v1240_v24 = vld [vmem:[%s1679_s22 + $0x60] sm:$0xf]  ;;  %v1398_v25 = vld [vmem:[%s1679_s22 + $0x64] sm:$0xf0] }
  0x2d   : > { %752 = vmatmul.bf16.vlgmr.msra.gmra.mxu1 %v1197_v26  ;;  %792 = vmatmul.bf16.vlgmr.msra.gmra.mxu3 %v1261_v27  ;;  %v1304_v26 = vld [vmem:[%s1679_s22 + $0xe0] sm:$0xf]  ;;  %v1414_v27 = vld [vmem:[%s1679_s22 + $0xe4] sm:$0xf0]  ;;  %v1241_v32 = vor.u32 %v1398_v25, %v1240_v24 }
  0x2e   : > { %v1305_v33 = vor.u32 %v1414_v27, %v1304_v26 }
  0x3c   : > { %668 = vmatmul.bf16.gmra.mxu0 %v1201_v36  ;;  %708 = vmatmul.bf16.gmra.mxu2 %v1265_v37  ;;  %v1248_v36 = vld [vmem:[%s1679_s22 + $0x70] sm:$0xf]  ;;  %v1400_v37 = vld [vmem:[%s1679_s22 + $0x74] sm:$0xf0] }
  0x3d   : > { %757 = vmatmul.bf16.gmra.mxu1 %v1205_v38  ;;  %797 = vmatmul.bf16.gmra.mxu3 %v1269_v39  ;;  %v1312_v38 = vld [vmem:[%s1679_s22 + $0xf0] sm:$0xf]  ;;  %v1416_v39 = vld [vmem:[%s1679_s22 + $0xf4] sm:$0xf0]  ;;  %v1249_v44 = vor.u32 %v1400_v37, %v1248_v36 }
  0x3e   : > { %v1313_v45 = vor.u32 %v1416_v39, %v1312_v38 }
  0x4c   : > { %673 = vmatmul.bf16.gmra.mxu0 %v1209_v48  ;;  %713 = vmatmul.bf16.gmra.mxu2 %v1273_v49 }
  0x4d   : > { %762 = vmatmul.bf16.gmra.mxu1 %v1213_v50  ;;  %802 = vmatmul.bf16.gmra.mxu3 %v1277_v51  ;;  %v1757_v51 = vld [vmem:[%s1824_s2] ss:$0 sm:$0xff] }
  0x5c   : > { %678 = vmatmul.bf16.gmra.mxu0 %v1217_v60  ;;  %718 = vmatmul.bf16.gmra.mxu2 %v1281_v61 }
  0x5d   : > { %767 = vmatmul.bf16.gmra.mxu1 %v1221_v62  ;;  %807 = vmatmul.bf16.gmra.mxu3 %v1285_v63 }
  0x6c   : > { %683 = vmatmul.bf16.gmra.mxu0 %v1225_v8  ;;  %723 = vmatmul.bf16.gmra.mxu2 %v1289_v9 }
  0x6d   : > { %772 = vmatmul.bf16.gmra.mxu1 %v1229_v10  ;;  %812 = vmatmul.bf16.gmra.mxu3 %v1293_v11 }
  0x7c   : > { %688 = vmatmul.bf16.gmra.mxu0 %v1233_v20  ;;  %728 = vmatmul.bf16.gmra.mxu2 %v1297_v21 }
  0x7d   : > { %777 = vmatmul.bf16.gmra.mxu1 %v1237_v22  ;;  %817 = vmatmul.bf16.gmra.mxu3 %v1301_v23 }
  0x8c   : > { %693 = vmatmul.bf16.gmra.mxu0 %v1241_v32  ;;  %733 = vmatmul.bf16.gmra.mxu2 %v1305_v33 }
  0x8d   : > { %782 = vmatmul.bf16.gmra.mxu1 %v1245_v34  ;;  %822 = vmatmul.bf16.gmra.mxu3 %v1309_v35 }
  0x9c   : > { %698 = vmatmul.bf16.gmra.mxu0 %v1249_v44  ;;  %738 = vmatmul.bf16.gmra.mxu2 %v1313_v45 }
  0x9d   : > { %787 = vmatmul.bf16.gmra.mxu1 %v1253_v46  ;;  %827 = vmatmul.bf16.gmra.mxu3 %v1317_v47 }
  0xa9   : > { %v664_v48 = vpop.f32.mrf.mxu0 }
  0xaa   : > { %v753_v49 = vpop.f32.mrf.mxu1 }
  0xab   : > { %v754_v50 = vadd.f32 %v753_v49, %v664_v48 }
  0xad   : > { %v936_v56 = vadd.f32 %v1757_v51, %v754_v50 }
  0xaf   : > { %v704_v52 = vpop.f32.mrf.mxu2  ;;  %v968_v60 = vmax.f32 %v936_v56, 0.0 }
  0xb0   : > { %v793_v53 = vpop.f32.mrf.mxu3 }
  0xb1   : > { %v666_v54 = vpop.f32.mrf.mxu0  ;;  %v794_v58 = vadd.f32 %v793_v53, %v704_v52 }
  0xb2   : > { %v755_v55 = vpop.f32.mrf.mxu1 }
  0xb3   : > { %v756_v57 = vadd.f32 %v755_v55, %v666_v54  ;;  %v952_v0 = vadd.f32 %v1757_v51, %v794_v58 }
  0xb5   : > { %v937_v59 = vadd.f32 %v1757_v51, %v756_v57  ;;  %v984_v6 = vmax.f32 %v952_v0, 0.0 }
  0xb7   : > { %v969_v61 = vmax.f32 %v937_v59, 0.0  ;;  %v706_v62 = vpop.f32.mrf.mxu2 }
  0xb8   : > { %v795_v63 = vpop.f32.mrf.mxu3 }
  0xb9   : > { %v1436_v1 = vpack.c.bf16 %v969_v61, %v968_v60  ;;  %v796_v2 = vadd.f32 %v795_v63, %v706_v62  ;;  %v669_v3 = vpop.f32.mrf.mxu0 }
  0xba   : > { %v758_v4 = vpop.f32.mrf.mxu1 }
  0xbb   : > { %1437 = vst [vmem:[%s1765_s8] sm:$0xff] %v1436_v1   ;;  %v953_v5 = vadd.f32 %v1757_v51, %v796_v2  ;;  %v759_v9 = vadd.f32 %v758_v4, %v669_v3 }
  0xbd   : > { %v985_v7 = vmax.f32 %v953_v5, 0.0  ;;  %v938_v14 = vadd.f32 %v1757_v51, %v759_v9 }
  0xbf   : > { %v1476_v8 = vpack.c.bf16 %v985_v7, %v984_v6  ;;  %v709_v10 = vpop.f32.mrf.mxu2  ;;  %v970_v18 = vmax.f32 %v938_v14, 0.0 }
  0xc0   : > { %v798_v11 = vpop.f32.mrf.mxu3 }
  0xc1   : > { %1520 = vst [vmem:[%s1765_s8 + $0x40] sm:$0xff] %v1476_v8   ;;  %v671_v12 = vpop.f32.mrf.mxu0  ;;  %v799_v16 = vadd.f32 %v798_v11, %v709_v10 }
  0xc2   : > { %v760_v13 = vpop.f32.mrf.mxu1 }
  0xc3   : > { %v761_v15 = vadd.f32 %v760_v13, %v671_v12  ;;  %v954_v22 = vadd.f32 %v1757_v51, %v799_v16 }
  0xc5   : > { %v939_v17 = vadd.f32 %v1757_v51, %v761_v15  ;;  %v986_v28 = vmax.f32 %v954_v22, 0.0 }
  0xc7   : > { %v971_v19 = vmax.f32 %v939_v17, 0.0  ;;  %v711_v20 = vpop.f32.mrf.mxu2 }
  0xc8   : > { %v800_v21 = vpop.f32.mrf.mxu3 }
  0xc9   : > { %v1441_v23 = vpack.c.bf16 %v971_v19, %v970_v18  ;;  %v801_v24 = vadd.f32 %v800_v21, %v711_v20  ;;  %v674_v25 = vpop.f32.mrf.mxu0 }
  0xca   : > { %v763_v26 = vpop.f32.mrf.mxu1 }
  0xcb   : > { %1513 = vst [vmem:[%s1765_s8 + $0x8] sm:$0xff] %v1441_v23   ;;  %v955_v27 = vadd.f32 %v1757_v51, %v801_v24  ;;  %v764_v31 = vadd.f32 %v763_v26, %v674_v25 }
  0xcd   : > { %v987_v29 = vmax.f32 %v955_v27, 0.0  ;;  %v940_v36 = vadd.f32 %v1757_v51, %v764_v31 }
  0xcf   : > { %v1481_v30 = vpack.c.bf16 %v987_v29, %v986_v28  ;;  %v714_v32 = vpop.f32.mrf.mxu2  ;;  %v972_v40 = vmax.f32 %v940_v36, 0.0 }
  0xd0   : > { %v803_v33 = vpop.f32.mrf.mxu3 }
  0xd1   : > { %1521 = vst [vmem:[%s1765_s8 + $0x48] sm:$0xff] %v1481_v30   ;;  %v676_v34 = vpop.f32.mrf.mxu0  ;;  %v804_v38 = vadd.f32 %v803_v33, %v714_v32 }
  0xd2   : > { %v765_v35 = vpop.f32.mrf.mxu1 }
  0xd3   : > { %v766_v37 = vadd.f32 %v765_v35, %v676_v34  ;;  %v956_v44 = vadd.f32 %v1757_v51, %v804_v38 }
  0xd5   : > { %v941_v39 = vadd.f32 %v1757_v51, %v766_v37  ;;  %v988_v50 = vmax.f32 %v956_v44, 0.0 }
  0xd7   : > { %v973_v41 = vmax.f32 %v941_v39, 0.0  ;;  %v716_v42 = vpop.f32.mrf.mxu2 }
  0xd8   : > { %v805_v43 = vpop.f32.mrf.mxu3 }
  0xd9   : > { %v1446_v45 = vpack.c.bf16 %v973_v41, %v972_v40  ;;  %v806_v46 = vadd.f32 %v805_v43, %v716_v42  ;;  %v679_v47 = vpop.f32.mrf.mxu0 }
  0xda   : > { %v768_v48 = vpop.f32.mrf.mxu1 }
  0xdb   : > { %1514 = vst [vmem:[%s1765_s8 + $0x10] sm:$0xff] %v1446_v45   ;;  %v957_v49 = vadd.f32 %v1757_v51, %v806_v46  ;;  %v769_v54 = vadd.f32 %v768_v48, %v679_v47 }
  0xdd   : > { %v989_v52 = vmax.f32 %v957_v49, 0.0  ;;  %v942_v59 = vadd.f32 %v1757_v51, %v769_v54 }
  0xdf   : > { %v1486_v53 = vpack.c.bf16 %v989_v52, %v988_v50  ;;  %v719_v55 = vpop.f32.mrf.mxu2  ;;  %v974_v63 = vmax.f32 %v942_v59, 0.0 }
  0xe0   : > { %v808_v56 = vpop.f32.mrf.mxu3 }
  0xe1   : > { %1522 = vst [vmem:[%s1765_s8 + $0x50] sm:$0xff] %v1486_v53   ;;  %v681_v57 = vpop.f32.mrf.mxu0  ;;  %v809_v61 = vadd.f32 %v808_v56, %v719_v55 }
  0xe2   : > { %v770_v58 = vpop.f32.mrf.mxu1 }
  0xe3   : > { %v771_v60 = vadd.f32 %v770_v58, %v681_v57  ;;  %v958_v3 = vadd.f32 %v1757_v51, %v809_v61 }
  0xe5   : > { %v943_v62 = vadd.f32 %v1757_v51, %v771_v60  ;;  %v990_v9 = vmax.f32 %v958_v3, 0.0 }
  0xe7   : > { %v975_v0 = vmax.f32 %v943_v62, 0.0  ;;  %v721_v1 = vpop.f32.mrf.mxu2 }
  0xe8   : > { %v810_v2 = vpop.f32.mrf.mxu3 }
  0xe9   : > { %v1451_v4 = vpack.c.bf16 %v975_v0, %v974_v63  ;;  %v811_v5 = vadd.f32 %v810_v2, %v721_v1  ;;  %v684_v6 = vpop.f32.mrf.mxu0 }
  0xea   : > { %v773_v7 = vpop.f32.mrf.mxu1 }
  0xeb   : > { %1515 = vst [vmem:[%s1765_s8 + $0x18] sm:$0xff] %v1451_v4   ;;  %v959_v8 = vadd.f32 %v1757_v51, %v811_v5  ;;  %v774_v12 = vadd.f32 %v773_v7, %v684_v6 }
  0xed   : > { %v991_v10 = vmax.f32 %v959_v8, 0.0  ;;  %v944_v17 = vadd.f32 %v1757_v51, %v774_v12 }
  0xef   : > { %v1491_v11 = vpack.c.bf16 %v991_v10, %v990_v9  ;;  %v724_v13 = vpop.f32.mrf.mxu2  ;;  %v976_v21 = vmax.f32 %v944_v17, 0.0 }
  0xf0   : > { %v813_v14 = vpop.f32.mrf.mxu3 }
  0xf1   : > { %1523 = vst [vmem:[%s1765_s8 + $0x58] sm:$0xff] %v1491_v11   ;;  %v686_v15 = vpop.f32.mrf.mxu0  ;;  %v814_v19 = vadd.f32 %v813_v14, %v724_v13 }
  0xf2   : > { %v775_v16 = vpop.f32.mrf.mxu1 }
  0xf3   : > { %v776_v18 = vadd.f32 %v775_v16, %v686_v15  ;;  %v960_v25 = vadd.f32 %v1757_v51, %v814_v19 }
  0xf5   : > { %v945_v20 = vadd.f32 %v1757_v51, %v776_v18  ;;  %v992_v31 = vmax.f32 %v960_v25, 0.0 }
  0xf7   : > { %v977_v22 = vmax.f32 %v945_v20, 0.0  ;;  %v726_v23 = vpop.f32.mrf.mxu2 }
  0xf8   : > { %v815_v24 = vpop.f32.mrf.mxu3 }
  0xf9   : > { %v1456_v26 = vpack.c.bf16 %v977_v22, %v976_v21  ;;  %v816_v27 = vadd.f32 %v815_v24, %v726_v23  ;;  %v689_v28 = vpop.f32.mrf.mxu0 }
  0xfa   : > { %v778_v29 = vpop.f32.mrf.mxu1 }
  0xfb   : > { %1516 = vst [vmem:[%s1765_s8 + $0x20] sm:$0xff] %v1456_v26   ;;  %v961_v30 = vadd.f32 %v1757_v51, %v816_v27  ;;  %v779_v34 = vadd.f32 %v778_v29, %v689_v28 }
  0xfd   : > { %v993_v32 = vmax.f32 %v961_v30, 0.0  ;;  %v946_v39 = vadd.f32 %v1757_v51, %v779_v34 }
  0xff   : > { %v1496_v33 = vpack.c.bf16 %v993_v32, %v992_v31  ;;  %v729_v35 = vpop.f32.mrf.mxu2  ;;  %v978_v43 = vmax.f32 %v946_v39, 0.0 }
 0x100   : > { %v818_v36 = vpop.f32.mrf.mxu3 }
 0x101   : > { %1524 = vst [vmem:[%s1765_s8 + $0x60] sm:$0xff] %v1496_v33   ;;  %v691_v37 = vpop.f32.mrf.mxu0  ;;  %v819_v41 = vadd.f32 %v818_v36, %v729_v35 }
 0x102   : > { %v780_v38 = vpop.f32.mrf.mxu1 }
 0x103   : > { %v781_v40 = vadd.f32 %v780_v38, %v691_v37  ;;  %v962_v47 = vadd.f32 %v1757_v51, %v819_v41 }
 0x105   : > { %v947_v42 = vadd.f32 %v1757_v51, %v781_v40  ;;  %v994_v54 = vmax.f32 %v962_v47, 0.0 }
 0x107   : > { %v979_v44 = vmax.f32 %v947_v42, 0.0  ;;  %v731_v45 = vpop.f32.mrf.mxu2 }
 0x108   : > { %v820_v46 = vpop.f32.mrf.mxu3 }
 0x109   : > { %v1461_v48 = vpack.c.bf16 %v979_v44, %v978_v43  ;;  %v821_v49 = vadd.f32 %v820_v46, %v731_v45  ;;  %v694_v50 = vpop.f32.mrf.mxu0 }
 0x10a   : > { %v783_v52 = vpop.f32.mrf.mxu1 }
 0x10b   : > { %1517 = vst [vmem:[%s1765_s8 + $0x28] sm:$0xff] %v1461_v48   ;;  %v963_v53 = vadd.f32 %v1757_v51, %v821_v49  ;;  %v784_v57 = vadd.f32 %v783_v52, %v694_v50 }
 0x10d   : > { %v995_v55 = vmax.f32 %v963_v53, 0.0  ;;  %v948_v62 = vadd.f32 %v1757_v51, %v784_v57 }
 0x10f   : > { %v1501_v56 = vpack.c.bf16 %v995_v55, %v994_v54  ;;  %v734_v58 = vpop.f32.mrf.mxu2  ;;  %v980_v2 = vmax.f32 %v948_v62, 0.0 }
 0x110   : > { %v823_v59 = vpop.f32.mrf.mxu3 }
 0x111   : > { %1525 = vst [vmem:[%s1765_s8 + $0x68] sm:$0xff] %v1501_v56   ;;  %v696_v60 = vpop.f32.mrf.mxu0  ;;  %v824_v0 = vadd.f32 %v823_v59, %v734_v58 }
 0x112   : > { %v785_v61 = vpop.f32.mrf.mxu1 }
 0x113   : > { %v786_v63 = vadd.f32 %v785_v61, %v696_v60  ;;  %v964_v6 = vadd.f32 %v1757_v51, %v824_v0 }
 0x115   : > { %v949_v1 = vadd.f32 %v1757_v51, %v786_v63  ;;  %v996_v12 = vmax.f32 %v964_v6, 0.0 }
 0x117   : > { %v981_v3 = vmax.f32 %v949_v1, 0.0  ;;  %v736_v4 = vpop.f32.mrf.mxu2 }
 0x118   : > { %v825_v5 = vpop.f32.mrf.mxu3 }
 0x119   : > { %v1466_v7 = vpack.c.bf16 %v981_v3, %v980_v2  ;;  %v826_v8 = vadd.f32 %v825_v5, %v736_v4  ;;  %v699_v9 = vpop.f32.mrf.mxu0 }
 0x11a   : > { %v788_v10 = vpop.f32.mrf.mxu1 }
 0x11b   : > { %1518 = vst [vmem:[%s1765_s8 + $0x30] sm:$0xff] %v1466_v7   ;;  %v965_v11 = vadd.f32 %v1757_v51, %v826_v8  ;;  %v789_v15 = vadd.f32 %v788_v10, %v699_v9 }
 0x11d   : > { %v997_v13 = vmax.f32 %v965_v11, 0.0  ;;  %v950_v20 = vadd.f32 %v1757_v51, %v789_v15 }
 0x11f   : > { %v1506_v14 = vpack.c.bf16 %v997_v13, %v996_v12  ;;  %v739_v16 = vpop.f32.mrf.mxu2  ;;  %v982_v24 = vmax.f32 %v950_v20, 0.0 }
 0x120   : > { %v828_v17 = vpop.f32.mrf.mxu3 }
 0x121   : > { %1526 = vst [vmem:[%s1765_s8 + $0x70] sm:$0xff] %v1506_v14   ;;  %v701_v18 = vpop.f32.mrf.mxu0  ;;  %v829_v22 = vadd.f32 %v828_v17, %v739_v16 }
 0x122   : > { %v790_v19 = vpop.f32.mrf.mxu1 }
 0x123   : > { %v791_v21 = vadd.f32 %v790_v19, %v701_v18  ;;  %v966_v28 = vadd.f32 %v1757_v51, %v829_v22 }
 0x125   : > { %v951_v23 = vadd.f32 %v1757_v51, %v791_v21  ;;  %v998_v32 = vmax.f32 %v966_v28, 0.0 }
 0x127   : > { %v983_v25 = vmax.f32 %v951_v23, 0.0  ;;  %v741_v26 = vpop.f32.mrf.mxu2 }
 0x128   : > { %v830_v27 = vpop.f32.mrf.mxu3 }
 0x129   : > { %v1471_v29 = vpack.c.bf16 %v983_v25, %v982_v24  ;;  %v831_v30 = vadd.f32 %v830_v27, %v741_v26 }
 0x12b   : > { %1519 = vst [vmem:[%s1765_s8 + $0x38] sm:$0xff] %v1471_v29   ;;  %v967_v31 = vadd.f32 %v1757_v51, %v831_v30 }
 0x12d   : > { %v999_v33 = vmax.f32 %v967_v31, 0.0 }
 0x12f   : > { %v1511_v34 = vpack.c.bf16 %v999_v33, %v998_v32 }
 0x131   : > { %1527 = vst [vmem:[%s1765_s8 + $0x78] sm:$0xff] %v1511_v34  }
 0x132 PF: > { %s13_s14 = sadd.s32 1, %s1591_s14   ;;  %s1826_s12 = smov %s1587_s13 }
 0x133   : > { %p10_p5 = scmp.ge.s32.totalorder %s13_s14, 4   ;;  %s1827_s13 = smov %s1829_s15 }
 0x135   :  { %12 = sbr.rel (!%p10_p5) target bundleno = 2 (0x2), region = 76 }

// kernel: resnet_custom_forward.23
= control target key start
LH: loop header
LB: loop body
LE: loop exit
PB: predicated region body
PF: predicated region fallthrough
CT: control target
= control target key end

     0   :  { %s1577_s12 = smov 0   ;;  %s1579_s13 = smov 0   ;;  %s1867_s0 = inlined_call_operand.vmem [shape: bf16[128,1152], index: 0, kind: input, shape index: {}]   ;;  %s1868_s1 = inlined_call_operand.vmem [shape: bf16[1152,128], index: 1, kind: input, shape index: {}]   ;;  %s1869_s2 = inlined_call_operand.vmem [shape: f32[1,128], index: 2, kind: input, shape index: {}]   ;;  %s1870_s3 = inlined_call_operand.vmem [shape: bf16[128,128], index: 3, kind: output, shape index: {}]  }
   0x1   :  { %s1581_s14 = smov 0   ;;  %s1583_s15 = smov 0  }
   0x2   :  { %s1585_s16 = smov 0  }
   0x3 LB: > { %s25_s17 = sadd.s32 1, %s1550_s15  ;;  %p48_p1 = scmp.ne.s32.totalorder %s1542_s13, %s1538_s12  ;;  %s1554_s16 = sphi %s1585_s16, %s13_s16   ;;  %s1550_s15 = sphi %s1583_s15, %s1874_s15   ;;  %s1546_s14 = sphi %s1581_s14, %s1873_s14   ;;  %s1542_s13 = sphi %s1579_s13, %s1872_s13   ;;  %s1538_s12 = sphi %s1577_s12, %s1871_s12  }
   0x4   : > { %p26_p0 = scmp.ge.s32.totalorder %s25_s17, 3  ;;  %p49_p2 = scmp.eq.s32.totalorder %s1554_s16, 0 }
   0x5   : > { %s41_s19 = sadd.s32 1, %s1542_s13  ;;  %p1118_p5 = scmp.ge.s32.totalorder %s1554_s16, 3 }
   0x6   : > { %s1876_s17 = smov (%p26_p0, %s25_s17), 0  ;;  %p50_p3 = por %p49_p2, %p48_p1 }
   0x7   : > { %s37_s18 = ssub.s32 %s1550_s15, %s1876_s17  ;;  %162 = sbr.rel (%p1118_p5) target bundleno = 49 (0x31), region = 20 }
   0x8   : > { %p39_p4 = scmp.eq.s32.totalorder %s37_s18, 0 }
   0xa   : > { %s1612_s20 = scalar_select %p39_p4, %s1542_s13, %s41_s19  }
   0xc   : > { %165 = sbr.rel (!%p50_p3) target bundleno = 49 (0x31), region = 24  ;;  %s167_s21 = sand.u32 (%p50_p3), 1, %s1542_s13  }
   0xd   : > { %s1352_s22 = smul.u32 (%p50_p3), 12, %s1550_s15 }
   0xe   : > { %s1472_s23 = smul.u32 (%p50_p3), 192, %s167_s21 }
   0xf   : > { %s1620_s26 = scalar_lea.vmem (%p50_p3), %s1867_s0, %s1352_s22 }
  0x10   : > { %v190_v0 = vld [vmem:[%s1620_s26] sm:$0xff] (%p50_p3)  ;;  %v194_v2 = vld [vmem:[%s1620_s26 + $0x48] sm:$0xff] (%p50_p3)  ;;  %s1625_s27 = scalar_lea.vmem (%p50_p3), [#allocation3], %s1472_s23  ;;  %v198_v4 = vld [vmem:[%s1620_s26 + $0x90] sm:$0xff] (%p50_p3) }
  0x11   : > { %v192_v1 = vld [vmem:[%s1620_s26 + $0x24] sm:$0xff]  ;;  %191 = vst [vmem:[%s1625_s27] sm:$0xff] %v190_v0  ;;  %v196_v3 = vld [vmem:[%s1620_s26 + $0x6c] sm:$0xff]  ;;  %v200_v5 = vld [vmem:[%s1620_s26 + $0xb4] sm:$0xff] }
  0x12   : > { %193 = vst [vmem:[%s1625_s27 + $0xc] sm:$0xff] %v192_v1  ;;  %v202_v6 = vld [vmem:[%s1620_s26 + $0xd8] sm:$0xff]  ;;  %v206_v8 = vld [vmem:[%s1620_s26 + $0x120] sm:$0xff]  ;;  %v210_v10 = vld [vmem:[%s1620_s26 + $0x168] sm:$0xff] }
  0x13   : > { %195 = vst [vmem:[%s1625_s27 + $0x18] sm:$0xff] %v194_v2  ;;  %v204_v7 = vld [vmem:[%s1620_s26 + $0xfc] sm:$0xff]  ;;  %v208_v9 = vld [vmem:[%s1620_s26 + $0x144] sm:$0xff]  ;;  %v212_v11 = vld [vmem:[%s1620_s26 + $0x18c] sm:$0xff] }
  0x14   : > { %197 = vst [vmem:[%s1625_s27 + $0x24] sm:$0xff] %v196_v3  ;;  %v214_v12 = vld [vmem:[%s1620_s26 + $0x1b0] sm:$0xff]  ;;  %v218_v14 = vld [vmem:[%s1620_s26 + $0x1f8] sm:$0xff]  ;;  %v1120_v16 = vld [vmem:[%s1620_s26 + $0x8] sm:$0xf] }
  0x15   : > { %199 = vst [vmem:[%s1625_s27 + $0x30] sm:$0xff] %v198_v4  ;;  %v216_v13 = vld [vmem:[%s1620_s26 + $0x1d4] sm:$0xff]  ;;  %v220_v15 = vld [vmem:[%s1620_s26 + $0x21c] sm:$0xff]  ;;  %v1122_v17 = vld [vmem:[%s1620_s26 + $0x2c] sm:$0xf] }
  0x16   : > { %201 = vst [vmem:[%s1625_s27 + $0x3c] sm:$0xff] %v200_v5  ;;  %v1124_v18 = vld [vmem:[%s1620_s26 + $0x50] sm:$0xf]  ;;  %v1126_v19 = vld [vmem:[%s1620_s26 + $0x74] sm:$0xf] }
  0x17   : > { %203 = vst [vmem:[%s1625_s27 + $0x48] sm:$0xff] %v202_v6  ;;  %v1128_v20 = vld [vmem:[%s1620_s26 + $0x98] sm:$0xf]  ;;  %v1130_v21 = vld [vmem:[%s1620_s26 + $0xbc] sm:$0xf] }
  0x18   : > { %205 = vst [vmem:[%s1625_s27 + $0x54] sm:$0xff] %v204_v7  ;;  %v1132_v22 = vld [vmem:[%s1620_s26 + $0xe0] sm:$0xf]  ;;  %v1134_v23 = vld [vmem:[%s1620_s26 + $0x104] sm:$0xf] }
  0x19   : > { %207 = vst [vmem:[%s1625_s27 + $0x60] sm:$0xff] %v206_v8  ;;  %v1136_v24 = vld [vmem:[%s1620_s26 + $0x128] sm:$0xf]  ;;  %v1138_v25 = vld [vmem:[%s1620_s26 + $0x14c] sm:$0xf] }
  0x1a   : > { %209 = vst [vmem:[%s1625_s27 + $0x6c] sm:$0xff] %v208_v9  ;;  %v1140_v26 = vld [vmem:[%s1620_s26 + $0x170] sm:$0xf]  ;;  %v1142_v27 = vld [vmem:[%s1620_s26 + $0x194] sm:$0xf] }
  0x1b   : > { %211 = vst [vmem:[%s1625_s27 + $0x78] sm:$0xff] %v210_v10  ;;  %v1144_v28 = vld [vmem:[%s1620_s26 + $0x1b8] sm:$0xf]  ;;  %v1146_v29 = vld [vmem:[%s1620_s26 + $0x1dc] sm:$0xf] }
  0x1c   : > { %213 = vst [vmem:[%s1625_s27 + $0x84] sm:$0xff] %v212_v11  ;;  %v1148_v30 = vld [vmem:[%s1620_s26 + $0x200] sm:$0xf]  ;;  %v1150_v31 = vld [vmem:[%s1620_s26 + $0x224] sm:$0xf] }
  0x1d   : > { %215 = vst [vmem:[%s1625_s27 + $0x90] sm:$0xff] %v214_v12 }
  0x1e   : > { %217 = vst [vmem:[%s1625_s27 + $0x9c] sm:$0xff] %v216_v13 }
  0x1f   : > { %219 = vst [vmem:[%s1625_s27 + $0xa8] sm:$0xff] %v218_v14 }
  0x20   : > { %221 = vst [vmem:[%s1625_s27 + $0xb4] sm:$0xff] %v220_v15 }
  0x21   : > { %1121 = vst [vmem:[%s1625_s27 + $0x8] sm:$0xf] %v1120_v16 }
  0x22   : > { %1123 = vst [vmem:[%s1625_s27 + $0x14] sm:$0xf] %v1122_v17 }
  0x23   : > { %1125 = vst [vmem:[%s1625_s27 + $0x20] sm:$0xf] %v1124_v18 }
  0x24   : > { %1127 = vst [vmem:[%s1625_s27 + $0x2c] sm:$0xf] %v1126_v19 }
  0x25   : > { %1129 = vst [vmem:[%s1625_s27 + $0x38] sm:$0xf] %v1128_v20 }
  0x26   : > { %1131 = vst [vmem:[%s1625_s27 + $0x44] sm:$0xf] %v1130_v21 }
  0x27   : > { %1133 = vst [vmem:[%s1625_s27 + $0x50] sm:$0xf] %v1132_v22 }
  0x28   : > { %1135 = vst [vmem:[%s1625_s27 + $0x5c] sm:$0xf] %v1134_v23 }
  0x29   : > { %1137 = vst [vmem:[%s1625_s27 + $0x68] sm:$0xf] %v1136_v24 }
  0x2a   : > { %1139 = vst [vmem:[%s1625_s27 + $0x74] sm:$0xf] %v1138_v25 }
  0x2b   : > { %1141 = vst [vmem:[%s1625_s27 + $0x80] sm:$0xf] %v1140_v26 }
  0x2c   : > { %1143 = vst [vmem:[%s1625_s27 + $0x8c] sm:$0xf] %v1142_v27 }
  0x2d   : > { %1145 = vst [vmem:[%s1625_s27 + $0x98] sm:$0xf] %v1144_v28 }
  0x2e   : > { %1147 = vst [vmem:[%s1625_s27 + $0xa4] sm:$0xf] %v1146_v29 }
  0x2f   : > { %1149 = vst [vmem:[%s1625_s27 + $0xb0] sm:$0xf] %v1148_v30 }
  0x30   : > { %1151 = vst [vmem:[%s1625_s27 + $0xbc] sm:$0xf] %v1150_v31 }
  0x31 PF: > { %p1152_p6 = scmp.ge.s32.totalorder %s1554_s16, 1  ;;  %p278_p7 = scmp.lt.s32.totalorder %s1554_s16, 4 }
  0x33   : > { %p279_p8 = pnand %p1152_p6, %p278_p7 }
  0x34   : > { %s285_s28 = sand.u32 (!%p279_p8), 1, %s1538_s12   ;;  %s324_s29 = smul.u32 (!%p279_p8), 48, %s1546_s14 }
  0x35   : > { %282 = sbr.rel (%p279_p8) target bundleno = 355 (0x163), region = 54  ;;  %p1154_p10 = scmp.ne.s32.totalorder (!%p279_p8), %s1546_s14, 0 }
  0x36   : > { %s1473_s30 = smul.u32 (!%p279_p8), 192, %s285_s28  ;;  %p325_p9 = scmp.lt.s32.totalorder (!%p279_p8), %s324_s29, 143 }
  0x38   : > { %s1697_s8 = scalar_lea.vmem (!%p279_p8), [#allocation3], %s1473_s30 }
  0x3a   : > { %s1878_s29 = smov (!%p325_p9, %s324_s29), 143  ;;  %348 = sbr.rel (%p1154_p10) target bundleno = 80 (0x50), region = 62 }
  0x3b   : > { %s1153_s4 = sshll.u32 %s1878_s29, 2 }
  0x3c   : > { %s1695_s7 = scalar_lea.vmem %s1868_s1, %s1153_s4 }
  0x3f   : > { %v1556_v32 = vmov 0.0  }
  0x40   : > { %349 = vst [vmem:[#allocation2 + $0x30] sm:$0xff] %v1556_v32 }
  0x41   : > { %350 = vst [vmem:[#allocation2] sm:$0xff] %v1556_v32 }
  0x42   : > { %351 = vst [vmem:[#allocation2 + $0x58] sm:$0xff] %v1556_v32 }
  0x43   : > { %352 = vst [vmem:[#allocation2 + $0x18] sm:$0xff] %v1556_v32 }
  0x44   : > { %353 = vst [vmem:[#allocation2 + $0x50] sm:$0xff] %v1556_v32 }
  0x45   : > { %354 = vst [vmem:[#allocation2 + $0x68] sm:$0xff] %v1556_v32 }
  0x46   : > { %355 = vst [vmem:[#allocation2 + $0x8] sm:$0xff] %v1556_v32 }
  0x47   : > { %356 = vst [vmem:[#allocation2 + $0x48] sm:$0xff] %v1556_v32 }
  0x48   : > { %357 = vst [vmem:[#allocation2 + $0x40] sm:$0xff] %v1556_v32 }
  0x49   : > { %358 = vst [vmem:[#allocation2 + $0x20] sm:$0xff] %v1556_v32 }
  0x4a   : > { %359 = vst [vmem:[#allocation2 + $0x10] sm:$0xff] %v1556_v32 }
  0x4b   : > { %360 = vst [vmem:[#allocation2 + $0x38] sm:$0xff] %v1556_v32 }
  0x4c   : > { %361 = vst [vmem:[#allocation2 + $0x60] sm:$0xff] %v1556_v32 }
  0x4d   : > { %362 = vst [vmem:[#allocation2 + $0x70] sm:$0xff] %v1556_v32 }
  0x4e   : > { %363 = vst [vmem:[#allocation2 + $0x78] sm:$0xff] %v1556_v32 }
  0x4f   : > { %364 = vst [vmem:[#allocation2 + $0x28] sm:$0xff] %v1556_v32 }
  0x50 PF: > { %v1384_v33 = vld [vmem:[%s1695_s7 + $0x38] sm:$0xff]  ;;  %v1383_v36 = vld [vmem:[%s1695_s7 + $0x30] sm:$0xff]  ;;  %v1382_v39 = vld [vmem:[%s1695_s7 + $0x28] sm:$0xff]  ;;  %p1347_p11 = scmp.ne.s32.totalorder %s1546_s14, 2 }
  0x51   : > { %v1702_v34 = vld [vmem:[%s1695_s7 + $0x78] sm:$0xff]  ;;  %733 = vmatpush.bf16.msra.mxu0 %v1384_v33  ;;  %1448 = vmatpush.bf16.msra.mxu3 %v1384_v33  ;;  %v1711_v37 = vld [vmem:[%s1695_s7 + $0x70] sm:$0xff]  ;;  %v1390_v40 = vld [vmem:[%s1695_s7 + $0x68] sm:$0xff] }
  0x52   : > { %v1705_v35 = vld [vmem:[%s1695_s7 + $0xb8] sm:$0xff]  ;;  %782 = vmatpush.bf16.msra.mxu1 %v1702_v34  ;;  %v1714_v38 = vld [vmem:[%s1695_s7 + $0xb0] sm:$0xff]  ;;  %v1721_v41 = vld [vmem:[%s1695_s7 + $0xa8] sm:$0xff] }
  0x53   : > { %831 = vmatpush.bf16.msra.mxu2 %v1705_v35  ;;  %v1381_v42 = vld [vmem:[%s1695_s7 + $0x20] sm:$0xff]  ;;  %v1380_v45 = vld [vmem:[%s1695_s7 + $0x18] sm:$0xff]  ;;  %v1379_v48 = vld [vmem:[%s1695_s7 + $0x10] sm:$0xff] }
  0x54   : > { %v1389_v43 = vld [vmem:[%s1695_s7 + $0x60] sm:$0xff]  ;;  %v1388_v46 = vld [vmem:[%s1695_s7 + $0x58] sm:$0xff]  ;;  %v1387_v49 = vld [vmem:[%s1695_s7 + $0x50] sm:$0xff] }
  0x55   : > { %734 = vmatpush.bf16.msra.mxu0 %v1383_v36  ;;  %1449 = vmatpush.bf16.msra.mxu3 %v1383_v36  ;;  %v1727_v44 = vld [vmem:[%s1695_s7 + $0xa0] sm:$0xff]  ;;  %v1733_v47 = vld [vmem:[%s1695_s7 + $0x98] sm:$0xff]  ;;  %v1739_v50 = vld [vmem:[%s1695_s7 + $0x90] sm:$0xff] }
  0x56   : > { %783 = vmatpush.bf16.msra.mxu1 %v1711_v37  ;;  %v1378_v51 = vld [vmem:[%s1695_s7 + $0x8] sm:$0xff]  ;;  %v1377_v54 = vld [vmem:[%s1695_s7] sm:$0xff]  ;;  %v1229_v59 = vld [vmem:[%s1697_s8 + $0x90] sm:$0xf] }
  0x57   : > { %832 = vmatpush.bf16.msra.mxu2 %v1714_v38  ;;  %v1386_v52 = vld [vmem:[%s1695_s7 + $0x48] sm:$0xff]  ;;  %v1385_v55 = vld [vmem:[%s1695_s7 + $0x40] sm:$0xff]  ;;  %v1372_v60 = vld [vmem:[%s1697_s8 + $0x98] sm:$0xf0] }
  0x58   : > { %v1745_v53 = vld [vmem:[%s1695_s7 + $0x88] sm:$0xff]  ;;  %v1750_v56 = vld [vmem:[%s1695_s7 + $0x80] sm:$0xff]  ;;  %v1159_v62 = vld [vmem:[%s1697_s8 + $0xc] sm:$0xf0]  ;;  %v1230_v2 = vor.u32 %v1372_v60, %v1229_v59 }
  0x59   : > { %735 = vmatpush.bf16.msra.mxu0 %v1382_v39  ;;  %1450 = vmatpush.bf16.msra.mxu3 %v1382_v39  ;;  %v1157_v57 = vld [vmem:[%s1697_s8] sm:$0xf]  ;;  %v1354_v58 = vld [vmem:[%s1697_s8 + $0x8] sm:$0xf0]  ;;  %v1353_v61 = vld [vmem:[%s1697_s8 + $0x4] sm:$0xf] }
  0x5a   : > { %784 = vmatpush.bf16.msra.mxu1 %v1390_v40  ;;  %v1165_v63 = vld [vmem:[%s1697_s8 + $0x8] sm:$0xf]  ;;  %v1355_v0 = vld [vmem:[%s1697_s8 + $0x10] sm:$0xf0]  ;;  %v1158_v1 = vor.u32 %v1354_v58, %v1157_v57  ;;  %v1162_v3 = vor.u32 %v1353_v61, %v1159_v62  ;;  %v1169_v5 = vld [vmem:[%s1697_s8 + $0x18] sm:$0xf] }
  0x5b   : > { %833 = vmatpush.bf16.msra.mxu2 %v1721_v41  ;;  %v1166_v4 = vor.u32 %v1355_v0, %v1165_v63  ;;  %v1357_v6 = vld [vmem:[%s1697_s8 + $0x20] sm:$0xf0]  ;;  %v1241_v7 = vld [vmem:[%s1697_s8 + $0xa8] sm:$0xf]  ;;  %v1375_v8 = vld [vmem:[%s1697_s8 + $0xb0] sm:$0xf0] }
  0x5c   : > { %v1356_v9 = vld [vmem:[%s1697_s8 + $0x1c] sm:$0xf]  ;;  %v1171_v10 = vld [vmem:[%s1697_s8 + $0x24] sm:$0xf0]  ;;  %v1177_v11 = vld [vmem:[%s1697_s8 + $0x20] sm:$0xf]  ;;  %v1170_v13 = vor.u32 %v1357_v6, %v1169_v5  ;;  %v1242_v14 = vor.u32 %v1375_v8, %v1241_v7 }
  0x5d   : > { %736 = vmatpush.bf16.msra.mxu0 %v1381_v42  ;;  %1451 = vmatpush.bf16.msra.mxu3 %v1381_v42  ;;  %v1358_v12 = vld [vmem:[%s1697_s8 + $0x28] sm:$0xf0]  ;;  %v1174_v15 = vor.u32 %v1356_v9, %v1171_v10  ;;  %v1181_v17 = vld [vmem:[%s1697_s8 + $0x30] sm:$0xf]  ;;  %v1360_v18 = vld [vmem:[%s1697_s8 + $0x38] sm:$0xf0] }
  0x5e   : > { %785 = vmatpush.bf16.msra.mxu1 %v1389_v43  ;;  %v1178_v16 = vor.u32 %v1358_v12, %v1177_v11  ;;  %v1359_v19 = vld [vmem:[%s1697_s8 + $0x34] sm:$0xf]  ;;  %v1231_v21 = vld [vmem:[%s1697_s8 + $0x9c] sm:$0xf0]  ;;  %v1189_v23 = vld [vmem:[%s1697_s8 + $0x38] sm:$0xf]  ;;  %v1182_v25 = vor.u32 %v1360_v18, %v1181_v17 }
  0x5f   : > { %834 = vmatpush.bf16.msra.mxu2 %v1727_v44  ;;  %v1371_v20 = vld [vmem:[%s1697_s8 + $0x94] sm:$0xf]  ;;  %v1183_v22 = vld [vmem:[%s1697_s8 + $0x3c] sm:$0xf0]  ;;  %v1361_v24 = vld [vmem:[%s1697_s8 + $0x40] sm:$0xf0] }
  0x60   : > { %v1234_v26 = vor.u32 %v1371_v20, %v1231_v21  ;;  %v1186_v27 = vor.u32 %v1359_v19, %v1183_v22  ;;  %v1190_v28 = vor.u32 %v1361_v24, %v1189_v23  ;;  %v1193_v29 = vld [vmem:[%s1697_s8 + $0x48] sm:$0xf]  ;;  %v1363_v30 = vld [vmem:[%s1697_s8 + $0x50] sm:$0xf0]  ;;  %v1362_v31 = vld [vmem:[%s1697_s8 + $0x4c] sm:$0xf] }
  0x61   : > { %737 = vmatpush.bf16.msra.mxu0 %v1380_v45  ;;  %1452 = vmatpush.bf16.msra.mxu3 %v1380_v45  ;;  %v1374_v32 = vld [vmem:[%s1697_s8 + $0xac] sm:$0xf]  ;;  %v1243_v33 = vld [vmem:[%s1697_s8 + $0xb4] sm:$0xf0]  ;;  %v1364_v36 = vld [vmem:[%s1697_s8 + $0x58] sm:$0xf0] }
  0x62   : > { %786 = vmatpush.bf16.msra.mxu1 %v1388_v46  ;;  %v1246_v39 = vor.u32 %v1374_v32, %v1243_v33  ;;  %v1366_v42 = vld [vmem:[%s1697_s8 + $0x68] sm:$0xf0]  ;;  %v1373_v45 = vld [vmem:[%s1697_s8 + $0xa0] sm:$0xf0]  ;;  %v1249_v57 = vld [vmem:[%s1697_s8 + $0xb0] sm:$0xf] }
  0x63   : > { %835 = vmatpush.bf16.msra.mxu2 %v1733_v47  ;;  %v1219_v58 = vld [vmem:[%s1697_s8 + $0x84] sm:$0xf0]  ;;  %v1225_v59 = vld [vmem:[%s1697_s8 + $0x80] sm:$0xf]  ;;  %v1370_v60 = vld [vmem:[%s1697_s8 + $0x88] sm:$0xf0] }
  0x64   : > { %v1226_v0 = vor.u32 %v1370_v60, %v1225_v59  ;;  %v365_v5 = vld [vmem:[#allocation2 + $0x30] sm:$0xff]  ;;  %v367_v21 = vld [vmem:[#allocation2 + $0x58] sm:$0xff] }
  0x65   : > { %738 = vmatpush.bf16.msra.mxu0 %v1379_v48  ;;  %1453 = vmatpush.bf16.msra.mxu3 %v1379_v48  ;;  %v1367_v48 = vld [vmem:[%s1697_s8 + $0x70] sm:$0xf0] }
  0x66   : > { %787 = vmatpush.bf16.msra.mxu1 %v1387_v49 }
  0x67   : > { %836 = vmatpush.bf16.msra.mxu2 %v1739_v50 }
  0x69   : > { %739 = vmatpush.bf16.msra.mxu0 %v1378_v51  ;;  %1454 = vmatpush.bf16.msra.mxu3 %v1378_v51 }
  0x6a   : > { %788 = vmatpush.bf16.msra.mxu1 %v1386_v52 }
  0x6b   : > { %837 = vmatpush.bf16.msra.mxu2 %v1745_v53 }
  0x6d   : > { %740 = vmatpush.bf16.msra.mxu0 %v1377_v54  ;;  %1455 = vmatpush.bf16.msra.mxu3 %v1377_v54  ;;  %v1369_v54 = vld [vmem:[%s1697_s8 + $0x80] sm:$0xf0] }
  0x6e   : > { %789 = vmatpush.bf16.msra.mxu1 %v1385_v55 }
  0x6f   : > { %838 = vmatpush.bf16.msra.mxu2 %v1750_v56 }
  0x70   : > { %741 = vmatmul.bf16.vlgmr.msra.gmra.mxu0 %v1158_v1  ;;  %771 = vmatmul.bf16.vlgmr.msra.gmra.mxu3 %v1230_v2 }
  0x71   : > { %1456 = vmatpush.bf16.msrb.mxu3 %v1702_v34  ;;  %790 = vmatmul.bf16.vlgmr.msra.gmra.mxu1 %v1162_v3  ;;  %v1195_v34 = vld [vmem:[%s1697_s8 + $0x54] sm:$0xf0] }
  0x72   : > { %839 = vmatmul.bf16.vlgmr.msra.gmra.mxu2 %v1166_v4 }
  0x75   : > { %1457 = vmatpush.bf16.msrb.mxu3 %v1711_v37  ;;  %v1194_v37 = vor.u32 %v1363_v30, %v1193_v29  ;;  %v368_v29 = vld [vmem:[#allocation2 + $0x18] sm:$0xff] }
  0x79   : > { %1458 = vmatpush.bf16.msrb.mxu3 %v1390_v40 }
  0x7d   : > { %1459 = vmatpush.bf16.msrb.mxu3 %v1389_v43  ;;  %v1365_v43 = vld [vmem:[%s1697_s8 + $0x64] sm:$0xf] }
  0x80   : > { %746 = vmatmul.bf16.gmra.mxu0 %v1170_v13  ;;  %776 = vmatmul.bf16.gmra.mxu3 %v1242_v14  ;;  %v366_v13 = vld [vmem:[#allocation2] sm:$0xff] }
  0x81   : > { %1460 = vmatpush.bf16.msrb.mxu3 %v1388_v46  ;;  %795 = vmatmul.bf16.gmra.mxu1 %v1174_v15  ;;  %v1207_v46 = vld [vmem:[%s1697_s8 + $0x6c] sm:$0xf0] }
  0x82   : > { %844 = vmatmul.bf16.gmra.mxu2 %v1178_v16  ;;  %v1210_v51 = vor.u32 %v1365_v43, %v1207_v46 }
  0x85   : > { %1461 = vmatpush.bf16.msrb.mxu3 %v1387_v49 }
  0x89   : > { %1462 = vmatpush.bf16.msrb.mxu3 %v1386_v52 }
  0x8d   : > { %1463 = vmatpush.bf16.msrb.mxu3 %v1385_v55  ;;  %v1368_v55 = vld [vmem:[%s1697_s8 + $0x7c] sm:$0xf] }
  0x8e   : > { %v1222_v63 = vor.u32 %v1368_v55, %v1219_v58 }
  0x90   : > { %751 = vmatmul.bf16.gmra.mxu0 %v1182_v25  ;;  %820 = vmatmul.bf16.vlgmr.msrb.gmra.mxu3 %v1234_v26 }
  0x91   : > { %1464 = vmatpush.bf16.msra.mxu3 %v1705_v35  ;;  %800 = vmatmul.bf16.gmra.mxu1 %v1186_v27  ;;  %v1201_v35 = vld [vmem:[%s1697_s8 + $0x50] sm:$0xf] }
  0x92   : > { %849 = vmatmul.bf16.gmra.mxu2 %v1190_v28  ;;  %v1202_v40 = vor.u32 %v1364_v36, %v1201_v35 }
  0x95   : > { %1465 = vmatpush.bf16.msra.mxu3 %v1714_v38  ;;  %v1198_v38 = vor.u32 %v1362_v31, %v1195_v34 }
  0x99   : > { %1466 = vmatpush.bf16.msra.mxu3 %v1721_v41  ;;  %v1205_v41 = vld [vmem:[%s1697_s8 + $0x60] sm:$0xf] }
  0x9a   : > { %v1206_v49 = vor.u32 %v1366_v42, %v1205_v41 }
  0x9d   : > { %1467 = vmatpush.bf16.msra.mxu3 %v1727_v44  ;;  %v1237_v44 = vld [vmem:[%s1697_s8 + $0x98] sm:$0xf] }
  0xa0   : > { %756 = vmatmul.bf16.gmra.mxu0 %v1194_v37  ;;  %825 = vmatmul.bf16.gmra.mxu3 %v1246_v39  ;;  %v369_v37 = vld [vmem:[#allocation2 + $0x50] sm:$0xff] }
  0xa1   : > { %1468 = vmatpush.bf16.msra.mxu3 %v1733_v47  ;;  %805 = vmatmul.bf16.gmra.mxu1 %v1198_v38  ;;  %v1213_v47 = vld [vmem:[%s1697_s8 + $0x68] sm:$0xf] }
  0xa2   : > { %854 = vmatmul.bf16.gmra.mxu2 %v1202_v40  ;;  %v1214_v52 = vor.u32 %v1367_v48, %v1213_v47 }
  0xa5   : > { %1469 = vmatpush.bf16.msra.mxu3 %v1739_v50  ;;  %v1238_v50 = vor.u32 %v1373_v45, %v1237_v44  ;;  %v370_v45 = vld [vmem:[#allocation2 + $0x68] sm:$0xff] }
  0xa9   : > { %1470 = vmatpush.bf16.msra.mxu3 %v1745_v53  ;;  %v1217_v53 = vld [vmem:[%s1697_s8 + $0x78] sm:$0xf] }
  0xaa   : > { %v1218_v61 = vor.u32 %v1369_v54, %v1217_v53  ;;  %v371_v53 = vld [vmem:[#allocation2 + $0x8] sm:$0xff] }
  0xad   : > { %1471 = vmatpush.bf16.msra.mxu3 %v1750_v56  ;;  %v1376_v56 = vld [vmem:[%s1697_s8 + $0xb8] sm:$0xf0] }
  0xae   : > { %v1250_v62 = vor.u32 %v1376_v56, %v1249_v57 }
  0xb0   : > { %761 = vmatmul.bf16.gmra.mxu0 %v1206_v49  ;;  %869 = vmatmul.bf16.vlgmr.msra.gmra.mxu3 %v1238_v50 }
  0xb1   : > { %810 = vmatmul.bf16.gmra.mxu1 %v1210_v51 }
  0xb2   : > { %859 = vmatmul.bf16.gmra.mxu2 %v1214_v52 }
  0xc0   : > { %766 = vmatmul.bf16.gmra.mxu0 %v1218_v61  ;;  %874 = vmatmul.bf16.gmra.mxu3 %v1250_v62  ;;  %v372_v61 = vld [vmem:[#allocation2 + $0x48] sm:$0xff] }
  0xc1   : > { %815 = vmatmul.bf16.gmra.mxu1 %v1222_v63 }
  0xc2   : > { %864 = vmatmul.bf16.gmra.mxu2 %v1226_v0 }
  0xed   : > { %v742_v1 = vpop.f32.mrf.mxu0 }
  0xee   : > { %v791_v2 = vpop.f32.mrf.mxu1 }
  0xef   : > { %v792_v3 = vadd.f32 %v791_v2, %v742_v1 }
  0xf3   : > { %v1812_v4 = vpop.f32.mrf.mxu3 }
  0xf5   : > { %v840_v6 = vpop.f32.mrf.mxu2  ;;  %v744_v8 = vpop.f32.mrf.mxu0 }
  0xf6   : > { %v841_v7 = vadd.f32 %v840_v6, %v792_v3  ;;  %v793_v9 = vpop.f32.mrf.mxu1  ;;  %v377_v6 = vld [vmem:[#allocation2 + $0x60] sm:$0xff] }
  0xf7   : > { %v794_v11 = vadd.f32 %v793_v9, %v744_v8  ;;  %v373_v8 = vld [vmem:[#allocation2 + $0x40] sm:$0xff] }
  0xf8   : > { %v880_v10 = vadd.f32 %v841_v7, %v365_v5 }
  0xfa   : > { %896 = vst [vmem:[#allocation2 + $0x30] sm:$0xff] %v880_v10 }
  0xfb   : > { %v1814_v12 = vpop.f32.mrf.mxu3 }
  0xfd   : > { %v842_v14 = vpop.f32.mrf.mxu2  ;;  %v747_v16 = vpop.f32.mrf.mxu0 }
  0xfe   : > { %v843_v15 = vadd.f32 %v842_v14, %v794_v11  ;;  %v796_v17 = vpop.f32.mrf.mxu1 }
  0xff   : > { %v797_v19 = vadd.f32 %v796_v17, %v747_v16 }
 0x100   : > { %v881_v18 = vadd.f32 %v843_v15, %v366_v13 }
 0x102   : > { %897 = vst [vmem:[#allocation2] sm:$0xff] %v881_v18 }
 0x103   : > { %v1816_v20 = vpop.f32.mrf.mxu3 }
 0x105   : > { %v845_v22 = vpop.f32.mrf.mxu2  ;;  %v749_v24 = vpop.f32.mrf.mxu0 }
 0x106   : > { %v846_v23 = vadd.f32 %v845_v22, %v797_v19  ;;  %v798_v25 = vpop.f32.mrf.mxu1  ;;  %v378_v19 = vld [vmem:[#allocation2 + $0x70] sm:$0xff]  ;;  %v374_v22 = vld [vmem:[#allocation2 + $0x20] sm:$0xff] }
 0x107   : > { %v799_v27 = vadd.f32 %v798_v25, %v749_v24 }
 0x108   : > { %v882_v26 = vadd.f32 %v846_v23, %v367_v21 }
 0x10a   : > { %898 = vst [vmem:[#allocation2 + $0x58] sm:$0xff] %v882_v26 }
 0x10b   : > { %v1818_v28 = vpop.f32.mrf.mxu3 }
 0x10d   : > { %v847_v30 = vpop.f32.mrf.mxu2  ;;  %v752_v32 = vpop.f32.mrf.mxu0 }
 0x10e   : > { %v848_v31 = vadd.f32 %v847_v30, %v799_v27  ;;  %v801_v33 = vpop.f32.mrf.mxu1 }
 0x10f   : > { %v802_v35 = vadd.f32 %v801_v33, %v752_v32  ;;  %v379_v32 = vld [vmem:[#allocation2 + $0x78] sm:$0xff] }
 0x110   : > { %v883_v34 = vadd.f32 %v848_v31, %v368_v29 }
 0x112   : > { %899 = vst [vmem:[#allocation2 + $0x18] sm:$0xff] %v883_v34  ;;  %v375_v34 = vld [vmem:[#allocation2 + $0x10] sm:$0xff] }
 0x113   : > { %v821_v36 = vpop.f32.mrf.mxu3 }
 0x114   : > { %v822_v5 = vadd.f32 %v821_v36, %v1812_v4 }
 0x115   : > { %v850_v39 = vpop.f32.mrf.mxu2  ;;  %v754_v40 = vpop.f32.mrf.mxu0 }
 0x116   : > { %v851_v38 = vadd.f32 %v850_v39, %v802_v35  ;;  %v803_v41 = vpop.f32.mrf.mxu1 }
 0x117   : > { %v804_v43 = vadd.f32 %v803_v41, %v754_v40 }
 0x118   : > { %v884_v42 = vadd.f32 %v851_v38, %v369_v37 }
 0x11a   : > { %900 = vst [vmem:[#allocation2 + $0x50] sm:$0xff] %v884_v42 }
 0x11b   : > { %v823_v44 = vpop.f32.mrf.mxu3 }
 0x11c   : > { %v824_v17 = vadd.f32 %v823_v44, %v1814_v12 }
 0x11d   : > { %v852_v46 = vpop.f32.mrf.mxu2  ;;  %v757_v48 = vpop.f32.mrf.mxu0 }
 0x11e   : > { %v853_v47 = vadd.f32 %v852_v46, %v804_v43  ;;  %v806_v49 = vpop.f32.mrf.mxu1  ;;  %v380_v43 = vld [vmem:[#allocation2 + $0x28] sm:$0xff] }
 0x11f   : > { %v807_v51 = vadd.f32 %v806_v49, %v757_v48 }
 0x120   : > { %v885_v50 = vadd.f32 %v853_v47, %v370_v45  ;;  %v376_v45 = vld [vmem:[#allocation2 + $0x38] sm:$0xff] }
 0x122   : > { %901 = vst [vmem:[#allocation2 + $0x68] sm:$0xff] %v885_v50 }
 0x123   : > { %v826_v52 = vpop.f32.mrf.mxu3 }
 0x124   : > { %v827_v31 = vadd.f32 %v826_v52, %v1816_v20 }
 0x125   : > { %v855_v54 = vpop.f32.mrf.mxu2  ;;  %v759_v57 = vpop.f32.mrf.mxu0 }
 0x126   : > { %v856_v55 = vadd.f32 %v855_v54, %v807_v51  ;;  %v808_v56 = vpop.f32.mrf.mxu1 }
 0x127   : > { %v809_v59 = vadd.f32 %v808_v56, %v759_v57 }
 0x128   : > { %v886_v58 = vadd.f32 %v856_v55, %v371_v53 }
 0x12a   : > { %902 = vst [vmem:[#allocation2 + $0x8] sm:$0xff] %v886_v58 }
 0x12b   : > { %v828_v60 = vpop.f32.mrf.mxu3 }
 0x12c   : > { %v829_v41 = vadd.f32 %v828_v60, %v1818_v28 }
 0x12d   : > { %v857_v62 = vpop.f32.mrf.mxu2  ;;  %v762_v0 = vpop.f32.mrf.mxu0 }
 0x12e   : > { %v858_v63 = vadd.f32 %v857_v62, %v809_v59  ;;  %v811_v1 = vpop.f32.mrf.mxu1 }
 0x12f   : > { %v812_v3 = vadd.f32 %v811_v1, %v762_v0 }
 0x130   : > { %v887_v2 = vadd.f32 %v858_v63, %v372_v61 }
 0x132   : > { %903 = vst [vmem:[#allocation2 + $0x48] sm:$0xff] %v887_v2 }
 0x133   : > { %v870_v7 = vpop.f32.mrf.mxu3 }
 0x134   : > { %v871_v10 = vadd.f32 %v870_v7, %v822_v5 }
 0x135   : > { %v860_v9 = vpop.f32.mrf.mxu2  ;;  %v764_v13 = vpop.f32.mrf.mxu0 }
 0x136   : > { %v861_v11 = vadd.f32 %v860_v9, %v812_v3  ;;  %v892_v14 = vadd.f32 %v871_v10, %v377_v6  ;;  %v813_v15 = vpop.f32.mrf.mxu1 }
 0x137   : > { %v814_v18 = vadd.f32 %v813_v15, %v764_v13 }
 0x138   : > { %v888_v16 = vadd.f32 %v861_v11, %v373_v8  ;;  %908 = vst [vmem:[#allocation2 + $0x60] sm:$0xff] %v892_v14 }
 0x13a   : > { %904 = vst [vmem:[#allocation2 + $0x40] sm:$0xff] %v888_v16 }
 0x13b   : > { %v872_v21 = vpop.f32.mrf.mxu3 }
 0x13c   : > { %v873_v4 = vadd.f32 %v872_v21, %v824_v17 }
 0x13d   : > { %v862_v23 = vpop.f32.mrf.mxu2  ;;  %v767_v26 = vpop.f32.mrf.mxu0 }
 0x13e   : > { %v863_v24 = vadd.f32 %v862_v23, %v814_v18  ;;  %v893_v25 = vadd.f32 %v873_v4, %v378_v19  ;;  %v816_v27 = vpop.f32.mrf.mxu1 }
 0x13f   : > { %v817_v30 = vadd.f32 %v816_v27, %v767_v26 }
 0x140   : > { %v889_v29 = vadd.f32 %v863_v24, %v374_v22  ;;  %909 = vst [vmem:[#allocation2 + $0x70] sm:$0xff] %v893_v25 }
 0x142   : > { %905 = vst [vmem:[#allocation2 + $0x20] sm:$0xff] %v889_v29 }
 0x143   : > { %v875_v33 = vpop.f32.mrf.mxu3 }
 0x144   : > { %v876_v35 = vadd.f32 %v875_v33, %v827_v31 }
 0x145   : > { %v865_v12 = vpop.f32.mrf.mxu2  ;;  %v769_v38 = vpop.f32.mrf.mxu0 }
 0x146   : > { %v866_v36 = vadd.f32 %v865_v12, %v817_v30  ;;  %v894_v37 = vadd.f32 %v876_v35, %v379_v32  ;;  %v818_v40 = vpop.f32.mrf.mxu1 }
 0x147   : > { %v819_v42 = vadd.f32 %v818_v40, %v769_v38 }
 0x148   : > { %v890_v39 = vadd.f32 %v866_v36, %v375_v34  ;;  %910 = vst [vmem:[#allocation2 + $0x78] sm:$0xff] %v894_v37 }
 0x14a   : > { %906 = vst [vmem:[#allocation2 + $0x10] sm:$0xff] %v890_v39 }
 0x14b   : > { %v877_v44 = vpop.f32.mrf.mxu3 }
 0x14c   : > { %v878_v20 = vadd.f32 %v877_v44, %v829_v41 }
 0x14d   : > { %v867_v46 = vpop.f32.mrf.mxu2 }
 0x14e   : > { %v868_v47 = vadd.f32 %v867_v46, %v819_v42  ;;  %v895_v48 = vadd.f32 %v878_v20, %v380_v43  ;;  %915 = sbr.rel (%p1347_p11) target bundleno = 355 (0x163), region = 66 }
 0x150   : > { %v891_v49 = vadd.f32 %v868_v47, %v376_v45  ;;  %911 = vst [vmem:[#allocation2 + $0x28] sm:$0xff] %v895_v48 }
 0x152   : > { %907 = vst [vmem:[#allocation2 + $0x38] sm:$0xff] %v891_v49 }
 0x153   : > { %v916_v50 = vld [vmem:[#allocation2 + $0x30] sm:$0xff]  ;;  %v917_v51 = vld [vmem:[#allocation2] sm:$0xff]  ;;  %v918_v52 = vld [vmem:[#allocation2 + $0x58] sm:$0xff] }
 0x154   : > { %v1515_v28 = vld [vmem:[%s1869_s2] ss:$0 sm:$0xff]  ;;  %v919_v53 = vld [vmem:[#allocation2 + $0x18] sm:$0xff]  ;;  %v920_v54 = vld [vmem:[#allocation2 + $0x50] sm:$0xff] }
 0x155   : > { %v921_v55 = vld [vmem:[#allocation2 + $0x68] sm:$0xff]  ;;  %v936_v56 = vadd.f32 %v1515_v28, %v916_v50  ;;  %v937_v58 = vadd.f32 %v1515_v28, %v917_v51  ;;  %v938_v59 = vadd.f32 %v1515_v28, %v918_v52  ;;  %v939_v60 = vadd.f32 %v1515_v28, %v919_v53  ;;  %v924_v2 = vld [vmem:[#allocation2 + $0x40] sm:$0xff]  ;;  %v926_v9 = vld [vmem:[#allocation2 + $0x10] sm:$0xff] }
 0x156   : > { %v922_v57 = vld [vmem:[#allocation2 + $0x8] sm:$0xff]  ;;  %v940_v62 = vadd.f32 %v1515_v28, %v920_v54  ;;  %v941_v63 = vadd.f32 %v1515_v28, %v921_v55  ;;  %v925_v3 = vld [vmem:[#allocation2 + $0x20] sm:$0xff]  ;;  %v929_v17 = vld [vmem:[#allocation2 + $0x70] sm:$0xff]  ;;  %v944_v21 = vadd.f32 %v1515_v28, %v924_v2  ;;  %v946_v26 = vadd.f32 %v1515_v28, %v926_v9 }
 0x157   : > { %v923_v61 = vld [vmem:[#allocation2 + $0x48] sm:$0xff]  ;;  %v942_v0 = vadd.f32 %v1515_v28, %v922_v57  ;;  %v952_v5 = vmax.f32 %v936_v56, 0.0  ;;  %v953_v6 = vmax.f32 %v937_v58, 0.0  ;;  %v954_v7 = vmax.f32 %v938_v59, 0.0  ;;  %v928_v16 = vld [vmem:[#allocation2 + $0x60] sm:$0xff]  ;;  %v930_v23 = vld [vmem:[#allocation2 + $0x78] sm:$0xff] }
 0x158   : > { %v943_v1 = vadd.f32 %v1515_v28, %v923_v61  ;;  %v955_v8 = vmax.f32 %v939_v60, 0.0  ;;  %v956_v11 = vmax.f32 %v940_v62, 0.0  ;;  %v957_v13 = vmax.f32 %v941_v63, 0.0  ;;  %v931_v4 = vld [vmem:[#allocation2 + $0x28] sm:$0xff] }
 0x159   : > { %v927_v10 = vld [vmem:[#allocation2 + $0x38] sm:$0xff]  ;;  %v958_v14 = vmax.f32 %v942_v0, 0.0  ;;  %v1404_v18 = vpack.c.bf16 %v953_v6, %v952_v5  ;;  %v945_v22 = vadd.f32 %v1515_v28, %v925_v3  ;;  %v960_v29 = vmax.f32 %v944_v21, 0.0 }
 0x15a   : > { %v959_v15 = vmax.f32 %v943_v1, 0.0  ;;  %v1409_v19 = vpack.c.bf16 %v955_v8, %v954_v7  ;;  %v1414_v24 = vpack.c.bf16 %v957_v13, %v956_v11  ;;  %v947_v27 = vadd.f32 %v1515_v28, %v927_v10 }
 0x15b   : > { %1405 = vst [vmem:[%s1870_s3] sm:$0xff] %v1404_v18   ;;  %v961_v30 = vmax.f32 %v945_v22, 0.0  ;;  %v948_v31 = vadd.f32 %v1515_v28, %v928_v16  ;;  %v949_v32 = vadd.f32 %v1515_v28, %v929_v17  ;;  %v962_v33 = vmax.f32 %v946_v26, 0.0 }
 0x15c   : > { %v1419_v25 = vpack.c.bf16 %v959_v15, %v958_v14  ;;  %1441 = vst [vmem:[%s1870_s3 + $0x8] sm:$0xff] %v1409_v19   ;;  %v963_v34 = vmax.f32 %v947_v27, 0.0  ;;  %v950_v12 = vadd.f32 %v1515_v28, %v930_v23  ;;  %v951_v35 = vadd.f32 %v1515_v28, %v931_v4 }
 0x15d   : > { %1442 = vst [vmem:[%s1870_s3 + $0x10] sm:$0xff] %v1414_v24   ;;  %v1424_v36 = vpack.c.bf16 %v961_v30, %v960_v29  ;;  %v964_v37 = vmax.f32 %v948_v31, 0.0  ;;  %v965_v39 = vmax.f32 %v949_v32, 0.0 }
 0x15e   : > { %1443 = vst [vmem:[%s1870_s3 + $0x18] sm:$0xff] %v1419_v25   ;;  %v1429_v38 = vpack.c.bf16 %v963_v34, %v962_v33  ;;  %v966_v40 = vmax.f32 %v950_v12, 0.0  ;;  %v967_v41 = vmax.f32 %v951_v35, 0.0 }
 0x15f   : > { %1444 = vst [vmem:[%s1870_s3 + $0x20] sm:$0xff] %v1424_v36   ;;  %v1434_v42 = vpack.c.bf16 %v965_v39, %v964_v37 }
 0x160   : > { %1445 = vst [vmem:[%s1870_s3 + $0x28] sm:$0xff] %v1429_v38   ;;  %v1439_v43 = vpack.c.bf16 %v967_v41, %v966_v40 }
 0x161   : > { %1446 = vst [vmem:[%s1870_s3 + $0x30] sm:$0xff] %v1434_v42  }
 0x162   : > { %1447 = vst [vmem:[%s1870_s3 + $0x38] sm:$0xff] %v1439_v43  }
 0x163 PF: > { %s13_s16 = sadd.s32 1, %s1554_s16   ;;  %s1871_s12 = smov %s1542_s13 }
 0x164   : > { %p10_p12 = scmp.ge.s32.totalorder %s13_s16, 5   ;;  %s1872_s13 = smov %s1612_s20 }
 0x165   : > { %s1873_s14 = smov %s1550_s15  ;;  %s1874_s15 = smov %s1876_s17 }
 0x166   :  { %12 = sbr.rel (!%p10_p12) target bundleno = 3 (0x3), region = 113 }

// kernel: resnet_custom_forward.24
= control target key start
LH: loop header
LB: loop body
LE: loop exit
PB: predicated region body
PF: predicated region fallthrough
CT: control target
= control target key end

     0   :  { %s1748_s15 = smov 0   ;;  %s1750_s16 = smov 0   ;;  %s2080_s0 = inlined_call_operand.vmem [shape: bf16[128,1152], index: 0, kind: input, shape index: {}]   ;;  %s2081_s1 = inlined_call_operand.vmem [shape: bf16[1152,128], index: 1, kind: input, shape index: {}]   ;;  %s2082_s2 = inlined_call_operand.vmem [shape: f32[1,128], index: 2, kind: input, shape index: {}]   ;;  %s2083_s3 = inlined_call_operand.vmem [shape: bf16[128,128], index: 3, kind: input, shape index: {}]   ;;  %s2084_s4 = inlined_call_operand.vmem [shape: bf16[128,128], index: 4, kind: output, shape index: {}]  }
   0x1   :  { %s1752_s17 = smov 0   ;;  %s1754_s18 = smov 0  }
   0x2   :  { %s1756_s19 = smov 0  }
   0x3 LB: > { %s26_s20 = sadd.s32 1, %s1716_s18  ;;  %p49_p1 = scmp.ne.s32.totalorder %s1708_s16, %s1704_s15  ;;  %s1720_s19 = sphi %s1756_s19, %s14_s19   ;;  %s1716_s18 = sphi %s1754_s18, %s2088_s18   ;;  %s1712_s17 = sphi %s1752_s17, %s2087_s17   ;;  %s1708_s16 = sphi %s1750_s16, %s2086_s16   ;;  %s1704_s15 = sphi %s1748_s15, %s2085_s15  }
   0x4   : > { %p27_p0 = scmp.ge.s32.totalorder %s26_s20, 3  ;;  %p50_p2 = scmp.eq.s32.totalorder %s1720_s19, 0 }
   0x5   : > { %s42_s22 = sadd.s32 1, %s1708_s16  ;;  %p1245_p5 = scmp.ge.s32.totalorder %s1720_s19, 3 }
   0x6   : > { %s2090_s20 = smov (%p27_p0, %s26_s20), 0  ;;  %p51_p3 = por %p50_p2, %p49_p1 }
   0x7   : > { %s38_s21 = ssub.s32 %s1716_s18, %s2090_s20  ;;  %203 = sbr.rel (%p1245_p5) target bundleno = 49 (0x31), region = 24 }
   0x8   : > { %p40_p4 = scmp.eq.s32.totalorder %s38_s21, 0 }
   0xa   : > { %s1783_s23 = scalar_select %p40_p4, %s1708_s16, %s42_s22  }
   0xc   : > { %206 = sbr.rel (!%p51_p3) target bundleno = 49 (0x31), region = 28  ;;  %s208_s24 = sand.u32 (%p51_p3), 1, %s1708_s16  }
   0xd   : > { %s1479_s25 = smul.u32 (%p51_p3), 12, %s1716_s18 }
   0xe   : > { %s1638_s26 = smul.u32 (%p51_p3), 192, %s208_s24 }
   0xf   : > { %s1791_s29 = scalar_lea.vmem (%p51_p3), %s2080_s0, %s1479_s25 }
  0x10   : > { %v231_v0 = vld [vmem:[%s1791_s29] sm:$0xff] (%p51_p3)  ;;  %v235_v2 = vld [vmem:[%s1791_s29 + $0x48] sm:$0xff] (%p51_p3)  ;;  %s1796_s30 = scalar_lea.vmem (%p51_p3), [#allocation3], %s1638_s26  ;;  %v239_v4 = vld [vmem:[%s1791_s29 + $0x90] sm:$0xff] (%p51_p3) }
  0x11   : > { %v233_v1 = vld [vmem:[%s1791_s29 + $0x24] sm:$0xff]  ;;  %232 = vst [vmem:[%s1796_s30] sm:$0xff] %v231_v0  ;;  %v237_v3 = vld [vmem:[%s1791_s29 + $0x6c] sm:$0xff]  ;;  %v241_v5 = vld [vmem:[%s1791_s29 + $0xb4] sm:$0xff] }
  0x12   : > { %234 = vst [vmem:[%s1796_s30 + $0xc] sm:$0xff] %v233_v1  ;;  %v243_v6 = vld [vmem:[%s1791_s29 + $0xd8] sm:$0xff]  ;;  %v247_v8 = vld [vmem:[%s1791_s29 + $0x120] sm:$0xff]  ;;  %v251_v10 = vld [vmem:[%s1791_s29 + $0x168] sm:$0xff] }
  0x13   : > { %236 = vst [vmem:[%s1796_s30 + $0x18] sm:$0xff] %v235_v2  ;;  %v245_v7 = vld [vmem:[%s1791_s29 + $0xfc] sm:$0xff]  ;;  %v249_v9 = vld [vmem:[%s1791_s29 + $0x144] sm:$0xff]  ;;  %v253_v11 = vld [vmem:[%s1791_s29 + $0x18c] sm:$0xff] }
  0x14   : > { %238 = vst [vmem:[%s1796_s30 + $0x24] sm:$0xff] %v237_v3  ;;  %v255_v12 = vld [vmem:[%s1791_s29 + $0x1b0] sm:$0xff]  ;;  %v259_v14 = vld [vmem:[%s1791_s29 + $0x1f8] sm:$0xff]  ;;  %v1247_v16 = vld [vmem:[%s1791_s29 + $0x8] sm:$0xf] }
  0x15   : > { %240 = vst [vmem:[%s1796_s30 + $0x30] sm:$0xff] %v239_v4  ;;  %v257_v13 = vld [vmem:[%s1791_s29 + $0x1d4] sm:$0xff]  ;;  %v261_v15 = vld [vmem:[%s1791_s29 + $0x21c] sm:$0xff]  ;;  %v1249_v17 = vld [vmem:[%s1791_s29 + $0x2c] sm:$0xf] }
  0x16   : > { %242 = vst [vmem:[%s1796_s30 + $0x3c] sm:$0xff] %v241_v5  ;;  %v1251_v18 = vld [vmem:[%s1791_s29 + $0x50] sm:$0xf]  ;;  %v1253_v19 = vld [vmem:[%s1791_s29 + $0x74] sm:$0xf] }
  0x17   : > { %244 = vst [vmem:[%s1796_s30 + $0x48] sm:$0xff] %v243_v6  ;;  %v1255_v20 = vld [vmem:[%s1791_s29 + $0x98] sm:$0xf]  ;;  %v1257_v21 = vld [vmem:[%s1791_s29 + $0xbc] sm:$0xf] }
  0x18   : > { %246 = vst [vmem:[%s1796_s30 + $0x54] sm:$0xff] %v245_v7  ;;  %v1259_v22 = vld [vmem:[%s1791_s29 + $0xe0] sm:$0xf]  ;;  %v1261_v23 = vld [vmem:[%s1791_s29 + $0x104] sm:$0xf] }
  0x19   : > { %248 = vst [vmem:[%s1796_s30 + $0x60] sm:$0xff] %v247_v8  ;;  %v1263_v24 = vld [vmem:[%s1791_s29 + $0x128] sm:$0xf]  ;;  %v1265_v25 = vld [vmem:[%s1791_s29 + $0x14c] sm:$0xf] }
  0x1a   : > { %250 = vst [vmem:[%s1796_s30 + $0x6c] sm:$0xff] %v249_v9  ;;  %v1267_v26 = vld [vmem:[%s1791_s29 + $0x170] sm:$0xf]  ;;  %v1269_v27 = vld [vmem:[%s1791_s29 + $0x194] sm:$0xf] }
  0x1b   : > { %252 = vst [vmem:[%s1796_s30 + $0x78] sm:$0xff] %v251_v10  ;;  %v1271_v28 = vld [vmem:[%s1791_s29 + $0x1b8] sm:$0xf]  ;;  %v1273_v29 = vld [vmem:[%s1791_s29 + $0x1dc] sm:$0xf] }
  0x1c   : > { %254 = vst [vmem:[%s1796_s30 + $0x84] sm:$0xff] %v253_v11  ;;  %v1275_v30 = vld [vmem:[%s1791_s29 + $0x200] sm:$0xf]  ;;  %v1277_v31 = vld [vmem:[%s1791_s29 + $0x224] sm:$0xf] }
  0x1d   : > { %256 = vst [vmem:[%s1796_s30 + $0x90] sm:$0xff] %v255_v12 }
  0x1e   : > { %258 = vst [vmem:[%s1796_s30 + $0x9c] sm:$0xff] %v257_v13 }
  0x1f   : > { %260 = vst [vmem:[%s1796_s30 + $0xa8] sm:$0xff] %v259_v14 }
  0x20   : > { %262 = vst [vmem:[%s1796_s30 + $0xb4] sm:$0xff] %v261_v15 }
  0x21   : > { %1248 = vst [vmem:[%s1796_s30 + $0x8] sm:$0xf] %v1247_v16 }
  0x22   : > { %1250 = vst [vmem:[%s1796_s30 + $0x14] sm:$0xf] %v1249_v17 }
  0x23   : > { %1252 = vst [vmem:[%s1796_s30 + $0x20] sm:$0xf] %v1251_v18 }
  0x24   : > { %1254 = vst [vmem:[%s1796_s30 + $0x2c] sm:$0xf] %v1253_v19 }
  0x25   : > { %1256 = vst [vmem:[%s1796_s30 + $0x38] sm:$0xf] %v1255_v20 }
  0x26   : > { %1258 = vst [vmem:[%s1796_s30 + $0x44] sm:$0xf] %v1257_v21 }
  0x27   : > { %1260 = vst [vmem:[%s1796_s30 + $0x50] sm:$0xf] %v1259_v22 }
  0x28   : > { %1262 = vst [vmem:[%s1796_s30 + $0x5c] sm:$0xf] %v1261_v23 }
  0x29   : > { %1264 = vst [vmem:[%s1796_s30 + $0x68] sm:$0xf] %v1263_v24 }
  0x2a   : > { %1266 = vst [vmem:[%s1796_s30 + $0x74] sm:$0xf] %v1265_v25 }
  0x2b   : > { %1268 = vst [vmem:[%s1796_s30 + $0x80] sm:$0xf] %v1267_v26 }
  0x2c   : > { %1270 = vst [vmem:[%s1796_s30 + $0x8c] sm:$0xf] %v1269_v27 }
  0x2d   : > { %1272 = vst [vmem:[%s1796_s30 + $0x98] sm:$0xf] %v1271_v28 }
  0x2e   : > { %1274 = vst [vmem:[%s1796_s30 + $0xa4] sm:$0xf] %v1273_v29 }
  0x2f   : > { %1276 = vst [vmem:[%s1796_s30 + $0xb0] sm:$0xf] %v1275_v30 }
  0x30   : > { %1278 = vst [vmem:[%s1796_s30 + $0xbc] sm:$0xf] %v1277_v31 }
  0x31 PF: > { %p1279_p6 = scmp.ge.s32.totalorder %s1720_s19, 1  ;;  %p319_p7 = scmp.lt.s32.totalorder %s1720_s19, 4 }
  0x33   : > { %p320_p8 = pnand %p1279_p6, %p319_p7 }
  0x34   : > { %s326_s5 = sand.u32 (!%p320_p8), 1, %s1704_s15   ;;  %s375_s6 = smul.u32 (!%p320_p8), 48, %s1712_s17 }
  0x35   : > { %323 = sbr.rel (%p320_p8) target bundleno = 365 (0x16d), region = 58  ;;  %p1281_p10 = scmp.ne.s32.totalorder (!%p320_p8), %s1712_s17, 0 }
  0x36   : > { %s1639_s7 = smul.u32 (!%p320_p8), 192, %s326_s5  ;;  %p376_p9 = scmp.lt.s32.totalorder (!%p320_p8), %s375_s6, 143 }
  0x38   : > { %s1868_s12 = scalar_lea.vmem (!%p320_p8), [#allocation3], %s1639_s7 }
  0x3a   : > { %s2092_s6 = smov (!%p376_p9, %s375_s6), 143  ;;  %408 = sbr.rel (%p1281_p10) target bundleno = 80 (0x50), region = 66 }
  0x3b   : > { %s1280_s8 = sshll.u32 %s2092_s6, 2 }
  0x3c   : > { %s1866_s11 = scalar_lea.vmem %s2081_s1, %s1280_s8 }
  0x3f   : > { %v1722_v32 = vmov 0.0  }
  0x40   : > { %409 = vst [vmem:[#allocation2 + $0x30] sm:$0xff] %v1722_v32 }
  0x41   : > { %410 = vst [vmem:[#allocation2] sm:$0xff] %v1722_v32 }
  0x42   : > { %411 = vst [vmem:[#allocation2 + $0x58] sm:$0xff] %v1722_v32 }
  0x43   : > { %412 = vst [vmem:[#allocation2 + $0x18] sm:$0xff] %v1722_v32 }
  0x44   : > { %413 = vst [vmem:[#allocation2 + $0x50] sm:$0xff] %v1722_v32 }
  0x45   : > { %414 = vst [vmem:[#allocation2 + $0x68] sm:$0xff] %v1722_v32 }
  0x46   : > { %415 = vst [vmem:[#allocation2 + $0x8] sm:$0xff] %v1722_v32 }
  0x47   : > { %416 = vst [vmem:[#allocation2 + $0x48] sm:$0xff] %v1722_v32 }
  0x48   : > { %417 = vst [vmem:[#allocation2 + $0x40] sm:$0xff] %v1722_v32 }
  0x49   : > { %418 = vst [vmem:[#allocation2 + $0x20] sm:$0xff] %v1722_v32 }
  0x4a   : > { %419 = vst [vmem:[#allocation2 + $0x10] sm:$0xff] %v1722_v32 }
  0x4b   : > { %420 = vst [vmem:[#allocation2 + $0x38] sm:$0xff] %v1722_v32 }
  0x4c   : > { %421 = vst [vmem:[#allocation2 + $0x60] sm:$0xff] %v1722_v32 }
  0x4d   : > { %422 = vst [vmem:[#allocation2 + $0x70] sm:$0xff] %v1722_v32 }
  0x4e   : > { %423 = vst [vmem:[#allocation2 + $0x78] sm:$0xff] %v1722_v32 }
  0x4f   : > { %424 = vst [vmem:[#allocation2 + $0x28] sm:$0xff] %v1722_v32 }
  0x50 PF: > { %v1511_v33 = vld [vmem:[%s1866_s11 + $0x38] sm:$0xff]  ;;  %v1510_v36 = vld [vmem:[%s1866_s11 + $0x30] sm:$0xff]  ;;  %v1509_v39 = vld [vmem:[%s1866_s11 + $0x28] sm:$0xff]  ;;  %p1474_p11 = scmp.ne.s32.totalorder %s1712_s17, 2 }
  0x51   : > { %v1873_v34 = vld [vmem:[%s1866_s11 + $0x78] sm:$0xff]  ;;  %793 = vmatpush.bf16.msra.mxu0 %v1511_v33  ;;  %1614 = vmatpush.bf16.msra.mxu3 %v1511_v33  ;;  %v1882_v37 = vld [vmem:[%s1866_s11 + $0x70] sm:$0xff]  ;;  %v1517_v40 = vld [vmem:[%s1866_s11 + $0x68] sm:$0xff] }
  0x52   : > { %v1876_v35 = vld [vmem:[%s1866_s11 + $0xb8] sm:$0xff]  ;;  %842 = vmatpush.bf16.msra.mxu1 %v1873_v34  ;;  %v1885_v38 = vld [vmem:[%s1866_s11 + $0xb0] sm:$0xff]  ;;  %v1892_v41 = vld [vmem:[%s1866_s11 + $0xa8] sm:$0xff] }
  0x53   : > { %891 = vmatpush.bf16.msra.mxu2 %v1876_v35  ;;  %v1508_v42 = vld [vmem:[%s1866_s11 + $0x20] sm:$0xff]  ;;  %v1507_v45 = vld [vmem:[%s1866_s11 + $0x18] sm:$0xff]  ;;  %v1506_v48 = vld [vmem:[%s1866_s11 + $0x10] sm:$0xff] }
  0x54   : > { %v1516_v43 = vld [vmem:[%s1866_s11 + $0x60] sm:$0xff]  ;;  %v1515_v46 = vld [vmem:[%s1866_s11 + $0x58] sm:$0xff]  ;;  %v1514_v49 = vld [vmem:[%s1866_s11 + $0x50] sm:$0xff] }
  0x55   : > { %794 = vmatpush.bf16.msra.mxu0 %v1510_v36  ;;  %1615 = vmatpush.bf16.msra.mxu3 %v1510_v36  ;;  %v1898_v44 = vld [vmem:[%s1866_s11 + $0xa0] sm:$0xff]  ;;  %v1904_v47 = vld [vmem:[%s1866_s11 + $0x98] sm:$0xff]  ;;  %v1910_v50 = vld [vmem:[%s1866_s11 + $0x90] sm:$0xff] }
  0x56   : > { %843 = vmatpush.bf16.msra.mxu1 %v1882_v37  ;;  %v1505_v51 = vld [vmem:[%s1866_s11 + $0x8] sm:$0xff]  ;;  %v1504_v54 = vld [vmem:[%s1866_s11] sm:$0xff]  ;;  %v1356_v59 = vld [vmem:[%s1868_s12 + $0x90] sm:$0xf] }
  0x57   : > { %892 = vmatpush.bf16.msra.mxu2 %v1885_v38  ;;  %v1513_v52 = vld [vmem:[%s1866_s11 + $0x48] sm:$0xff]  ;;  %v1512_v55 = vld [vmem:[%s1866_s11 + $0x40] sm:$0xff]  ;;  %v1499_v60 = vld [vmem:[%s1868_s12 + $0x98] sm:$0xf0] }
  0x58   : > { %v1916_v53 = vld [vmem:[%s1866_s11 + $0x88] sm:$0xff]  ;;  %v1921_v56 = vld [vmem:[%s1866_s11 + $0x80] sm:$0xff]  ;;  %v1286_v62 = vld [vmem:[%s1868_s12 + $0xc] sm:$0xf0]  ;;  %v1357_v2 = vor.u32 %v1499_v60, %v1356_v59 }
  0x59   : > { %795 = vmatpush.bf16.msra.mxu0 %v1509_v39  ;;  %1616 = vmatpush.bf16.msra.mxu3 %v1509_v39  ;;  %v1284_v57 = vld [vmem:[%s1868_s12] sm:$0xf]  ;;  %v1481_v58 = vld [vmem:[%s1868_s12 + $0x8] sm:$0xf0]  ;;  %v1480_v61 = vld [vmem:[%s1868_s12 + $0x4] sm:$0xf] }
  0x5a   : > { %844 = vmatpush.bf16.msra.mxu1 %v1517_v40  ;;  %v1292_v63 = vld [vmem:[%s1868_s12 + $0x8] sm:$0xf]  ;;  %v1482_v0 = vld [vmem:[%s1868_s12 + $0x10] sm:$0xf0]  ;;  %v1285_v1 = vor.u32 %v1481_v58, %v1284_v57  ;;  %v1289_v3 = vor.u32 %v1480_v61, %v1286_v62  ;;  %v1296_v5 = vld [vmem:[%s1868_s12 + $0x18] sm:$0xf] }
  0x5b   : > { %893 = vmatpush.bf16.msra.mxu2 %v1892_v41  ;;  %v1293_v4 = vor.u32 %v1482_v0, %v1292_v63  ;;  %v1484_v6 = vld [vmem:[%s1868_s12 + $0x20] sm:$0xf0]  ;;  %v1368_v7 = vld [vmem:[%s1868_s12 + $0xa8] sm:$0xf]  ;;  %v1502_v8 = vld [vmem:[%s1868_s12 + $0xb0] sm:$0xf0] }
  0x5c   : > { %v1483_v9 = vld [vmem:[%s1868_s12 + $0x1c] sm:$0xf]  ;;  %v1298_v10 = vld [vmem:[%s1868_s12 + $0x24] sm:$0xf0]  ;;  %v1304_v11 = vld [vmem:[%s1868_s12 + $0x20] sm:$0xf]  ;;  %v1297_v13 = vor.u32 %v1484_v6, %v1296_v5  ;;  %v1369_v14 = vor.u32 %v1502_v8, %v1368_v7 }
  0x5d   : > { %796 = vmatpush.bf16.msra.mxu0 %v1508_v42  ;;  %1617 = vmatpush.bf16.msra.mxu3 %v1508_v42  ;;  %v1485_v12 = vld [vmem:[%s1868_s12 + $0x28] sm:$0xf0]  ;;  %v1301_v15 = vor.u32 %v1483_v9, %v1298_v10  ;;  %v1308_v17 = vld [vmem:[%s1868_s12 + $0x30] sm:$0xf]  ;;  %v1487_v18 = vld [vmem:[%s1868_s12 + $0x38] sm:$0xf0] }
  0x5e   : > { %845 = vmatpush.bf16.msra.mxu1 %v1516_v43  ;;  %v1305_v16 = vor.u32 %v1485_v12, %v1304_v11  ;;  %v1486_v19 = vld [vmem:[%s1868_s12 + $0x34] sm:$0xf]  ;;  %v1358_v21 = vld [vmem:[%s1868_s12 + $0x9c] sm:$0xf0]  ;;  %v1316_v23 = vld [vmem:[%s1868_s12 + $0x38] sm:$0xf]  ;;  %v1309_v25 = vor.u32 %v1487_v18, %v1308_v17 }
  0x5f   : > { %894 = vmatpush.bf16.msra.mxu2 %v1898_v44  ;;  %v1498_v20 = vld [vmem:[%s1868_s12 + $0x94] sm:$0xf]  ;;  %v1310_v22 = vld [vmem:[%s1868_s12 + $0x3c] sm:$0xf0]  ;;  %v1488_v24 = vld [vmem:[%s1868_s12 + $0x40] sm:$0xf0] }
  0x60   : > { %v1361_v26 = vor.u32 %v1498_v20, %v1358_v21  ;;  %v1313_v27 = vor.u32 %v1486_v19, %v1310_v22  ;;  %v1317_v28 = vor.u32 %v1488_v24, %v1316_v23  ;;  %v1320_v29 = vld [vmem:[%s1868_s12 + $0x48] sm:$0xf]  ;;  %v1490_v30 = vld [vmem:[%s1868_s12 + $0x50] sm:$0xf0]  ;;  %v1489_v31 = vld [vmem:[%s1868_s12 + $0x4c] sm:$0xf] }
  0x61   : > { %797 = vmatpush.bf16.msra.mxu0 %v1507_v45  ;;  %1618 = vmatpush.bf16.msra.mxu3 %v1507_v45  ;;  %v1501_v32 = vld [vmem:[%s1868_s12 + $0xac] sm:$0xf]  ;;  %v1370_v33 = vld [vmem:[%s1868_s12 + $0xb4] sm:$0xf0]  ;;  %v1491_v36 = vld [vmem:[%s1868_s12 + $0x58] sm:$0xf0] }
  0x62   : > { %846 = vmatpush.bf16.msra.mxu1 %v1515_v46  ;;  %v1373_v39 = vor.u32 %v1501_v32, %v1370_v33  ;;  %v1493_v42 = vld [vmem:[%s1868_s12 + $0x68] sm:$0xf0]  ;;  %v1500_v45 = vld [vmem:[%s1868_s12 + $0xa0] sm:$0xf0]  ;;  %v1376_v57 = vld [vmem:[%s1868_s12 + $0xb0] sm:$0xf] }
  0x63   : > { %895 = vmatpush.bf16.msra.mxu2 %v1904_v47  ;;  %v1346_v58 = vld [vmem:[%s1868_s12 + $0x84] sm:$0xf0]  ;;  %v1352_v59 = vld [vmem:[%s1868_s12 + $0x80] sm:$0xf]  ;;  %v1497_v60 = vld [vmem:[%s1868_s12 + $0x88] sm:$0xf0] }
  0x64   : > { %v1353_v0 = vor.u32 %v1497_v60, %v1352_v59  ;;  %v425_v5 = vld [vmem:[#allocation2 + $0x30] sm:$0xff]  ;;  %v427_v21 = vld [vmem:[#allocation2 + $0x58] sm:$0xff] }
  0x65   : > { %798 = vmatpush.bf16.msra.mxu0 %v1506_v48  ;;  %1619 = vmatpush.bf16.msra.mxu3 %v1506_v48  ;;  %v1494_v48 = vld [vmem:[%s1868_s12 + $0x70] sm:$0xf0] }
  0x66   : > { %847 = vmatpush.bf16.msra.mxu1 %v1514_v49 }
  0x67   : > { %896 = vmatpush.bf16.msra.mxu2 %v1910_v50 }
  0x69   : > { %799 = vmatpush.bf16.msra.mxu0 %v1505_v51  ;;  %1620 = vmatpush.bf16.msra.mxu3 %v1505_v51 }
  0x6a   : > { %848 = vmatpush.bf16.msra.mxu1 %v1513_v52 }
  0x6b   : > { %897 = vmatpush.bf16.msra.mxu2 %v1916_v53 }
  0x6d   : > { %800 = vmatpush.bf16.msra.mxu0 %v1504_v54  ;;  %1621 = vmatpush.bf16.msra.mxu3 %v1504_v54  ;;  %v1496_v54 = vld [vmem:[%s1868_s12 + $0x80] sm:$0xf0] }
  0x6e   : > { %849 = vmatpush.bf16.msra.mxu1 %v1512_v55 }
  0x6f   : > { %898 = vmatpush.bf16.msra.mxu2 %v1921_v56 }
  0x70   : > { %801 = vmatmul.bf16.vlgmr.msra.gmra.mxu0 %v1285_v1  ;;  %831 = vmatmul.bf16.vlgmr.msra.gmra.mxu3 %v1357_v2 }
  0x71   : > { %1622 = vmatpush.bf16.msrb.mxu3 %v1873_v34  ;;  %850 = vmatmul.bf16.vlgmr.msra.gmra.mxu1 %v1289_v3  ;;  %v1322_v34 = vld [vmem:[%s1868_s12 + $0x54] sm:$0xf0] }
  0x72   : > { %899 = vmatmul.bf16.vlgmr.msra.gmra.mxu2 %v1293_v4 }
  0x75   : > { %1623 = vmatpush.bf16.msrb.mxu3 %v1882_v37  ;;  %v1321_v37 = vor.u32 %v1490_v30, %v1320_v29  ;;  %v428_v29 = vld [vmem:[#allocation2 + $0x18] sm:$0xff] }
  0x79   : > { %1624 = vmatpush.bf16.msrb.mxu3 %v1517_v40 }
  0x7d   : > { %1625 = vmatpush.bf16.msrb.mxu3 %v1516_v43  ;;  %v1492_v43 = vld [vmem:[%s1868_s12 + $0x64] sm:$0xf] }
  0x80   : > { %806 = vmatmul.bf16.gmra.mxu0 %v1297_v13  ;;  %836 = vmatmul.bf16.gmra.mxu3 %v1369_v14  ;;  %v426_v13 = vld [vmem:[#allocation2] sm:$0xff] }
  0x81   : > { %1626 = vmatpush.bf16.msrb.mxu3 %v1515_v46  ;;  %855 = vmatmul.bf16.gmra.mxu1 %v1301_v15  ;;  %v1334_v46 = vld [vmem:[%s1868_s12 + $0x6c] sm:$0xf0] }
  0x82   : > { %904 = vmatmul.bf16.gmra.mxu2 %v1305_v16  ;;  %v1337_v51 = vor.u32 %v1492_v43, %v1334_v46 }
  0x85   : > { %1627 = vmatpush.bf16.msrb.mxu3 %v1514_v49 }
  0x89   : > { %1628 = vmatpush.bf16.msrb.mxu3 %v1513_v52 }
  0x8d   : > { %1629 = vmatpush.bf16.msrb.mxu3 %v1512_v55  ;;  %v1495_v55 = vld [vmem:[%s1868_s12 + $0x7c] sm:$0xf] }
  0x8e   : > { %v1349_v63 = vor.u32 %v1495_v55, %v1346_v58 }
  0x90   : > { %811 = vmatmul.bf16.gmra.mxu0 %v1309_v25  ;;  %880 = vmatmul.bf16.vlgmr.msrb.gmra.mxu3 %v1361_v26 }
  0x91   : > { %1630 = vmatpush.bf16.msra.mxu3 %v1876_v35  ;;  %860 = vmatmul.bf16.gmra.mxu1 %v1313_v27  ;;  %v1328_v35 = vld [vmem:[%s1868_s12 + $0x50] sm:$0xf] }
  0x92   : > { %909 = vmatmul.bf16.gmra.mxu2 %v1317_v28  ;;  %v1329_v40 = vor.u32 %v1491_v36, %v1328_v35 }
  0x95   : > { %1631 = vmatpush.bf16.msra.mxu3 %v1885_v38  ;;  %v1325_v38 = vor.u32 %v1489_v31, %v1322_v34 }
  0x99   : > { %1632 = vmatpush.bf16.msra.mxu3 %v1892_v41  ;;  %v1332_v41 = vld [vmem:[%s1868_s12 + $0x60] sm:$0xf] }
  0x9a   : > { %v1333_v49 = vor.u32 %v1493_v42, %v1332_v41 }
  0x9d   : > { %1633 = vmatpush.bf16.msra.mxu3 %v1898_v44  ;;  %v1364_v44 = vld [vmem:[%s1868_s12 + $0x98] sm:$0xf] }
  0xa0   : > { %816 = vmatmul.bf16.gmra.mxu0 %v1321_v37  ;;  %885 = vmatmul.bf16.gmra.mxu3 %v1373_v39  ;;  %v429_v37 = vld [vmem:[#allocation2 + $0x50] sm:$0xff] }
  0xa1   : > { %1634 = vmatpush.bf16.msra.mxu3 %v1904_v47  ;;  %865 = vmatmul.bf16.gmra.mxu1 %v1325_v38  ;;  %v1340_v47 = vld [vmem:[%s1868_s12 + $0x68] sm:$0xf] }
  0xa2   : > { %914 = vmatmul.bf16.gmra.mxu2 %v1329_v40  ;;  %v1341_v52 = vor.u32 %v1494_v48, %v1340_v47 }
  0xa5   : > { %1635 = vmatpush.bf16.msra.mxu3 %v1910_v50  ;;  %v1365_v50 = vor.u32 %v1500_v45, %v1364_v44  ;;  %v430_v45 = vld [vmem:[#allocation2 + $0x68] sm:$0xff] }
  0xa9   : > { %1636 = vmatpush.bf16.msra.mxu3 %v1916_v53  ;;  %v1344_v53 = vld [vmem:[%s1868_s12 + $0x78] sm:$0xf] }
  0xaa   : > { %v1345_v61 = vor.u32 %v1496_v54, %v1344_v53  ;;  %v431_v53 = vld [vmem:[#allocation2 + $0x8] sm:$0xff] }
  0xad   : > { %1637 = vmatpush.bf16.msra.mxu3 %v1921_v56  ;;  %v1503_v56 = vld [vmem:[%s1868_s12 + $0xb8] sm:$0xf0] }
  0xae   : > { %v1377_v62 = vor.u32 %v1503_v56, %v1376_v57 }
  0xb0   : > { %821 = vmatmul.bf16.gmra.mxu0 %v1333_v49  ;;  %929 = vmatmul.bf16.vlgmr.msra.gmra.mxu3 %v1365_v50 }
  0xb1   : > { %870 = vmatmul.bf16.gmra.mxu1 %v1337_v51 }
  0xb2   : > { %919 = vmatmul.bf16.gmra.mxu2 %v1341_v52 }
  0xc0   : > { %826 = vmatmul.bf16.gmra.mxu0 %v1345_v61  ;;  %934 = vmatmul.bf16.gmra.mxu3 %v1377_v62  ;;  %v432_v61 = vld [vmem:[#allocation2 + $0x48] sm:$0xff] }
  0xc1   : > { %875 = vmatmul.bf16.gmra.mxu1 %v1349_v63 }
  0xc2   : > { %924 = vmatmul.bf16.gmra.mxu2 %v1353_v0 }
  0xed   : > { %v802_v1 = vpop.f32.mrf.mxu0 }
  0xee   : > { %v851_v2 = vpop.f32.mrf.mxu1 }
  0xef   : > { %v852_v3 = vadd.f32 %v851_v2, %v802_v1 }
  0xf3   : > { %v1983_v4 = vpop.f32.mrf.mxu3 }
  0xf5   : > { %v900_v6 = vpop.f32.mrf.mxu2  ;;  %v804_v8 = vpop.f32.mrf.mxu0 }
  0xf6   : > { %v901_v7 = vadd.f32 %v900_v6, %v852_v3  ;;  %v853_v9 = vpop.f32.mrf.mxu1  ;;  %v437_v6 = vld [vmem:[#allocation2 + $0x60] sm:$0xff] }
  0xf7   : > { %v854_v11 = vadd.f32 %v853_v9, %v804_v8  ;;  %v433_v8 = vld [vmem:[#allocation2 + $0x40] sm:$0xff] }
  0xf8   : > { %v940_v10 = vadd.f32 %v901_v7, %v425_v5 }
  0xfa   : > { %956 = vst [vmem:[#allocation2 + $0x30] sm:$0xff] %v940_v10 }
  0xfb   : > { %v1985_v12 = vpop.f32.mrf.mxu3 }
  0xfd   : > { %v902_v14 = vpop.f32.mrf.mxu2  ;;  %v807_v16 = vpop.f32.mrf.mxu0 }
  0xfe   : > { %v903_v15 = vadd.f32 %v902_v14, %v854_v11  ;;  %v856_v17 = vpop.f32.mrf.mxu1 }
  0xff   : > { %v857_v19 = vadd.f32 %v856_v17, %v807_v16 }
 0x100   : > { %v941_v18 = vadd.f32 %v903_v15, %v426_v13 }
 0x102   : > { %957 = vst [vmem:[#allocation2] sm:$0xff] %v941_v18 }
 0x103   : > { %v1987_v20 = vpop.f32.mrf.mxu3 }
 0x105   : > { %v905_v22 = vpop.f32.mrf.mxu2  ;;  %v809_v24 = vpop.f32.mrf.mxu0 }
 0x106   : > { %v906_v23 = vadd.f32 %v905_v22, %v857_v19  ;;  %v858_v25 = vpop.f32.mrf.mxu1  ;;  %v438_v19 = vld [vmem:[#allocation2 + $0x70] sm:$0xff]  ;;  %v434_v22 = vld [vmem:[#allocation2 + $0x20] sm:$0xff] }
 0x107   : > { %v859_v27 = vadd.f32 %v858_v25, %v809_v24 }
 0x108   : > { %v942_v26 = vadd.f32 %v906_v23, %v427_v21 }
 0x10a   : > { %958 = vst [vmem:[#allocation2 + $0x58] sm:$0xff] %v942_v26 }
 0x10b   : > { %v1989_v28 = vpop.f32.mrf.mxu3 }
 0x10d   : > { %v907_v30 = vpop.f32.mrf.mxu2  ;;  %v812_v32 = vpop.f32.mrf.mxu0 }
 0x10e   : > { %v908_v31 = vadd.f32 %v907_v30, %v859_v27  ;;  %v861_v33 = vpop.f32.mrf.mxu1 }
 0x10f   : > { %v862_v35 = vadd.f32 %v861_v33, %v812_v32  ;;  %v439_v32 = vld [vmem:[#allocation2 + $0x78] sm:$0xff] }
 0x110   : > { %v943_v34 = vadd.f32 %v908_v31, %v428_v29 }
 0x112   : > { %959 = vst [vmem:[#allocation2 + $0x18] sm:$0xff] %v943_v34  ;;  %v435_v34 = vld [vmem:[#allocation2 + $0x10] sm:$0xff] }
 0x113   : > { %v881_v36 = vpop.f32.mrf.mxu3 }
 0x114   : > { %v882_v5 = vadd.f32 %v881_v36, %v1983_v4 }
 0x115   : > { %v910_v39 = vpop.f32.mrf.mxu2  ;;  %v814_v40 = vpop.f32.mrf.mxu0 }
 0x116   : > { %v911_v38 = vadd.f32 %v910_v39, %v862_v35  ;;  %v863_v41 = vpop.f32.mrf.mxu1 }
 0x117   : > { %v864_v43 = vadd.f32 %v863_v41, %v814_v40 }
 0x118   : > { %v944_v42 = vadd.f32 %v911_v38, %v429_v37 }
 0x11a   : > { %960 = vst [vmem:[#allocation2 + $0x50] sm:$0xff] %v944_v42 }
 0x11b   : > { %v883_v44 = vpop.f32.mrf.mxu3 }
 0x11c   : > { %v884_v17 = vadd.f32 %v883_v44, %v1985_v12 }
 0x11d   : > { %v912_v46 = vpop.f32.mrf.mxu2  ;;  %v817_v48 = vpop.f32.mrf.mxu0 }
 0x11e   : > { %v913_v47 = vadd.f32 %v912_v46, %v864_v43  ;;  %v866_v49 = vpop.f32.mrf.mxu1  ;;  %v440_v43 = vld [vmem:[#allocation2 + $0x28] sm:$0xff] }
 0x11f   : > { %v867_v51 = vadd.f32 %v866_v49, %v817_v48 }
 0x120   : > { %v945_v50 = vadd.f32 %v913_v47, %v430_v45  ;;  %v436_v45 = vld [vmem:[#allocation2 + $0x38] sm:$0xff] }
 0x122   : > { %961 = vst [vmem:[#allocation2 + $0x68] sm:$0xff] %v945_v50 }
 0x123   : > { %v886_v52 = vpop.f32.mrf.mxu3 }
 0x124   : > { %v887_v31 = vadd.f32 %v886_v52, %v1987_v20 }
 0x125   : > { %v915_v54 = vpop.f32.mrf.mxu2  ;;  %v819_v57 = vpop.f32.mrf.mxu0 }
 0x126   : > { %v916_v55 = vadd.f32 %v915_v54, %v867_v51  ;;  %v868_v56 = vpop.f32.mrf.mxu1 }
 0x127   : > { %v869_v59 = vadd.f32 %v868_v56, %v819_v57 }
 0x128   : > { %v946_v58 = vadd.f32 %v916_v55, %v431_v53 }
 0x12a   : > { %962 = vst [vmem:[#allocation2 + $0x8] sm:$0xff] %v946_v58 }
 0x12b   : > { %v888_v60 = vpop.f32.mrf.mxu3 }
 0x12c   : > { %v889_v41 = vadd.f32 %v888_v60, %v1989_v28 }
 0x12d   : > { %v917_v62 = vpop.f32.mrf.mxu2  ;;  %v822_v0 = vpop.f32.mrf.mxu0 }
 0x12e   : > { %v918_v63 = vadd.f32 %v917_v62, %v869_v59  ;;  %v871_v1 = vpop.f32.mrf.mxu1 }
 0x12f   : > { %v872_v3 = vadd.f32 %v871_v1, %v822_v0 }
 0x130   : > { %v947_v2 = vadd.f32 %v918_v63, %v432_v61 }
 0x132   : > { %963 = vst [vmem:[#allocation2 + $0x48] sm:$0xff] %v947_v2 }
 0x133   : > { %v930_v7 = vpop.f32.mrf.mxu3 }
 0x134   : > { %v931_v10 = vadd.f32 %v930_v7, %v882_v5 }
 0x135   : > { %v920_v9 = vpop.f32.mrf.mxu2  ;;  %v824_v13 = vpop.f32.mrf.mxu0 }
 0x136   : > { %v921_v11 = vadd.f32 %v920_v9, %v872_v3  ;;  %v952_v14 = vadd.f32 %v931_v10, %v437_v6  ;;  %v873_v15 = vpop.f32.mrf.mxu1 }
 0x137   : > { %v874_v18 = vadd.f32 %v873_v15, %v824_v13 }
 0x138   : > { %v948_v16 = vadd.f32 %v921_v11, %v433_v8  ;;  %968 = vst [vmem:[#allocation2 + $0x60] sm:$0xff] %v952_v14 }
 0x13a   : > { %964 = vst [vmem:[#allocation2 + $0x40] sm:$0xff] %v948_v16 }
 0x13b   : > { %v932_v21 = vpop.f32.mrf.mxu3 }
 0x13c   : > { %v933_v4 = vadd.f32 %v932_v21, %v884_v17 }
 0x13d   : > { %v922_v23 = vpop.f32.mrf.mxu2  ;;  %v827_v26 = vpop.f32.mrf.mxu0 }
 0x13e   : > { %v923_v24 = vadd.f32 %v922_v23, %v874_v18  ;;  %v953_v25 = vadd.f32 %v933_v4, %v438_v19  ;;  %v876_v27 = vpop.f32.mrf.mxu1 }
 0x13f   : > { %v877_v30 = vadd.f32 %v876_v27, %v827_v26 }
 0x140   : > { %v949_v29 = vadd.f32 %v923_v24, %v434_v22  ;;  %969 = vst [vmem:[#allocation2 + $0x70] sm:$0xff] %v953_v25 }
 0x142   : > { %965 = vst [vmem:[#allocation2 + $0x20] sm:$0xff] %v949_v29 }
 0x143   : > { %v935_v33 = vpop.f32.mrf.mxu3 }
 0x144   : > { %v936_v35 = vadd.f32 %v935_v33, %v887_v31 }
 0x145   : > { %v925_v12 = vpop.f32.mrf.mxu2  ;;  %v829_v38 = vpop.f32.mrf.mxu0 }
 0x146   : > { %v926_v36 = vadd.f32 %v925_v12, %v877_v30  ;;  %v954_v37 = vadd.f32 %v936_v35, %v439_v32  ;;  %v878_v40 = vpop.f32.mrf.mxu1 }
 0x147   : > { %v879_v42 = vadd.f32 %v878_v40, %v829_v38 }
 0x148   : > { %v950_v39 = vadd.f32 %v926_v36, %v435_v34  ;;  %970 = vst [vmem:[#allocation2 + $0x78] sm:$0xff] %v954_v37 }
 0x14a   : > { %966 = vst [vmem:[#allocation2 + $0x10] sm:$0xff] %v950_v39 }
 0x14b   : > { %v937_v44 = vpop.f32.mrf.mxu3 }
 0x14c   : > { %v938_v20 = vadd.f32 %v937_v44, %v889_v41 }
 0x14d   : > { %v927_v46 = vpop.f32.mrf.mxu2 }
 0x14e   : > { %v928_v47 = vadd.f32 %v927_v46, %v879_v42  ;;  %v955_v48 = vadd.f32 %v938_v20, %v440_v43  ;;  %975 = sbr.rel (%p1474_p11) target bundleno = 365 (0x16d), region = 70 }
 0x150   : > { %v951_v49 = vadd.f32 %v928_v47, %v436_v45  ;;  %971 = vst [vmem:[#allocation2 + $0x28] sm:$0xff] %v955_v48 }
 0x152   : > { %967 = vst [vmem:[#allocation2 + $0x38] sm:$0xff] %v951_v49 }
 0x153   : > { %v976_v50 = vld [vmem:[#allocation2 + $0x30] sm:$0xff]  ;;  %v977_v51 = vld [vmem:[#allocation2] sm:$0xff]  ;;  %v978_v53 = vld [vmem:[#allocation2 + $0x58] sm:$0xff] }
 0x154   : > { %v1999_v28 = vld [vmem:[%s2082_s2] ss:$0 sm:$0xff]  ;;  %v979_v57 = vld [vmem:[#allocation2 + $0x18] sm:$0xff]  ;;  %v1600_v56 = vld [vmem:[%s2083_s3 + $0x8] sm:$0xff]  }
 0x155   : > { %v1529_v52 = vld [vmem:[%s2083_s3] sm:$0xff]   ;;  %v980_v58 = vld [vmem:[#allocation2 + $0x50] sm:$0xff]  ;;  %v996_v59 = vadd.f32 %v1999_v28, %v976_v50  ;;  %v997_v60 = vadd.f32 %v1999_v28, %v977_v51  ;;  %v998_v61 = vadd.f32 %v1999_v28, %v978_v53  ;;  %v999_v62 = vadd.f32 %v1999_v28, %v979_v57  ;;  %v981_v63 = vld [vmem:[#allocation2 + $0x68] sm:$0xff] }
 0x156   : > { %v1530_v54 = vunpack.c.l.bf16 %v1529_v52  ;;  %v1531_v55 = vunpack.c.h.bf16 %v1529_v52  ;;  %v1601_v0 = vld [vmem:[%s2083_s3 + $0x10] sm:$0xff]   ;;  %v982_v1 = vld [vmem:[#allocation2 + $0x8] sm:$0xff]  ;;  %v1534_v2 = vunpack.c.l.bf16 %v1600_v56  ;;  %v1535_v3 = vunpack.c.h.bf16 %v1600_v56  ;;  %v1602_v13 = vld [vmem:[%s2083_s3 + $0x18] sm:$0xff]  }
 0x157   : > { %v1000_v5 = vadd.f32 %v1999_v28, %v980_v58  ;;  %v1001_v6 = vadd.f32 %v1999_v28, %v981_v63  ;;  %v983_v7 = vld [vmem:[#allocation2 + $0x48] sm:$0xff]  ;;  %v1538_v10 = vunpack.c.l.bf16 %v1601_v0  ;;  %v1539_v11 = vunpack.c.h.bf16 %v1601_v0  ;;  %v984_v18 = vld [vmem:[#allocation2 + $0x40] sm:$0xff]  ;;  %v986_v30 = vld [vmem:[#allocation2 + $0x10] sm:$0xff] }
 0x158   : > { %v1044_v8 = vadd.f32 %v1530_v54, %v996_v59  ;;  %v1045_v9 = vadd.f32 %v1531_v55, %v997_v60  ;;  %v1046_v14 = vadd.f32 %v1534_v2, %v998_v61  ;;  %v1047_v15 = vadd.f32 %v1535_v3, %v999_v62  ;;  %v985_v4 = vld [vmem:[#allocation2 + $0x20] sm:$0xff]  ;;  %v1604_v35 = vld [vmem:[%s2083_s3 + $0x28] sm:$0xff]   ;;  %v989_v45 = vld [vmem:[#allocation2 + $0x70] sm:$0xff] }
 0x159   : > { %v1002_v16 = vadd.f32 %v1999_v28, %v982_v1  ;;  %v1003_v17 = vadd.f32 %v1999_v28, %v983_v7  ;;  %v1048_v22 = vadd.f32 %v1538_v10, %v1000_v5  ;;  %v1049_v23 = vadd.f32 %v1539_v11, %v1001_v6  ;;  %v1603_v29 = vld [vmem:[%s2083_s3 + $0x20] sm:$0xff]   ;;  %v987_v12 = vld [vmem:[#allocation2 + $0x38] sm:$0xff]  ;;  %v1605_v46 = vld [vmem:[%s2083_s3 + $0x30] sm:$0xff]  }
 0x15a   : > { %v1060_v19 = vmax.f32 %v1044_v8, 0.0  ;;  %v1061_v21 = vmax.f32 %v1045_v9, 0.0  ;;  %v1062_v24 = vmax.f32 %v1046_v14, 0.0  ;;  %v1063_v25 = vmax.f32 %v1047_v15, 0.0  ;;  %v988_v40 = vld [vmem:[#allocation2 + $0x60] sm:$0xff]  ;;  %v990_v54 = vld [vmem:[#allocation2 + $0x78] sm:$0xff] }
 0x15b   : > { %v1542_v26 = vunpack.c.l.bf16 %v1602_v13  ;;  %v1543_v27 = vunpack.c.h.bf16 %v1602_v13  ;;  %v1064_v32 = vmax.f32 %v1048_v22, 0.0  ;;  %v1065_v33 = vmax.f32 %v1049_v23, 0.0  ;;  %v991_v55 = vld [vmem:[#allocation2 + $0x28] sm:$0xff]  ;;  %v1606_v60 = vld [vmem:[%s2083_s3 + $0x38] sm:$0xff]  }
 0x15c   : > { %v1563_v31 = vpack.c.bf16 %v1061_v21, %v1060_v19  ;;  %v1004_v34 = vadd.f32 %v1999_v28, %v984_v18  ;;  %v1568_v36 = vpack.c.bf16 %v1063_v25, %v1062_v24  ;;  %v1005_v38 = vadd.f32 %v1999_v28, %v985_v4 }
 0x15d   : > { %v1050_v37 = vadd.f32 %v1542_v26, %v1002_v16  ;;  %v1051_v39 = vadd.f32 %v1543_v27, %v1003_v17  ;;  %v1573_v41 = vpack.c.bf16 %v1065_v33, %v1064_v32  ;;  %v1546_v42 = vunpack.c.l.bf16 %v1603_v29 }
 0x15e   : > { %1564 = vst [vmem:[%s2084_s4] sm:$0xff] %v1563_v31   ;;  %v1547_v43 = vunpack.c.h.bf16 %v1603_v29  ;;  %v1006_v44 = vadd.f32 %v1999_v28, %v986_v30  ;;  %v1007_v48 = vadd.f32 %v1999_v28, %v987_v12  ;;  %v1550_v49 = vunpack.c.l.bf16 %v1604_v35 }
 0x15f   : > { %1607 = vst [vmem:[%s2084_s4 + $0x8] sm:$0xff] %v1568_v36   ;;  %v1066_v20 = vmax.f32 %v1050_v37, 0.0  ;;  %v1067_v47 = vmax.f32 %v1051_v39, 0.0  ;;  %v1052_v50 = vadd.f32 %v1546_v42, %v1004_v34  ;;  %v1551_v52 = vunpack.c.h.bf16 %v1604_v35 }
 0x160   : > { %1608 = vst [vmem:[%s2084_s4 + $0x10] sm:$0xff] %v1573_v41   ;;  %v1053_v51 = vadd.f32 %v1547_v43, %v1005_v38  ;;  %v1008_v53 = vadd.f32 %v1999_v28, %v988_v40  ;;  %v1054_v56 = vadd.f32 %v1550_v49, %v1006_v44  ;;  %v1009_v58 = vadd.f32 %v1999_v28, %v989_v45 }
 0x161   : > { %v1578_v57 = vpack.c.bf16 %v1067_v47, %v1066_v20  ;;  %v1554_v59 = vunpack.c.l.bf16 %v1605_v46  ;;  %v1068_v61 = vmax.f32 %v1052_v50, 0.0  ;;  %v1055_v63 = vadd.f32 %v1551_v52, %v1007_v48 }
 0x162   : > { %v1069_v62 = vmax.f32 %v1053_v51, 0.0  ;;  %v1555_v0 = vunpack.c.h.bf16 %v1605_v46  ;;  %v1070_v1 = vmax.f32 %v1054_v56, 0.0  ;;  %v1010_v3 = vadd.f32 %v1999_v28, %v990_v54 }
 0x163   : > { %1609 = vst [vmem:[%s2084_s4 + $0x18] sm:$0xff] %v1578_v57   ;;  %v1056_v2 = vadd.f32 %v1554_v59, %v1008_v53  ;;  %v1011_v5 = vadd.f32 %v1999_v28, %v991_v55  ;;  %v1071_v7 = vmax.f32 %v1055_v63, 0.0  ;;  %v1558_v9 = vunpack.c.l.bf16 %v1606_v60 }
 0x164   : > { %v1583_v6 = vpack.c.bf16 %v1069_v62, %v1068_v61  ;;  %v1057_v8 = vadd.f32 %v1555_v0, %v1009_v58  ;;  %v1559_v11 = vunpack.c.h.bf16 %v1606_v60 }
 0x165   : > { %v1072_v10 = vmax.f32 %v1056_v2, 0.0  ;;  %v1588_v13 = vpack.c.bf16 %v1071_v7, %v1070_v1  ;;  %v1058_v15 = vadd.f32 %v1558_v9, %v1010_v3 }
 0x166   : > { %1610 = vst [vmem:[%s2084_s4 + $0x20] sm:$0xff] %v1583_v6   ;;  %v1073_v14 = vmax.f32 %v1057_v8, 0.0  ;;  %v1059_v16 = vadd.f32 %v1559_v11, %v1011_v5 }
 0x167   : > { %1611 = vst [vmem:[%s2084_s4 + $0x28] sm:$0xff] %v1588_v13   ;;  %v1074_v28 = vmax.f32 %v1058_v15, 0.0 }
 0x168   : > { %v1593_v17 = vpack.c.bf16 %v1073_v14, %v1072_v10  ;;  %v1075_v18 = vmax.f32 %v1059_v16, 0.0 }
 0x16a   : > { %1612 = vst [vmem:[%s2084_s4 + $0x30] sm:$0xff] %v1593_v17   ;;  %v1598_v19 = vpack.c.bf16 %v1075_v18, %v1074_v28 }
 0x16c   : > { %1613 = vst [vmem:[%s2084_s4 + $0x38] sm:$0xff] %v1598_v19  }
 0x16d PF: > { %s14_s19 = sadd.s32 1, %s1720_s19   ;;  %s2085_s15 = smov %s1708_s16 }
 0x16e   : > { %p11_p12 = scmp.ge.s32.totalorder %s14_s19, 5   ;;  %s2086_s16 = smov %s1783_s23 }
 0x16f   : > { %s2087_s17 = smov %s1716_s18  ;;  %s2088_s18 = smov %s2090_s20 }
 0x170   :  { %13 = sbr.rel (!%p11_p12) target bundleno = 3 (0x3), region = 120 }

// kernel: resnet_custom_forward.28
= control target key start
LH: loop header
LB: loop body
LE: loop exit
PB: predicated region body
PF: predicated region fallthrough
CT: control target
= control target key end

     0   :  { %s1045_s12 = smov 0   ;;  %s1047_s13 = smov 0   ;;  %s1161_s0 = inlined_call_operand.vmem [shape: bf16[32,1152], index: 0, kind: input, shape index: {}]   ;;  %s1162_s1 = inlined_call_operand.vmem [shape: bf16[1152,128], index: 1, kind: input, shape index: {}]   ;;  %s1163_s2 = inlined_call_operand.vmem [shape: f32[1,128], index: 2, kind: input, shape index: {}]   ;;  %s1164_s3 = inlined_call_operand.vmem [shape: bf16[32,128], index: 3, kind: output, shape index: {}]  }
   0x1   :  { %s1049_s14 = smov 0   ;;  %s1051_s15 = smov 0  }
   0x2   :  { %s1053_s16 = smov 0  }
   0x3 LB: > { %s25_s17 = sadd.s32 1, %s1018_s15  ;;  %p48_p1 = scmp.ne.s32.totalorder %s1010_s13, %s1006_s12  ;;  %s1022_s16 = sphi %s1053_s16, %s13_s16   ;;  %s1018_s15 = sphi %s1051_s15, %s1168_s15   ;;  %s1014_s14 = sphi %s1049_s14, %s1167_s14   ;;  %s1010_s13 = sphi %s1047_s13, %s1166_s13   ;;  %s1006_s12 = sphi %s1045_s12, %s1165_s12  }
   0x4   : > { %p26_p0 = scmp.ge.s32.totalorder %s25_s17, 3  ;;  %p49_p2 = scmp.eq.s32.totalorder %s1022_s16, 0 }
   0x5   : > { %s41_s19 = sadd.s32 1, %s1010_s13  ;;  %p752_p5 = scmp.ge.s32.totalorder %s1022_s16, 3 }
   0x6   : > { %s1170_s17 = smov (%p26_p0, %s25_s17), 0  ;;  %p50_p3 = por %p49_p2, %p48_p1 }
   0x7   : > { %s37_s18 = ssub.s32 %s1018_s15, %s1170_s17  ;;  %162 = sbr.rel (%p752_p5) target bundleno = 25 (0x19), region = 20 }
   0x8   : > { %p39_p4 = scmp.eq.s32.totalorder %s37_s18, 0 }
   0xa   : > { %s1080_s20 = scalar_select %p39_p4, %s1010_s13, %s41_s19  }
   0xc   : > { %165 = sbr.rel (!%p50_p3) target bundleno = 25 (0x19), region = 24  ;;  %s167_s21 = sand.u32 (%p50_p3), 1, %s1010_s13  }
   0xd   : > { %s890_s22 = smul.u32 (%p50_p3), 12, %s1018_s15 }
   0xe   : > { %s940_s23 = smul.u32 (%p50_p3), 48, %s167_s21 }
   0xf   : > { %s175_s26 = scalar_lea.vmem (%p50_p3), %s1161_s0, %s890_s22 }
  0x10   : > { %v190_v0 = vld [vmem:[%s175_s26] sm:$0xff] (%p50_p3)  ;;  %v194_v2 = vld [vmem:[%s175_s26 + $0x48] sm:$0xff] (%p50_p3)  ;;  %s169_s27 = scalar_lea.vmem (%p50_p3), [#allocation3], %s940_s23  ;;  %v758_v6 = vld [vmem:[%s175_s26 + $0x50] sm:$0xf] (%p50_p3) }
  0x11   : > { %v192_v1 = vld [vmem:[%s175_s26 + $0x24] sm:$0xff]  ;;  %191 = vst [vmem:[%s169_s27] sm:$0xff] %v190_v0  ;;  %v196_v3 = vld [vmem:[%s175_s26 + $0x6c] sm:$0xff]  ;;  %v760_v7 = vld [vmem:[%s175_s26 + $0x74] sm:$0xf] }
  0x12   : > { %193 = vst [vmem:[%s169_s27 + $0xc] sm:$0xff] %v192_v1  ;;  %v754_v4 = vld [vmem:[%s175_s26 + $0x8] sm:$0xf]  ;;  %v756_v5 = vld [vmem:[%s175_s26 + $0x2c] sm:$0xf] }
  0x13   : > { %195 = vst [vmem:[%s169_s27 + $0x18] sm:$0xff] %v194_v2 }
  0x14   : > { %197 = vst [vmem:[%s169_s27 + $0x24] sm:$0xff] %v196_v3 }
  0x15   : > { %755 = vst [vmem:[%s169_s27 + $0x8] sm:$0xf] %v754_v4 }
  0x16   : > { %757 = vst [vmem:[%s169_s27 + $0x14] sm:$0xf] %v756_v5 }
  0x17   : > { %759 = vst [vmem:[%s169_s27 + $0x20] sm:$0xf] %v758_v6 }
  0x18   : > { %761 = vst [vmem:[%s169_s27 + $0x2c] sm:$0xf] %v760_v7 }
  0x19 PF: > { %p762_p6 = scmp.ge.s32.totalorder %s1022_s16, 1  ;;  %p230_p7 = scmp.lt.s32.totalorder %s1022_s16, 4 }
  0x1b   : > { %p231_p8 = pnand %p762_p6, %p230_p7 }
  0x1c   : > { %s237_s28 = sand.u32 (!%p231_p8), 1, %s1006_s12   ;;  %s276_s29 = smul.u32 (!%p231_p8), 48, %s1014_s14 }
  0x1d   : > { %234 = sbr.rel (%p231_p8) target bundleno = 253 (0xfd), region = 54  ;;  %p764_p10 = scmp.ne.s32.totalorder (!%p231_p8), %s1014_s14, 0 }
  0x1e   : > { %s941_s30 = smul.u32 (!%p231_p8), 48, %s237_s28  ;;  %p277_p9 = scmp.lt.s32.totalorder (!%p231_p8), %s276_s29, 143 }
  0x20   : > { %s1097_s8 = scalar_lea.vmem (!%p231_p8), [#allocation3], %s941_s30 }
  0x22   : > { %s1172_s29 = smov (!%p277_p9, %s276_s29), 143  ;;  %300 = sbr.rel (%p764_p10) target bundleno = 44 (0x2c), region = 62 }
  0x23   : > { %s763_s4 = sshll.u32 %s1172_s29, 2 }
  0x24   : > { %s1095_s7 = scalar_lea.vmem %s1162_s1, %s763_s4 }
  0x27   : > { %v1024_v8 = vmov 0.0  }
  0x28   : > { %301 = vst [vmem:[#allocation2 + $0x10] sm:$0xff] %v1024_v8 }
  0x29   : > { %302 = vst [vmem:[#allocation2] sm:$0xff] %v1024_v8 }
  0x2a   : > { %303 = vst [vmem:[#allocation2 + $0x18] sm:$0xff] %v1024_v8 }
  0x2b   : > { %304 = vst [vmem:[#allocation2 + $0x8] sm:$0xff] %v1024_v8 }
  0x2c PF: > { %v904_v9 = vld [vmem:[%s1095_s7 + $0x38] sm:$0xff]  ;;  %v903_v12 = vld [vmem:[%s1095_s7 + $0x30] sm:$0xff]  ;;  %v902_v15 = vld [vmem:[%s1095_s7 + $0x28] sm:$0xff]  ;;  %p885_p11 = scmp.ne.s32.totalorder %s1014_s14, 2 }
  0x2d   : > { %v912_v10 = vld [vmem:[%s1095_s7 + $0x78] sm:$0xff]  ;;  %541 = vmatpush.bf16.msra.mxu0 %v904_v9  ;;  %v911_v13 = vld [vmem:[%s1095_s7 + $0x70] sm:$0xff]  ;;  %932 = vmatpush.bf16.msra.mxu3 %v904_v9  ;;  %v910_v16 = vld [vmem:[%s1095_s7 + $0x68] sm:$0xff] }
  0x2e   : > { %v920_v11 = vld [vmem:[%s1095_s7 + $0xb8] sm:$0xff]  ;;  %560 = vmatpush.bf16.msra.mxu1 %v912_v10  ;;  %v919_v14 = vld [vmem:[%s1095_s7 + $0xb0] sm:$0xff]  ;;  %v918_v17 = vld [vmem:[%s1095_s7 + $0xa8] sm:$0xff] }
  0x2f   : > { %579 = vmatpush.bf16.msra.mxu2 %v920_v11  ;;  %v901_v18 = vld [vmem:[%s1095_s7 + $0x20] sm:$0xff]  ;;  %v900_v21 = vld [vmem:[%s1095_s7 + $0x18] sm:$0xff]  ;;  %v899_v24 = vld [vmem:[%s1095_s7 + $0x10] sm:$0xff] }
  0x30   : > { %v909_v19 = vld [vmem:[%s1095_s7 + $0x60] sm:$0xff]  ;;  %v908_v22 = vld [vmem:[%s1095_s7 + $0x58] sm:$0xff]  ;;  %v907_v25 = vld [vmem:[%s1095_s7 + $0x50] sm:$0xff] }
  0x31   : > { %542 = vmatpush.bf16.msra.mxu0 %v903_v12  ;;  %933 = vmatpush.bf16.msra.mxu3 %v903_v12  ;;  %v917_v20 = vld [vmem:[%s1095_s7 + $0xa0] sm:$0xff]  ;;  %v916_v23 = vld [vmem:[%s1095_s7 + $0x98] sm:$0xff]  ;;  %v915_v26 = vld [vmem:[%s1095_s7 + $0x90] sm:$0xff] }
  0x32   : > { %561 = vmatpush.bf16.msra.mxu1 %v911_v13  ;;  %v898_v27 = vld [vmem:[%s1095_s7 + $0x8] sm:$0xff]  ;;  %v897_v30 = vld [vmem:[%s1095_s7] sm:$0xff]  ;;  %v305_v54 = vld [vmem:[#allocation2 + $0x10] sm:$0xff] }
  0x33   : > { %580 = vmatpush.bf16.msra.mxu2 %v919_v14  ;;  %v906_v28 = vld [vmem:[%s1095_s7 + $0x48] sm:$0xff]  ;;  %v905_v31 = vld [vmem:[%s1095_s7 + $0x40] sm:$0xff]  ;;  %v307_v4 = vld [vmem:[#allocation2 + $0x18] sm:$0xff] }
  0x34   : > { %v914_v29 = vld [vmem:[%s1095_s7 + $0x88] sm:$0xff]  ;;  %v913_v32 = vld [vmem:[%s1095_s7 + $0x80] sm:$0xff] }
  0x35   : > { %543 = vmatpush.bf16.msra.mxu0 %v902_v15  ;;  %934 = vmatpush.bf16.msra.mxu3 %v902_v15  ;;  %v767_v33 = vld [vmem:[%s1097_s8] sm:$0xf]  ;;  %v892_v34 = vld [vmem:[%s1097_s8 + $0x8] sm:$0xf0]  ;;  %v891_v35 = vld [vmem:[%s1097_s8 + $0x4] sm:$0xf] }
  0x36   : > { %562 = vmatpush.bf16.msra.mxu1 %v910_v16  ;;  %v769_v36 = vld [vmem:[%s1097_s8 + $0xc] sm:$0xf0]  ;;  %v775_v37 = vld [vmem:[%s1097_s8 + $0x8] sm:$0xf]  ;;  %v893_v38 = vld [vmem:[%s1097_s8 + $0x10] sm:$0xf0]  ;;  %v768_v41 = vor.u32 %v892_v34, %v767_v33 }
  0x37   : > { %581 = vmatpush.bf16.msra.mxu2 %v918_v17  ;;  %v779_v39 = vld [vmem:[%s1097_s8 + $0x18] sm:$0xf]  ;;  %v895_v40 = vld [vmem:[%s1097_s8 + $0x20] sm:$0xf0]  ;;  %v772_v42 = vor.u32 %v891_v35, %v769_v36  ;;  %v776_v43 = vor.u32 %v893_v38, %v775_v37  ;;  %v894_v45 = vld [vmem:[%s1097_s8 + $0x1c] sm:$0xf] }
  0x38   : > { %v780_v44 = vor.u32 %v895_v40, %v779_v39  ;;  %v781_v46 = vld [vmem:[%s1097_s8 + $0x24] sm:$0xf0]  ;;  %v787_v47 = vld [vmem:[%s1097_s8 + $0x20] sm:$0xf]  ;;  %v896_v48 = vld [vmem:[%s1097_s8 + $0x28] sm:$0xf0] }
  0x39   : > { %544 = vmatpush.bf16.msra.mxu0 %v901_v18  ;;  %935 = vmatpush.bf16.msra.mxu3 %v901_v18  ;;  %v784_v49 = vor.u32 %v894_v45, %v781_v46  ;;  %v788_v50 = vor.u32 %v896_v48, %v787_v47  ;;  %v306_v61 = vld [vmem:[#allocation2] sm:$0xff]  ;;  %v308_v11 = vld [vmem:[#allocation2 + $0x8] sm:$0xff] }
  0x3a   : > { %563 = vmatpush.bf16.msra.mxu1 %v909_v19 }
  0x3b   : > { %582 = vmatpush.bf16.msra.mxu2 %v917_v20 }
  0x3d   : > { %545 = vmatpush.bf16.msra.mxu0 %v900_v21  ;;  %936 = vmatpush.bf16.msra.mxu3 %v900_v21 }
  0x3e   : > { %564 = vmatpush.bf16.msra.mxu1 %v908_v22 }
  0x3f   : > { %583 = vmatpush.bf16.msra.mxu2 %v916_v23 }
  0x41   : > { %546 = vmatpush.bf16.msra.mxu0 %v899_v24  ;;  %937 = vmatpush.bf16.msra.mxu3 %v899_v24 }
  0x42   : > { %565 = vmatpush.bf16.msra.mxu1 %v907_v25 }
  0x43   : > { %584 = vmatpush.bf16.msra.mxu2 %v915_v26 }
  0x45   : > { %547 = vmatpush.bf16.msra.mxu0 %v898_v27  ;;  %938 = vmatpush.bf16.msra.mxu3 %v898_v27 }
  0x46   : > { %566 = vmatpush.bf16.msra.mxu1 %v906_v28 }
  0x47   : > { %585 = vmatpush.bf16.msra.mxu2 %v914_v29 }
  0x49   : > { %548 = vmatpush.bf16.msra.mxu0 %v897_v30  ;;  %939 = vmatpush.bf16.msra.mxu3 %v897_v30 }
  0x4a   : > { %567 = vmatpush.bf16.msra.mxu1 %v905_v31 }
  0x4b   : > { %586 = vmatpush.bf16.msra.mxu2 %v913_v32 }
  0x4c   : > { %549 = vmatmul.bf16.vlgmr.msra.gmra.mxu0 %v768_v41  ;;  %554 = vmatmul.bf16.vlgmr.msra.gmra.mxu3 %v780_v44 }
  0x4d   : > { %568 = vmatmul.bf16.vlgmr.msra.gmra.mxu1 %v772_v42 }
  0x4e   : > { %587 = vmatmul.bf16.vlgmr.msra.gmra.mxu2 %v776_v43 }
  0x5d   : > { %573 = vmatmul.bf16.gmra.mxu1 %v784_v49 }
  0x5e   : > { %592 = vmatmul.bf16.gmra.mxu2 %v788_v50 }
  0xc9   : > { %v550_v52 = vpop.f32.mrf.mxu0 }
  0xca   : > { %v569_v51 = vpop.f32.mrf.mxu1 }
  0xcb   : > { %v570_v53 = vadd.f32 %v569_v51, %v550_v52 }
  0xcf   : > { %v555_v2 = vpop.f32.mrf.mxu3 }
  0xd1   : > { %v588_v55 = vpop.f32.mrf.mxu2  ;;  %v552_v59 = vpop.f32.mrf.mxu0 }
  0xd2   : > { %v589_v56 = vadd.f32 %v588_v55, %v570_v53  ;;  %v571_v57 = vpop.f32.mrf.mxu1 }
  0xd3   : > { %v572_v60 = vadd.f32 %v571_v57, %v552_v59 }
  0xd4   : > { %v598_v58 = vadd.f32 %v589_v56, %v305_v54 }
  0xd6   : > { %602 = vst [vmem:[#allocation2 + $0x10] sm:$0xff] %v598_v58 }
  0xd7   : > { %v557_v9 = vpop.f32.mrf.mxu3 }
  0xd9   : > { %v590_v62 = vpop.f32.mrf.mxu2 }
  0xda   : > { %v591_v63 = vadd.f32 %v590_v62, %v572_v60  ;;  %v574_v0 = vpop.f32.mrf.mxu1 }
  0xdb   : > { %v575_v3 = vadd.f32 %v574_v0, %v555_v2 }
  0xdc   : > { %v599_v1 = vadd.f32 %v591_v63, %v306_v61 }
  0xde   : > { %603 = vst [vmem:[#allocation2] sm:$0xff] %v599_v1 }
  0xe1   : > { %v593_v5 = vpop.f32.mrf.mxu2 }
  0xe2   : > { %v594_v6 = vadd.f32 %v593_v5, %v575_v3  ;;  %v576_v8 = vpop.f32.mrf.mxu1 }
  0xe3   : > { %v577_v10 = vadd.f32 %v576_v8, %v557_v9 }
  0xe4   : > { %v600_v7 = vadd.f32 %v594_v6, %v307_v4 }
  0xe6   : > { %604 = vst [vmem:[#allocation2 + $0x18] sm:$0xff] %v600_v7 }
  0xe9   : > { %v595_v12 = vpop.f32.mrf.mxu2 }
  0xea   : > { %v596_v13 = vadd.f32 %v595_v12, %v577_v10  ;;  %609 = sbr.rel (%p885_p11) target bundleno = 253 (0xfd), region = 66 }
  0xec   : > { %v601_v14 = vadd.f32 %v596_v13, %v308_v11 }
  0xee   : > { %605 = vst [vmem:[#allocation2 + $0x8] sm:$0xff] %v601_v14 }
  0xef   : > { %v610_v15 = vld [vmem:[#allocation2 + $0x10] sm:$0xff]  ;;  %v611_v16 = vld [vmem:[#allocation2] sm:$0xff]  ;;  %v612_v18 = vld [vmem:[#allocation2 + $0x18] sm:$0xff] }
  0xf0   : > { %v983_v17 = vld [vmem:[%s1163_s2] ss:$0 sm:$0xff] }
  0xf1   : > { %v618_v20 = vadd.f32 %v983_v17, %v610_v15  ;;  %v619_v21 = vadd.f32 %v983_v17, %v611_v16  ;;  %v620_v22 = vadd.f32 %v983_v17, %v612_v18 }
  0xf3   : > { %v622_v24 = vmax.f32 %v618_v20, 0.0  ;;  %v623_v25 = vmax.f32 %v619_v21, 0.0  ;;  %v624_v26 = vmax.f32 %v620_v22, 0.0 }
  0xf5   : > { %v613_v19 = vld [vmem:[#allocation2 + $0x8] sm:$0xff]  ;;  %v924_v28 = vpack.c.bf16 %v623_v25, %v622_v24 }
  0xf6   : > { %v621_v23 = vadd.f32 %v983_v17, %v613_v19 }
  0xf7   : > { %925 = vst [vmem:[%s1164_s3] sm:$0xff] %v924_v28  }
  0xf8   : > { %v625_v27 = vmax.f32 %v621_v23, 0.0 }
  0xfa   : > { %v929_v29 = vpack.c.bf16 %v625_v27, %v624_v26 }
  0xfc   : > { %931 = vst [vmem:[%s1164_s3 + $0x8] sm:$0xff] %v929_v29  }
  0xfd PF: > { %s13_s16 = sadd.s32 1, %s1022_s16   ;;  %s1165_s12 = smov %s1010_s13 }
  0xfe   : > { %p10_p12 = scmp.ge.s32.totalorder %s13_s16, 5   ;;  %s1166_s13 = smov %s1080_s20 }
  0xff   : > { %s1167_s14 = smov %s1018_s15  ;;  %s1168_s15 = smov %s1170_s17 }
 0x100   :  { %12 = sbr.rel (!%p10_p12) target bundleno = 3 (0x3), region = 113 }

// kernel: resnet_custom_forward.27
= control target key start
LH: loop header
LB: loop body
LE: loop exit
PB: predicated region body
PF: predicated region fallthrough
CT: control target
= control target key end

     0   :  { %s289_s1 = inlined_call_operand.vmem [shape: bf16[128,128], index: 1, kind: input, shape index: {}]   ;;  %s290_s2 = inlined_call_operand.vmem [shape: f32[1,128], index: 2, kind: input, shape index: {}]   ;;  %s291_s0 = inlined_call_operand.vmem [shape: bf16[32,128], index: 0, kind: input, shape index: {}]   ;;  %s292_s3 = inlined_call_operand.vmem [shape: bf16[32,128], index: 3, kind: output, shape index: {}]  }
   0x1   :  { %v209_v0 = vld [vmem:[%s289_s1 + $0x38] sm:$0xff]  ;;  %v208_v1 = vld [vmem:[%s289_s1 + $0x30] sm:$0xff]  ;;  %v207_v2 = vld [vmem:[%s289_s1 + $0x28] sm:$0xff] }
   0x2   :  { %106 = vmatpush.bf16.msra.mxu0 %v209_v0  ;;  %221 = vmatpush.bf16.msra.mxu1 %v209_v0  ;;  %v206_v3 = vld [vmem:[%s289_s1 + $0x20] sm:$0xff]  ;;  %v205_v4 = vld [vmem:[%s289_s1 + $0x18] sm:$0xff]  ;;  %v204_v5 = vld [vmem:[%s289_s1 + $0x10] sm:$0xff] }
   0x3   :  { %v203_v6 = vld [vmem:[%s289_s1 + $0x8] sm:$0xff]  ;;  %v202_v7 = vld [vmem:[%s289_s1] sm:$0xff] }
   0x4   :  { %v200_v8 = vld [vmem:[%s291_s0] sm:$0xff]  ;;  %v201_v9 = vld [vmem:[%s291_s0 + $0x8] sm:$0xff] }
   0x5   :  { %v229_v12 = vld [vmem:[%s290_s2] ss:$0 sm:$0xff] }
   0x6   :  { %107 = vmatpush.bf16.msra.mxu0 %v208_v1  ;;  %222 = vmatpush.bf16.msra.mxu1 %v208_v1 }
   0xa   :  { %108 = vmatpush.bf16.msra.mxu0 %v207_v2  ;;  %223 = vmatpush.bf16.msra.mxu1 %v207_v2 }
   0xe   :  { %109 = vmatpush.bf16.msra.mxu0 %v206_v3  ;;  %224 = vmatpush.bf16.msra.mxu1 %v206_v3 }
  0x12   :  { %110 = vmatpush.bf16.msra.mxu0 %v205_v4  ;;  %225 = vmatpush.bf16.msra.mxu1 %v205_v4 }
  0x16   :  { %111 = vmatpush.bf16.msra.mxu0 %v204_v5  ;;  %226 = vmatpush.bf16.msra.mxu1 %v204_v5 }
  0x1a   :  { %112 = vmatpush.bf16.msra.mxu0 %v203_v6  ;;  %227 = vmatpush.bf16.msra.mxu1 %v203_v6 }
  0x1e   :  { %113 = vmatpush.bf16.msra.mxu0 %v202_v7  ;;  %228 = vmatpush.bf16.msra.mxu1 %v202_v7 }
  0x21   :  { %114 = vmatmul.bf16.vlgmr.msra.gmra.mxu0 %v200_v8  ;;  %119 = vmatmul.bf16.vlgmr.msra.gmra.mxu1 %v201_v9 }
  0x9e   :  { %v115_v10 = vpop.f32.mrf.mxu0  ;;  %v120_v11 = vpop.f32.mrf.mxu1 }
  0x9f   :  { %v144_v15 = vadd.f32 %v229_v12, %v115_v10  ;;  %v146_v16 = vadd.f32 %v229_v12, %v120_v11 }
  0xa6   :  { %v117_v13 = vpop.f32.mrf.mxu0  ;;  %v122_v14 = vpop.f32.mrf.mxu1 }
  0xa7   :  { %v145_v17 = vadd.f32 %v229_v12, %v117_v13  ;;  %v147_v18 = vadd.f32 %v229_v12, %v122_v14 }
  0xa9   :  { %v213_v19 = vpack.c.bf16 %v145_v17, %v144_v15  ;;  %v218_v20 = vpack.c.bf16 %v147_v18, %v146_v16 }
  0xab   :  { %214 = vst [vmem:[%s292_s3] sm:$0xff] %v213_v19  }
  0xac   :  { %220 = vst [vmem:[%s292_s3 + $0x8] sm:$0xff] %v218_v20  }

// kernel: resnet_custom_forward.29
= control target key start
LH: loop header
LB: loop body
LE: loop exit
PB: predicated region body
PF: predicated region fallthrough
CT: control target
= control target key end

     0   :  { %s1150_s15 = smov 0   ;;  %s1152_s16 = smov 0   ;;  %s1272_s0 = inlined_call_operand.vmem [shape: bf16[32,1152], index: 0, kind: input, shape index: {}]   ;;  %s1273_s1 = inlined_call_operand.vmem [shape: bf16[1152,128], index: 1, kind: input, shape index: {}]   ;;  %s1274_s2 = inlined_call_operand.vmem [shape: f32[1,128], index: 2, kind: input, shape index: {}]   ;;  %s1275_s3 = inlined_call_operand.vmem [shape: bf16[32,128], index: 3, kind: input, shape index: {}]   ;;  %s1276_s4 = inlined_call_operand.vmem [shape: bf16[32,128], index: 4, kind: output, shape index: {}]  }
   0x1   :  { %s1154_s17 = smov 0   ;;  %s1156_s18 = smov 0  }
   0x2   :  { %s1158_s19 = smov 0  }
   0x3 LB: > { %s26_s20 = sadd.s32 1, %s1118_s18  ;;  %p49_p1 = scmp.ne.s32.totalorder %s1110_s16, %s1106_s15  ;;  %s1122_s19 = sphi %s1158_s19, %s14_s19   ;;  %s1118_s18 = sphi %s1156_s18, %s1280_s18   ;;  %s1114_s17 = sphi %s1154_s17, %s1279_s17   ;;  %s1110_s16 = sphi %s1152_s16, %s1278_s16   ;;  %s1106_s15 = sphi %s1150_s15, %s1277_s15  }
   0x4   : > { %p27_p0 = scmp.ge.s32.totalorder %s26_s20, 3  ;;  %p50_p2 = scmp.eq.s32.totalorder %s1122_s19, 0 }
   0x5   : > { %s42_s22 = sadd.s32 1, %s1110_s16  ;;  %p843_p5 = scmp.ge.s32.totalorder %s1122_s19, 3 }
   0x6   : > { %s1282_s20 = smov (%p27_p0, %s26_s20), 0  ;;  %p51_p3 = por %p50_p2, %p49_p1 }
   0x7   : > { %s38_s21 = ssub.s32 %s1118_s18, %s1282_s20  ;;  %203 = sbr.rel (%p843_p5) target bundleno = 25 (0x19), region = 24 }
   0x8   : > { %p40_p4 = scmp.eq.s32.totalorder %s38_s21, 0 }
   0xa   : > { %s1185_s23 = scalar_select %p40_p4, %s1110_s16, %s42_s22  }
   0xc   : > { %206 = sbr.rel (!%p51_p3) target bundleno = 25 (0x19), region = 28  ;;  %s208_s24 = sand.u32 (%p51_p3), 1, %s1110_s16  }
   0xd   : > { %s981_s25 = smul.u32 (%p51_p3), 12, %s1118_s18 }
   0xe   : > { %s1040_s26 = smul.u32 (%p51_p3), 48, %s208_s24 }
   0xf   : > { %s216_s29 = scalar_lea.vmem (%p51_p3), %s1272_s0, %s981_s25 }
  0x10   : > { %v231_v0 = vld [vmem:[%s216_s29] sm:$0xff] (%p51_p3)  ;;  %v235_v2 = vld [vmem:[%s216_s29 + $0x48] sm:$0xff] (%p51_p3)  ;;  %s210_s30 = scalar_lea.vmem (%p51_p3), [#allocation3], %s1040_s26  ;;  %v849_v6 = vld [vmem:[%s216_s29 + $0x50] sm:$0xf] (%p51_p3) }
  0x11   : > { %v233_v1 = vld [vmem:[%s216_s29 + $0x24] sm:$0xff]  ;;  %232 = vst [vmem:[%s210_s30] sm:$0xff] %v231_v0  ;;  %v237_v3 = vld [vmem:[%s216_s29 + $0x6c] sm:$0xff]  ;;  %v851_v7 = vld [vmem:[%s216_s29 + $0x74] sm:$0xf] }
  0x12   : > { %234 = vst [vmem:[%s210_s30 + $0xc] sm:$0xff] %v233_v1  ;;  %v845_v4 = vld [vmem:[%s216_s29 + $0x8] sm:$0xf]  ;;  %v847_v5 = vld [vmem:[%s216_s29 + $0x2c] sm:$0xf] }
  0x13   : > { %236 = vst [vmem:[%s210_s30 + $0x18] sm:$0xff] %v235_v2 }
  0x14   : > { %238 = vst [vmem:[%s210_s30 + $0x24] sm:$0xff] %v237_v3 }
  0x15   : > { %846 = vst [vmem:[%s210_s30 + $0x8] sm:$0xf] %v845_v4 }
  0x16   : > { %848 = vst [vmem:[%s210_s30 + $0x14] sm:$0xf] %v847_v5 }
  0x17   : > { %850 = vst [vmem:[%s210_s30 + $0x20] sm:$0xf] %v849_v6 }
  0x18   : > { %852 = vst [vmem:[%s210_s30 + $0x2c] sm:$0xf] %v851_v7 }
  0x19 PF: > { %p853_p6 = scmp.ge.s32.totalorder %s1122_s19, 1  ;;  %p271_p7 = scmp.lt.s32.totalorder %s1122_s19, 4 }
  0x1b   : > { %p272_p8 = pnand %p853_p6, %p271_p7 }
  0x1c   : > { %s278_s5 = sand.u32 (!%p272_p8), 1, %s1106_s15   ;;  %s327_s6 = smul.u32 (!%p272_p8), 48, %s1114_s17 }
  0x1d   : > { %275 = sbr.rel (%p272_p8) target bundleno = 255 (0xff), region = 58  ;;  %p855_p10 = scmp.ne.s32.totalorder (!%p272_p8), %s1114_s17, 0 }
  0x1e   : > { %s1041_s7 = smul.u32 (!%p272_p8), 48, %s278_s5  ;;  %p328_p9 = scmp.lt.s32.totalorder (!%p272_p8), %s327_s6, 143 }
  0x20   : > { %s1202_s12 = scalar_lea.vmem (!%p272_p8), [#allocation3], %s1041_s7 }
  0x22   : > { %s1284_s6 = smov (!%p328_p9, %s327_s6), 143  ;;  %360 = sbr.rel (%p855_p10) target bundleno = 44 (0x2c), region = 66 }
  0x23   : > { %s854_s8 = sshll.u32 %s1284_s6, 2 }
  0x24   : > { %s1200_s11 = scalar_lea.vmem %s1273_s1, %s854_s8 }
  0x27   : > { %v1124_v8 = vmov 0.0  }
  0x28   : > { %361 = vst [vmem:[#allocation2 + $0x10] sm:$0xff] %v1124_v8 }
  0x29   : > { %362 = vst [vmem:[#allocation2] sm:$0xff] %v1124_v8 }
  0x2a   : > { %363 = vst [vmem:[#allocation2 + $0x18] sm:$0xff] %v1124_v8 }
  0x2b   : > { %364 = vst [vmem:[#allocation2 + $0x8] sm:$0xff] %v1124_v8 }
  0x2c PF: > { %v995_v9 = vld [vmem:[%s1200_s11 + $0x38] sm:$0xff]  ;;  %v994_v12 = vld [vmem:[%s1200_s11 + $0x30] sm:$0xff]  ;;  %v993_v15 = vld [vmem:[%s1200_s11 + $0x28] sm:$0xff]  ;;  %p976_p11 = scmp.ne.s32.totalorder %s1114_s17, 2 }
  0x2d   : > { %v1003_v10 = vld [vmem:[%s1200_s11 + $0x78] sm:$0xff]  ;;  %601 = vmatpush.bf16.msra.mxu0 %v995_v9  ;;  %v1002_v13 = vld [vmem:[%s1200_s11 + $0x70] sm:$0xff]  ;;  %1032 = vmatpush.bf16.msra.mxu3 %v995_v9  ;;  %v1001_v16 = vld [vmem:[%s1200_s11 + $0x68] sm:$0xff] }
  0x2e   : > { %v1011_v11 = vld [vmem:[%s1200_s11 + $0xb8] sm:$0xff]  ;;  %620 = vmatpush.bf16.msra.mxu1 %v1003_v10  ;;  %v1010_v14 = vld [vmem:[%s1200_s11 + $0xb0] sm:$0xff]  ;;  %v1009_v17 = vld [vmem:[%s1200_s11 + $0xa8] sm:$0xff] }
  0x2f   : > { %639 = vmatpush.bf16.msra.mxu2 %v1011_v11  ;;  %v992_v18 = vld [vmem:[%s1200_s11 + $0x20] sm:$0xff]  ;;  %v991_v21 = vld [vmem:[%s1200_s11 + $0x18] sm:$0xff]  ;;  %v990_v24 = vld [vmem:[%s1200_s11 + $0x10] sm:$0xff] }
  0x30   : > { %v1000_v19 = vld [vmem:[%s1200_s11 + $0x60] sm:$0xff]  ;;  %v999_v22 = vld [vmem:[%s1200_s11 + $0x58] sm:$0xff]  ;;  %v998_v25 = vld [vmem:[%s1200_s11 + $0x50] sm:$0xff] }
  0x31   : > { %602 = vmatpush.bf16.msra.mxu0 %v994_v12  ;;  %1033 = vmatpush.bf16.msra.mxu3 %v994_v12  ;;  %v1008_v20 = vld [vmem:[%s1200_s11 + $0xa0] sm:$0xff]  ;;  %v1007_v23 = vld [vmem:[%s1200_s11 + $0x98] sm:$0xff]  ;;  %v1006_v26 = vld [vmem:[%s1200_s11 + $0x90] sm:$0xff] }
  0x32   : > { %621 = vmatpush.bf16.msra.mxu1 %v1002_v13  ;;  %v989_v27 = vld [vmem:[%s1200_s11 + $0x8] sm:$0xff]  ;;  %v988_v30 = vld [vmem:[%s1200_s11] sm:$0xff]  ;;  %v365_v54 = vld [vmem:[#allocation2 + $0x10] sm:$0xff] }
  0x33   : > { %640 = vmatpush.bf16.msra.mxu2 %v1010_v14  ;;  %v997_v28 = vld [vmem:[%s1200_s11 + $0x48] sm:$0xff]  ;;  %v996_v31 = vld [vmem:[%s1200_s11 + $0x40] sm:$0xff]  ;;  %v367_v4 = vld [vmem:[#allocation2 + $0x18] sm:$0xff] }
  0x34   : > { %v1005_v29 = vld [vmem:[%s1200_s11 + $0x88] sm:$0xff]  ;;  %v1004_v32 = vld [vmem:[%s1200_s11 + $0x80] sm:$0xff] }
  0x35   : > { %603 = vmatpush.bf16.msra.mxu0 %v993_v15  ;;  %1034 = vmatpush.bf16.msra.mxu3 %v993_v15  ;;  %v858_v33 = vld [vmem:[%s1202_s12] sm:$0xf]  ;;  %v983_v34 = vld [vmem:[%s1202_s12 + $0x8] sm:$0xf0]  ;;  %v982_v35 = vld [vmem:[%s1202_s12 + $0x4] sm:$0xf] }
  0x36   : > { %622 = vmatpush.bf16.msra.mxu1 %v1001_v16  ;;  %v860_v36 = vld [vmem:[%s1202_s12 + $0xc] sm:$0xf0]  ;;  %v866_v37 = vld [vmem:[%s1202_s12 + $0x8] sm:$0xf]  ;;  %v984_v38 = vld [vmem:[%s1202_s12 + $0x10] sm:$0xf0]  ;;  %v859_v41 = vor.u32 %v983_v34, %v858_v33 }
  0x37   : > { %641 = vmatpush.bf16.msra.mxu2 %v1009_v17  ;;  %v870_v39 = vld [vmem:[%s1202_s12 + $0x18] sm:$0xf]  ;;  %v986_v40 = vld [vmem:[%s1202_s12 + $0x20] sm:$0xf0]  ;;  %v863_v42 = vor.u32 %v982_v35, %v860_v36  ;;  %v867_v43 = vor.u32 %v984_v38, %v866_v37  ;;  %v985_v45 = vld [vmem:[%s1202_s12 + $0x1c] sm:$0xf] }
  0x38   : > { %v871_v44 = vor.u32 %v986_v40, %v870_v39  ;;  %v872_v46 = vld [vmem:[%s1202_s12 + $0x24] sm:$0xf0]  ;;  %v878_v47 = vld [vmem:[%s1202_s12 + $0x20] sm:$0xf]  ;;  %v987_v48 = vld [vmem:[%s1202_s12 + $0x28] sm:$0xf0] }
  0x39   : > { %604 = vmatpush.bf16.msra.mxu0 %v992_v18  ;;  %1035 = vmatpush.bf16.msra.mxu3 %v992_v18  ;;  %v875_v49 = vor.u32 %v985_v45, %v872_v46  ;;  %v879_v50 = vor.u32 %v987_v48, %v878_v47  ;;  %v366_v61 = vld [vmem:[#allocation2] sm:$0xff]  ;;  %v368_v11 = vld [vmem:[#allocation2 + $0x8] sm:$0xff] }
  0x3a   : > { %623 = vmatpush.bf16.msra.mxu1 %v1000_v19 }
  0x3b   : > { %642 = vmatpush.bf16.msra.mxu2 %v1008_v20 }
  0x3d   : > { %605 = vmatpush.bf16.msra.mxu0 %v991_v21  ;;  %1036 = vmatpush.bf16.msra.mxu3 %v991_v21 }
  0x3e   : > { %624 = vmatpush.bf16.msra.mxu1 %v999_v22 }
  0x3f   : > { %643 = vmatpush.bf16.msra.mxu2 %v1007_v23 }
  0x41   : > { %606 = vmatpush.bf16.msra.mxu0 %v990_v24  ;;  %1037 = vmatpush.bf16.msra.mxu3 %v990_v24 }
  0x42   : > { %625 = vmatpush.bf16.msra.mxu1 %v998_v25 }
  0x43   : > { %644 = vmatpush.bf16.msra.mxu2 %v1006_v26 }
  0x45   : > { %607 = vmatpush.bf16.msra.mxu0 %v989_v27  ;;  %1038 = vmatpush.bf16.msra.mxu3 %v989_v27 }
  0x46   : > { %626 = vmatpush.bf16.msra.mxu1 %v997_v28 }
  0x47   : > { %645 = vmatpush.bf16.msra.mxu2 %v1005_v29 }
  0x49   : > { %608 = vmatpush.bf16.msra.mxu0 %v988_v30  ;;  %1039 = vmatpush.bf16.msra.mxu3 %v988_v30 }
  0x4a   : > { %627 = vmatpush.bf16.msra.mxu1 %v996_v31 }
  0x4b   : > { %646 = vmatpush.bf16.msra.mxu2 %v1004_v32 }
  0x4c   : > { %609 = vmatmul.bf16.vlgmr.msra.gmra.mxu0 %v859_v41  ;;  %614 = vmatmul.bf16.vlgmr.msra.gmra.mxu3 %v871_v44 }
  0x4d   : > { %628 = vmatmul.bf16.vlgmr.msra.gmra.mxu1 %v863_v42 }
  0x4e   : > { %647 = vmatmul.bf16.vlgmr.msra.gmra.mxu2 %v867_v43 }
  0x5d   : > { %633 = vmatmul.bf16.gmra.mxu1 %v875_v49 }
  0x5e   : > { %652 = vmatmul.bf16.gmra.mxu2 %v879_v50 }
  0xc9   : > { %v610_v52 = vpop.f32.mrf.mxu0 }
  0xca   : > { %v629_v51 = vpop.f32.mrf.mxu1 }
  0xcb   : > { %v630_v53 = vadd.f32 %v629_v51, %v610_v52 }
  0xcf   : > { %v615_v2 = vpop.f32.mrf.mxu3 }
  0xd1   : > { %v648_v55 = vpop.f32.mrf.mxu2  ;;  %v612_v59 = vpop.f32.mrf.mxu0 }
  0xd2   : > { %v649_v56 = vadd.f32 %v648_v55, %v630_v53  ;;  %v631_v57 = vpop.f32.mrf.mxu1 }
  0xd3   : > { %v632_v60 = vadd.f32 %v631_v57, %v612_v59 }
  0xd4   : > { %v658_v58 = vadd.f32 %v649_v56, %v365_v54 }
  0xd6   : > { %662 = vst [vmem:[#allocation2 + $0x10] sm:$0xff] %v658_v58 }
  0xd7   : > { %v617_v9 = vpop.f32.mrf.mxu3 }
  0xd9   : > { %v650_v62 = vpop.f32.mrf.mxu2 }
  0xda   : > { %v651_v63 = vadd.f32 %v650_v62, %v632_v60  ;;  %v634_v0 = vpop.f32.mrf.mxu1 }
  0xdb   : > { %v635_v3 = vadd.f32 %v634_v0, %v615_v2 }
  0xdc   : > { %v659_v1 = vadd.f32 %v651_v63, %v366_v61 }
  0xde   : > { %663 = vst [vmem:[#allocation2] sm:$0xff] %v659_v1 }
  0xe1   : > { %v653_v5 = vpop.f32.mrf.mxu2 }
  0xe2   : > { %v654_v6 = vadd.f32 %v653_v5, %v635_v3  ;;  %v636_v8 = vpop.f32.mrf.mxu1 }
  0xe3   : > { %v637_v10 = vadd.f32 %v636_v8, %v617_v9 }
  0xe4   : > { %v660_v7 = vadd.f32 %v654_v6, %v367_v4 }
  0xe6   : > { %664 = vst [vmem:[#allocation2 + $0x18] sm:$0xff] %v660_v7 }
  0xe9   : > { %v655_v12 = vpop.f32.mrf.mxu2 }
  0xea   : > { %v656_v13 = vadd.f32 %v655_v12, %v637_v10  ;;  %669 = sbr.rel (%p976_p11) target bundleno = 255 (0xff), region = 70 }
  0xec   : > { %v661_v14 = vadd.f32 %v656_v13, %v368_v11 }
  0xee   : > { %665 = vst [vmem:[#allocation2 + $0x8] sm:$0xff] %v661_v14 }
  0xef   : > { %v670_v15 = vld [vmem:[#allocation2 + $0x10] sm:$0xff]  ;;  %v671_v16 = vld [vmem:[#allocation2] sm:$0xff]  ;;  %v672_v19 = vld [vmem:[#allocation2 + $0x18] sm:$0xff] }
  0xf0   : > { %v1083_v17 = vld [vmem:[%s1274_s2] ss:$0 sm:$0xff]  ;;  %v1030_v23 = vld [vmem:[%s1275_s3 + $0x8] sm:$0xff]  }
  0xf1   : > { %v1013_v18 = vld [vmem:[%s1275_s3] sm:$0xff]   ;;  %v678_v24 = vadd.f32 %v1083_v17, %v670_v15  ;;  %v679_v25 = vadd.f32 %v1083_v17, %v671_v16  ;;  %v680_v26 = vadd.f32 %v1083_v17, %v672_v19  ;;  %v1018_v28 = vunpack.c.l.bf16 %v1030_v23 }
  0xf2   : > { %v1014_v20 = vunpack.c.l.bf16 %v1013_v18  ;;  %v1015_v21 = vunpack.c.h.bf16 %v1013_v18  ;;  %v1019_v29 = vunpack.c.h.bf16 %v1030_v23 }
  0xf3   : > { %v692_v32 = vadd.f32 %v1018_v28, %v680_v26 }
  0xf4   : > { %v690_v30 = vadd.f32 %v1014_v20, %v678_v24  ;;  %v691_v31 = vadd.f32 %v1015_v21, %v679_v25 }
  0xf5   : > { %v673_v22 = vld [vmem:[#allocation2 + $0x8] sm:$0xff]  ;;  %v696_v36 = vmax.f32 %v692_v32, 0.0 }
  0xf6   : > { %v681_v27 = vadd.f32 %v1083_v17, %v673_v22  ;;  %v694_v34 = vmax.f32 %v690_v30, 0.0  ;;  %v695_v35 = vmax.f32 %v691_v31, 0.0 }
  0xf8   : > { %v693_v33 = vadd.f32 %v1019_v29, %v681_v27  ;;  %v1023_v38 = vpack.c.bf16 %v695_v35, %v694_v34 }
  0xfa   : > { %v697_v37 = vmax.f32 %v693_v33, 0.0  ;;  %1024 = vst [vmem:[%s1276_s4] sm:$0xff] %v1023_v38  }
  0xfc   : > { %v1028_v39 = vpack.c.bf16 %v697_v37, %v696_v36 }
  0xfe   : > { %1031 = vst [vmem:[%s1276_s4 + $0x8] sm:$0xff] %v1028_v39  }
  0xff PF: > { %s14_s19 = sadd.s32 1, %s1122_s19   ;;  %s1277_s15 = smov %s1110_s16 }
 0x100   : > { %p11_p12 = scmp.ge.s32.totalorder %s14_s19, 5   ;;  %s1278_s16 = smov %s1185_s23 }
 0x101   : > { %s1279_s17 = smov %s1118_s18  ;;  %s1280_s18 = smov %s1282_s20 }
 0x102   :  { %13 = sbr.rel (!%p11_p12) target bundleno = 3 (0x3), region = 120 }

// kernel: resnet_custom_forward.33
= control target key start
LH: loop header
LB: loop body
LE: loop exit
PB: predicated region body
PF: predicated region fallthrough
CT: control target
= control target key end

     0   :  { %s1128_s12 = smov 0   ;;  %s1130_s13 = smov 0   ;;  %s1279_s0 = inlined_call_operand.vmem [shape: bf16[8,1152], index: 0, kind: input, shape index: {}]   ;;  %s1280_s1 = inlined_call_operand.vmem [shape: bf16[1152,256], index: 1, kind: input, shape index: {}]   ;;  %s1281_s2 = inlined_call_operand.vmem [shape: f32[1,256], index: 2, kind: input, shape index: {}]   ;;  %s1282_s3 = inlined_call_operand.vmem [shape: bf16[8,256], index: 3, kind: output, shape index: {}]  }
   0x1   :  { %s1132_s14 = smov 0  }
   0x2 LB: > { %s25_s15 = sadd.s32 1, %s1101_s13  ;;  %p807_p0 = scmp.ge.s32.totalorder %s1105_s14, 1  ;;  %s1105_s14 = sphi %s1132_s14, %s13_s14   ;;  %s1101_s13 = sphi %s1130_s13, %s1284_s13   ;;  %s1097_s12 = sphi %s1128_s12, %s1283_s12  }
   0x3   : > { %p26_p1 = scmp.ge.s32.totalorder %s25_s15, 3  ;;  %p194_p2 = scmp.lt.s32.totalorder %s1105_s14, 4 }
   0x5   : > { %s1286_s15 = smov (%p26_p1, %s25_s15), 0  ;;  %p195_p3 = pnand %p807_p0, %p194_p2 }
   0x6   : > { %s240_s16 = smul.u32 (!%p195_p3), 3, %s1097_s12  ;;  %p811_p6 = scmp.ne.s32.totalorder (!%p195_p3), %s1097_s12, 0 }
   0x7   : > { %198 = sbr.rel (%p195_p3) target bundleno = 236 (0xec), region = 32 }
   0x8   : > { %s250_s17 = smul.u32 (!%p195_p3), 48, %s1097_s12  ;;  %p243_p4 = scmp.lt.s32.totalorder (!%p195_p3), %s240_s16, 8 }
   0xa   : > { %p252_p5 = scmp.lt.s32.totalorder (!%p195_p3), %s250_s17, 143 }
   0xc   : > { %s1288_s16 = smov (!%p243_p4, %s240_s16), 8  ;;  %s1290_s17 = smov (!%p252_p5, %s250_s17), 143 }
   0xd   : > { %s808_s18 = sshll.u32 %s1288_s16, 2  ;;  %s1009_s22 = sshll.u32 %s1290_s17, 3 }
   0xe   : > { %s1153_s21 = scalar_lea.vmem %s1279_s0, %s808_s18  ;;  %s1158_s25 = scalar_lea.vmem %s1280_s1, %s1009_s22 }
   0xf   : > { %280 = sbr.rel (%p811_p6) target bundleno = 23 (0x17), region = 36 }
  0x14   : > { %v1107_v0 = vmov 0.0  }
  0x15   : > { %281 = vst [vmem:[#allocation2] sm:$0xff] %v1107_v0 }
  0x16   : > { %282 = vst [vmem:[#allocation2 + $0x8] sm:$0xff] %v1107_v0 }
  0x17 PF: > { %v870_v1 = vld [vmem:[%s1158_s25 + $0x70] sm:$0xf]  ;;  %v1025_v2 = vld [vmem:[%s1158_s25 + $0x74] sm:$0xf0]  ;;  %v862_v6 = vld [vmem:[%s1158_s25 + $0x60] sm:$0xf] }
  0x18   : > { %v934_v3 = vld [vmem:[%s1158_s25 + $0xf0] sm:$0xf]  ;;  %v871_v4 = vor.u32 %v1025_v2, %v870_v1  ;;  %v1041_v5 = vld [vmem:[%s1158_s25 + $0xf4] sm:$0xf0]  ;;  %v1023_v7 = vld [vmem:[%s1158_s25 + $0x64] sm:$0xf0] }
  0x19   : > { %v935_v8 = vor.u32 %v1041_v5, %v934_v3  ;;  %v926_v9 = vld [vmem:[%s1158_s25 + $0xe0] sm:$0xf]  ;;  %v1039_v10 = vld [vmem:[%s1158_s25 + $0xe4] sm:$0xf0]  ;;  %v863_v11 = vor.u32 %v1023_v7, %v862_v6  ;;  %v854_v12 = vld [vmem:[%s1158_s25 + $0x50] sm:$0xf] }
  0x1a   : > { %586 = vmatpush.bf16.msra.mxu0 %v871_v4  ;;  %v927_v13 = vor.u32 %v1039_v10, %v926_v9  ;;  %v1021_v14 = vld [vmem:[%s1158_s25 + $0x54] sm:$0xf0]  ;;  %v998_v15 = vld [vmem:[%s1158_s25 + $0x170] sm:$0xf]  ;;  %v990_v20 = vld [vmem:[%s1158_s25 + $0x160] sm:$0xf] }
  0x1b   : > { %599 = vmatpush.bf16.msra.mxu1 %v935_v8  ;;  %v1057_v16 = vld [vmem:[%s1158_s25 + $0x174] sm:$0xf0]  ;;  %v918_v17 = vld [vmem:[%s1158_s25 + $0xd0] sm:$0xf]  ;;  %v1055_v21 = vld [vmem:[%s1158_s25 + $0x164] sm:$0xf0]  ;;  %v855_v23 = vor.u32 %v1021_v14, %v854_v12 }
  0x1c   : > { %v1037_v18 = vld [vmem:[%s1158_s25 + $0xd4] sm:$0xf0]  ;;  %v999_v19 = vor.u32 %v1057_v16, %v998_v15  ;;  %v1024_v22 = vld [vmem:[%s1158_s25 + $0x74] sm:$0xf]  ;;  %v846_v24 = vld [vmem:[%s1158_s25 + $0x40] sm:$0xf]  ;;  %v991_v26 = vor.u32 %v1055_v21, %v990_v20 }
  0x1d   : > { %v1019_v25 = vld [vmem:[%s1158_s25 + $0x44] sm:$0xf0]  ;;  %v872_v27 = vld [vmem:[%s1158_s25 + $0x78] sm:$0xf0]  ;;  %v919_v28 = vor.u32 %v1037_v18, %v918_v17  ;;  %v910_v29 = vld [vmem:[%s1158_s25 + $0xc0] sm:$0xf] }
  0x1e   : > { %587 = vmatpush.bf16.msra.mxu0 %v863_v11  ;;  %612 = vmatpush.bf16.msra.mxu2 %v999_v19  ;;  %v1035_v30 = vld [vmem:[%s1158_s25 + $0xc4] sm:$0xf0]  ;;  %v875_v31 = vor.u32 %v1024_v22, %v872_v27  ;;  %v982_v32 = vld [vmem:[%s1158_s25 + $0x150] sm:$0xf]  ;;  %v1053_v33 = vld [vmem:[%s1158_s25 + $0x154] sm:$0xf0]  ;;  %v847_v37 = vor.u32 %v1019_v25, %v846_v24 }
  0x1f   : > { %600 = vmatpush.bf16.msra.mxu1 %v927_v13  ;;  %v1022_v34 = vld [vmem:[%s1158_s25 + $0x64] sm:$0xf]  ;;  %v864_v35 = vld [vmem:[%s1158_s25 + $0x68] sm:$0xf0]  ;;  %v838_v38 = vld [vmem:[%s1158_s25 + $0x30] sm:$0xf]  ;;  %v983_v40 = vor.u32 %v1053_v33, %v982_v32  ;;  %v911_v42 = vor.u32 %v1035_v30, %v910_v29 }
  0x20   : > { %625 = vmatpush.bf16.msra.mxu3 %v875_v31  ;;  %v867_v36 = vor.u32 %v1022_v34, %v864_v35  ;;  %v1017_v39 = vld [vmem:[%s1158_s25 + $0x34] sm:$0xf0]  ;;  %v974_v41 = vld [vmem:[%s1158_s25 + $0x140] sm:$0xf]  ;;  %v1051_v43 = vld [vmem:[%s1158_s25 + $0x144] sm:$0xf0] }
  0x21   : > { %v1020_v44 = vld [vmem:[%s1158_s25 + $0x54] sm:$0xf]  ;;  %v856_v45 = vld [vmem:[%s1158_s25 + $0x58] sm:$0xf0]  ;;  %v902_v46 = vld [vmem:[%s1158_s25 + $0xb0] sm:$0xf]  ;;  %v839_v49 = vor.u32 %v1017_v39, %v838_v38  ;;  %v975_v51 = vor.u32 %v1051_v43, %v974_v41 }
  0x22   : > { %588 = vmatpush.bf16.msra.mxu0 %v855_v23  ;;  %613 = vmatpush.bf16.msra.mxu2 %v991_v26  ;;  %v1033_v47 = vld [vmem:[%s1158_s25 + $0xb4] sm:$0xf0]  ;;  %v859_v48 = vor.u32 %v1020_v44, %v856_v45  ;;  %v830_v50 = vld [vmem:[%s1158_s25 + $0x20] sm:$0xf]  ;;  %v1018_v52 = vld [vmem:[%s1158_s25 + $0x44] sm:$0xf] }
  0x23   : > { %601 = vmatpush.bf16.msra.mxu1 %v919_v28  ;;  %v848_v53 = vld [vmem:[%s1158_s25 + $0x48] sm:$0xf0]  ;;  %v903_v54 = vor.u32 %v1033_v47, %v902_v46  ;;  %v1015_v55 = vld [vmem:[%s1158_s25 + $0x24] sm:$0xf0]  ;;  %v966_v56 = vld [vmem:[%s1158_s25 + $0x130] sm:$0xf] }
  0x24   : > { %626 = vmatpush.bf16.msra.mxu3 %v867_v36  ;;  %v1049_v57 = vld [vmem:[%s1158_s25 + $0x134] sm:$0xf0]  ;;  %v894_v58 = vld [vmem:[%s1158_s25 + $0xa0] sm:$0xf]  ;;  %v1031_v59 = vld [vmem:[%s1158_s25 + $0xa4] sm:$0xf0]  ;;  %v851_v60 = vor.u32 %v1018_v52, %v848_v53  ;;  %v831_v61 = vor.u32 %v1015_v55, %v830_v50 }
  0x25   : > { %v822_v62 = vld [vmem:[%s1158_s25 + $0x10] sm:$0xf]  ;;  %v967_v63 = vor.u32 %v1049_v57, %v966_v56  ;;  %v1016_v0 = vld [vmem:[%s1158_s25 + $0x34] sm:$0xf]  ;;  %v840_v1 = vld [vmem:[%s1158_s25 + $0x38] sm:$0xf0]  ;;  %v895_v2 = vor.u32 %v1031_v59, %v894_v58 }
  0x26   : > { %589 = vmatpush.bf16.msra.mxu0 %v847_v37  ;;  %614 = vmatpush.bf16.msra.mxu2 %v983_v40  ;;  %v1013_v3 = vld [vmem:[%s1158_s25 + $0x14] sm:$0xf0]  ;;  %v958_v4 = vld [vmem:[%s1158_s25 + $0x120] sm:$0xf]  ;;  %v1047_v5 = vld [vmem:[%s1158_s25 + $0x124] sm:$0xf0]  ;;  %v843_v10 = vor.u32 %v1016_v0, %v840_v1 }
  0x27   : > { %602 = vmatpush.bf16.msra.mxu1 %v911_v42  ;;  %v886_v6 = vld [vmem:[%s1158_s25 + $0x90] sm:$0xf]  ;;  %v1029_v7 = vld [vmem:[%s1158_s25 + $0x94] sm:$0xf0]  ;;  %v814_v8 = vld [vmem:[%s1158_s25] sm:$0xf]  ;;  %v823_v11 = vor.u32 %v1013_v3, %v822_v62  ;;  %v959_v12 = vor.u32 %v1047_v5, %v958_v4 }
  0x28   : > { %627 = vmatpush.bf16.msra.mxu3 %v859_v48  ;;  %v1011_v9 = vld [vmem:[%s1158_s25 + $0x4] sm:$0xf0]  ;;  %v1014_v13 = vld [vmem:[%s1158_s25 + $0x24] sm:$0xf]  ;;  %v832_v14 = vld [vmem:[%s1158_s25 + $0x28] sm:$0xf0]  ;;  %v887_v16 = vor.u32 %v1029_v7, %v886_v6 }
  0x29   : > { %v285_v15 = vld [vmem:[%s1153_s21] sm:$0xff]  ;;  %v950_v18 = vld [vmem:[%s1158_s25 + $0x110] sm:$0xf]  ;;  %v1045_v19 = vld [vmem:[%s1158_s25 + $0x114] sm:$0xf0]  ;;  %v835_v25 = vor.u32 %v1014_v13, %v832_v14  ;;  %v815_v27 = vor.u32 %v1011_v9, %v814_v8  ;;  %p1004_p7 = scmp.ne.s32.totalorder %s1097_s12, 2 }
  0x2a   : > { %590 = vmatpush.bf16.msra.mxu0 %v839_v49  ;;  %615 = vmatpush.bf16.msra.mxu2 %v975_v51  ;;  %v878_v17 = vld [vmem:[%s1158_s25 + $0x80] sm:$0xf]  ;;  %v1027_v20 = vld [vmem:[%s1158_s25 + $0x84] sm:$0xf0]  ;;  %v1040_v21 = vld [vmem:[%s1158_s25 + $0xf4] sm:$0xf]  ;;  %v337_v26 = vunpack.c.l.b16 %v285_v15  ;;  %v951_v28 = vor.u32 %v1045_v19, %v950_v18  ;;  %v338_v29 = vunpack.c.h.b16 %v285_v15 }
  0x2b   : > { %603 = vmatpush.bf16.msra.mxu1 %v903_v54  ;;  %v936_v22 = vld [vmem:[%s1158_s25 + $0xf8] sm:$0xf0]  ;;  %v1056_v23 = vld [vmem:[%s1158_s25 + $0x174] sm:$0xf]  ;;  %v286_v32 = vld [vmem:[%s1153_s21 + $0x8] sm:$0xf]  ;;  %v879_v33 = vor.u32 %v1027_v20, %v878_v17 }
  0x2c   : > { %628 = vmatpush.bf16.msra.mxu3 %v851_v60  ;;  %v1000_v24 = vld [vmem:[%s1158_s25 + $0x178] sm:$0xf0]  ;;  %v1012_v30 = vld [vmem:[%s1158_s25 + $0x14] sm:$0xf]  ;;  %v939_v34 = vor.u32 %v1040_v21, %v936_v22  ;;  %v942_v35 = vld [vmem:[%s1158_s25 + $0x100] sm:$0xf]  ;;  %v340_v42 = vpack.c.b16 %v337_v26, %v337_v26  ;;  %v339_v44 = vunpack.c.l.b16 %v286_v32  ;;  %v1233_v45 = vpack.c.b16 %v338_v29, %v338_v29 }
  0x2d   : > { %v824_v31 = vld [vmem:[%s1158_s25 + $0x18] sm:$0xf0]  ;;  %v1043_v36 = vld [vmem:[%s1158_s25 + $0x104] sm:$0xf0]  ;;  %v1003_v37 = vor.u32 %v1056_v23, %v1000_v24  ;;  %v1038_v38 = vld [vmem:[%s1158_s25 + $0xe4] sm:$0xf] }
  0x2e   : > { %591 = vmatpush.bf16.msra.mxu0 %v831_v61  ;;  %616 = vmatpush.bf16.msra.mxu2 %v967_v63  ;;  %v928_v39 = vld [vmem:[%s1158_s25 + $0xe8] sm:$0xf0]  ;;  %v1054_v40 = vld [vmem:[%s1158_s25 + $0x164] sm:$0xf]  ;;  %v827_v43 = vor.u32 %v1012_v30, %v824_v31  ;;  %v943_v46 = vor.u32 %v1043_v36, %v942_v35  ;;  %v1036_v51 = vld [vmem:[%s1158_s25 + $0xd4] sm:$0xf]  ;;  %v342_v55 = vpack.c.b16 %v339_v44, %v339_v44 }
  0x2f   : > { %604 = vmatpush.bf16.msra.mxu1 %v895_v2  ;;  %v992_v41 = vld [vmem:[%s1158_s25 + $0x168] sm:$0xf0]  ;;  %v1010_v47 = vld [vmem:[%s1158_s25 + $0x4] sm:$0xf]  ;;  %v931_v49 = vor.u32 %v1038_v38, %v928_v39  ;;  %v920_v52 = vld [vmem:[%s1158_s25 + $0xd8] sm:$0xf0] }
  0x30   : > { %629 = vmatpush.bf16.msra.mxu3 %v843_v10  ;;  %v816_v48 = vld [vmem:[%s1158_s25 + $0x8] sm:$0xf0]  ;;  %v995_v50 = vor.u32 %v1054_v40, %v992_v41  ;;  %v1052_v53 = vld [vmem:[%s1158_s25 + $0x154] sm:$0xf]  ;;  %v984_v54 = vld [vmem:[%s1158_s25 + $0x158] sm:$0xf0]  ;;  %v923_v57 = vor.u32 %v1036_v51, %v920_v52 }
  0x31   : > { %v819_v56 = vor.u32 %v1010_v47, %v816_v48  ;;  %v987_v58 = vor.u32 %v1052_v53, %v984_v54  ;;  %v1034_v59 = vld [vmem:[%s1158_s25 + $0xc4] sm:$0xf]  ;;  %v912_v60 = vld [vmem:[%s1158_s25 + $0xc8] sm:$0xf0]  ;;  %v1032_v1 = vld [vmem:[%s1158_s25 + $0xb4] sm:$0xf] }
  0x32   : > { %592 = vmatpush.bf16.msra.mxu0 %v823_v11  ;;  %617 = vmatpush.bf16.msra.mxu2 %v959_v12  ;;  %v1050_v61 = vld [vmem:[%s1158_s25 + $0x144] sm:$0xf]  ;;  %v976_v62 = vld [vmem:[%s1158_s25 + $0x148] sm:$0xf0]  ;;  %v915_v63 = vor.u32 %v1034_v59, %v912_v60  ;;  %v904_v2 = vld [vmem:[%s1158_s25 + $0xb8] sm:$0xf0] }
  0x33   : > { %605 = vmatpush.bf16.msra.mxu1 %v887_v16  ;;  %v979_v0 = vor.u32 %v1050_v61, %v976_v62  ;;  %v1048_v3 = vld [vmem:[%s1158_s25 + $0x134] sm:$0xf]  ;;  %v968_v4 = vld [vmem:[%s1158_s25 + $0x138] sm:$0xf0]  ;;  %v907_v5 = vor.u32 %v1032_v1, %v904_v2  ;;  %v1030_v7 = vld [vmem:[%s1158_s25 + $0xa4] sm:$0xf] }
  0x34   : > { %630 = vmatpush.bf16.msra.mxu3 %v835_v25  ;;  %v971_v6 = vor.u32 %v1048_v3, %v968_v4  ;;  %v896_v8 = vld [vmem:[%s1158_s25 + $0xa8] sm:$0xf0]  ;;  %v1046_v9 = vld [vmem:[%s1158_s25 + $0x124] sm:$0xf]  ;;  %v1028_v13 = vld [vmem:[%s1158_s25 + $0x94] sm:$0xf] }
  0x35   : > { %v960_v10 = vld [vmem:[%s1158_s25 + $0x128] sm:$0xf0]  ;;  %v899_v11 = vor.u32 %v1030_v7, %v896_v8  ;;  %v888_v14 = vld [vmem:[%s1158_s25 + $0x98] sm:$0xf0]  ;;  %v1044_v15 = vld [vmem:[%s1158_s25 + $0x114] sm:$0xf] }
  0x36   : > { %593 = vmatpush.bf16.msra.mxu0 %v815_v27  ;;  %618 = vmatpush.bf16.msra.mxu2 %v951_v28  ;;  %v963_v12 = vor.u32 %v1046_v9, %v960_v10  ;;  %v952_v16 = vld [vmem:[%s1158_s25 + $0x118] sm:$0xf0]  ;;  %v891_v17 = vor.u32 %v1028_v13, %v888_v14  ;;  %v1026_v19 = vld [vmem:[%s1158_s25 + $0x84] sm:$0xf]  ;;  %v880_v20 = vld [vmem:[%s1158_s25 + $0x88] sm:$0xf0] }
  0x37   : > { %606 = vmatpush.bf16.msra.mxu1 %v879_v33  ;;  %v955_v18 = vor.u32 %v1044_v15, %v952_v16  ;;  %v1042_v21 = vld [vmem:[%s1158_s25 + $0x104] sm:$0xf]  ;;  %v944_v22 = vld [vmem:[%s1158_s25 + $0x108] sm:$0xf0]  ;;  %v883_v23 = vor.u32 %v1026_v19, %v880_v20 }
  0x38   : > { %631 = vmatpush.bf16.msra.mxu3 %v827_v43  ;;  %v947_v24 = vor.u32 %v1042_v21, %v944_v22  ;;  %v283_v30 = vld [vmem:[#allocation2] sm:$0xff]  ;;  %v284_v40 = vld [vmem:[#allocation2 + $0x8] sm:$0xff] }
  0x39   : > { %594 = vmatmul.bf16.vlgmr.msra.gmra.mxu0 %v340_v42 }
  0x3a   : > { %638 = vmatpush.bf16.msrb.mxu0 %v939_v34  ;;  %607 = vmatmul.bf16.vlgmr.msra.gmra.mxu1 %v1233_v45 }
  0x3b   : > { %651 = vmatpush.bf16.msrb.mxu1 %v1003_v37  ;;  %619 = vmatpush.bf16.msra.mxu2 %v943_v46 }
  0x3c   : > { %632 = vmatpush.bf16.msra.mxu3 %v819_v56 }
  0x3e   : > { %639 = vmatpush.bf16.msrb.mxu0 %v931_v49  ;;  %620 = vmatmul.bf16.vlgmr.msra.gmra.mxu2 %v342_v55 }
  0x3f   : > { %652 = vmatpush.bf16.msrb.mxu1 %v995_v50  ;;  %633 = vmatmul.bf16.vlgmr.msra.gmra.mxu3 %v340_v42 }
  0x42   : > { %640 = vmatpush.bf16.msrb.mxu0 %v923_v57 }
  0x43   : > { %653 = vmatpush.bf16.msrb.mxu1 %v987_v58 }
  0x46   : > { %641 = vmatpush.bf16.msrb.mxu0 %v915_v63 }
  0x47   : > { %654 = vmatpush.bf16.msrb.mxu1 %v979_v0 }
  0x4a   : > { %642 = vmatpush.bf16.msrb.mxu0 %v907_v5 }
  0x4b   : > { %655 = vmatpush.bf16.msrb.mxu1 %v971_v6 }
  0x4e   : > { %643 = vmatpush.bf16.msrb.mxu0 %v899_v11 }
  0x4f   : > { %656 = vmatpush.bf16.msrb.mxu1 %v963_v12 }
  0x52   : > { %644 = vmatpush.bf16.msrb.mxu0 %v891_v17 }
  0x53   : > { %657 = vmatpush.bf16.msrb.mxu1 %v955_v18 }
  0x56   : > { %645 = vmatpush.bf16.msrb.mxu0 %v883_v23 }
  0x57   : > { %658 = vmatpush.bf16.msrb.mxu1 %v947_v24 }
  0x59   : > { %646 = vmatmul.bf16.vlgmr.msrb.gmra.mxu0 %v1233_v45 }
  0x5a   : > { %659 = vmatmul.bf16.vlgmr.msrb.gmra.mxu1 %v342_v55 }
  0xb6   : > { %v595_v25 = vpop.f32.mrf.mxu0 }
  0xb7   : > { %v608_v26 = vpop.f32.mrf.mxu1 }
  0xb8   : > { %v609_v27 = vadd.f32 %v608_v26, %v595_v25 }
  0xbe   : > { %v597_v28 = vpop.f32.mrf.mxu0 }
  0xbf   : > { %v610_v29 = vpop.f32.mrf.mxu1 }
  0xc1   : > { %v621_v31 = vpop.f32.mrf.mxu2 }
  0xc2   : > { %v622_v32 = vadd.f32 %v621_v31, %v609_v27  ;;  %v634_v34 = vpop.f32.mrf.mxu3 }
  0xc4   : > { %v664_v33 = vadd.f32 %v622_v32, %v283_v30 }
  0xc6   : > { %666 = vst [vmem:[#allocation2] sm:$0xff] %v664_v33 }
  0xc9   : > { %v623_v35 = vpop.f32.mrf.mxu2 }
  0xca   : > { %v636_v36 = vpop.f32.mrf.mxu3 }
  0xd6   : > { %v647_v37 = vpop.f32.mrf.mxu0 }
  0xd7   : > { %v648_v38 = vadd.f32 %v647_v37, %v634_v34  ;;  %v660_v39 = vpop.f32.mrf.mxu1 }
  0xd9   : > { %v661_v41 = vadd.f32 %v660_v39, %v648_v38 }
  0xdb   : > { %v665_v42 = vadd.f32 %v661_v41, %v284_v40  ;;  %671 = sbr.rel (%p1004_p7) target bundleno = 236 (0xec), region = 40 }
  0xdd   : > { %667 = vst [vmem:[#allocation2 + $0x8] sm:$0xff] %v665_v42 }
  0xde   : > { %v649_v43 = vpop.f32.mrf.mxu0 }
  0xdf   : > { %v662_v44 = vpop.f32.mrf.mxu1 }
  0xe0   : > { %v672_v45 = vld [vmem:[#allocation2] sm:$0xff] }
  0xe1   : > { %v674_v47 = vld [vmem:[%s1281_s2] sm:$0x3] }
  0xe2   : > { %v676_v48 = vperm.slane %v674_v47, 0  ;;  %v677_v49 = vperm.slane %v674_v47, 1 }
  0xe4   : > { %v673_v46 = vld [vmem:[#allocation2 + $0x8] sm:$0xff]  ;;  %v680_v50 = vadd.f32 %v676_v48, %v672_v45 }
  0xe5   : > { %v681_v51 = vadd.f32 %v677_v49, %v673_v46 }
  0xe6   : > { %v682_v52 = vmax.f32 %v680_v50, 0.0 }
  0xe7   : > { %v683_v53 = vmax.f32 %v681_v51, 0.0 }
  0xe9   : > { %v684_v54 = vpack.c.bf16 %v683_v53, %v682_v52 }
  0xeb   : > { %685 = vst [vmem:[%s1282_s3] sm:$0xff] %v684_v54 }
  0xec PF: > { %s13_s14 = sadd.s32 1, %s1105_s14   ;;  %s1283_s12 = smov %s1101_s13 }
  0xed   : > { %p10_p8 = scmp.ge.s32.totalorder %s13_s14, 5   ;;  %s1284_s13 = smov %s1286_s15 }
  0xef   :  { %12 = sbr.rel (!%p10_p8) target bundleno = 2 (0x2), region = 76 }

// kernel: resnet_custom_forward.32
= control target key start
LH: loop header
LB: loop body
LE: loop exit
PB: predicated region body
PF: predicated region fallthrough
CT: control target
= control target key end

     0   :  { %s373_s1 = inlined_call_operand.vmem [shape: bf16[128,256], index: 1, kind: input, shape index: {}]   ;;  %s374_s0 = inlined_call_operand.vmem [shape: bf16[8,128], index: 0, kind: input, shape index: {}]   ;;  %s375_s2 = inlined_call_operand.vmem [shape: f32[1,256], index: 2, kind: input, shape index: {}]   ;;  %s376_s3 = inlined_call_operand.vmem [shape: bf16[8,256], index: 3, kind: output, shape index: {}]  }
   0x1   :  { %v226_v0 = vld [vmem:[%s373_s1 + $0x70] sm:$0xf]  ;;  %v247_v1 = vld [vmem:[%s373_s1 + $0x74] sm:$0xf0]  ;;  %v246_v2 = vld [vmem:[%s373_s1 + $0x74] sm:$0xf] }
   0x2   :  { %v227_v3 = vor.u32 %v247_v1, %v226_v0  ;;  %v228_v4 = vld [vmem:[%s373_s1 + $0x78] sm:$0xf0]  ;;  %v218_v5 = vld [vmem:[%s373_s1 + $0x60] sm:$0xf]  ;;  %v245_v6 = vld [vmem:[%s373_s1 + $0x64] sm:$0xf0] }
   0x3   :  { %v231_v7 = vor.u32 %v246_v2, %v228_v4  ;;  %v244_v8 = vld [vmem:[%s373_s1 + $0x64] sm:$0xf]  ;;  %v220_v9 = vld [vmem:[%s373_s1 + $0x68] sm:$0xf0]  ;;  %v219_v10 = vor.u32 %v245_v6, %v218_v5  ;;  %v210_v12 = vld [vmem:[%s373_s1 + $0x50] sm:$0xf] }
   0x4   :  { %119 = vmatpush.bf16.msra.mxu0 %v227_v3  ;;  %v223_v11 = vor.u32 %v244_v8, %v220_v9  ;;  %v243_v13 = vld [vmem:[%s373_s1 + $0x54] sm:$0xf0]  ;;  %v242_v14 = vld [vmem:[%s373_s1 + $0x54] sm:$0xf]  ;;  %v212_v15 = vld [vmem:[%s373_s1 + $0x58] sm:$0xf0] }
   0x5   :  { %132 = vmatpush.bf16.msra.mxu1 %v231_v7  ;;  %v211_v16 = vor.u32 %v243_v13, %v210_v12  ;;  %v215_v17 = vor.u32 %v242_v14, %v212_v15  ;;  %v202_v18 = vld [vmem:[%s373_s1 + $0x40] sm:$0xf]  ;;  %v241_v19 = vld [vmem:[%s373_s1 + $0x44] sm:$0xf0]  ;;  %v240_v20 = vld [vmem:[%s373_s1 + $0x44] sm:$0xf] }
   0x6   :  { %v204_v21 = vld [vmem:[%s373_s1 + $0x48] sm:$0xf0]  ;;  %v203_v22 = vor.u32 %v241_v19, %v202_v18  ;;  %v194_v24 = vld [vmem:[%s373_s1 + $0x30] sm:$0xf]  ;;  %v239_v25 = vld [vmem:[%s373_s1 + $0x34] sm:$0xf0] }
   0x7   :  { %v207_v23 = vor.u32 %v240_v20, %v204_v21  ;;  %v238_v26 = vld [vmem:[%s373_s1 + $0x34] sm:$0xf]  ;;  %v196_v27 = vld [vmem:[%s373_s1 + $0x38] sm:$0xf0]  ;;  %v195_v28 = vor.u32 %v239_v25, %v194_v24  ;;  %v186_v30 = vld [vmem:[%s373_s1 + $0x20] sm:$0xf] }
   0x8   :  { %120 = vmatpush.bf16.msra.mxu0 %v219_v10  ;;  %v199_v29 = vor.u32 %v238_v26, %v196_v27  ;;  %v237_v31 = vld [vmem:[%s373_s1 + $0x24] sm:$0xf0]  ;;  %v236_v32 = vld [vmem:[%s373_s1 + $0x24] sm:$0xf]  ;;  %v188_v33 = vld [vmem:[%s373_s1 + $0x28] sm:$0xf0] }
   0x9   :  { %133 = vmatpush.bf16.msra.mxu1 %v223_v11  ;;  %v187_v34 = vor.u32 %v237_v31, %v186_v30  ;;  %v191_v35 = vor.u32 %v236_v32, %v188_v33  ;;  %v178_v36 = vld [vmem:[%s373_s1 + $0x10] sm:$0xf]  ;;  %v235_v37 = vld [vmem:[%s373_s1 + $0x14] sm:$0xf0]  ;;  %v234_v38 = vld [vmem:[%s373_s1 + $0x14] sm:$0xf] }
   0xa   :  { %v180_v39 = vld [vmem:[%s373_s1 + $0x18] sm:$0xf0]  ;;  %v179_v40 = vor.u32 %v235_v37, %v178_v36  ;;  %v170_v42 = vld [vmem:[%s373_s1] sm:$0xf]  ;;  %v233_v43 = vld [vmem:[%s373_s1 + $0x4] sm:$0xf0] }
   0xb   :  { %v183_v41 = vor.u32 %v234_v38, %v180_v39  ;;  %v232_v44 = vld [vmem:[%s373_s1 + $0x4] sm:$0xf]  ;;  %v172_v45 = vld [vmem:[%s373_s1 + $0x8] sm:$0xf0]  ;;  %v171_v46 = vor.u32 %v233_v43, %v170_v42  ;;  %v22_v48 = vld [vmem:[%s374_s0] sm:$0xf] }
   0xc   :  { %121 = vmatpush.bf16.msra.mxu0 %v211_v16  ;;  %v175_v47 = vor.u32 %v232_v44, %v172_v45  ;;  %v154_v49 = vld [vmem:[%s375_s2] sm:$0x3] }
   0xd   :  { %134 = vmatpush.bf16.msra.mxu1 %v215_v17  ;;  %v156_v50 = vperm.slane %v154_v49, 0  ;;  %v157_v51 = vperm.slane %v154_v49, 1 }
  0x10   :  { %122 = vmatpush.bf16.msra.mxu0 %v203_v22 }
  0x11   :  { %135 = vmatpush.bf16.msra.mxu1 %v207_v23 }
  0x14   :  { %123 = vmatpush.bf16.msra.mxu0 %v195_v28 }
  0x15   :  { %136 = vmatpush.bf16.msra.mxu1 %v199_v29 }
  0x18   :  { %124 = vmatpush.bf16.msra.mxu0 %v187_v34 }
  0x19   :  { %137 = vmatpush.bf16.msra.mxu1 %v191_v35 }
  0x1c   :  { %125 = vmatpush.bf16.msra.mxu0 %v179_v40 }
  0x1d   :  { %138 = vmatpush.bf16.msra.mxu1 %v183_v41 }
  0x20   :  { %126 = vmatpush.bf16.msra.mxu0 %v171_v46 }
  0x21   :  { %139 = vmatpush.bf16.msra.mxu1 %v175_v47 }
  0x23   :  { %127 = vmatmul.bf16.vlgmr.msra.gmra.mxu0 %v22_v48 }
  0x24   :  { %140 = vmatmul.bf16.vlgmr.msra.gmra.mxu1 %v22_v48 }
  0xa0   :  { %v128_v52 = vpop.f32.mrf.mxu0 }
  0xa1   :  { %v160_v53 = vadd.f32 %v156_v50, %v128_v52  ;;  %v141_v54 = vpop.f32.mrf.mxu1 }
  0xa2   :  { %v161_v55 = vadd.f32 %v157_v51, %v141_v54 }
  0xa4   :  { %v162_v56 = vpack.c.bf16 %v161_v55, %v160_v53 }
  0xa6   :  { %163 = vst [vmem:[%s376_s3] sm:$0xff] %v162_v56 }
  0xa8   :  { %v130_v57 = vpop.f32.mrf.mxu0 }
  0xa9   :  { %v143_v58 = vpop.f32.mrf.mxu1 }

// kernel: resnet_custom_forward.34
= control target key start
LH: loop header
LB: loop body
LE: loop exit
PB: predicated region body
PF: predicated region fallthrough
CT: control target
= control target key end

     0   :  { %s1223_s15 = smov 0   ;;  %s1225_s16 = smov 0   ;;  %s1377_s0 = inlined_call_operand.vmem [shape: bf16[8,2304], index: 0, kind: input, shape index: {}]   ;;  %s1378_s1 = inlined_call_operand.vmem [shape: bf16[2304,256], index: 1, kind: input, shape index: {}]   ;;  %s1379_s2 = inlined_call_operand.vmem [shape: f32[1,256], index: 2, kind: input, shape index: {}]   ;;  %s1380_s3 = inlined_call_operand.vmem [shape: bf16[8,256], index: 3, kind: input, shape index: {}]   ;;  %s1381_s4 = inlined_call_operand.vmem [shape: bf16[8,256], index: 4, kind: output, shape index: {}]  }
   0x1   :  { %s1227_s17 = smov 0  }
   0x2 LB: > { %s26_s18 = sadd.s32 1, %s1191_s16  ;;  %p897_p0 = scmp.ge.s32.totalorder %s1195_s17, 1  ;;  %s1195_s17 = sphi %s1227_s17, %s14_s17   ;;  %s1191_s16 = sphi %s1225_s16, %s1383_s16   ;;  %s1187_s15 = sphi %s1223_s15, %s1382_s15  }
   0x3   : > { %p27_p1 = scmp.ge.s32.totalorder %s26_s18, 6  ;;  %p236_p2 = scmp.lt.s32.totalorder %s1195_s17, 7 }
   0x5   : > { %s1385_s18 = smov (%p27_p1, %s26_s18), 0  ;;  %p237_p3 = pnand %p897_p0, %p236_p2 }
   0x6   : > { %s293_s19 = smul.u32 (!%p237_p3), 3, %s1187_s15  ;;  %p901_p6 = scmp.ne.s32.totalorder (!%p237_p3), %s1187_s15, 0 }
   0x7   : > { %240 = sbr.rel (%p237_p3) target bundleno = 238 (0xee), region = 36 }
   0x8   : > { %s303_s20 = smul.u32 (!%p237_p3), 48, %s1187_s15  ;;  %p296_p4 = scmp.lt.s32.totalorder (!%p237_p3), %s293_s19, 17 }
   0xa   : > { %p305_p5 = scmp.lt.s32.totalorder (!%p237_p3), %s303_s20, 287 }
   0xc   : > { %s1387_s19 = smov (!%p296_p4, %s293_s19), 17  ;;  %s1389_s20 = smov (!%p305_p5, %s303_s20), 287 }
   0xd   : > { %s898_s21 = sshll.u32 %s1387_s19, 2  ;;  %s1099_s25 = sshll.u32 %s1389_s20, 3 }
   0xe   : > { %s1248_s24 = scalar_lea.vmem %s1377_s0, %s898_s21  ;;  %s1253_s28 = scalar_lea.vmem %s1378_s1, %s1099_s25 }
   0xf   : > { %343 = sbr.rel (%p901_p6) target bundleno = 23 (0x17), region = 40 }
  0x14   : > { %v1197_v0 = vmov 0.0  }
  0x15   : > { %344 = vst [vmem:[#allocation2] sm:$0xff] %v1197_v0 }
  0x16   : > { %345 = vst [vmem:[#allocation2 + $0x8] sm:$0xff] %v1197_v0 }
  0x17 PF: > { %v960_v1 = vld [vmem:[%s1253_s28 + $0x70] sm:$0xf]  ;;  %v1115_v2 = vld [vmem:[%s1253_s28 + $0x74] sm:$0xf0]  ;;  %v952_v6 = vld [vmem:[%s1253_s28 + $0x60] sm:$0xf] }
  0x18   : > { %v1024_v3 = vld [vmem:[%s1253_s28 + $0xf0] sm:$0xf]  ;;  %v961_v4 = vor.u32 %v1115_v2, %v960_v1  ;;  %v1131_v5 = vld [vmem:[%s1253_s28 + $0xf4] sm:$0xf0]  ;;  %v1113_v7 = vld [vmem:[%s1253_s28 + $0x64] sm:$0xf0] }
  0x19   : > { %v1025_v8 = vor.u32 %v1131_v5, %v1024_v3  ;;  %v1016_v9 = vld [vmem:[%s1253_s28 + $0xe0] sm:$0xf]  ;;  %v1129_v10 = vld [vmem:[%s1253_s28 + $0xe4] sm:$0xf0]  ;;  %v953_v11 = vor.u32 %v1113_v7, %v952_v6  ;;  %v944_v12 = vld [vmem:[%s1253_s28 + $0x50] sm:$0xf] }
  0x1a   : > { %649 = vmatpush.bf16.msra.mxu0 %v961_v4  ;;  %v1017_v13 = vor.u32 %v1129_v10, %v1016_v9  ;;  %v1111_v14 = vld [vmem:[%s1253_s28 + $0x54] sm:$0xf0]  ;;  %v1088_v15 = vld [vmem:[%s1253_s28 + $0x170] sm:$0xf]  ;;  %v1080_v20 = vld [vmem:[%s1253_s28 + $0x160] sm:$0xf] }
  0x1b   : > { %662 = vmatpush.bf16.msra.mxu1 %v1025_v8  ;;  %v1147_v16 = vld [vmem:[%s1253_s28 + $0x174] sm:$0xf0]  ;;  %v1008_v17 = vld [vmem:[%s1253_s28 + $0xd0] sm:$0xf]  ;;  %v1145_v21 = vld [vmem:[%s1253_s28 + $0x164] sm:$0xf0]  ;;  %v945_v23 = vor.u32 %v1111_v14, %v944_v12 }
  0x1c   : > { %v1127_v18 = vld [vmem:[%s1253_s28 + $0xd4] sm:$0xf0]  ;;  %v1089_v19 = vor.u32 %v1147_v16, %v1088_v15  ;;  %v1114_v22 = vld [vmem:[%s1253_s28 + $0x74] sm:$0xf]  ;;  %v936_v24 = vld [vmem:[%s1253_s28 + $0x40] sm:$0xf]  ;;  %v1081_v26 = vor.u32 %v1145_v21, %v1080_v20 }
  0x1d   : > { %v1109_v25 = vld [vmem:[%s1253_s28 + $0x44] sm:$0xf0]  ;;  %v962_v27 = vld [vmem:[%s1253_s28 + $0x78] sm:$0xf0]  ;;  %v1009_v28 = vor.u32 %v1127_v18, %v1008_v17  ;;  %v1000_v29 = vld [vmem:[%s1253_s28 + $0xc0] sm:$0xf] }
  0x1e   : > { %650 = vmatpush.bf16.msra.mxu0 %v953_v11  ;;  %675 = vmatpush.bf16.msra.mxu2 %v1089_v19  ;;  %v1125_v30 = vld [vmem:[%s1253_s28 + $0xc4] sm:$0xf0]  ;;  %v965_v31 = vor.u32 %v1114_v22, %v962_v27  ;;  %v1072_v32 = vld [vmem:[%s1253_s28 + $0x150] sm:$0xf]  ;;  %v1143_v33 = vld [vmem:[%s1253_s28 + $0x154] sm:$0xf0]  ;;  %v937_v37 = vor.u32 %v1109_v25, %v936_v24 }
  0x1f   : > { %663 = vmatpush.bf16.msra.mxu1 %v1017_v13  ;;  %v1112_v34 = vld [vmem:[%s1253_s28 + $0x64] sm:$0xf]  ;;  %v954_v35 = vld [vmem:[%s1253_s28 + $0x68] sm:$0xf0]  ;;  %v928_v38 = vld [vmem:[%s1253_s28 + $0x30] sm:$0xf]  ;;  %v1073_v40 = vor.u32 %v1143_v33, %v1072_v32  ;;  %v1001_v42 = vor.u32 %v1125_v30, %v1000_v29 }
  0x20   : > { %688 = vmatpush.bf16.msra.mxu3 %v965_v31  ;;  %v957_v36 = vor.u32 %v1112_v34, %v954_v35  ;;  %v1107_v39 = vld [vmem:[%s1253_s28 + $0x34] sm:$0xf0]  ;;  %v1064_v41 = vld [vmem:[%s1253_s28 + $0x140] sm:$0xf]  ;;  %v1141_v43 = vld [vmem:[%s1253_s28 + $0x144] sm:$0xf0] }
  0x21   : > { %v1110_v44 = vld [vmem:[%s1253_s28 + $0x54] sm:$0xf]  ;;  %v946_v45 = vld [vmem:[%s1253_s28 + $0x58] sm:$0xf0]  ;;  %v992_v46 = vld [vmem:[%s1253_s28 + $0xb0] sm:$0xf]  ;;  %v929_v49 = vor.u32 %v1107_v39, %v928_v38  ;;  %v1065_v51 = vor.u32 %v1141_v43, %v1064_v41 }
  0x22   : > { %651 = vmatpush.bf16.msra.mxu0 %v945_v23  ;;  %676 = vmatpush.bf16.msra.mxu2 %v1081_v26  ;;  %v1123_v47 = vld [vmem:[%s1253_s28 + $0xb4] sm:$0xf0]  ;;  %v949_v48 = vor.u32 %v1110_v44, %v946_v45  ;;  %v920_v50 = vld [vmem:[%s1253_s28 + $0x20] sm:$0xf]  ;;  %v1108_v52 = vld [vmem:[%s1253_s28 + $0x44] sm:$0xf] }
  0x23   : > { %664 = vmatpush.bf16.msra.mxu1 %v1009_v28  ;;  %v938_v53 = vld [vmem:[%s1253_s28 + $0x48] sm:$0xf0]  ;;  %v993_v54 = vor.u32 %v1123_v47, %v992_v46  ;;  %v1105_v55 = vld [vmem:[%s1253_s28 + $0x24] sm:$0xf0]  ;;  %v1056_v56 = vld [vmem:[%s1253_s28 + $0x130] sm:$0xf] }
  0x24   : > { %689 = vmatpush.bf16.msra.mxu3 %v957_v36  ;;  %v1139_v57 = vld [vmem:[%s1253_s28 + $0x134] sm:$0xf0]  ;;  %v984_v58 = vld [vmem:[%s1253_s28 + $0xa0] sm:$0xf]  ;;  %v1121_v59 = vld [vmem:[%s1253_s28 + $0xa4] sm:$0xf0]  ;;  %v941_v60 = vor.u32 %v1108_v52, %v938_v53  ;;  %v921_v61 = vor.u32 %v1105_v55, %v920_v50 }
  0x25   : > { %v912_v62 = vld [vmem:[%s1253_s28 + $0x10] sm:$0xf]  ;;  %v1057_v63 = vor.u32 %v1139_v57, %v1056_v56  ;;  %v1106_v0 = vld [vmem:[%s1253_s28 + $0x34] sm:$0xf]  ;;  %v930_v1 = vld [vmem:[%s1253_s28 + $0x38] sm:$0xf0]  ;;  %v985_v2 = vor.u32 %v1121_v59, %v984_v58 }
  0x26   : > { %652 = vmatpush.bf16.msra.mxu0 %v937_v37  ;;  %677 = vmatpush.bf16.msra.mxu2 %v1073_v40  ;;  %v1103_v3 = vld [vmem:[%s1253_s28 + $0x14] sm:$0xf0]  ;;  %v1048_v4 = vld [vmem:[%s1253_s28 + $0x120] sm:$0xf]  ;;  %v1137_v5 = vld [vmem:[%s1253_s28 + $0x124] sm:$0xf0]  ;;  %v933_v10 = vor.u32 %v1106_v0, %v930_v1 }
  0x27   : > { %665 = vmatpush.bf16.msra.mxu1 %v1001_v42  ;;  %v976_v6 = vld [vmem:[%s1253_s28 + $0x90] sm:$0xf]  ;;  %v1119_v7 = vld [vmem:[%s1253_s28 + $0x94] sm:$0xf0]  ;;  %v904_v8 = vld [vmem:[%s1253_s28] sm:$0xf]  ;;  %v913_v11 = vor.u32 %v1103_v3, %v912_v62  ;;  %v1049_v12 = vor.u32 %v1137_v5, %v1048_v4 }
  0x28   : > { %690 = vmatpush.bf16.msra.mxu3 %v949_v48  ;;  %v1101_v9 = vld [vmem:[%s1253_s28 + $0x4] sm:$0xf0]  ;;  %v1104_v13 = vld [vmem:[%s1253_s28 + $0x24] sm:$0xf]  ;;  %v922_v14 = vld [vmem:[%s1253_s28 + $0x28] sm:$0xf0]  ;;  %v977_v16 = vor.u32 %v1119_v7, %v976_v6 }
  0x29   : > { %v348_v15 = vld [vmem:[%s1248_s24] sm:$0xff]  ;;  %v1040_v18 = vld [vmem:[%s1253_s28 + $0x110] sm:$0xf]  ;;  %v1135_v19 = vld [vmem:[%s1253_s28 + $0x114] sm:$0xf0]  ;;  %v925_v25 = vor.u32 %v1104_v13, %v922_v14  ;;  %v905_v27 = vor.u32 %v1101_v9, %v904_v8  ;;  %p1094_p7 = scmp.ne.s32.totalorder %s1187_s15, 5 }
  0x2a   : > { %653 = vmatpush.bf16.msra.mxu0 %v929_v49  ;;  %678 = vmatpush.bf16.msra.mxu2 %v1065_v51  ;;  %v968_v17 = vld [vmem:[%s1253_s28 + $0x80] sm:$0xf]  ;;  %v1117_v20 = vld [vmem:[%s1253_s28 + $0x84] sm:$0xf0]  ;;  %v1130_v21 = vld [vmem:[%s1253_s28 + $0xf4] sm:$0xf]  ;;  %v400_v26 = vunpack.c.l.b16 %v348_v15  ;;  %v1041_v28 = vor.u32 %v1135_v19, %v1040_v18  ;;  %v401_v29 = vunpack.c.h.b16 %v348_v15 }
  0x2b   : > { %666 = vmatpush.bf16.msra.mxu1 %v993_v54  ;;  %v1026_v22 = vld [vmem:[%s1253_s28 + $0xf8] sm:$0xf0]  ;;  %v1146_v23 = vld [vmem:[%s1253_s28 + $0x174] sm:$0xf]  ;;  %v349_v32 = vld [vmem:[%s1248_s24 + $0x8] sm:$0xf]  ;;  %v969_v33 = vor.u32 %v1117_v20, %v968_v17 }
  0x2c   : > { %691 = vmatpush.bf16.msra.mxu3 %v941_v60  ;;  %v1090_v24 = vld [vmem:[%s1253_s28 + $0x178] sm:$0xf0]  ;;  %v1102_v30 = vld [vmem:[%s1253_s28 + $0x14] sm:$0xf]  ;;  %v1029_v34 = vor.u32 %v1130_v21, %v1026_v22  ;;  %v1032_v35 = vld [vmem:[%s1253_s28 + $0x100] sm:$0xf]  ;;  %v403_v42 = vpack.c.b16 %v400_v26, %v400_v26  ;;  %v402_v44 = vunpack.c.l.b16 %v349_v32  ;;  %v1328_v45 = vpack.c.b16 %v401_v29, %v401_v29 }
  0x2d   : > { %v914_v31 = vld [vmem:[%s1253_s28 + $0x18] sm:$0xf0]  ;;  %v1133_v36 = vld [vmem:[%s1253_s28 + $0x104] sm:$0xf0]  ;;  %v1093_v37 = vor.u32 %v1146_v23, %v1090_v24  ;;  %v1128_v38 = vld [vmem:[%s1253_s28 + $0xe4] sm:$0xf] }
  0x2e   : > { %654 = vmatpush.bf16.msra.mxu0 %v921_v61  ;;  %679 = vmatpush.bf16.msra.mxu2 %v1057_v63  ;;  %v1018_v39 = vld [vmem:[%s1253_s28 + $0xe8] sm:$0xf0]  ;;  %v1144_v40 = vld [vmem:[%s1253_s28 + $0x164] sm:$0xf]  ;;  %v917_v43 = vor.u32 %v1102_v30, %v914_v31  ;;  %v1033_v46 = vor.u32 %v1133_v36, %v1032_v35  ;;  %v1126_v51 = vld [vmem:[%s1253_s28 + $0xd4] sm:$0xf]  ;;  %v405_v55 = vpack.c.b16 %v402_v44, %v402_v44 }
  0x2f   : > { %667 = vmatpush.bf16.msra.mxu1 %v985_v2  ;;  %v1082_v41 = vld [vmem:[%s1253_s28 + $0x168] sm:$0xf0]  ;;  %v1100_v47 = vld [vmem:[%s1253_s28 + $0x4] sm:$0xf]  ;;  %v1021_v49 = vor.u32 %v1128_v38, %v1018_v39  ;;  %v1010_v52 = vld [vmem:[%s1253_s28 + $0xd8] sm:$0xf0] }
  0x30   : > { %692 = vmatpush.bf16.msra.mxu3 %v933_v10  ;;  %v906_v48 = vld [vmem:[%s1253_s28 + $0x8] sm:$0xf0]  ;;  %v1085_v50 = vor.u32 %v1144_v40, %v1082_v41  ;;  %v1142_v53 = vld [vmem:[%s1253_s28 + $0x154] sm:$0xf]  ;;  %v1074_v54 = vld [vmem:[%s1253_s28 + $0x158] sm:$0xf0]  ;;  %v1013_v57 = vor.u32 %v1126_v51, %v1010_v52 }
  0x31   : > { %v909_v56 = vor.u32 %v1100_v47, %v906_v48  ;;  %v1077_v58 = vor.u32 %v1142_v53, %v1074_v54  ;;  %v1124_v59 = vld [vmem:[%s1253_s28 + $0xc4] sm:$0xf]  ;;  %v1002_v60 = vld [vmem:[%s1253_s28 + $0xc8] sm:$0xf0]  ;;  %v1122_v1 = vld [vmem:[%s1253_s28 + $0xb4] sm:$0xf] }
  0x32   : > { %655 = vmatpush.bf16.msra.mxu0 %v913_v11  ;;  %680 = vmatpush.bf16.msra.mxu2 %v1049_v12  ;;  %v1140_v61 = vld [vmem:[%s1253_s28 + $0x144] sm:$0xf]  ;;  %v1066_v62 = vld [vmem:[%s1253_s28 + $0x148] sm:$0xf0]  ;;  %v1005_v63 = vor.u32 %v1124_v59, %v1002_v60  ;;  %v994_v2 = vld [vmem:[%s1253_s28 + $0xb8] sm:$0xf0] }
  0x33   : > { %668 = vmatpush.bf16.msra.mxu1 %v977_v16  ;;  %v1069_v0 = vor.u32 %v1140_v61, %v1066_v62  ;;  %v1138_v3 = vld [vmem:[%s1253_s28 + $0x134] sm:$0xf]  ;;  %v1058_v4 = vld [vmem:[%s1253_s28 + $0x138] sm:$0xf0]  ;;  %v997_v5 = vor.u32 %v1122_v1, %v994_v2  ;;  %v1120_v7 = vld [vmem:[%s1253_s28 + $0xa4] sm:$0xf] }
  0x34   : > { %693 = vmatpush.bf16.msra.mxu3 %v925_v25  ;;  %v1061_v6 = vor.u32 %v1138_v3, %v1058_v4  ;;  %v986_v8 = vld [vmem:[%s1253_s28 + $0xa8] sm:$0xf0]  ;;  %v1136_v9 = vld [vmem:[%s1253_s28 + $0x124] sm:$0xf]  ;;  %v1118_v13 = vld [vmem:[%s1253_s28 + $0x94] sm:$0xf] }
  0x35   : > { %v1050_v10 = vld [vmem:[%s1253_s28 + $0x128] sm:$0xf0]  ;;  %v989_v11 = vor.u32 %v1120_v7, %v986_v8  ;;  %v978_v14 = vld [vmem:[%s1253_s28 + $0x98] sm:$0xf0]  ;;  %v1134_v15 = vld [vmem:[%s1253_s28 + $0x114] sm:$0xf] }
  0x36   : > { %656 = vmatpush.bf16.msra.mxu0 %v905_v27  ;;  %681 = vmatpush.bf16.msra.mxu2 %v1041_v28  ;;  %v1053_v12 = vor.u32 %v1136_v9, %v1050_v10  ;;  %v1042_v16 = vld [vmem:[%s1253_s28 + $0x118] sm:$0xf0]  ;;  %v981_v17 = vor.u32 %v1118_v13, %v978_v14  ;;  %v1116_v19 = vld [vmem:[%s1253_s28 + $0x84] sm:$0xf]  ;;  %v970_v20 = vld [vmem:[%s1253_s28 + $0x88] sm:$0xf0] }
  0x37   : > { %669 = vmatpush.bf16.msra.mxu1 %v969_v33  ;;  %v1045_v18 = vor.u32 %v1134_v15, %v1042_v16  ;;  %v1132_v21 = vld [vmem:[%s1253_s28 + $0x104] sm:$0xf]  ;;  %v1034_v22 = vld [vmem:[%s1253_s28 + $0x108] sm:$0xf0]  ;;  %v973_v23 = vor.u32 %v1116_v19, %v970_v20 }
  0x38   : > { %694 = vmatpush.bf16.msra.mxu3 %v917_v43  ;;  %v1037_v24 = vor.u32 %v1132_v21, %v1034_v22  ;;  %v346_v30 = vld [vmem:[#allocation2] sm:$0xff]  ;;  %v347_v40 = vld [vmem:[#allocation2 + $0x8] sm:$0xff] }
  0x39   : > { %657 = vmatmul.bf16.vlgmr.msra.gmra.mxu0 %v403_v42 }
  0x3a   : > { %701 = vmatpush.bf16.msrb.mxu0 %v1029_v34  ;;  %670 = vmatmul.bf16.vlgmr.msra.gmra.mxu1 %v1328_v45 }
  0x3b   : > { %714 = vmatpush.bf16.msrb.mxu1 %v1093_v37  ;;  %682 = vmatpush.bf16.msra.mxu2 %v1033_v46 }
  0x3c   : > { %695 = vmatpush.bf16.msra.mxu3 %v909_v56 }
  0x3e   : > { %702 = vmatpush.bf16.msrb.mxu0 %v1021_v49  ;;  %683 = vmatmul.bf16.vlgmr.msra.gmra.mxu2 %v405_v55 }
  0x3f   : > { %715 = vmatpush.bf16.msrb.mxu1 %v1085_v50  ;;  %696 = vmatmul.bf16.vlgmr.msra.gmra.mxu3 %v403_v42 }
  0x42   : > { %703 = vmatpush.bf16.msrb.mxu0 %v1013_v57 }
  0x43   : > { %716 = vmatpush.bf16.msrb.mxu1 %v1077_v58 }
  0x46   : > { %704 = vmatpush.bf16.msrb.mxu0 %v1005_v63 }
  0x47   : > { %717 = vmatpush.bf16.msrb.mxu1 %v1069_v0 }
  0x4a   : > { %705 = vmatpush.bf16.msrb.mxu0 %v997_v5 }
  0x4b   : > { %718 = vmatpush.bf16.msrb.mxu1 %v1061_v6 }
  0x4e   : > { %706 = vmatpush.bf16.msrb.mxu0 %v989_v11 }
  0x4f   : > { %719 = vmatpush.bf16.msrb.mxu1 %v1053_v12 }
  0x52   : > { %707 = vmatpush.bf16.msrb.mxu0 %v981_v17 }
  0x53   : > { %720 = vmatpush.bf16.msrb.mxu1 %v1045_v18 }
  0x56   : > { %708 = vmatpush.bf16.msrb.mxu0 %v973_v23 }
  0x57   : > { %721 = vmatpush.bf16.msrb.mxu1 %v1037_v24 }
  0x59   : > { %709 = vmatmul.bf16.vlgmr.msrb.gmra.mxu0 %v1328_v45 }
  0x5a   : > { %722 = vmatmul.bf16.vlgmr.msrb.gmra.mxu1 %v405_v55 }
  0xb6   : > { %v658_v25 = vpop.f32.mrf.mxu0 }
  0xb7   : > { %v671_v26 = vpop.f32.mrf.mxu1 }
  0xb8   : > { %v672_v27 = vadd.f32 %v671_v26, %v658_v25 }
  0xbe   : > { %v660_v28 = vpop.f32.mrf.mxu0 }
  0xbf   : > { %v673_v29 = vpop.f32.mrf.mxu1 }
  0xc1   : > { %v684_v31 = vpop.f32.mrf.mxu2 }
  0xc2   : > { %v685_v32 = vadd.f32 %v684_v31, %v672_v27  ;;  %v697_v34 = vpop.f32.mrf.mxu3 }
  0xc4   : > { %v727_v33 = vadd.f32 %v685_v32, %v346_v30 }
  0xc6   : > { %729 = vst [vmem:[#allocation2] sm:$0xff] %v727_v33 }
  0xc9   : > { %v686_v35 = vpop.f32.mrf.mxu2 }
  0xca   : > { %v699_v36 = vpop.f32.mrf.mxu3 }
  0xd6   : > { %v710_v37 = vpop.f32.mrf.mxu0 }
  0xd7   : > { %v711_v38 = vadd.f32 %v710_v37, %v697_v34  ;;  %v723_v39 = vpop.f32.mrf.mxu1 }
  0xd9   : > { %v724_v41 = vadd.f32 %v723_v39, %v711_v38 }
  0xdb   : > { %v728_v42 = vadd.f32 %v724_v41, %v347_v40  ;;  %734 = sbr.rel (%p1094_p7) target bundleno = 238 (0xee), region = 44 }
  0xdd   : > { %730 = vst [vmem:[#allocation2 + $0x8] sm:$0xff] %v728_v42 }
  0xde   : > { %v712_v43 = vpop.f32.mrf.mxu0 }
  0xdf   : > { %v725_v44 = vpop.f32.mrf.mxu1 }
  0xe0   : > { %v735_v45 = vld [vmem:[#allocation2] sm:$0xff] }
  0xe1   : > { %v737_v47 = vld [vmem:[%s1379_s2] sm:$0x3] }
  0xe2   : > { %v739_v48 = vperm.slane %v737_v47, 0  ;;  %v740_v49 = vperm.slane %v737_v47, 1  ;;  %v745_v50 = vld [vmem:[%s1380_s3] sm:$0xff] }
  0xe3   : > { %v746_v51 = vunpack.c.l.bf16 %v745_v50  ;;  %v747_v52 = vunpack.c.h.bf16 %v745_v50 }
  0xe4   : > { %v736_v46 = vld [vmem:[#allocation2 + $0x8] sm:$0xff]  ;;  %v743_v53 = vadd.f32 %v739_v48, %v735_v45 }
  0xe5   : > { %v744_v54 = vadd.f32 %v740_v49, %v736_v46 }
  0xe6   : > { %v748_v55 = vadd.f32 %v746_v51, %v743_v53 }
  0xe7   : > { %v749_v56 = vadd.f32 %v747_v52, %v744_v54 }
  0xe8   : > { %v750_v57 = vmax.f32 %v748_v55, 0.0 }
  0xe9   : > { %v751_v58 = vmax.f32 %v749_v56, 0.0 }
  0xeb   : > { %v752_v59 = vpack.c.bf16 %v751_v58, %v750_v57 }
  0xed   : > { %753 = vst [vmem:[%s1381_s4] sm:$0xff] %v752_v59 }
  0xee PF: > { %s14_s17 = sadd.s32 1, %s1195_s17   ;;  %s1382_s15 = smov %s1191_s16 }
  0xef   : > { %p11_p8 = scmp.ge.s32.totalorder %s14_s17, 8   ;;  %s1383_s16 = smov %s1385_s18 }
  0xf1   :  { %13 = sbr.rel (!%p11_p8) target bundleno = 2 (0x2), region = 83 }

// kernel: resnet_custom_forward.35
= control target key start
LH: loop header
LB: loop body
LE: loop exit
PB: predicated region body
PF: predicated region fallthrough
CT: control target
= control target key end

     0   :  { %s1128_s12 = smov 0   ;;  %s1130_s13 = smov 0   ;;  %s1279_s0 = inlined_call_operand.vmem [shape: bf16[8,2304], index: 0, kind: input, shape index: {}]   ;;  %s1280_s1 = inlined_call_operand.vmem [shape: bf16[2304,256], index: 1, kind: input, shape index: {}]   ;;  %s1281_s2 = inlined_call_operand.vmem [shape: f32[1,256], index: 2, kind: input, shape index: {}]   ;;  %s1282_s3 = inlined_call_operand.vmem [shape: bf16[8,256], index: 3, kind: output, shape index: {}]  }
   0x1   :  { %s1132_s14 = smov 0  }
   0x2 LB: > { %s25_s15 = sadd.s32 1, %s1101_s13  ;;  %p807_p0 = scmp.ge.s32.totalorder %s1105_s14, 1  ;;  %s1105_s14 = sphi %s1132_s14, %s13_s14   ;;  %s1101_s13 = sphi %s1130_s13, %s1284_s13   ;;  %s1097_s12 = sphi %s1128_s12, %s1283_s12  }
   0x3   : > { %p26_p1 = scmp.ge.s32.totalorder %s25_s15, 6  ;;  %p194_p2 = scmp.lt.s32.totalorder %s1105_s14, 7 }
   0x5   : > { %s1286_s15 = smov (%p26_p1, %s25_s15), 0  ;;  %p195_p3 = pnand %p807_p0, %p194_p2 }
   0x6   : > { %s240_s16 = smul.u32 (!%p195_p3), 3, %s1097_s12  ;;  %p811_p6 = scmp.ne.s32.totalorder (!%p195_p3), %s1097_s12, 0 }
   0x7   : > { %198 = sbr.rel (%p195_p3) target bundleno = 236 (0xec), region = 32 }
   0x8   : > { %s250_s17 = smul.u32 (!%p195_p3), 48, %s1097_s12  ;;  %p243_p4 = scmp.lt.s32.totalorder (!%p195_p3), %s240_s16, 17 }
   0xa   : > { %p252_p5 = scmp.lt.s32.totalorder (!%p195_p3), %s250_s17, 287 }
   0xc   : > { %s1288_s16 = smov (!%p243_p4, %s240_s16), 17  ;;  %s1290_s17 = smov (!%p252_p5, %s250_s17), 287 }
   0xd   : > { %s808_s18 = sshll.u32 %s1288_s16, 2  ;;  %s1009_s22 = sshll.u32 %s1290_s17, 3 }
   0xe   : > { %s1153_s21 = scalar_lea.vmem %s1279_s0, %s808_s18  ;;  %s1158_s25 = scalar_lea.vmem %s1280_s1, %s1009_s22 }
   0xf   : > { %280 = sbr.rel (%p811_p6) target bundleno = 23 (0x17), region = 36 }
  0x14   : > { %v1107_v0 = vmov 0.0  }
  0x15   : > { %281 = vst [vmem:[#allocation2] sm:$0xff] %v1107_v0 }
  0x16   : > { %282 = vst [vmem:[#allocation2 + $0x8] sm:$0xff] %v1107_v0 }
  0x17 PF: > { %v870_v1 = vld [vmem:[%s1158_s25 + $0x70] sm:$0xf]  ;;  %v1025_v2 = vld [vmem:[%s1158_s25 + $0x74] sm:$0xf0]  ;;  %v862_v6 = vld [vmem:[%s1158_s25 + $0x60] sm:$0xf] }
  0x18   : > { %v934_v3 = vld [vmem:[%s1158_s25 + $0xf0] sm:$0xf]  ;;  %v871_v4 = vor.u32 %v1025_v2, %v870_v1  ;;  %v1041_v5 = vld [vmem:[%s1158_s25 + $0xf4] sm:$0xf0]  ;;  %v1023_v7 = vld [vmem:[%s1158_s25 + $0x64] sm:$0xf0] }
  0x19   : > { %v935_v8 = vor.u32 %v1041_v5, %v934_v3  ;;  %v926_v9 = vld [vmem:[%s1158_s25 + $0xe0] sm:$0xf]  ;;  %v1039_v10 = vld [vmem:[%s1158_s25 + $0xe4] sm:$0xf0]  ;;  %v863_v11 = vor.u32 %v1023_v7, %v862_v6  ;;  %v854_v12 = vld [vmem:[%s1158_s25 + $0x50] sm:$0xf] }
  0x1a   : > { %586 = vmatpush.bf16.msra.mxu0 %v871_v4  ;;  %v927_v13 = vor.u32 %v1039_v10, %v926_v9  ;;  %v1021_v14 = vld [vmem:[%s1158_s25 + $0x54] sm:$0xf0]  ;;  %v998_v15 = vld [vmem:[%s1158_s25 + $0x170] sm:$0xf]  ;;  %v990_v20 = vld [vmem:[%s1158_s25 + $0x160] sm:$0xf] }
  0x1b   : > { %599 = vmatpush.bf16.msra.mxu1 %v935_v8  ;;  %v1057_v16 = vld [vmem:[%s1158_s25 + $0x174] sm:$0xf0]  ;;  %v918_v17 = vld [vmem:[%s1158_s25 + $0xd0] sm:$0xf]  ;;  %v1055_v21 = vld [vmem:[%s1158_s25 + $0x164] sm:$0xf0]  ;;  %v855_v23 = vor.u32 %v1021_v14, %v854_v12 }
  0x1c   : > { %v1037_v18 = vld [vmem:[%s1158_s25 + $0xd4] sm:$0xf0]  ;;  %v999_v19 = vor.u32 %v1057_v16, %v998_v15  ;;  %v1024_v22 = vld [vmem:[%s1158_s25 + $0x74] sm:$0xf]  ;;  %v846_v24 = vld [vmem:[%s1158_s25 + $0x40] sm:$0xf]  ;;  %v991_v26 = vor.u32 %v1055_v21, %v990_v20 }
  0x1d   : > { %v1019_v25 = vld [vmem:[%s1158_s25 + $0x44] sm:$0xf0]  ;;  %v872_v27 = vld [vmem:[%s1158_s25 + $0x78] sm:$0xf0]  ;;  %v919_v28 = vor.u32 %v1037_v18, %v918_v17  ;;  %v910_v29 = vld [vmem:[%s1158_s25 + $0xc0] sm:$0xf] }
  0x1e   : > { %587 = vmatpush.bf16.msra.mxu0 %v863_v11  ;;  %612 = vmatpush.bf16.msra.mxu2 %v999_v19  ;;  %v1035_v30 = vld [vmem:[%s1158_s25 + $0xc4] sm:$0xf0]  ;;  %v875_v31 = vor.u32 %v1024_v22, %v872_v27  ;;  %v982_v32 = vld [vmem:[%s1158_s25 + $0x150] sm:$0xf]  ;;  %v1053_v33 = vld [vmem:[%s1158_s25 + $0x154] sm:$0xf0]  ;;  %v847_v37 = vor.u32 %v1019_v25, %v846_v24 }
  0x1f   : > { %600 = vmatpush.bf16.msra.mxu1 %v927_v13  ;;  %v1022_v34 = vld [vmem:[%s1158_s25 + $0x64] sm:$0xf]  ;;  %v864_v35 = vld [vmem:[%s1158_s25 + $0x68] sm:$0xf0]  ;;  %v838_v38 = vld [vmem:[%s1158_s25 + $0x30] sm:$0xf]  ;;  %v983_v40 = vor.u32 %v1053_v33, %v982_v32  ;;  %v911_v42 = vor.u32 %v1035_v30, %v910_v29 }
  0x20   : > { %625 = vmatpush.bf16.msra.mxu3 %v875_v31  ;;  %v867_v36 = vor.u32 %v1022_v34, %v864_v35  ;;  %v1017_v39 = vld [vmem:[%s1158_s25 + $0x34] sm:$0xf0]  ;;  %v974_v41 = vld [vmem:[%s1158_s25 + $0x140] sm:$0xf]  ;;  %v1051_v43 = vld [vmem:[%s1158_s25 + $0x144] sm:$0xf0] }
  0x21   : > { %v1020_v44 = vld [vmem:[%s1158_s25 + $0x54] sm:$0xf]  ;;  %v856_v45 = vld [vmem:[%s1158_s25 + $0x58] sm:$0xf0]  ;;  %v902_v46 = vld [vmem:[%s1158_s25 + $0xb0] sm:$0xf]  ;;  %v839_v49 = vor.u32 %v1017_v39, %v838_v38  ;;  %v975_v51 = vor.u32 %v1051_v43, %v974_v41 }
  0x22   : > { %588 = vmatpush.bf16.msra.mxu0 %v855_v23  ;;  %613 = vmatpush.bf16.msra.mxu2 %v991_v26  ;;  %v1033_v47 = vld [vmem:[%s1158_s25 + $0xb4] sm:$0xf0]  ;;  %v859_v48 = vor.u32 %v1020_v44, %v856_v45  ;;  %v830_v50 = vld [vmem:[%s1158_s25 + $0x20] sm:$0xf]  ;;  %v1018_v52 = vld [vmem:[%s1158_s25 + $0x44] sm:$0xf] }
  0x23   : > { %601 = vmatpush.bf16.msra.mxu1 %v919_v28  ;;  %v848_v53 = vld [vmem:[%s1158_s25 + $0x48] sm:$0xf0]  ;;  %v903_v54 = vor.u32 %v1033_v47, %v902_v46  ;;  %v1015_v55 = vld [vmem:[%s1158_s25 + $0x24] sm:$0xf0]  ;;  %v966_v56 = vld [vmem:[%s1158_s25 + $0x130] sm:$0xf] }
  0x24   : > { %626 = vmatpush.bf16.msra.mxu3 %v867_v36  ;;  %v1049_v57 = vld [vmem:[%s1158_s25 + $0x134] sm:$0xf0]  ;;  %v894_v58 = vld [vmem:[%s1158_s25 + $0xa0] sm:$0xf]  ;;  %v1031_v59 = vld [vmem:[%s1158_s25 + $0xa4] sm:$0xf0]  ;;  %v851_v60 = vor.u32 %v1018_v52, %v848_v53  ;;  %v831_v61 = vor.u32 %v1015_v55, %v830_v50 }
  0x25   : > { %v822_v62 = vld [vmem:[%s1158_s25 + $0x10] sm:$0xf]  ;;  %v967_v63 = vor.u32 %v1049_v57, %v966_v56  ;;  %v1016_v0 = vld [vmem:[%s1158_s25 + $0x34] sm:$0xf]  ;;  %v840_v1 = vld [vmem:[%s1158_s25 + $0x38] sm:$0xf0]  ;;  %v895_v2 = vor.u32 %v1031_v59, %v894_v58 }
  0x26   : > { %589 = vmatpush.bf16.msra.mxu0 %v847_v37  ;;  %614 = vmatpush.bf16.msra.mxu2 %v983_v40  ;;  %v1013_v3 = vld [vmem:[%s1158_s25 + $0x14] sm:$0xf0]  ;;  %v958_v4 = vld [vmem:[%s1158_s25 + $0x120] sm:$0xf]  ;;  %v1047_v5 = vld [vmem:[%s1158_s25 + $0x124] sm:$0xf0]  ;;  %v843_v10 = vor.u32 %v1016_v0, %v840_v1 }
  0x27   : > { %602 = vmatpush.bf16.msra.mxu1 %v911_v42  ;;  %v886_v6 = vld [vmem:[%s1158_s25 + $0x90] sm:$0xf]  ;;  %v1029_v7 = vld [vmem:[%s1158_s25 + $0x94] sm:$0xf0]  ;;  %v814_v8 = vld [vmem:[%s1158_s25] sm:$0xf]  ;;  %v823_v11 = vor.u32 %v1013_v3, %v822_v62  ;;  %v959_v12 = vor.u32 %v1047_v5, %v958_v4 }
  0x28   : > { %627 = vmatpush.bf16.msra.mxu3 %v859_v48  ;;  %v1011_v9 = vld [vmem:[%s1158_s25 + $0x4] sm:$0xf0]  ;;  %v1014_v13 = vld [vmem:[%s1158_s25 + $0x24] sm:$0xf]  ;;  %v832_v14 = vld [vmem:[%s1158_s25 + $0x28] sm:$0xf0]  ;;  %v887_v16 = vor.u32 %v1029_v7, %v886_v6 }
  0x29   : > { %v285_v15 = vld [vmem:[%s1153_s21] sm:$0xff]  ;;  %v950_v18 = vld [vmem:[%s1158_s25 + $0x110] sm:$0xf]  ;;  %v1045_v19 = vld [vmem:[%s1158_s25 + $0x114] sm:$0xf0]  ;;  %v835_v25 = vor.u32 %v1014_v13, %v832_v14  ;;  %v815_v27 = vor.u32 %v1011_v9, %v814_v8  ;;  %p1004_p7 = scmp.ne.s32.totalorder %s1097_s12, 5 }
  0x2a   : > { %590 = vmatpush.bf16.msra.mxu0 %v839_v49  ;;  %615 = vmatpush.bf16.msra.mxu2 %v975_v51  ;;  %v878_v17 = vld [vmem:[%s1158_s25 + $0x80] sm:$0xf]  ;;  %v1027_v20 = vld [vmem:[%s1158_s25 + $0x84] sm:$0xf0]  ;;  %v1040_v21 = vld [vmem:[%s1158_s25 + $0xf4] sm:$0xf]  ;;  %v337_v26 = vunpack.c.l.b16 %v285_v15  ;;  %v951_v28 = vor.u32 %v1045_v19, %v950_v18  ;;  %v338_v29 = vunpack.c.h.b16 %v285_v15 }
  0x2b   : > { %603 = vmatpush.bf16.msra.mxu1 %v903_v54  ;;  %v936_v22 = vld [vmem:[%s1158_s25 + $0xf8] sm:$0xf0]  ;;  %v1056_v23 = vld [vmem:[%s1158_s25 + $0x174] sm:$0xf]  ;;  %v286_v32 = vld [vmem:[%s1153_s21 + $0x8] sm:$0xf]  ;;  %v879_v33 = vor.u32 %v1027_v20, %v878_v17 }
  0x2c   : > { %628 = vmatpush.bf16.msra.mxu3 %v851_v60  ;;  %v1000_v24 = vld [vmem:[%s1158_s25 + $0x178] sm:$0xf0]  ;;  %v1012_v30 = vld [vmem:[%s1158_s25 + $0x14] sm:$0xf]  ;;  %v939_v34 = vor.u32 %v1040_v21, %v936_v22  ;;  %v942_v35 = vld [vmem:[%s1158_s25 + $0x100] sm:$0xf]  ;;  %v340_v42 = vpack.c.b16 %v337_v26, %v337_v26  ;;  %v339_v44 = vunpack.c.l.b16 %v286_v32  ;;  %v1233_v45 = vpack.c.b16 %v338_v29, %v338_v29 }
  0x2d   : > { %v824_v31 = vld [vmem:[%s1158_s25 + $0x18] sm:$0xf0]  ;;  %v1043_v36 = vld [vmem:[%s1158_s25 + $0x104] sm:$0xf0]  ;;  %v1003_v37 = vor.u32 %v1056_v23, %v1000_v24  ;;  %v1038_v38 = vld [vmem:[%s1158_s25 + $0xe4] sm:$0xf] }
  0x2e   : > { %591 = vmatpush.bf16.msra.mxu0 %v831_v61  ;;  %616 = vmatpush.bf16.msra.mxu2 %v967_v63  ;;  %v928_v39 = vld [vmem:[%s1158_s25 + $0xe8] sm:$0xf0]  ;;  %v1054_v40 = vld [vmem:[%s1158_s25 + $0x164] sm:$0xf]  ;;  %v827_v43 = vor.u32 %v1012_v30, %v824_v31  ;;  %v943_v46 = vor.u32 %v1043_v36, %v942_v35  ;;  %v1036_v51 = vld [vmem:[%s1158_s25 + $0xd4] sm:$0xf]  ;;  %v342_v55 = vpack.c.b16 %v339_v44, %v339_v44 }
  0x2f   : > { %604 = vmatpush.bf16.msra.mxu1 %v895_v2  ;;  %v992_v41 = vld [vmem:[%s1158_s25 + $0x168] sm:$0xf0]  ;;  %v1010_v47 = vld [vmem:[%s1158_s25 + $0x4] sm:$0xf]  ;;  %v931_v49 = vor.u32 %v1038_v38, %v928_v39  ;;  %v920_v52 = vld [vmem:[%s1158_s25 + $0xd8] sm:$0xf0] }
  0x30   : > { %629 = vmatpush.bf16.msra.mxu3 %v843_v10  ;;  %v816_v48 = vld [vmem:[%s1158_s25 + $0x8] sm:$0xf0]  ;;  %v995_v50 = vor.u32 %v1054_v40, %v992_v41  ;;  %v1052_v53 = vld [vmem:[%s1158_s25 + $0x154] sm:$0xf]  ;;  %v984_v54 = vld [vmem:[%s1158_s25 + $0x158] sm:$0xf0]  ;;  %v923_v57 = vor.u32 %v1036_v51, %v920_v52 }
  0x31   : > { %v819_v56 = vor.u32 %v1010_v47, %v816_v48  ;;  %v987_v58 = vor.u32 %v1052_v53, %v984_v54  ;;  %v1034_v59 = vld [vmem:[%s1158_s25 + $0xc4] sm:$0xf]  ;;  %v912_v60 = vld [vmem:[%s1158_s25 + $0xc8] sm:$0xf0]  ;;  %v1032_v1 = vld [vmem:[%s1158_s25 + $0xb4] sm:$0xf] }
  0x32   : > { %592 = vmatpush.bf16.msra.mxu0 %v823_v11  ;;  %617 = vmatpush.bf16.msra.mxu2 %v959_v12  ;;  %v1050_v61 = vld [vmem:[%s1158_s25 + $0x144] sm:$0xf]  ;;  %v976_v62 = vld [vmem:[%s1158_s25 + $0x148] sm:$0xf0]  ;;  %v915_v63 = vor.u32 %v1034_v59, %v912_v60  ;;  %v904_v2 = vld [vmem:[%s1158_s25 + $0xb8] sm:$0xf0] }
  0x33   : > { %605 = vmatpush.bf16.msra.mxu1 %v887_v16  ;;  %v979_v0 = vor.u32 %v1050_v61, %v976_v62  ;;  %v1048_v3 = vld [vmem:[%s1158_s25 + $0x134] sm:$0xf]  ;;  %v968_v4 = vld [vmem:[%s1158_s25 + $0x138] sm:$0xf0]  ;;  %v907_v5 = vor.u32 %v1032_v1, %v904_v2  ;;  %v1030_v7 = vld [vmem:[%s1158_s25 + $0xa4] sm:$0xf] }
  0x34   : > { %630 = vmatpush.bf16.msra.mxu3 %v835_v25  ;;  %v971_v6 = vor.u32 %v1048_v3, %v968_v4  ;;  %v896_v8 = vld [vmem:[%s1158_s25 + $0xa8] sm:$0xf0]  ;;  %v1046_v9 = vld [vmem:[%s1158_s25 + $0x124] sm:$0xf]  ;;  %v1028_v13 = vld [vmem:[%s1158_s25 + $0x94] sm:$0xf] }
  0x35   : > { %v960_v10 = vld [vmem:[%s1158_s25 + $0x128] sm:$0xf0]  ;;  %v899_v11 = vor.u32 %v1030_v7, %v896_v8  ;;  %v888_v14 = vld [vmem:[%s1158_s25 + $0x98] sm:$0xf0]  ;;  %v1044_v15 = vld [vmem:[%s1158_s25 + $0x114] sm:$0xf] }
  0x36   : > { %593 = vmatpush.bf16.msra.mxu0 %v815_v27  ;;  %618 = vmatpush.bf16.msra.mxu2 %v951_v28  ;;  %v963_v12 = vor.u32 %v1046_v9, %v960_v10  ;;  %v952_v16 = vld [vmem:[%s1158_s25 + $0x118] sm:$0xf0]  ;;  %v891_v17 = vor.u32 %v1028_v13, %v888_v14  ;;  %v1026_v19 = vld [vmem:[%s1158_s25 + $0x84] sm:$0xf]  ;;  %v880_v20 = vld [vmem:[%s1158_s25 + $0x88] sm:$0xf0] }
  0x37   : > { %606 = vmatpush.bf16.msra.mxu1 %v879_v33  ;;  %v955_v18 = vor.u32 %v1044_v15, %v952_v16  ;;  %v1042_v21 = vld [vmem:[%s1158_s25 + $0x104] sm:$0xf]  ;;  %v944_v22 = vld [vmem:[%s1158_s25 + $0x108] sm:$0xf0]  ;;  %v883_v23 = vor.u32 %v1026_v19, %v880_v20 }
  0x38   : > { %631 = vmatpush.bf16.msra.mxu3 %v827_v43  ;;  %v947_v24 = vor.u32 %v1042_v21, %v944_v22  ;;  %v283_v30 = vld [vmem:[#allocation2] sm:$0xff]  ;;  %v284_v40 = vld [vmem:[#allocation2 + $0x8] sm:$0xff] }
  0x39   : > { %594 = vmatmul.bf16.vlgmr.msra.gmra.mxu0 %v340_v42 }
  0x3a   : > { %638 = vmatpush.bf16.msrb.mxu0 %v939_v34  ;;  %607 = vmatmul.bf16.vlgmr.msra.gmra.mxu1 %v1233_v45 }
  0x3b   : > { %651 = vmatpush.bf16.msrb.mxu1 %v1003_v37  ;;  %619 = vmatpush.bf16.msra.mxu2 %v943_v46 }
  0x3c   : > { %632 = vmatpush.bf16.msra.mxu3 %v819_v56 }
  0x3e   : > { %639 = vmatpush.bf16.msrb.mxu0 %v931_v49  ;;  %620 = vmatmul.bf16.vlgmr.msra.gmra.mxu2 %v342_v55 }
  0x3f   : > { %652 = vmatpush.bf16.msrb.mxu1 %v995_v50  ;;  %633 = vmatmul.bf16.vlgmr.msra.gmra.mxu3 %v340_v42 }
  0x42   : > { %640 = vmatpush.bf16.msrb.mxu0 %v923_v57 }
  0x43   : > { %653 = vmatpush.bf16.msrb.mxu1 %v987_v58 }
  0x46   : > { %641 = vmatpush.bf16.msrb.mxu0 %v915_v63 }
  0x47   : > { %654 = vmatpush.bf16.msrb.mxu1 %v979_v0 }
  0x4a   : > { %642 = vmatpush.bf16.msrb.mxu0 %v907_v5 }
  0x4b   : > { %655 = vmatpush.bf16.msrb.mxu1 %v971_v6 }
  0x4e   : > { %643 = vmatpush.bf16.msrb.mxu0 %v899_v11 }
  0x4f   : > { %656 = vmatpush.bf16.msrb.mxu1 %v963_v12 }
  0x52   : > { %644 = vmatpush.bf16.msrb.mxu0 %v891_v17 }
  0x53   : > { %657 = vmatpush.bf16.msrb.mxu1 %v955_v18 }
  0x56   : > { %645 = vmatpush.bf16.msrb.mxu0 %v883_v23 }
  0x57   : > { %658 = vmatpush.bf16.msrb.mxu1 %v947_v24 }
  0x59   : > { %646 = vmatmul.bf16.vlgmr.msrb.gmra.mxu0 %v1233_v45 }
  0x5a   : > { %659 = vmatmul.bf16.vlgmr.msrb.gmra.mxu1 %v342_v55 }
  0xb6   : > { %v595_v25 = vpop.f32.mrf.mxu0 }
  0xb7   : > { %v608_v26 = vpop.f32.mrf.mxu1 }
  0xb8   : > { %v609_v27 = vadd.f32 %v608_v26, %v595_v25 }
  0xbe   : > { %v597_v28 = vpop.f32.mrf.mxu0 }
  0xbf   : > { %v610_v29 = vpop.f32.mrf.mxu1 }
  0xc1   : > { %v621_v31 = vpop.f32.mrf.mxu2 }
  0xc2   : > { %v622_v32 = vadd.f32 %v621_v31, %v609_v27  ;;  %v634_v34 = vpop.f32.mrf.mxu3 }
  0xc4   : > { %v664_v33 = vadd.f32 %v622_v32, %v283_v30 }
  0xc6   : > { %666 = vst [vmem:[#allocation2] sm:$0xff] %v664_v33 }
  0xc9   : > { %v623_v35 = vpop.f32.mrf.mxu2 }
  0xca   : > { %v636_v36 = vpop.f32.mrf.mxu3 }
  0xd6   : > { %v647_v37 = vpop.f32.mrf.mxu0 }
  0xd7   : > { %v648_v38 = vadd.f32 %v647_v37, %v634_v34  ;;  %v660_v39 = vpop.f32.mrf.mxu1 }
  0xd9   : > { %v661_v41 = vadd.f32 %v660_v39, %v648_v38 }
  0xdb   : > { %v665_v42 = vadd.f32 %v661_v41, %v284_v40  ;;  %671 = sbr.rel (%p1004_p7) target bundleno = 236 (0xec), region = 40 }
  0xdd   : > { %667 = vst [vmem:[#allocation2 + $0x8] sm:$0xff] %v665_v42 }
  0xde   : > { %v649_v43 = vpop.f32.mrf.mxu0 }
  0xdf   : > { %v662_v44 = vpop.f32.mrf.mxu1 }
  0xe0   : > { %v672_v45 = vld [vmem:[#allocation2] sm:$0xff] }
  0xe1   : > { %v674_v47 = vld [vmem:[%s1281_s2] sm:$0x3] }
  0xe2   : > { %v676_v48 = vperm.slane %v674_v47, 0  ;;  %v677_v49 = vperm.slane %v674_v47, 1 }
  0xe4   : > { %v673_v46 = vld [vmem:[#allocation2 + $0x8] sm:$0xff]  ;;  %v680_v50 = vadd.f32 %v676_v48, %v672_v45 }
  0xe5   : > { %v681_v51 = vadd.f32 %v677_v49, %v673_v46 }
  0xe6   : > { %v682_v52 = vmax.f32 %v680_v50, 0.0 }
  0xe7   : > { %v683_v53 = vmax.f32 %v681_v51, 0.0 }
  0xe9   : > { %v684_v54 = vpack.c.bf16 %v683_v53, %v682_v52 }
  0xeb   : > { %685 = vst [vmem:[%s1282_s3] sm:$0xff] %v684_v54 }
  0xec PF: > { %s13_s14 = sadd.s32 1, %s1105_s14   ;;  %s1283_s12 = smov %s1101_s13 }
  0xed   : > { %p10_p8 = scmp.ge.s32.totalorder %s13_s14, 8   ;;  %s1284_s13 = smov %s1286_s15 }
  0xef   :  { %12 = sbr.rel (!%p10_p8) target bundleno = 2 (0x2), region = 76 }

// kernel: resnet_custom_forward.38
= control target key start
LH: loop header
LB: loop body
LE: loop exit
PB: predicated region body
PF: predicated region fallthrough
CT: control target
= control target key end

     0   :  { %s1412_s12 = smov 0   ;;  %s1414_s13 = smov 0   ;;  %s1727_s0 = inlined_call_operand.vmem [shape: bf16[8,2304], index: 0, kind: input, shape index: {}]   ;;  %s1728_s1 = inlined_call_operand.vmem [shape: bf16[2304,512], index: 1, kind: input, shape index: {}]   ;;  %s1729_s2 = inlined_call_operand.vmem [shape: f32[1,512], index: 2, kind: input, shape index: {}]   ;;  %s1730_s3 = inlined_call_operand.vmem [shape: bf16[8,512], index: 3, kind: output, shape index: {}]  }
   0x1   :  { %s1416_s14 = smov 0   ;;  %s1418_s15 = smov 0  }
   0x2   :  { %s1420_s16 = smov 0   ;;  %s1422_s17 = smov 0  }
   0x3   :  { %s1424_s18 = smov 0  }
   0x4 LB: > { %s25_s19 = sadd.s32 1, %s1381_s16  ;;  %s28_s20 = sadd.s32 1, %s1385_s17  ;;  %s1389_s18 = sphi %s1424_s18, %s13_s18   ;;  %s1385_s17 = sphi %s1422_s17, %s1736_s17   ;;  %s1381_s16 = sphi %s1420_s16, %s1735_s16   ;;  %s1377_s15 = sphi %s1418_s15, %s1734_s15   ;;  %s1373_s14 = sphi %s1416_s14, %s1733_s14   ;;  %s1369_s13 = sphi %s1414_s13, %s1732_s13   ;;  %s1365_s12 = sphi %s1412_s12, %s1731_s12  }
   0x5   : > { %p26_p0 = scmp.ge.s32.totalorder %s25_s19, 6  ;;  %p76_p1 = scmp.ne.s32.totalorder %s1369_s13, %s1365_s12 }
   0x6   : > { %p77_p2 = scmp.eq.s32.totalorder %s1389_s18, 0  ;;  %s69_s24 = sadd.s32 1, %s1369_s13 }
   0x7   : > { %s1738_s19 = smov (%p26_p0, %s25_s19), 0  ;;  %s1740_s20 = smov (!%p26_p0, %s28_s20), %s1385_s17 }
   0x8   : > { %p78_p3 = por %p77_p2, %p76_p1  ;;  %p30_p4 = scmp.ge.s32.totalorder %s1740_s20, 2 }
   0x9   : > { %s64_s21 = ssub.s32 %s1381_s16, %s1738_s19  ;;  %p1022_p6 = scmp.ge.s32.totalorder %s1389_s18, 12 }
   0xa   : > { %s1742_s20 = smov (%p30_p4, %s1740_s20), 0 }
   0xb   : > { %s65_s22 = ssub.s32 %s1385_s17, %s1742_s20  ;;  %156 = sbr.rel (%p1022_p6) target bundleno = 72 (0x48), region = 16 }
   0xc   : > { %s66_s23 = sor.u32 %s65_s22, %s64_s21 }
   0xd   : > { %p67_p5 = scmp.eq.s32.totalorder %s66_s23, 0 }
   0xf   : > { %s1463_s25 = scalar_select %p67_p5, %s1369_s13, %s69_s24  }
  0x10   : > { %172 = sbr.rel (!%p78_p3) target bundleno = 72 (0x48), region = 24  ;;  %s174_s26 = sand.u32 (%p78_p3), 1, %s1369_s13  }
  0x11   : > { %s1276_s27 = smul.u32 (%p78_p3), 384, %s174_s26  ;;  %s1023_s28 = sshll.u32 (%p78_p3), %s1385_s17, 1 }
  0x12   : > { %s1227_s29 = smul.u32 (%p78_p3), 192, %s1381_s16 }
  0x13   : > { %s1477_s8 = scalar_lea.vmem (%p78_p3), [#allocation3], %s1276_s27 }
  0x14   : > { %s180_s30 = sadd.s32 (%p78_p3), %s1227_s29, %s1023_s28 }
  0x15   : > { %s1025_s4 = sshll.u32 %s180_s30, 2 }
  0x16   : > { %s1472_s7 = scalar_lea.vmem %s1728_s1, %s1025_s4 }
  0x17   : > { %v305_v0 = vld [vmem:[%s1472_s7] sm:$0xff]  ;;  %v307_v1 = vld [vmem:[%s1472_s7 + $0x10] sm:$0xff] }
  0x18   : > { %v309_v2 = vld [vmem:[%s1472_s7 + $0x20] sm:$0xff]  ;;  %306 = vst [vmem:[%s1477_s8] sm:$0xff] %v305_v0  ;;  %v311_v3 = vld [vmem:[%s1472_s7 + $0x30] sm:$0xff] }
  0x19   : > { %308 = vst [vmem:[%s1477_s8 + $0x8] sm:$0xff] %v307_v1  ;;  %v313_v4 = vld [vmem:[%s1472_s7 + $0x40] sm:$0xff]  ;;  %v315_v5 = vld [vmem:[%s1472_s7 + $0x50] sm:$0xff] }
  0x1a   : > { %310 = vst [vmem:[%s1477_s8 + $0x10] sm:$0xff] %v309_v2  ;;  %v317_v6 = vld [vmem:[%s1472_s7 + $0x60] sm:$0xff]  ;;  %v319_v7 = vld [vmem:[%s1472_s7 + $0x70] sm:$0xff] }
  0x1b   : > { %312 = vst [vmem:[%s1477_s8 + $0x18] sm:$0xff] %v311_v3  ;;  %v321_v8 = vld [vmem:[%s1472_s7 + $0x80] sm:$0xff]  ;;  %v323_v9 = vld [vmem:[%s1472_s7 + $0x90] sm:$0xff] }
  0x1c   : > { %314 = vst [vmem:[%s1477_s8 + $0x20] sm:$0xff] %v313_v4  ;;  %v325_v10 = vld [vmem:[%s1472_s7 + $0xa0] sm:$0xff]  ;;  %v327_v11 = vld [vmem:[%s1472_s7 + $0xb0] sm:$0xff] }
  0x1d   : > { %316 = vst [vmem:[%s1477_s8 + $0x28] sm:$0xff] %v315_v5  ;;  %v329_v12 = vld [vmem:[%s1472_s7 + $0xc0] sm:$0xff]  ;;  %v331_v13 = vld [vmem:[%s1472_s7 + $0xd0] sm:$0xff] }
  0x1e   : > { %318 = vst [vmem:[%s1477_s8 + $0x30] sm:$0xff] %v317_v6  ;;  %v333_v14 = vld [vmem:[%s1472_s7 + $0xe0] sm:$0xff]  ;;  %v335_v15 = vld [vmem:[%s1472_s7 + $0xf0] sm:$0xff] }
  0x1f   : > { %320 = vst [vmem:[%s1477_s8 + $0x38] sm:$0xff] %v319_v7  ;;  %v337_v16 = vld [vmem:[%s1472_s7 + $0x100] sm:$0xff]  ;;  %v339_v17 = vld [vmem:[%s1472_s7 + $0x110] sm:$0xff] }
  0x20   : > { %322 = vst [vmem:[%s1477_s8 + $0x40] sm:$0xff] %v321_v8  ;;  %v341_v18 = vld [vmem:[%s1472_s7 + $0x120] sm:$0xff]  ;;  %v343_v19 = vld [vmem:[%s1472_s7 + $0x130] sm:$0xff] }
  0x21   : > { %324 = vst [vmem:[%s1477_s8 + $0x48] sm:$0xff] %v323_v9  ;;  %v345_v20 = vld [vmem:[%s1472_s7 + $0x140] sm:$0xff]  ;;  %v347_v21 = vld [vmem:[%s1472_s7 + $0x150] sm:$0xff] }
  0x22   : > { %326 = vst [vmem:[%s1477_s8 + $0x50] sm:$0xff] %v325_v10  ;;  %v349_v22 = vld [vmem:[%s1472_s7 + $0x160] sm:$0xff]  ;;  %v351_v23 = vld [vmem:[%s1472_s7 + $0x170] sm:$0xff] }
  0x23   : > { %328 = vst [vmem:[%s1477_s8 + $0x58] sm:$0xff] %v327_v11  ;;  %v353_v24 = vld [vmem:[%s1472_s7 + $0x180] sm:$0xff]  ;;  %v355_v25 = vld [vmem:[%s1472_s7 + $0x190] sm:$0xff] }
  0x24   : > { %330 = vst [vmem:[%s1477_s8 + $0x60] sm:$0xff] %v329_v12  ;;  %v357_v26 = vld [vmem:[%s1472_s7 + $0x1a0] sm:$0xff]  ;;  %v359_v27 = vld [vmem:[%s1472_s7 + $0x1b0] sm:$0xff] }
  0x25   : > { %332 = vst [vmem:[%s1477_s8 + $0x68] sm:$0xff] %v331_v13  ;;  %v361_v28 = vld [vmem:[%s1472_s7 + $0x1c0] sm:$0xff]  ;;  %v363_v29 = vld [vmem:[%s1472_s7 + $0x1d0] sm:$0xff] }
  0x26   : > { %334 = vst [vmem:[%s1477_s8 + $0x70] sm:$0xff] %v333_v14  ;;  %v365_v30 = vld [vmem:[%s1472_s7 + $0x1e0] sm:$0xff]  ;;  %v367_v31 = vld [vmem:[%s1472_s7 + $0x1f0] sm:$0xff] }
  0x27   : > { %336 = vst [vmem:[%s1477_s8 + $0x78] sm:$0xff] %v335_v15  ;;  %v369_v32 = vld [vmem:[%s1472_s7 + $0x200] sm:$0xff]  ;;  %v371_v33 = vld [vmem:[%s1472_s7 + $0x210] sm:$0xff] }
  0x28   : > { %338 = vst [vmem:[%s1477_s8 + $0x80] sm:$0xff] %v337_v16  ;;  %v373_v34 = vld [vmem:[%s1472_s7 + $0x220] sm:$0xff]  ;;  %v375_v35 = vld [vmem:[%s1472_s7 + $0x230] sm:$0xff] }
  0x29   : > { %340 = vst [vmem:[%s1477_s8 + $0x88] sm:$0xff] %v339_v17  ;;  %v377_v36 = vld [vmem:[%s1472_s7 + $0x240] sm:$0xff]  ;;  %v379_v37 = vld [vmem:[%s1472_s7 + $0x250] sm:$0xff] }
  0x2a   : > { %342 = vst [vmem:[%s1477_s8 + $0x90] sm:$0xff] %v341_v18  ;;  %v381_v38 = vld [vmem:[%s1472_s7 + $0x260] sm:$0xff]  ;;  %v383_v39 = vld [vmem:[%s1472_s7 + $0x270] sm:$0xff] }
  0x2b   : > { %344 = vst [vmem:[%s1477_s8 + $0x98] sm:$0xff] %v343_v19  ;;  %v385_v40 = vld [vmem:[%s1472_s7 + $0x280] sm:$0xff]  ;;  %v387_v41 = vld [vmem:[%s1472_s7 + $0x290] sm:$0xff] }
  0x2c   : > { %346 = vst [vmem:[%s1477_s8 + $0xa0] sm:$0xff] %v345_v20  ;;  %v389_v42 = vld [vmem:[%s1472_s7 + $0x2a0] sm:$0xff]  ;;  %v391_v43 = vld [vmem:[%s1472_s7 + $0x2b0] sm:$0xff] }
  0x2d   : > { %348 = vst [vmem:[%s1477_s8 + $0xa8] sm:$0xff] %v347_v21  ;;  %v393_v44 = vld [vmem:[%s1472_s7 + $0x2c0] sm:$0xff]  ;;  %v395_v45 = vld [vmem:[%s1472_s7 + $0x2d0] sm:$0xff] }
  0x2e   : > { %350 = vst [vmem:[%s1477_s8 + $0xb0] sm:$0xff] %v349_v22  ;;  %v397_v46 = vld [vmem:[%s1472_s7 + $0x2e0] sm:$0xff]  ;;  %v399_v47 = vld [vmem:[%s1472_s7 + $0x2f0] sm:$0xff] }
  0x2f   : > { %352 = vst [vmem:[%s1477_s8 + $0xb8] sm:$0xff] %v351_v23 }
  0x30   : > { %354 = vst [vmem:[%s1477_s8 + $0xc0] sm:$0xff] %v353_v24 }
  0x31   : > { %356 = vst [vmem:[%s1477_s8 + $0xc8] sm:$0xff] %v355_v25 }
  0x32   : > { %358 = vst [vmem:[%s1477_s8 + $0xd0] sm:$0xff] %v357_v26 }
  0x33   : > { %360 = vst [vmem:[%s1477_s8 + $0xd8] sm:$0xff] %v359_v27 }
  0x34   : > { %362 = vst [vmem:[%s1477_s8 + $0xe0] sm:$0xff] %v361_v28 }
  0x35   : > { %364 = vst [vmem:[%s1477_s8 + $0xe8] sm:$0xff] %v363_v29 }
  0x36   : > { %366 = vst [vmem:[%s1477_s8 + $0xf0] sm:$0xff] %v365_v30 }
  0x37   : > { %368 = vst [vmem:[%s1477_s8 + $0xf8] sm:$0xff] %v367_v31 }
  0x38   : > { %370 = vst [vmem:[%s1477_s8 + $0x100] sm:$0xff] %v369_v32 }
  0x39   : > { %372 = vst [vmem:[%s1477_s8 + $0x108] sm:$0xff] %v371_v33 }
  0x3a   : > { %374 = vst [vmem:[%s1477_s8 + $0x110] sm:$0xff] %v373_v34 }
  0x3b   : > { %376 = vst [vmem:[%s1477_s8 + $0x118] sm:$0xff] %v375_v35 }
  0x3c   : > { %378 = vst [vmem:[%s1477_s8 + $0x120] sm:$0xff] %v377_v36 }
  0x3d   : > { %380 = vst [vmem:[%s1477_s8 + $0x128] sm:$0xff] %v379_v37 }
  0x3e   : > { %382 = vst [vmem:[%s1477_s8 + $0x130] sm:$0xff] %v381_v38 }
  0x3f   : > { %384 = vst [vmem:[%s1477_s8 + $0x138] sm:$0xff] %v383_v39 }
  0x40   : > { %386 = vst [vmem:[%s1477_s8 + $0x140] sm:$0xff] %v385_v40 }
  0x41   : > { %388 = vst [vmem:[%s1477_s8 + $0x148] sm:$0xff] %v387_v41 }
  0x42   : > { %390 = vst [vmem:[%s1477_s8 + $0x150] sm:$0xff] %v389_v42 }
  0x43   : > { %392 = vst [vmem:[%s1477_s8 + $0x158] sm:$0xff] %v391_v43 }
  0x44   : > { %394 = vst [vmem:[%s1477_s8 + $0x160] sm:$0xff] %v393_v44 }
  0x45   : > { %396 = vst [vmem:[%s1477_s8 + $0x168] sm:$0xff] %v395_v45 }
  0x46   : > { %398 = vst [vmem:[%s1477_s8 + $0x170] sm:$0xff] %v397_v46 }
  0x47   : > { %400 = vst [vmem:[%s1477_s8 + $0x178] sm:$0xff] %v399_v47 }
  0x48 PF: > { %p1026_p7 = scmp.ge.s32.totalorder %s1389_s18, 1  ;;  %p413_p8 = scmp.lt.s32.totalorder %s1389_s18, 13 }
  0x4a   : > { %p414_p9 = pnand %p1026_p7, %p413_p8 }
  0x4b   : > { %s420_s9 = sand.u32 (!%p414_p9), 1, %s1365_s12   ;;  %s460_s10 = smul.u32 (!%p414_p9), 3, %s1373_s14 }
  0x4c   : > { %417 = sbr.rel (%p414_p9) target bundleno = 305 (0x131), region = 66  ;;  %s1028_s21 = sshll.u32 (!%p414_p9), %s1377_s15, 1 }
  0x4d   : > { %s1277_s11 = smul.u32 (!%p414_p9), 384, %s420_s9  ;;  %p463_p10 = scmp.lt.s32.totalorder (!%p414_p9), %s460_s10, 17 }
  0x4e   : > { %p473_p11 = scmp.lt.s32.totalorder (!%p414_p9), %s1028_s21, 3  ;;  %p1031_p12 = scmp.ne.s32.totalorder (!%p414_p9), %s1373_s14, 0 }
  0x4f   : > { %s1594_s5 = scalar_lea.vmem (!%p414_p9), [#allocation3], %s1277_s11 }
  0x51   : > { %s1744_s10 = smov (!%p463_p10, %s460_s10), 17  ;;  %s1746_s21 = smov (!%p473_p11, %s1028_s21), 3 }
  0x52   : > { %s1027_s22 = sshll.u32 %s1744_s10, 2  ;;  %s475_s12 = scalar_lea.vmem %s1729_s2, %s1746_s21 }
  0x53   : > { %s1582_s26 = scalar_lea.vmem %s1727_s0, %s1027_s22  ;;  %s1030_s29 = sshll.u32 %s1746_s21, 2 }
  0x54   : > { %s1592_s4 = scalar_lea.vmem %s1730_s3, %s1030_s29  ;;  %490 = sbr.rel (%p1031_p12) target bundleno = 92 (0x5c), region = 74 }
  0x59   : > { %v1391_v48 = vmov 0.0  }
  0x5a   : > { %491 = vst [vmem:[#allocation2] sm:$0xff] %v1391_v48 }
  0x5b   : > { %492 = vst [vmem:[#allocation2 + $0x8] sm:$0xff] %v1391_v48 }
  0x5c PF: > { %v1090_v49 = vld [vmem:[%s1594_s5 + $0x70] sm:$0xf]  ;;  %v1243_v50 = vld [vmem:[%s1594_s5 + $0x74] sm:$0xf0]  ;;  %v1082_v54 = vld [vmem:[%s1594_s5 + $0x60] sm:$0xf] }
  0x5d   : > { %v1154_v51 = vld [vmem:[%s1594_s5 + $0xf0] sm:$0xf]  ;;  %v1091_v52 = vor.u32 %v1243_v50, %v1090_v49  ;;  %v1259_v53 = vld [vmem:[%s1594_s5 + $0xf4] sm:$0xf0]  ;;  %v1241_v55 = vld [vmem:[%s1594_s5 + $0x64] sm:$0xf0] }
  0x5e   : > { %v1155_v56 = vor.u32 %v1259_v53, %v1154_v51  ;;  %v1146_v57 = vld [vmem:[%s1594_s5 + $0xe0] sm:$0xf]  ;;  %v1257_v58 = vld [vmem:[%s1594_s5 + $0xe4] sm:$0xf0]  ;;  %v1083_v59 = vor.u32 %v1241_v55, %v1082_v54  ;;  %v1074_v60 = vld [vmem:[%s1594_s5 + $0x50] sm:$0xf] }
  0x5f   : > { %796 = vmatpush.bf16.msra.mxu0 %v1091_v52  ;;  %v1147_v61 = vor.u32 %v1257_v58, %v1146_v57  ;;  %v1239_v62 = vld [vmem:[%s1594_s5 + $0x54] sm:$0xf0]  ;;  %v1218_v63 = vld [vmem:[%s1594_s5 + $0x170] sm:$0xf]  ;;  %v1210_v4 = vld [vmem:[%s1594_s5 + $0x160] sm:$0xf] }
  0x60   : > { %809 = vmatpush.bf16.msra.mxu1 %v1155_v56  ;;  %v1275_v0 = vld [vmem:[%s1594_s5 + $0x174] sm:$0xf0]  ;;  %v1138_v1 = vld [vmem:[%s1594_s5 + $0xd0] sm:$0xf]  ;;  %v1273_v5 = vld [vmem:[%s1594_s5 + $0x164] sm:$0xf0]  ;;  %v1075_v7 = vor.u32 %v1239_v62, %v1074_v60 }
  0x61   : > { %v1255_v2 = vld [vmem:[%s1594_s5 + $0xd4] sm:$0xf0]  ;;  %v1219_v3 = vor.u32 %v1275_v0, %v1218_v63  ;;  %v1242_v6 = vld [vmem:[%s1594_s5 + $0x74] sm:$0xf]  ;;  %v1066_v8 = vld [vmem:[%s1594_s5 + $0x40] sm:$0xf]  ;;  %v1211_v10 = vor.u32 %v1273_v5, %v1210_v4 }
  0x62   : > { %v1237_v9 = vld [vmem:[%s1594_s5 + $0x44] sm:$0xf0]  ;;  %v1092_v11 = vld [vmem:[%s1594_s5 + $0x78] sm:$0xf0]  ;;  %v1139_v12 = vor.u32 %v1255_v2, %v1138_v1  ;;  %v1130_v13 = vld [vmem:[%s1594_s5 + $0xc0] sm:$0xf] }
  0x63   : > { %797 = vmatpush.bf16.msra.mxu0 %v1083_v59  ;;  %822 = vmatpush.bf16.msra.mxu2 %v1219_v3  ;;  %v1253_v14 = vld [vmem:[%s1594_s5 + $0xc4] sm:$0xf0]  ;;  %v1095_v15 = vor.u32 %v1242_v6, %v1092_v11  ;;  %v1202_v16 = vld [vmem:[%s1594_s5 + $0x150] sm:$0xf]  ;;  %v1271_v17 = vld [vmem:[%s1594_s5 + $0x154] sm:$0xf0]  ;;  %v1067_v21 = vor.u32 %v1237_v9, %v1066_v8 }
  0x64   : > { %810 = vmatpush.bf16.msra.mxu1 %v1147_v61  ;;  %v1240_v18 = vld [vmem:[%s1594_s5 + $0x64] sm:$0xf]  ;;  %v1084_v19 = vld [vmem:[%s1594_s5 + $0x68] sm:$0xf0]  ;;  %v1058_v22 = vld [vmem:[%s1594_s5 + $0x30] sm:$0xf]  ;;  %v1203_v24 = vor.u32 %v1271_v17, %v1202_v16  ;;  %v1131_v26 = vor.u32 %v1253_v14, %v1130_v13 }
  0x65   : > { %835 = vmatpush.bf16.msra.mxu3 %v1095_v15  ;;  %v1087_v20 = vor.u32 %v1240_v18, %v1084_v19  ;;  %v1235_v23 = vld [vmem:[%s1594_s5 + $0x34] sm:$0xf0]  ;;  %v1194_v25 = vld [vmem:[%s1594_s5 + $0x140] sm:$0xf]  ;;  %v1269_v27 = vld [vmem:[%s1594_s5 + $0x144] sm:$0xf0] }
  0x66   : > { %v1238_v28 = vld [vmem:[%s1594_s5 + $0x54] sm:$0xf]  ;;  %v1076_v29 = vld [vmem:[%s1594_s5 + $0x58] sm:$0xf0]  ;;  %v1122_v30 = vld [vmem:[%s1594_s5 + $0xb0] sm:$0xf]  ;;  %v1059_v33 = vor.u32 %v1235_v23, %v1058_v22  ;;  %v1195_v35 = vor.u32 %v1269_v27, %v1194_v25 }
  0x67   : > { %798 = vmatpush.bf16.msra.mxu0 %v1075_v7  ;;  %823 = vmatpush.bf16.msra.mxu2 %v1211_v10  ;;  %v1251_v31 = vld [vmem:[%s1594_s5 + $0xb4] sm:$0xf0]  ;;  %v1079_v32 = vor.u32 %v1238_v28, %v1076_v29  ;;  %v1050_v34 = vld [vmem:[%s1594_s5 + $0x20] sm:$0xf]  ;;  %v1236_v36 = vld [vmem:[%s1594_s5 + $0x44] sm:$0xf] }
  0x68   : > { %811 = vmatpush.bf16.msra.mxu1 %v1139_v12  ;;  %v1068_v37 = vld [vmem:[%s1594_s5 + $0x48] sm:$0xf0]  ;;  %v1123_v38 = vor.u32 %v1251_v31, %v1122_v30  ;;  %v1233_v39 = vld [vmem:[%s1594_s5 + $0x24] sm:$0xf0]  ;;  %v1186_v40 = vld [vmem:[%s1594_s5 + $0x130] sm:$0xf] }
  0x69   : > { %836 = vmatpush.bf16.msra.mxu3 %v1087_v20  ;;  %v1267_v41 = vld [vmem:[%s1594_s5 + $0x134] sm:$0xf0]  ;;  %v1114_v42 = vld [vmem:[%s1594_s5 + $0xa0] sm:$0xf]  ;;  %v1249_v43 = vld [vmem:[%s1594_s5 + $0xa4] sm:$0xf0]  ;;  %v1071_v44 = vor.u32 %v1236_v36, %v1068_v37  ;;  %v1051_v45 = vor.u32 %v1233_v39, %v1050_v34 }
  0x6a   : > { %v1042_v46 = vld [vmem:[%s1594_s5 + $0x10] sm:$0xf]  ;;  %v1187_v47 = vor.u32 %v1267_v41, %v1186_v40  ;;  %v1234_v48 = vld [vmem:[%s1594_s5 + $0x34] sm:$0xf]  ;;  %v1060_v49 = vld [vmem:[%s1594_s5 + $0x38] sm:$0xf0]  ;;  %v1115_v50 = vor.u32 %v1249_v43, %v1114_v42 }
  0x6b   : > { %799 = vmatpush.bf16.msra.mxu0 %v1067_v21  ;;  %824 = vmatpush.bf16.msra.mxu2 %v1203_v24  ;;  %v1231_v51 = vld [vmem:[%s1594_s5 + $0x14] sm:$0xf0]  ;;  %v1178_v52 = vld [vmem:[%s1594_s5 + $0x120] sm:$0xf]  ;;  %v1265_v53 = vld [vmem:[%s1594_s5 + $0x124] sm:$0xf0]  ;;  %v1063_v58 = vor.u32 %v1234_v48, %v1060_v49 }
  0x6c   : > { %812 = vmatpush.bf16.msra.mxu1 %v1131_v26  ;;  %v1106_v54 = vld [vmem:[%s1594_s5 + $0x90] sm:$0xf]  ;;  %v1247_v55 = vld [vmem:[%s1594_s5 + $0x94] sm:$0xf0]  ;;  %v1034_v56 = vld [vmem:[%s1594_s5] sm:$0xf]  ;;  %v1043_v59 = vor.u32 %v1231_v51, %v1042_v46  ;;  %v1179_v60 = vor.u32 %v1265_v53, %v1178_v52 }
  0x6d   : > { %837 = vmatpush.bf16.msra.mxu3 %v1079_v32  ;;  %v1229_v57 = vld [vmem:[%s1594_s5 + $0x4] sm:$0xf0]  ;;  %v1232_v61 = vld [vmem:[%s1594_s5 + $0x24] sm:$0xf]  ;;  %v1052_v62 = vld [vmem:[%s1594_s5 + $0x28] sm:$0xf0]  ;;  %v1107_v0 = vor.u32 %v1247_v55, %v1106_v54 }
  0x6e   : > { %v495_v63 = vld [vmem:[%s1582_s26] sm:$0xff]  ;;  %v1098_v1 = vld [vmem:[%s1594_s5 + $0x80] sm:$0xf]  ;;  %v1263_v3 = vld [vmem:[%s1594_s5 + $0x114] sm:$0xf0]  ;;  %v1055_v9 = vor.u32 %v1232_v61, %v1052_v62  ;;  %v1035_v11 = vor.u32 %v1229_v57, %v1034_v56  ;;  %p1224_p13 = scmp.ne.s32.totalorder %s1373_s14, 5 }
  0x6f   : > { %800 = vmatpush.bf16.msra.mxu0 %v1059_v33  ;;  %825 = vmatpush.bf16.msra.mxu2 %v1195_v35  ;;  %v1170_v2 = vld [vmem:[%s1594_s5 + $0x110] sm:$0xf]  ;;  %v1245_v4 = vld [vmem:[%s1594_s5 + $0x84] sm:$0xf0]  ;;  %v1258_v5 = vld [vmem:[%s1594_s5 + $0xf4] sm:$0xf]  ;;  %v547_v10 = vunpack.c.l.b16 %v495_v63  ;;  %v548_v13 = vunpack.c.h.b16 %v495_v63 }
  0x70   : > { %813 = vmatpush.bf16.msra.mxu1 %v1123_v38  ;;  %v1156_v6 = vld [vmem:[%s1594_s5 + $0xf8] sm:$0xf0]  ;;  %v1274_v7 = vld [vmem:[%s1594_s5 + $0x174] sm:$0xf]  ;;  %v1171_v12 = vor.u32 %v1263_v3, %v1170_v2  ;;  %v496_v16 = vld [vmem:[%s1582_s26 + $0x8] sm:$0xf]  ;;  %v1099_v17 = vor.u32 %v1245_v4, %v1098_v1 }
  0x71   : > { %838 = vmatpush.bf16.msra.mxu3 %v1071_v44  ;;  %v1220_v8 = vld [vmem:[%s1594_s5 + $0x178] sm:$0xf0]  ;;  %v1230_v14 = vld [vmem:[%s1594_s5 + $0x14] sm:$0xf]  ;;  %v1159_v18 = vor.u32 %v1258_v5, %v1156_v6  ;;  %v1162_v19 = vld [vmem:[%s1594_s5 + $0x100] sm:$0xf]  ;;  %v550_v26 = vpack.c.b16 %v547_v10, %v547_v10  ;;  %v549_v28 = vunpack.c.l.b16 %v496_v16  ;;  %v1669_v29 = vpack.c.b16 %v548_v13, %v548_v13 }
  0x72   : > { %v1044_v15 = vld [vmem:[%s1594_s5 + $0x18] sm:$0xf0]  ;;  %v1261_v20 = vld [vmem:[%s1594_s5 + $0x104] sm:$0xf0]  ;;  %v1223_v21 = vor.u32 %v1274_v7, %v1220_v8  ;;  %v1256_v22 = vld [vmem:[%s1594_s5 + $0xe4] sm:$0xf] }
  0x73   : > { %801 = vmatpush.bf16.msra.mxu0 %v1051_v45  ;;  %826 = vmatpush.bf16.msra.mxu2 %v1187_v47  ;;  %v1148_v23 = vld [vmem:[%s1594_s5 + $0xe8] sm:$0xf0]  ;;  %v1272_v24 = vld [vmem:[%s1594_s5 + $0x164] sm:$0xf]  ;;  %v1047_v27 = vor.u32 %v1230_v14, %v1044_v15  ;;  %v1163_v30 = vor.u32 %v1261_v20, %v1162_v19  ;;  %v1254_v35 = vld [vmem:[%s1594_s5 + $0xd4] sm:$0xf]  ;;  %v552_v39 = vpack.c.b16 %v549_v28, %v549_v28 }
  0x74   : > { %814 = vmatpush.bf16.msra.mxu1 %v1115_v50  ;;  %v1212_v25 = vld [vmem:[%s1594_s5 + $0x168] sm:$0xf0]  ;;  %v1228_v31 = vld [vmem:[%s1594_s5 + $0x4] sm:$0xf]  ;;  %v1151_v33 = vor.u32 %v1256_v22, %v1148_v23  ;;  %v1140_v36 = vld [vmem:[%s1594_s5 + $0xd8] sm:$0xf0] }
  0x75   : > { %839 = vmatpush.bf16.msra.mxu3 %v1063_v58  ;;  %v1036_v32 = vld [vmem:[%s1594_s5 + $0x8] sm:$0xf0]  ;;  %v1215_v34 = vor.u32 %v1272_v24, %v1212_v25  ;;  %v1270_v37 = vld [vmem:[%s1594_s5 + $0x154] sm:$0xf]  ;;  %v1204_v38 = vld [vmem:[%s1594_s5 + $0x158] sm:$0xf0]  ;;  %v1143_v41 = vor.u32 %v1254_v35, %v1140_v36 }
  0x76   : > { %v1039_v40 = vor.u32 %v1228_v31, %v1036_v32  ;;  %v1207_v42 = vor.u32 %v1270_v37, %v1204_v38  ;;  %v1252_v43 = vld [vmem:[%s1594_s5 + $0xc4] sm:$0xf]  ;;  %v1132_v44 = vld [vmem:[%s1594_s5 + $0xc8] sm:$0xf0]  ;;  %v1250_v49 = vld [vmem:[%s1594_s5 + $0xb4] sm:$0xf] }
  0x77   : > { %802 = vmatpush.bf16.msra.mxu0 %v1043_v59  ;;  %827 = vmatpush.bf16.msra.mxu2 %v1179_v60  ;;  %v1268_v45 = vld [vmem:[%s1594_s5 + $0x144] sm:$0xf]  ;;  %v1196_v46 = vld [vmem:[%s1594_s5 + $0x148] sm:$0xf0]  ;;  %v1135_v47 = vor.u32 %v1252_v43, %v1132_v44  ;;  %v1124_v50 = vld [vmem:[%s1594_s5 + $0xb8] sm:$0xf0] }
  0x78   : > { %815 = vmatpush.bf16.msra.mxu1 %v1107_v0  ;;  %v1199_v48 = vor.u32 %v1268_v45, %v1196_v46  ;;  %v1266_v51 = vld [vmem:[%s1594_s5 + $0x134] sm:$0xf]  ;;  %v1188_v52 = vld [vmem:[%s1594_s5 + $0x138] sm:$0xf0]  ;;  %v1127_v53 = vor.u32 %v1250_v49, %v1124_v50  ;;  %v1248_v55 = vld [vmem:[%s1594_s5 + $0xa4] sm:$0xf] }
  0x79   : > { %840 = vmatpush.bf16.msra.mxu3 %v1055_v9  ;;  %v1191_v54 = vor.u32 %v1266_v51, %v1188_v52  ;;  %v1116_v56 = vld [vmem:[%s1594_s5 + $0xa8] sm:$0xf0]  ;;  %v1264_v57 = vld [vmem:[%s1594_s5 + $0x124] sm:$0xf]  ;;  %v1246_v61 = vld [vmem:[%s1594_s5 + $0x94] sm:$0xf] }
  0x7a   : > { %v1180_v58 = vld [vmem:[%s1594_s5 + $0x128] sm:$0xf0]  ;;  %v1119_v59 = vor.u32 %v1248_v55, %v1116_v56  ;;  %v1108_v62 = vld [vmem:[%s1594_s5 + $0x98] sm:$0xf0]  ;;  %v1262_v63 = vld [vmem:[%s1594_s5 + $0x114] sm:$0xf] }
  0x7b   : > { %803 = vmatpush.bf16.msra.mxu0 %v1035_v11  ;;  %828 = vmatpush.bf16.msra.mxu2 %v1171_v12  ;;  %v1183_v60 = vor.u32 %v1264_v57, %v1180_v58  ;;  %v1172_v0 = vld [vmem:[%s1594_s5 + $0x118] sm:$0xf0]  ;;  %v1111_v1 = vor.u32 %v1246_v61, %v1108_v62  ;;  %v1244_v3 = vld [vmem:[%s1594_s5 + $0x84] sm:$0xf]  ;;  %v1100_v4 = vld [vmem:[%s1594_s5 + $0x88] sm:$0xf0] }
  0x7c   : > { %816 = vmatpush.bf16.msra.mxu1 %v1099_v17  ;;  %v1175_v2 = vor.u32 %v1262_v63, %v1172_v0  ;;  %v1260_v5 = vld [vmem:[%s1594_s5 + $0x104] sm:$0xf]  ;;  %v1164_v6 = vld [vmem:[%s1594_s5 + $0x108] sm:$0xf0]  ;;  %v1103_v7 = vor.u32 %v1244_v3, %v1100_v4  ;;  %v493_v14 = vld [vmem:[#allocation2] sm:$0xff] }
  0x7d   : > { %841 = vmatpush.bf16.msra.mxu3 %v1047_v27  ;;  %v1167_v8 = vor.u32 %v1260_v5, %v1164_v6  ;;  %v494_v24 = vld [vmem:[#allocation2 + $0x8] sm:$0xff] }
  0x7e   : > { %804 = vmatmul.bf16.vlgmr.msra.gmra.mxu0 %v550_v26 }
  0x7f   : > { %848 = vmatpush.bf16.msrb.mxu0 %v1159_v18  ;;  %817 = vmatmul.bf16.vlgmr.msra.gmra.mxu1 %v1669_v29 }
  0x80   : > { %861 = vmatpush.bf16.msrb.mxu1 %v1223_v21  ;;  %829 = vmatpush.bf16.msra.mxu2 %v1163_v30 }
  0x81   : > { %842 = vmatpush.bf16.msra.mxu3 %v1039_v40 }
  0x83   : > { %849 = vmatpush.bf16.msrb.mxu0 %v1151_v33  ;;  %830 = vmatmul.bf16.vlgmr.msra.gmra.mxu2 %v552_v39 }
  0x84   : > { %862 = vmatpush.bf16.msrb.mxu1 %v1215_v34  ;;  %843 = vmatmul.bf16.vlgmr.msra.gmra.mxu3 %v550_v26 }
  0x87   : > { %850 = vmatpush.bf16.msrb.mxu0 %v1143_v41 }
  0x88   : > { %863 = vmatpush.bf16.msrb.mxu1 %v1207_v42 }
  0x8b   : > { %851 = vmatpush.bf16.msrb.mxu0 %v1135_v47 }
  0x8c   : > { %864 = vmatpush.bf16.msrb.mxu1 %v1199_v48 }
  0x8f   : > { %852 = vmatpush.bf16.msrb.mxu0 %v1127_v53 }
  0x90   : > { %865 = vmatpush.bf16.msrb.mxu1 %v1191_v54 }
  0x93   : > { %853 = vmatpush.bf16.msrb.mxu0 %v1119_v59 }
  0x94   : > { %866 = vmatpush.bf16.msrb.mxu1 %v1183_v60 }
  0x97   : > { %854 = vmatpush.bf16.msrb.mxu0 %v1111_v1 }
  0x98   : > { %867 = vmatpush.bf16.msrb.mxu1 %v1175_v2 }
  0x9b   : > { %855 = vmatpush.bf16.msrb.mxu0 %v1103_v7 }
  0x9c   : > { %868 = vmatpush.bf16.msrb.mxu1 %v1167_v8 }
  0x9e   : > { %856 = vmatmul.bf16.vlgmr.msrb.gmra.mxu0 %v1669_v29 }
  0x9f   : > { %869 = vmatmul.bf16.vlgmr.msrb.gmra.mxu1 %v552_v39 }
  0xfb   : > { %v805_v9 = vpop.f32.mrf.mxu0 }
  0xfc   : > { %v818_v10 = vpop.f32.mrf.mxu1 }
  0xfd   : > { %v819_v11 = vadd.f32 %v818_v10, %v805_v9 }
 0x103   : > { %v807_v12 = vpop.f32.mrf.mxu0 }
 0x104   : > { %v820_v13 = vpop.f32.mrf.mxu1 }
 0x106   : > { %v831_v15 = vpop.f32.mrf.mxu2 }
 0x107   : > { %v832_v16 = vadd.f32 %v831_v15, %v819_v11  ;;  %v844_v18 = vpop.f32.mrf.mxu3 }
 0x109   : > { %v874_v17 = vadd.f32 %v832_v16, %v493_v14 }
 0x10b   : > { %876 = vst [vmem:[#allocation2] sm:$0xff] %v874_v17 }
 0x10e   : > { %v833_v19 = vpop.f32.mrf.mxu2 }
 0x10f   : > { %v846_v20 = vpop.f32.mrf.mxu3 }
 0x11b   : > { %v857_v21 = vpop.f32.mrf.mxu0 }
 0x11c   : > { %v858_v22 = vadd.f32 %v857_v21, %v844_v18  ;;  %v870_v23 = vpop.f32.mrf.mxu1 }
 0x11e   : > { %v871_v25 = vadd.f32 %v870_v23, %v858_v22 }
 0x120   : > { %v875_v26 = vadd.f32 %v871_v25, %v494_v24  ;;  %881 = sbr.rel (%p1224_p13) target bundleno = 305 (0x131), region = 78 }
 0x122   : > { %877 = vst [vmem:[#allocation2 + $0x8] sm:$0xff] %v875_v26 }
 0x123   : > { %v859_v27 = vpop.f32.mrf.mxu0 }
 0x124   : > { %v872_v28 = vpop.f32.mrf.mxu1 }
 0x125   : > { %v882_v29 = vld [vmem:[#allocation2] sm:$0xff] }
 0x126   : > { %v884_v31 = vld [vmem:[%s475_s12] sm:$0x3] }
 0x127   : > { %v886_v32 = vperm.slane %v884_v31, 0  ;;  %v887_v33 = vperm.slane %v884_v31, 1 }
 0x129   : > { %v883_v30 = vld [vmem:[#allocation2 + $0x8] sm:$0xff]  ;;  %v890_v34 = vadd.f32 %v886_v32, %v882_v29 }
 0x12a   : > { %v891_v35 = vadd.f32 %v887_v33, %v883_v30 }
 0x12b   : > { %v892_v36 = vmax.f32 %v890_v34, 0.0 }
 0x12c   : > { %v893_v37 = vmax.f32 %v891_v35, 0.0 }
 0x12e   : > { %v894_v38 = vpack.c.bf16 %v893_v37, %v892_v36 }
 0x130   : > { %895 = vst [vmem:[%s1592_s4] sm:$0xff] %v894_v38 }
 0x131 PF: > { %s13_s18 = sadd.s32 1, %s1389_s18   ;;  %s1731_s12 = smov %s1369_s13 }
 0x132   : > { %p10_p0 = scmp.ge.s32.totalorder %s13_s18, 14   ;;  %s1732_s13 = smov %s1463_s25 }
 0x133   : > { %s1733_s14 = smov %s1381_s16  ;;  %s1734_s15 = smov %s1385_s17 }
 0x134   : > { %s1735_s16 = smov %s1738_s19  ;;  %s1736_s17 = smov %s1742_s20 }
 0x135   :  { %12 = sbr.rel (!%p10_p0) target bundleno = 4 (0x4), region = 119 }

// kernel: resnet_custom_forward.37
= control target key start
LH: loop header
LB: loop body
LE: loop exit
PB: predicated region body
PF: predicated region fallthrough
CT: control target
= control target key end

     0   :  { %s1101_s12 = smov 0   ;;  %s1103_s13 = smov 0   ;;  %s1306_s0 = inlined_call_operand.vmem [shape: bf16[8,256], index: 0, kind: input, shape index: {}]   ;;  %s1307_s1 = inlined_call_operand.vmem [shape: bf16[256,512], index: 1, kind: input, shape index: {}]   ;;  %s1308_s2 = inlined_call_operand.vmem [shape: f32[1,512], index: 2, kind: input, shape index: {}]   ;;  %s1309_s3 = inlined_call_operand.vmem [shape: bf16[8,512], index: 3, kind: output, shape index: {}]  }
   0x1   :  { %s1105_s14 = smov 0   ;;  %s1107_s15 = smov 0  }
   0x2   :  { %s1109_s16 = smov 0  }
   0x3 LB: > { %s28_s17 = sadd.s32 1, %s1075_s15  ;;  %p76_p1 = scmp.ne.s32.totalorder %s1067_s13, %s1063_s12  ;;  %s1079_s16 = sphi %s1109_s16, %s13_s16   ;;  %s1075_s15 = sphi %s1107_s15, %s1313_s15   ;;  %s1071_s14 = sphi %s1105_s14, %s1312_s14   ;;  %s1067_s13 = sphi %s1103_s13, %s1311_s13   ;;  %s1063_s12 = sphi %s1101_s12, %s1310_s12  }
   0x4   : > { %p30_p0 = scmp.ge.s32.totalorder %s28_s17, 2  ;;  %p77_p2 = scmp.eq.s32.totalorder %s1079_s16, 0 }
   0x5   : > { %s69_s19 = sadd.s32 1, %s1067_s13  ;;  %p829_p5 = scmp.ge.s32.totalorder %s1079_s16, 2 }
   0x6   : > { %s1315_s17 = smov (%p30_p0, %s28_s17), 0  ;;  %p78_p3 = por %p77_p2, %p76_p1 }
   0x7   : > { %s65_s18 = ssub.s32 %s1075_s15, %s1315_s17  ;;  %169 = sbr.rel (%p829_p5) target bundleno = 48 (0x30), region = 20 }
   0x8   : > { %p67_p4 = scmp.eq.s32.totalorder %s65_s18, 0 }
   0xa   : > { %s1136_s20 = scalar_select %p67_p4, %s1067_s13, %s69_s19  }
   0xc   : > { %172 = sbr.rel (!%p78_p3) target bundleno = 48 (0x30), region = 24  ;;  %s174_s21 = sand.u32 (%p78_p3), 1, %s1067_s13  }
   0xd   : > { %s968_s22 = sshll.u32 (%p78_p3), %s1075_s15, 3  ;;  %s830_s23 = sshll.u32 (%p78_p3), %s174_s21, 8 }
   0xe   : > { %s1144_s26 = scalar_lea.vmem (%p78_p3), %s1307_s1, %s968_s22  ;;  %s1149_s27 = scalar_lea.vmem (%p78_p3), [#allocation3], %s830_s23 }
   0xf   : > { %v273_v0 = vld [vmem:[%s1144_s26] sm:$0xff] (%p78_p3)  ;;  %v275_v1 = vld [vmem:[%s1144_s26 + $0x10] sm:$0xff] (%p78_p3) }
  0x10   : > { %v277_v2 = vld [vmem:[%s1144_s26 + $0x20] sm:$0xff] (%p78_p3)  ;;  %274 = vst [vmem:[%s1149_s27] sm:$0xff] (%p78_p3), %v273_v0  ;;  %v279_v3 = vld [vmem:[%s1144_s26 + $0x30] sm:$0xff] (%p78_p3) }
  0x11   : > { %276 = vst [vmem:[%s1149_s27 + $0x8] sm:$0xff] %v275_v1  ;;  %v281_v4 = vld [vmem:[%s1144_s26 + $0x40] sm:$0xff]  ;;  %v283_v5 = vld [vmem:[%s1144_s26 + $0x50] sm:$0xff] }
  0x12   : > { %278 = vst [vmem:[%s1149_s27 + $0x10] sm:$0xff] %v277_v2  ;;  %v285_v6 = vld [vmem:[%s1144_s26 + $0x60] sm:$0xff]  ;;  %v287_v7 = vld [vmem:[%s1144_s26 + $0x70] sm:$0xff] }
  0x13   : > { %280 = vst [vmem:[%s1149_s27 + $0x18] sm:$0xff] %v279_v3  ;;  %v289_v8 = vld [vmem:[%s1144_s26 + $0x80] sm:$0xff]  ;;  %v291_v9 = vld [vmem:[%s1144_s26 + $0x90] sm:$0xff] }
  0x14   : > { %282 = vst [vmem:[%s1149_s27 + $0x20] sm:$0xff] %v281_v4  ;;  %v293_v10 = vld [vmem:[%s1144_s26 + $0xa0] sm:$0xff]  ;;  %v295_v11 = vld [vmem:[%s1144_s26 + $0xb0] sm:$0xff] }
  0x15   : > { %284 = vst [vmem:[%s1149_s27 + $0x28] sm:$0xff] %v283_v5  ;;  %v297_v12 = vld [vmem:[%s1144_s26 + $0xc0] sm:$0xff]  ;;  %v299_v13 = vld [vmem:[%s1144_s26 + $0xd0] sm:$0xff] }
  0x16   : > { %286 = vst [vmem:[%s1149_s27 + $0x30] sm:$0xff] %v285_v6  ;;  %v301_v14 = vld [vmem:[%s1144_s26 + $0xe0] sm:$0xff]  ;;  %v303_v15 = vld [vmem:[%s1144_s26 + $0xf0] sm:$0xff] }
  0x17   : > { %288 = vst [vmem:[%s1149_s27 + $0x38] sm:$0xff] %v287_v7  ;;  %v305_v16 = vld [vmem:[%s1144_s26 + $0x100] sm:$0xff]  ;;  %v307_v17 = vld [vmem:[%s1144_s26 + $0x110] sm:$0xff] }
  0x18   : > { %290 = vst [vmem:[%s1149_s27 + $0x40] sm:$0xff] %v289_v8  ;;  %v309_v18 = vld [vmem:[%s1144_s26 + $0x120] sm:$0xff]  ;;  %v311_v19 = vld [vmem:[%s1144_s26 + $0x130] sm:$0xff] }
  0x19   : > { %292 = vst [vmem:[%s1149_s27 + $0x48] sm:$0xff] %v291_v9  ;;  %v313_v20 = vld [vmem:[%s1144_s26 + $0x140] sm:$0xff]  ;;  %v315_v21 = vld [vmem:[%s1144_s26 + $0x150] sm:$0xff] }
  0x1a   : > { %294 = vst [vmem:[%s1149_s27 + $0x50] sm:$0xff] %v293_v10  ;;  %v317_v22 = vld [vmem:[%s1144_s26 + $0x160] sm:$0xff]  ;;  %v319_v23 = vld [vmem:[%s1144_s26 + $0x170] sm:$0xff] }
  0x1b   : > { %296 = vst [vmem:[%s1149_s27 + $0x58] sm:$0xff] %v295_v11  ;;  %v321_v24 = vld [vmem:[%s1144_s26 + $0x180] sm:$0xff]  ;;  %v323_v25 = vld [vmem:[%s1144_s26 + $0x190] sm:$0xff] }
  0x1c   : > { %298 = vst [vmem:[%s1149_s27 + $0x60] sm:$0xff] %v297_v12  ;;  %v325_v26 = vld [vmem:[%s1144_s26 + $0x1a0] sm:$0xff]  ;;  %v327_v27 = vld [vmem:[%s1144_s26 + $0x1b0] sm:$0xff] }
  0x1d   : > { %300 = vst [vmem:[%s1149_s27 + $0x68] sm:$0xff] %v299_v13  ;;  %v329_v28 = vld [vmem:[%s1144_s26 + $0x1c0] sm:$0xff]  ;;  %v331_v29 = vld [vmem:[%s1144_s26 + $0x1d0] sm:$0xff] }
  0x1e   : > { %302 = vst [vmem:[%s1149_s27 + $0x70] sm:$0xff] %v301_v14  ;;  %v333_v30 = vld [vmem:[%s1144_s26 + $0x1e0] sm:$0xff]  ;;  %v335_v31 = vld [vmem:[%s1144_s26 + $0x1f0] sm:$0xff] }
  0x1f   : > { %304 = vst [vmem:[%s1149_s27 + $0x78] sm:$0xff] %v303_v15 }
  0x20   : > { %306 = vst [vmem:[%s1149_s27 + $0x80] sm:$0xff] %v305_v16 }
  0x21   : > { %308 = vst [vmem:[%s1149_s27 + $0x88] sm:$0xff] %v307_v17 }
  0x22   : > { %310 = vst [vmem:[%s1149_s27 + $0x90] sm:$0xff] %v309_v18 }
  0x23   : > { %312 = vst [vmem:[%s1149_s27 + $0x98] sm:$0xff] %v311_v19 }
  0x24   : > { %314 = vst [vmem:[%s1149_s27 + $0xa0] sm:$0xff] %v313_v20 }
  0x25   : > { %316 = vst [vmem:[%s1149_s27 + $0xa8] sm:$0xff] %v315_v21 }
  0x26   : > { %318 = vst [vmem:[%s1149_s27 + $0xb0] sm:$0xff] %v317_v22 }
  0x27   : > { %320 = vst [vmem:[%s1149_s27 + $0xb8] sm:$0xff] %v319_v23 }
  0x28   : > { %322 = vst [vmem:[%s1149_s27 + $0xc0] sm:$0xff] %v321_v24 }
  0x29   : > { %324 = vst [vmem:[%s1149_s27 + $0xc8] sm:$0xff] %v323_v25 }
  0x2a   : > { %326 = vst [vmem:[%s1149_s27 + $0xd0] sm:$0xff] %v325_v26 }
  0x2b   : > { %328 = vst [vmem:[%s1149_s27 + $0xd8] sm:$0xff] %v327_v27 }
  0x2c   : > { %330 = vst [vmem:[%s1149_s27 + $0xe0] sm:$0xff] %v329_v28 }
  0x2d   : > { %332 = vst [vmem:[%s1149_s27 + $0xe8] sm:$0xff] %v331_v29 }
  0x2e   : > { %334 = vst [vmem:[%s1149_s27 + $0xf0] sm:$0xff] %v333_v30 }
  0x2f   : > { %336 = vst [vmem:[%s1149_s27 + $0xf8] sm:$0xff] %v335_v31 }
  0x30 PF: > { %p833_p6 = scmp.ge.s32.totalorder %s1079_s16, 1  ;;  %p349_p7 = scmp.lt.s32.totalorder %s1079_s16, 3 }
  0x32   : > { %p350_p8 = pnand %p833_p6, %p349_p7 }
  0x33   : > { %s356_s28 = sand.u32 (!%p350_p8), 1, %s1063_s12   ;;  %s835_s6 = sshll.u32 (!%p350_p8), %s1071_s14, 1 }
  0x34   : > { %353 = sbr.rel (%p350_p8) target bundleno = 233 (0xe9), region = 66  ;;  %s834_s29 = sshll.u32 (!%p350_p8), %s356_s28, 8 }
  0x35   : > { %s1215_s30 = scalar_lea.vmem (!%p350_p8), [#allocation3], %s834_s29  ;;  %p409_p9 = scmp.lt.s32.totalorder (!%p350_p8), %s835_s6, 3 }
  0x39   : > { %v896_v32 = vld [vmem:[%s1215_s30 + $0x70] sm:$0xf]  ;;  %v984_v33 = vld [vmem:[%s1215_s30 + $0x74] sm:$0xf0]  ;;  %v983_v37 = vld [vmem:[%s1215_s30 + $0x74] sm:$0xf] }
  0x3a   : > { %v960_v34 = vld [vmem:[%s1215_s30 + $0xf0] sm:$0xf]  ;;  %v897_v35 = vor.u32 %v984_v33, %v896_v32  ;;  %v1000_v36 = vld [vmem:[%s1215_s30 + $0xf4] sm:$0xf0]  ;;  %v898_v38 = vld [vmem:[%s1215_s30 + $0x78] sm:$0xf0] }
  0x3b   : > { %v961_v39 = vor.u32 %v1000_v36, %v960_v34  ;;  %v901_v40 = vor.u32 %v983_v37, %v898_v38  ;;  %v999_v41 = vld [vmem:[%s1215_s30 + $0xf4] sm:$0xf]  ;;  %v962_v42 = vld [vmem:[%s1215_s30 + $0xf8] sm:$0xf0]  ;;  %v888_v43 = vld [vmem:[%s1215_s30 + $0x60] sm:$0xf] }
  0x3c   : > { %631 = vmatpush.bf16.msra.mxu0 %v897_v35  ;;  %v965_v44 = vor.u32 %v999_v41, %v962_v42  ;;  %v982_v45 = vld [vmem:[%s1215_s30 + $0x64] sm:$0xf0]  ;;  %v952_v46 = vld [vmem:[%s1215_s30 + $0xe0] sm:$0xf]  ;;  %v981_v50 = vld [vmem:[%s1215_s30 + $0x64] sm:$0xf] }
  0x3d   : > { %v998_v47 = vld [vmem:[%s1215_s30 + $0xe4] sm:$0xf0]  ;;  %644 = vmatpush.bf16.msra.mxu1 %v961_v39  ;;  %657 = vmatpush.bf16.msra.mxu2 %v901_v40  ;;  %v889_v48 = vor.u32 %v982_v45, %v888_v43  ;;  %v890_v51 = vld [vmem:[%s1215_s30 + $0x68] sm:$0xf0]  ;;  %v997_v52 = vld [vmem:[%s1215_s30 + $0xe4] sm:$0xf] }
  0x3e   : > { %v953_v49 = vor.u32 %v998_v47, %v952_v46  ;;  %670 = vmatpush.bf16.msra.mxu3 %v965_v44  ;;  %v893_v53 = vor.u32 %v981_v50, %v890_v51  ;;  %v954_v54 = vld [vmem:[%s1215_s30 + $0xe8] sm:$0xf0]  ;;  %v880_v55 = vld [vmem:[%s1215_s30 + $0x50] sm:$0xf]  ;;  %v980_v56 = vld [vmem:[%s1215_s30 + $0x54] sm:$0xf0] }
  0x3f   : > { %v957_v57 = vor.u32 %v997_v52, %v954_v54  ;;  %v944_v58 = vld [vmem:[%s1215_s30 + $0xd0] sm:$0xf]  ;;  %v996_v59 = vld [vmem:[%s1215_s30 + $0xd4] sm:$0xf0]  ;;  %v979_v60 = vld [vmem:[%s1215_s30 + $0x54] sm:$0xf]  ;;  %v881_v61 = vor.u32 %v980_v56, %v880_v55 }
  0x40   : > { %632 = vmatpush.bf16.msra.mxu0 %v889_v48  ;;  %v882_v62 = vld [vmem:[%s1215_s30 + $0x58] sm:$0xf0]  ;;  %v995_v63 = vld [vmem:[%s1215_s30 + $0xd4] sm:$0xf]  ;;  %v945_v1 = vor.u32 %v996_v59, %v944_v58  ;;  %v872_v3 = vld [vmem:[%s1215_s30 + $0x40] sm:$0xf] }
  0x41   : > { %v946_v0 = vld [vmem:[%s1215_s30 + $0xd8] sm:$0xf0]  ;;  %645 = vmatpush.bf16.msra.mxu1 %v953_v49  ;;  %658 = vmatpush.bf16.msra.mxu2 %v893_v53  ;;  %v885_v2 = vor.u32 %v979_v60, %v882_v62  ;;  %v978_v4 = vld [vmem:[%s1215_s30 + $0x44] sm:$0xf0]  ;;  %v936_v5 = vld [vmem:[%s1215_s30 + $0xc0] sm:$0xf] }
  0x42   : > { %671 = vmatpush.bf16.msra.mxu3 %v957_v57  ;;  %v949_v6 = vor.u32 %v995_v63, %v946_v0  ;;  %v994_v7 = vld [vmem:[%s1215_s30 + $0xc4] sm:$0xf0]  ;;  %v977_v8 = vld [vmem:[%s1215_s30 + $0x44] sm:$0xf]  ;;  %v874_v9 = vld [vmem:[%s1215_s30 + $0x48] sm:$0xf0]  ;;  %v873_v12 = vor.u32 %v978_v4, %v872_v3 }
  0x43   : > { %v993_v10 = vld [vmem:[%s1215_s30 + $0xc4] sm:$0xf]  ;;  %v938_v11 = vld [vmem:[%s1215_s30 + $0xc8] sm:$0xf0]  ;;  %v937_v13 = vor.u32 %v994_v7, %v936_v5  ;;  %v877_v14 = vor.u32 %v977_v8, %v874_v9  ;;  %v864_v15 = vld [vmem:[%s1215_s30 + $0x30] sm:$0xf] }
  0x44   : > { %633 = vmatpush.bf16.msra.mxu0 %v881_v61  ;;  %v976_v16 = vld [vmem:[%s1215_s30 + $0x34] sm:$0xf0]  ;;  %v928_v17 = vld [vmem:[%s1215_s30 + $0xb0] sm:$0xf]  ;;  %v941_v18 = vor.u32 %v993_v10, %v938_v11  ;;  %v975_v20 = vld [vmem:[%s1215_s30 + $0x34] sm:$0xf] }
  0x45   : > { %646 = vmatpush.bf16.msra.mxu1 %v945_v1  ;;  %659 = vmatpush.bf16.msra.mxu2 %v885_v2  ;;  %v992_v19 = vld [vmem:[%s1215_s30 + $0xb4] sm:$0xf0]  ;;  %v866_v21 = vld [vmem:[%s1215_s30 + $0x38] sm:$0xf0]  ;;  %v991_v22 = vld [vmem:[%s1215_s30 + $0xb4] sm:$0xf]  ;;  %v865_v24 = vor.u32 %v976_v16, %v864_v15 }
  0x46   : > { %672 = vmatpush.bf16.msra.mxu3 %v949_v6  ;;  %v930_v23 = vld [vmem:[%s1215_s30 + $0xb8] sm:$0xf0]  ;;  %v929_v25 = vor.u32 %v992_v19, %v928_v17  ;;  %v869_v26 = vor.u32 %v975_v20, %v866_v21  ;;  %v856_v27 = vld [vmem:[%s1215_s30 + $0x20] sm:$0xf]  ;;  %v974_v28 = vld [vmem:[%s1215_s30 + $0x24] sm:$0xf0] }
  0x47   : > { %v920_v29 = vld [vmem:[%s1215_s30 + $0xa0] sm:$0xf]  ;;  %v933_v30 = vor.u32 %v991_v22, %v930_v23  ;;  %v990_v31 = vld [vmem:[%s1215_s30 + $0xa4] sm:$0xf0]  ;;  %v973_v32 = vld [vmem:[%s1215_s30 + $0x24] sm:$0xf]  ;;  %v857_v36 = vor.u32 %v974_v28, %v856_v27 }
  0x48   : > { %634 = vmatpush.bf16.msra.mxu0 %v873_v12  ;;  %v858_v33 = vld [vmem:[%s1215_s30 + $0x28] sm:$0xf0]  ;;  %v989_v34 = vld [vmem:[%s1215_s30 + $0xa4] sm:$0xf]  ;;  %v921_v37 = vor.u32 %v990_v31, %v920_v29  ;;  %v848_v39 = vld [vmem:[%s1215_s30 + $0x10] sm:$0xf] }
  0x49   : > { %647 = vmatpush.bf16.msra.mxu1 %v937_v13  ;;  %660 = vmatpush.bf16.msra.mxu2 %v877_v14  ;;  %v922_v35 = vld [vmem:[%s1215_s30 + $0xa8] sm:$0xf0]  ;;  %v861_v38 = vor.u32 %v973_v32, %v858_v33  ;;  %v972_v40 = vld [vmem:[%s1215_s30 + $0x14] sm:$0xf0]  ;;  %v912_v41 = vld [vmem:[%s1215_s30 + $0x90] sm:$0xf] }
  0x4a   : > { %673 = vmatpush.bf16.msra.mxu3 %v941_v18  ;;  %v925_v42 = vor.u32 %v989_v34, %v922_v35  ;;  %v988_v43 = vld [vmem:[%s1215_s30 + $0x94] sm:$0xf0]  ;;  %v971_v44 = vld [vmem:[%s1215_s30 + $0x14] sm:$0xf]  ;;  %v850_v45 = vld [vmem:[%s1215_s30 + $0x18] sm:$0xf0]  ;;  %v849_v48 = vor.u32 %v972_v40, %v848_v39 }
  0x4b   : > { %v987_v46 = vld [vmem:[%s1215_s30 + $0x94] sm:$0xf]  ;;  %v914_v47 = vld [vmem:[%s1215_s30 + $0x98] sm:$0xf0]  ;;  %v431_v49 = vld [vmem:[%s1306_s0] sm:$0xff]  ;;  %v913_v50 = vor.u32 %v988_v43, %v912_v41  ;;  %v853_v51 = vor.u32 %v971_v44, %v850_v45  ;;  %s1317_s6 = smov (!%p409_p9, %s835_s6), 3 }
  0x4c   : > { %635 = vmatpush.bf16.msra.mxu0 %v865_v24  ;;  %v840_v52 = vld [vmem:[%s1215_s30] sm:$0xf]  ;;  %v970_v53 = vld [vmem:[%s1215_s30 + $0x4] sm:$0xf0]  ;;  %v917_v55 = vor.u32 %v987_v46, %v914_v47  ;;  %v969_v57 = vld [vmem:[%s1215_s30 + $0x4] sm:$0xf]  ;;  %v465_v61 = vunpack.c.l.b16 %v431_v49  ;;  %v466_v63 = vunpack.c.h.b16 %v431_v49  ;;  %s411_s9 = scalar_lea.vmem %s1308_s2, %s1317_s6 }
  0x4d   : > { %648 = vmatpush.bf16.msra.mxu1 %v929_v25  ;;  %661 = vmatpush.bf16.msra.mxu2 %v869_v26  ;;  %v904_v54 = vld [vmem:[%s1215_s30 + $0x80] sm:$0xf]  ;;  %v986_v56 = vld [vmem:[%s1215_s30 + $0x84] sm:$0xf0]  ;;  %v842_v58 = vld [vmem:[%s1215_s30 + $0x8] sm:$0xf0]  ;;  %v841_v62 = vor.u32 %v970_v53, %v840_v52 }
  0x4e   : > { %674 = vmatpush.bf16.msra.mxu3 %v933_v30  ;;  %v985_v59 = vld [vmem:[%s1215_s30 + $0x84] sm:$0xf]  ;;  %v906_v60 = vld [vmem:[%s1215_s30 + $0x88] sm:$0xf0]  ;;  %v905_v0 = vor.u32 %v986_v56, %v904_v54  ;;  %v845_v1 = vor.u32 %v969_v57, %v842_v58  ;;  %v467_v3 = vpack.c.b16 %v465_v61, %v465_v61  ;;  %v468_v4 = vpack.c.b16 %v466_v63, %v466_v63  ;;  %v692_v7 = vld [vmem:[%s411_s9] sm:$0x3] }
  0x4f   : > { %v909_v2 = vor.u32 %v985_v59, %v906_v60  ;;  %v694_v9 = vperm.slane %v692_v7, 0  ;;  %v695_v11 = vperm.slane %v692_v7, 1  ;;  %s837_s10 = sshll.u32 %s1317_s6, 2 }
  0x50   : > { %636 = vmatpush.bf16.msra.mxu0 %v857_v36  ;;  %s421_s14 = scalar_lea.vmem %s1309_s3, %s837_s10 }
  0x51   : > { %649 = vmatpush.bf16.msra.mxu1 %v921_v37  ;;  %662 = vmatpush.bf16.msra.mxu2 %v861_v38 }
  0x52   : > { %675 = vmatpush.bf16.msra.mxu3 %v925_v42 }
  0x54   : > { %637 = vmatpush.bf16.msra.mxu0 %v849_v48 }
  0x55   : > { %650 = vmatpush.bf16.msra.mxu1 %v913_v50  ;;  %663 = vmatpush.bf16.msra.mxu2 %v853_v51 }
  0x56   : > { %676 = vmatpush.bf16.msra.mxu3 %v917_v55 }
  0x58   : > { %638 = vmatpush.bf16.msra.mxu0 %v841_v62 }
  0x59   : > { %651 = vmatpush.bf16.msra.mxu1 %v905_v0  ;;  %664 = vmatpush.bf16.msra.mxu2 %v845_v1 }
  0x5a   : > { %677 = vmatpush.bf16.msra.mxu3 %v909_v2 }
  0x5b   : > { %639 = vmatmul.bf16.vlgmr.msra.gmra.mxu0 %v467_v3 }
  0x5c   : > { %652 = vmatmul.bf16.vlgmr.msra.gmra.mxu1 %v468_v4  ;;  %665 = vmatmul.bf16.vlgmr.msra.gmra.mxu2 %v467_v3 }
  0x5d   : > { %678 = vmatmul.bf16.vlgmr.msra.gmra.mxu3 %v468_v4 }
  0xd8   : > { %v640_v5 = vpop.f32.mrf.mxu0 }
  0xd9   : > { %v653_v6 = vpop.f32.mrf.mxu1 }
  0xda   : > { %v654_v8 = vadd.f32 %v653_v6, %v640_v5 }
  0xdc   : > { %v698_v14 = vadd.f32 %v694_v9, %v654_v8 }
  0xdf   : > { %v666_v10 = vpop.f32.mrf.mxu2 }
  0xe0   : > { %v679_v12 = vpop.f32.mrf.mxu3  ;;  %v642_v13 = vpop.f32.mrf.mxu0 }
  0xe1   : > { %v680_v15 = vadd.f32 %v679_v12, %v666_v10  ;;  %v655_v16 = vpop.f32.mrf.mxu1 }
  0xe3   : > { %v699_v17 = vadd.f32 %v695_v11, %v680_v15 }
  0xe5   : > { %v700_v18 = vpack.c.bf16 %v699_v17, %v698_v14 }
  0xe7   : > { %701 = vst [vmem:[%s421_s14] sm:$0xff] %v700_v18  ;;  %v668_v19 = vpop.f32.mrf.mxu2 }
  0xe8   : > { %v681_v20 = vpop.f32.mrf.mxu3 }
  0xe9 PF: > { %s13_s16 = sadd.s32 1, %s1079_s16   ;;  %s1310_s12 = smov %s1067_s13 }
  0xea   : > { %p10_p10 = scmp.ge.s32.totalorder %s13_s16, 4   ;;  %s1311_s13 = smov %s1136_s20 }
  0xeb   : > { %s1312_s14 = smov %s1075_s15  ;;  %s1313_s15 = smov %s1315_s17 }
  0xec   :  { %12 = sbr.rel (!%p10_p10) target bundleno = 3 (0x3), region = 119 }

// kernel: resnet_custom_forward.39
= control target key start
LH: loop header
LB: loop body
LE: loop exit
PB: predicated region body
PF: predicated region fallthrough
CT: control target
= control target key end

     0   :  { %s1776_s15 = smov 0   ;;  %s1778_s16 = smov 0   ;;  %s2173_s0 = inlined_call_operand.vmem [shape: bf16[8,4608], index: 0, kind: input, shape index: {}]   ;;  %s2174_s1 = inlined_call_operand.vmem [shape: bf16[4608,512], index: 1, kind: input, shape index: {}]   ;;  %s2175_s2 = inlined_call_operand.vmem [shape: f32[1,512], index: 2, kind: input, shape index: {}]   ;;  %s2176_s3 = inlined_call_operand.vmem [shape: bf16[8,512], index: 3, kind: input, shape index: {}]   ;;  %s2177_s4 = inlined_call_operand.vmem [shape: bf16[8,512], index: 4, kind: output, shape index: {}]  }
   0x1   :  { %s1780_s17 = smov 0   ;;  %s1782_s18 = smov 0  }
   0x2   :  { %s1784_s19 = smov 0   ;;  %s1786_s20 = smov 0  }
   0x3   :  { %s1788_s21 = smov 0  }
   0x4 LB: > { %s26_s22 = sadd.s32 1, %s1740_s19  ;;  %s29_s23 = sadd.s32 1, %s1744_s20  ;;  %s1748_s21 = sphi %s1788_s21, %s14_s21   ;;  %s1744_s20 = sphi %s1786_s20, %s2183_s20   ;;  %s1740_s19 = sphi %s1784_s19, %s2182_s19   ;;  %s1736_s18 = sphi %s1782_s18, %s2181_s18   ;;  %s1732_s17 = sphi %s1780_s17, %s2180_s17   ;;  %s1728_s16 = sphi %s1778_s16, %s2179_s16   ;;  %s1724_s15 = sphi %s1776_s15, %s2178_s15  }
   0x5   : > { %p27_p0 = scmp.ge.s32.totalorder %s26_s22, 9  ;;  %p77_p1 = scmp.ne.s32.totalorder %s1728_s16, %s1724_s15 }
   0x6   : > { %p78_p2 = scmp.eq.s32.totalorder %s1748_s21, 0  ;;  %s70_s27 = sadd.s32 1, %s1728_s16 }
   0x7   : > { %s2185_s22 = smov (%p27_p0, %s26_s22), 0  ;;  %s2187_s23 = smov (!%p27_p0, %s29_s23), %s1744_s20 }
   0x8   : > { %p79_p3 = por %p78_p2, %p77_p1  ;;  %p31_p4 = scmp.ge.s32.totalorder %s2187_s23, 2 }
   0x9   : > { %s65_s24 = ssub.s32 %s1740_s19, %s2185_s22  ;;  %p1297_p6 = scmp.ge.s32.totalorder %s1748_s21, 18 }
   0xa   : > { %s2189_s23 = smov (%p31_p4, %s2187_s23), 0 }
   0xb   : > { %s66_s25 = ssub.s32 %s1744_s20, %s2189_s23  ;;  %185 = sbr.rel (%p1297_p6) target bundleno = 87 (0x57), region = 16 }
   0xc   : > { %s67_s26 = sor.u32 %s66_s25, %s65_s24 }
   0xd   : > { %p68_p5 = scmp.eq.s32.totalorder %s67_s26, 0 }
   0xf   : > { %s1827_s28 = scalar_select %p68_p5, %s1728_s16, %s70_s27  }
  0x10   : > { %201 = sbr.rel (!%p79_p3) target bundleno = 87 (0x57), region = 24  ;;  %s203_s29 = sand.u32 (%p79_p3), 1, %s1728_s16  }
  0x11   : > { %s1300_s30 = sshll.u32 (%p79_p3), %s1744_s20, 1  ;;  %s1298_s5 = sshll.u32 (%p79_p3), %s203_s29, 9 }
  0x12   : > { %s1572_s6 = sshll.u32 (%p79_p3), %s1740_s19, 8  ;;  %s1841_s12 = scalar_lea.vmem (%p79_p3), [#allocation3], %s1298_s5 }
  0x13   : > { %s209_s7 = sadd.s32 (%p79_p3), %s1572_s6, %s1300_s30 }
  0x14   : > { %s1302_s8 = sshll.u32 (%p79_p3), %s209_s7, 2 }
  0x15   : > { %s1836_s11 = scalar_lea.vmem %s2174_s1, %s1302_s8 }
  0x16   : > { %v366_v0 = vld [vmem:[%s1836_s11] sm:$0xff]  ;;  %v368_v1 = vld [vmem:[%s1836_s11 + $0x10] sm:$0xff] }
  0x17   : > { %v370_v2 = vld [vmem:[%s1836_s11 + $0x20] sm:$0xff]  ;;  %367 = vst [vmem:[%s1841_s12] sm:$0xff] %v366_v0  ;;  %v372_v3 = vld [vmem:[%s1836_s11 + $0x30] sm:$0xff] }
  0x18   : > { %369 = vst [vmem:[%s1841_s12 + $0x8] sm:$0xff] %v368_v1  ;;  %v374_v4 = vld [vmem:[%s1836_s11 + $0x40] sm:$0xff]  ;;  %v376_v5 = vld [vmem:[%s1836_s11 + $0x50] sm:$0xff] }
  0x19   : > { %371 = vst [vmem:[%s1841_s12 + $0x10] sm:$0xff] %v370_v2  ;;  %v378_v6 = vld [vmem:[%s1836_s11 + $0x60] sm:$0xff]  ;;  %v380_v7 = vld [vmem:[%s1836_s11 + $0x70] sm:$0xff] }
  0x1a   : > { %373 = vst [vmem:[%s1841_s12 + $0x18] sm:$0xff] %v372_v3  ;;  %v382_v8 = vld [vmem:[%s1836_s11 + $0x80] sm:$0xff]  ;;  %v384_v9 = vld [vmem:[%s1836_s11 + $0x90] sm:$0xff] }
  0x1b   : > { %375 = vst [vmem:[%s1841_s12 + $0x20] sm:$0xff] %v374_v4  ;;  %v386_v10 = vld [vmem:[%s1836_s11 + $0xa0] sm:$0xff]  ;;  %v388_v11 = vld [vmem:[%s1836_s11 + $0xb0] sm:$0xff] }
  0x1c   : > { %377 = vst [vmem:[%s1841_s12 + $0x28] sm:$0xff] %v376_v5  ;;  %v390_v12 = vld [vmem:[%s1836_s11 + $0xc0] sm:$0xff]  ;;  %v392_v13 = vld [vmem:[%s1836_s11 + $0xd0] sm:$0xff] }
  0x1d   : > { %379 = vst [vmem:[%s1841_s12 + $0x30] sm:$0xff] %v378_v6  ;;  %v394_v14 = vld [vmem:[%s1836_s11 + $0xe0] sm:$0xff]  ;;  %v396_v15 = vld [vmem:[%s1836_s11 + $0xf0] sm:$0xff] }
  0x1e   : > { %381 = vst [vmem:[%s1841_s12 + $0x38] sm:$0xff] %v380_v7  ;;  %v398_v16 = vld [vmem:[%s1836_s11 + $0x100] sm:$0xff]  ;;  %v400_v17 = vld [vmem:[%s1836_s11 + $0x110] sm:$0xff] }
  0x1f   : > { %383 = vst [vmem:[%s1841_s12 + $0x40] sm:$0xff] %v382_v8  ;;  %v402_v18 = vld [vmem:[%s1836_s11 + $0x120] sm:$0xff]  ;;  %v404_v19 = vld [vmem:[%s1836_s11 + $0x130] sm:$0xff] }
  0x20   : > { %385 = vst [vmem:[%s1841_s12 + $0x48] sm:$0xff] %v384_v9  ;;  %v406_v20 = vld [vmem:[%s1836_s11 + $0x140] sm:$0xff]  ;;  %v408_v21 = vld [vmem:[%s1836_s11 + $0x150] sm:$0xff] }
  0x21   : > { %387 = vst [vmem:[%s1841_s12 + $0x50] sm:$0xff] %v386_v10  ;;  %v410_v22 = vld [vmem:[%s1836_s11 + $0x160] sm:$0xff]  ;;  %v412_v23 = vld [vmem:[%s1836_s11 + $0x170] sm:$0xff] }
  0x22   : > { %389 = vst [vmem:[%s1841_s12 + $0x58] sm:$0xff] %v388_v11  ;;  %v414_v24 = vld [vmem:[%s1836_s11 + $0x180] sm:$0xff]  ;;  %v416_v25 = vld [vmem:[%s1836_s11 + $0x190] sm:$0xff] }
  0x23   : > { %391 = vst [vmem:[%s1841_s12 + $0x60] sm:$0xff] %v390_v12  ;;  %v418_v26 = vld [vmem:[%s1836_s11 + $0x1a0] sm:$0xff]  ;;  %v420_v27 = vld [vmem:[%s1836_s11 + $0x1b0] sm:$0xff] }
  0x24   : > { %393 = vst [vmem:[%s1841_s12 + $0x68] sm:$0xff] %v392_v13  ;;  %v422_v28 = vld [vmem:[%s1836_s11 + $0x1c0] sm:$0xff]  ;;  %v424_v29 = vld [vmem:[%s1836_s11 + $0x1d0] sm:$0xff] }
  0x25   : > { %395 = vst [vmem:[%s1841_s12 + $0x70] sm:$0xff] %v394_v14  ;;  %v426_v30 = vld [vmem:[%s1836_s11 + $0x1e0] sm:$0xff]  ;;  %v428_v31 = vld [vmem:[%s1836_s11 + $0x1f0] sm:$0xff] }
  0x26   : > { %397 = vst [vmem:[%s1841_s12 + $0x78] sm:$0xff] %v396_v15  ;;  %v430_v32 = vld [vmem:[%s1836_s11 + $0x200] sm:$0xff]  ;;  %v432_v33 = vld [vmem:[%s1836_s11 + $0x210] sm:$0xff] }
  0x27   : > { %399 = vst [vmem:[%s1841_s12 + $0x80] sm:$0xff] %v398_v16  ;;  %v434_v34 = vld [vmem:[%s1836_s11 + $0x220] sm:$0xff]  ;;  %v436_v35 = vld [vmem:[%s1836_s11 + $0x230] sm:$0xff] }
  0x28   : > { %401 = vst [vmem:[%s1841_s12 + $0x88] sm:$0xff] %v400_v17  ;;  %v438_v36 = vld [vmem:[%s1836_s11 + $0x240] sm:$0xff]  ;;  %v440_v37 = vld [vmem:[%s1836_s11 + $0x250] sm:$0xff] }
  0x29   : > { %403 = vst [vmem:[%s1841_s12 + $0x90] sm:$0xff] %v402_v18  ;;  %v442_v38 = vld [vmem:[%s1836_s11 + $0x260] sm:$0xff]  ;;  %v444_v39 = vld [vmem:[%s1836_s11 + $0x270] sm:$0xff] }
  0x2a   : > { %405 = vst [vmem:[%s1841_s12 + $0x98] sm:$0xff] %v404_v19  ;;  %v446_v40 = vld [vmem:[%s1836_s11 + $0x280] sm:$0xff]  ;;  %v448_v41 = vld [vmem:[%s1836_s11 + $0x290] sm:$0xff] }
  0x2b   : > { %407 = vst [vmem:[%s1841_s12 + $0xa0] sm:$0xff] %v406_v20  ;;  %v450_v42 = vld [vmem:[%s1836_s11 + $0x2a0] sm:$0xff]  ;;  %v452_v43 = vld [vmem:[%s1836_s11 + $0x2b0] sm:$0xff] }
  0x2c   : > { %409 = vst [vmem:[%s1841_s12 + $0xa8] sm:$0xff] %v408_v21  ;;  %v454_v44 = vld [vmem:[%s1836_s11 + $0x2c0] sm:$0xff]  ;;  %v456_v45 = vld [vmem:[%s1836_s11 + $0x2d0] sm:$0xff] }
  0x2d   : > { %411 = vst [vmem:[%s1841_s12 + $0xb0] sm:$0xff] %v410_v22  ;;  %v458_v46 = vld [vmem:[%s1836_s11 + $0x2e0] sm:$0xff]  ;;  %v460_v47 = vld [vmem:[%s1836_s11 + $0x2f0] sm:$0xff] }
  0x2e   : > { %413 = vst [vmem:[%s1841_s12 + $0xb8] sm:$0xff] %v412_v23  ;;  %v462_v48 = vld [vmem:[%s1836_s11 + $0x300] sm:$0xff]  ;;  %v464_v49 = vld [vmem:[%s1836_s11 + $0x310] sm:$0xff] }
  0x2f   : > { %415 = vst [vmem:[%s1841_s12 + $0xc0] sm:$0xff] %v414_v24  ;;  %v466_v50 = vld [vmem:[%s1836_s11 + $0x320] sm:$0xff]  ;;  %v468_v51 = vld [vmem:[%s1836_s11 + $0x330] sm:$0xff] }
  0x30   : > { %417 = vst [vmem:[%s1841_s12 + $0xc8] sm:$0xff] %v416_v25  ;;  %v470_v52 = vld [vmem:[%s1836_s11 + $0x340] sm:$0xff]  ;;  %v472_v53 = vld [vmem:[%s1836_s11 + $0x350] sm:$0xff] }
  0x31   : > { %419 = vst [vmem:[%s1841_s12 + $0xd0] sm:$0xff] %v418_v26  ;;  %v474_v54 = vld [vmem:[%s1836_s11 + $0x360] sm:$0xff]  ;;  %v476_v55 = vld [vmem:[%s1836_s11 + $0x370] sm:$0xff] }
  0x32   : > { %421 = vst [vmem:[%s1841_s12 + $0xd8] sm:$0xff] %v420_v27  ;;  %v478_v56 = vld [vmem:[%s1836_s11 + $0x380] sm:$0xff]  ;;  %v480_v57 = vld [vmem:[%s1836_s11 + $0x390] sm:$0xff] }
  0x33   : > { %423 = vst [vmem:[%s1841_s12 + $0xe0] sm:$0xff] %v422_v28  ;;  %v482_v58 = vld [vmem:[%s1836_s11 + $0x3a0] sm:$0xff]  ;;  %v484_v59 = vld [vmem:[%s1836_s11 + $0x3b0] sm:$0xff] }
  0x34   : > { %425 = vst [vmem:[%s1841_s12 + $0xe8] sm:$0xff] %v424_v29  ;;  %v486_v60 = vld [vmem:[%s1836_s11 + $0x3c0] sm:$0xff]  ;;  %v488_v61 = vld [vmem:[%s1836_s11 + $0x3d0] sm:$0xff] }
  0x35   : > { %427 = vst [vmem:[%s1841_s12 + $0xf0] sm:$0xff] %v426_v30  ;;  %v490_v62 = vld [vmem:[%s1836_s11 + $0x3e0] sm:$0xff]  ;;  %v492_v63 = vld [vmem:[%s1836_s11 + $0x3f0] sm:$0xff] }
  0x36   : > { %429 = vst [vmem:[%s1841_s12 + $0xf8] sm:$0xff] %v428_v31 }
  0x37   : > { %431 = vst [vmem:[%s1841_s12 + $0x100] sm:$0xff] %v430_v32 }
  0x38   : > { %433 = vst [vmem:[%s1841_s12 + $0x108] sm:$0xff] %v432_v33 }
  0x39   : > { %435 = vst [vmem:[%s1841_s12 + $0x110] sm:$0xff] %v434_v34 }
  0x3a   : > { %437 = vst [vmem:[%s1841_s12 + $0x118] sm:$0xff] %v436_v35 }
  0x3b   : > { %439 = vst [vmem:[%s1841_s12 + $0x120] sm:$0xff] %v438_v36 }
  0x3c   : > { %441 = vst [vmem:[%s1841_s12 + $0x128] sm:$0xff] %v440_v37 }
  0x3d   : > { %443 = vst [vmem:[%s1841_s12 + $0x130] sm:$0xff] %v442_v38 }
  0x3e   : > { %445 = vst [vmem:[%s1841_s12 + $0x138] sm:$0xff] %v444_v39 }
  0x3f   : > { %447 = vst [vmem:[%s1841_s12 + $0x140] sm:$0xff] %v446_v40 }
  0x40   : > { %449 = vst [vmem:[%s1841_s12 + $0x148] sm:$0xff] %v448_v41 }
  0x41   : > { %451 = vst [vmem:[%s1841_s12 + $0x150] sm:$0xff] %v450_v42 }
  0x42   : > { %453 = vst [vmem:[%s1841_s12 + $0x158] sm:$0xff] %v452_v43 }
  0x43   : > { %455 = vst [vmem:[%s1841_s12 + $0x160] sm:$0xff] %v454_v44 }
  0x44   : > { %457 = vst [vmem:[%s1841_s12 + $0x168] sm:$0xff] %v456_v45 }
  0x45   : > { %459 = vst [vmem:[%s1841_s12 + $0x170] sm:$0xff] %v458_v46 }
  0x46   : > { %461 = vst [vmem:[%s1841_s12 + $0x178] sm:$0xff] %v460_v47 }
  0x47   : > { %463 = vst [vmem:[%s1841_s12 + $0x180] sm:$0xff] %v462_v48 }
  0x48   : > { %465 = vst [vmem:[%s1841_s12 + $0x188] sm:$0xff] %v464_v49 }
  0x49   : > { %467 = vst [vmem:[%s1841_s12 + $0x190] sm:$0xff] %v466_v50 }
  0x4a   : > { %469 = vst [vmem:[%s1841_s12 + $0x198] sm:$0xff] %v468_v51 }
  0x4b   : > { %471 = vst [vmem:[%s1841_s12 + $0x1a0] sm:$0xff] %v470_v52 }
  0x4c   : > { %473 = vst [vmem:[%s1841_s12 + $0x1a8] sm:$0xff] %v472_v53 }
  0x4d   : > { %475 = vst [vmem:[%s1841_s12 + $0x1b0] sm:$0xff] %v474_v54 }
  0x4e   : > { %477 = vst [vmem:[%s1841_s12 + $0x1b8] sm:$0xff] %v476_v55 }
  0x4f   : > { %479 = vst [vmem:[%s1841_s12 + $0x1c0] sm:$0xff] %v478_v56 }
  0x50   : > { %481 = vst [vmem:[%s1841_s12 + $0x1c8] sm:$0xff] %v480_v57 }
  0x51   : > { %483 = vst [vmem:[%s1841_s12 + $0x1d0] sm:$0xff] %v482_v58 }
  0x52   : > { %485 = vst [vmem:[%s1841_s12 + $0x1d8] sm:$0xff] %v484_v59 }
  0x53   : > { %487 = vst [vmem:[%s1841_s12 + $0x1e0] sm:$0xff] %v486_v60 }
  0x54   : > { %489 = vst [vmem:[%s1841_s12 + $0x1e8] sm:$0xff] %v488_v61 }
  0x55   : > { %491 = vst [vmem:[%s1841_s12 + $0x1f0] sm:$0xff] %v490_v62 }
  0x56   : > { %493 = vst [vmem:[%s1841_s12 + $0x1f8] sm:$0xff] %v492_v63 }
  0x57 PF: > { %p1303_p7 = scmp.ge.s32.totalorder %s1748_s21, 1  ;;  %p519_p8 = scmp.lt.s32.totalorder %s1748_s21, 19 }
  0x59   : > { %p520_p9 = pnand %p1303_p7, %p519_p8 }
  0x5a   : > { %s526_s13 = sand.u32 (!%p520_p9), 1, %s1724_s15   ;;  %s1305_s14 = sshll.u32 (!%p520_p9), %s1732_s17, 2 }
  0x5b   : > { %523 = sbr.rel (%p520_p9) target bundleno = 331 (0x14b), region = 70  ;;  %s1304_s24 = sshll.u32 (!%p520_p9), %s526_s13, 9 }
  0x5c   : > { %p580_p10 = scmp.lt.s32.totalorder (!%p520_p9), %s1305_s14, 35  ;;  %s1307_s25 = sshll.u32 (!%p520_p9), %s1736_s18, 1 }
  0x5d   : > { %p590_p11 = scmp.lt.s32.totalorder (!%p520_p9), %s1307_s25, 3  ;;  %s1995_s13 = scalar_lea.vmem (!%p520_p9), [#allocation3], %s1304_s24 }
  0x5e   : > { %p1312_p12 = scmp.ne.s32.totalorder (!%p520_p9), %s1732_s17, 0 }
  0x60   : > { %s2191_s14 = smov (!%p580_p10, %s1305_s14), 35  ;;  %s2193_s25 = smov (!%p590_p11, %s1307_s25), 3 }
  0x61   : > { %s1306_s26 = sshll.u32 %s2191_s14, 2  ;;  %s592_s15 = scalar_lea.vmem %s2175_s2, %s2193_s25 }
  0x62   : > { %s1976_s30 = scalar_lea.vmem %s2173_s0, %s1306_s26  ;;  %s1309_s7 = sshll.u32 %s2193_s25, 2 }
  0x63   : > { %s1988_s18 = scalar_lea.vmem %s2176_s3, %s1309_s7  ;;  %s1993_s12 = scalar_lea.vmem %s2177_s4, %s1309_s7 }
  0x64   : > { %617 = sbr.rel (%p1312_p12) target bundleno = 108 (0x6c), region = 78 }
  0x69   : > { %v1750_v0 = vmov 0.0  }
  0x6a   : > { %618 = vst [vmem:[#allocation2] sm:$0xff] %v1750_v0 }
  0x6b   : > { %619 = vst [vmem:[#allocation2 + $0x8] sm:$0xff] %v1750_v0 }
  0x6c PF: > { %v1371_v1 = vld [vmem:[%s1995_s13 + $0x70] sm:$0xf]  ;;  %v1588_v2 = vld [vmem:[%s1995_s13 + $0x74] sm:$0xf0]  ;;  %v1363_v12 = vld [vmem:[%s1995_s13 + $0x60] sm:$0xf] }
  0x6d   : > { %v1435_v3 = vld [vmem:[%s1995_s13 + $0xf0] sm:$0xf]  ;;  %v1372_v4 = vor.u32 %v1588_v2, %v1371_v1  ;;  %v1604_v5 = vld [vmem:[%s1995_s13 + $0xf4] sm:$0xf0]  ;;  %v1586_v14 = vld [vmem:[%s1995_s13 + $0x64] sm:$0xf0] }
  0x6e   : > { %v1499_v6 = vld [vmem:[%s1995_s13 + $0x170] sm:$0xf]  ;;  %v1620_v7 = vld [vmem:[%s1995_s13 + $0x174] sm:$0xf0]  ;;  %v1436_v8 = vor.u32 %v1604_v5, %v1435_v3  ;;  %v1427_v15 = vld [vmem:[%s1995_s13 + $0xe0] sm:$0xf]  ;;  %v1364_v17 = vor.u32 %v1586_v14, %v1363_v12 }
  0x6f   : > { %v1500_v9 = vor.u32 %v1620_v7, %v1499_v6  ;;  %v1563_v10 = vld [vmem:[%s1995_s13 + $0x1f0] sm:$0xf]  ;;  %v1636_v11 = vld [vmem:[%s1995_s13 + $0x1f4] sm:$0xf0]  ;;  %1022 = vmatpush.bf16.msra.mxu0 %v1372_v4  ;;  %v1602_v16 = vld [vmem:[%s1995_s13 + $0xe4] sm:$0xf0] }
  0x70   : > { %v1564_v13 = vor.u32 %v1636_v11, %v1563_v10  ;;  %1035 = vmatpush.bf16.msra.mxu1 %v1436_v8  ;;  %v1428_v18 = vor.u32 %v1602_v16, %v1427_v15  ;;  %v1491_v19 = vld [vmem:[%s1995_s13 + $0x160] sm:$0xf]  ;;  %v1618_v20 = vld [vmem:[%s1995_s13 + $0x164] sm:$0xf0]  ;;  %v1355_v24 = vld [vmem:[%s1995_s13 + $0x50] sm:$0xf] }
  0x71   : > { %1048 = vmatpush.bf16.msra.mxu2 %v1500_v9  ;;  %v1555_v21 = vld [vmem:[%s1995_s13 + $0x1e0] sm:$0xf]  ;;  %v1492_v22 = vor.u32 %v1618_v20, %v1491_v19  ;;  %v1634_v23 = vld [vmem:[%s1995_s13 + $0x1e4] sm:$0xf0]  ;;  %v1584_v25 = vld [vmem:[%s1995_s13 + $0x54] sm:$0xf0] }
  0x72   : > { %1061 = vmatpush.bf16.msra.mxu3 %v1564_v13  ;;  %v1556_v26 = vor.u32 %v1634_v23, %v1555_v21  ;;  %v1419_v27 = vld [vmem:[%s1995_s13 + $0xd0] sm:$0xf]  ;;  %v1600_v28 = vld [vmem:[%s1995_s13 + $0xd4] sm:$0xf0]  ;;  %v1356_v30 = vor.u32 %v1584_v25, %v1355_v24  ;;  %v1347_v36 = vld [vmem:[%s1995_s13 + $0x40] sm:$0xf] }
  0x73   : > { %v1483_v29 = vld [vmem:[%s1995_s13 + $0x150] sm:$0xf]  ;;  %1023 = vmatpush.bf16.msra.mxu0 %v1364_v17  ;;  %v1616_v31 = vld [vmem:[%s1995_s13 + $0x154] sm:$0xf0]  ;;  %v1420_v34 = vor.u32 %v1600_v28, %v1419_v27  ;;  %v1582_v37 = vld [vmem:[%s1995_s13 + $0x44] sm:$0xf0] }
  0x74   : > { %v1547_v32 = vld [vmem:[%s1995_s13 + $0x1d0] sm:$0xf]  ;;  %v1632_v33 = vld [vmem:[%s1995_s13 + $0x1d4] sm:$0xf0]  ;;  %1036 = vmatpush.bf16.msra.mxu1 %v1428_v18  ;;  %v1484_v35 = vor.u32 %v1616_v31, %v1483_v29  ;;  %v1411_v38 = vld [vmem:[%s1995_s13 + $0xc0] sm:$0xf]  ;;  %v1348_v45 = vor.u32 %v1582_v37, %v1347_v36 }
  0x75   : > { %1049 = vmatpush.bf16.msra.mxu2 %v1492_v22  ;;  %v1548_v39 = vor.u32 %v1632_v33, %v1547_v32  ;;  %v1598_v40 = vld [vmem:[%s1995_s13 + $0xc4] sm:$0xf0]  ;;  %v1475_v41 = vld [vmem:[%s1995_s13 + $0x140] sm:$0xf]  ;;  %v1339_v48 = vld [vmem:[%s1995_s13 + $0x30] sm:$0xf] }
  0x76   : > { %1062 = vmatpush.bf16.msra.mxu3 %v1556_v26  ;;  %v1614_v42 = vld [vmem:[%s1995_s13 + $0x144] sm:$0xf0]  ;;  %v1539_v43 = vld [vmem:[%s1995_s13 + $0x1c0] sm:$0xf]  ;;  %v1412_v46 = vor.u32 %v1598_v40, %v1411_v38  ;;  %v1580_v49 = vld [vmem:[%s1995_s13 + $0x34] sm:$0xf0] }
  0x77   : > { %v1630_v44 = vld [vmem:[%s1995_s13 + $0x1c4] sm:$0xf0]  ;;  %1024 = vmatpush.bf16.msra.mxu0 %v1356_v30  ;;  %v1476_v47 = vor.u32 %v1614_v42, %v1475_v41  ;;  %v1403_v50 = vld [vmem:[%s1995_s13 + $0xb0] sm:$0xf]  ;;  %v1596_v52 = vld [vmem:[%s1995_s13 + $0xb4] sm:$0xf0]  ;;  %v1340_v57 = vor.u32 %v1580_v49, %v1339_v48 }
  0x78   : > { %1037 = vmatpush.bf16.msra.mxu1 %v1420_v34  ;;  %v1540_v51 = vor.u32 %v1630_v44, %v1539_v43  ;;  %v1467_v53 = vld [vmem:[%s1995_s13 + $0x130] sm:$0xf]  ;;  %v1612_v54 = vld [vmem:[%s1995_s13 + $0x134] sm:$0xf0]  ;;  %v1404_v58 = vor.u32 %v1596_v52, %v1403_v50  ;;  %v1331_v60 = vld [vmem:[%s1995_s13 + $0x20] sm:$0xf] }
  0x79   : > { %1050 = vmatpush.bf16.msra.mxu2 %v1484_v35  ;;  %v1531_v55 = vld [vmem:[%s1995_s13 + $0x1b0] sm:$0xf]  ;;  %v1628_v56 = vld [vmem:[%s1995_s13 + $0x1b4] sm:$0xf0]  ;;  %v1468_v59 = vor.u32 %v1612_v54, %v1467_v53  ;;  %v1578_v61 = vld [vmem:[%s1995_s13 + $0x24] sm:$0xf0] }
  0x7a   : > { %1063 = vmatpush.bf16.msra.mxu3 %v1548_v39  ;;  %v1395_v62 = vld [vmem:[%s1995_s13 + $0xa0] sm:$0xf]  ;;  %v1532_v63 = vor.u32 %v1628_v56, %v1531_v55  ;;  %v1594_v0 = vld [vmem:[%s1995_s13 + $0xa4] sm:$0xf0]  ;;  %v1332_v5 = vor.u32 %v1578_v61, %v1331_v60  ;;  %v1323_v8 = vld [vmem:[%s1995_s13 + $0x10] sm:$0xf] }
  0x7b   : > { %1025 = vmatpush.bf16.msra.mxu0 %v1348_v45  ;;  %v1459_v1 = vld [vmem:[%s1995_s13 + $0x120] sm:$0xf]  ;;  %v1610_v2 = vld [vmem:[%s1995_s13 + $0x124] sm:$0xf0]  ;;  %v1396_v6 = vor.u32 %v1594_v0, %v1395_v62  ;;  %v1576_v9 = vld [vmem:[%s1995_s13 + $0x14] sm:$0xf0] }
  0x7c   : > { %1038 = vmatpush.bf16.msra.mxu1 %v1412_v46  ;;  %v1523_v3 = vld [vmem:[%s1995_s13 + $0x1a0] sm:$0xf]  ;;  %v1626_v4 = vld [vmem:[%s1995_s13 + $0x1a4] sm:$0xf0]  ;;  %v1460_v7 = vor.u32 %v1610_v2, %v1459_v1  ;;  %v1387_v10 = vld [vmem:[%s1995_s13 + $0x90] sm:$0xf]  ;;  %v1324_v17 = vor.u32 %v1576_v9, %v1323_v8 }
  0x7d   : > { %1051 = vmatpush.bf16.msra.mxu2 %v1476_v47  ;;  %v1524_v11 = vor.u32 %v1626_v4, %v1523_v3  ;;  %v1592_v12 = vld [vmem:[%s1995_s13 + $0x94] sm:$0xf0]  ;;  %v1451_v13 = vld [vmem:[%s1995_s13 + $0x110] sm:$0xf]  ;;  %v1315_v18 = vld [vmem:[%s1995_s13] sm:$0xf] }
  0x7e   : > { %1064 = vmatpush.bf16.msra.mxu3 %v1540_v51  ;;  %v1608_v14 = vld [vmem:[%s1995_s13 + $0x114] sm:$0xf0]  ;;  %v1515_v15 = vld [vmem:[%s1995_s13 + $0x190] sm:$0xf]  ;;  %v1574_v19 = vld [vmem:[%s1995_s13 + $0x4] sm:$0xf0]  ;;  %v1388_v21 = vor.u32 %v1592_v12, %v1387_v10 }
  0x7f   : > { %1026 = vmatpush.bf16.msra.mxu0 %v1340_v57  ;;  %v1624_v16 = vld [vmem:[%s1995_s13 + $0x194] sm:$0xf0]  ;;  %v1379_v20 = vld [vmem:[%s1995_s13 + $0x80] sm:$0xf]  ;;  %v1452_v22 = vor.u32 %v1608_v14, %v1451_v13  ;;  %v1590_v23 = vld [vmem:[%s1995_s13 + $0x84] sm:$0xf0]  ;;  %v1316_v33 = vor.u32 %v1574_v19, %v1315_v18 }
  0x80   : > { %1039 = vmatpush.bf16.msra.mxu1 %v1404_v58  ;;  %v1443_v24 = vld [vmem:[%s1995_s13 + $0x100] sm:$0xf]  ;;  %v1606_v25 = vld [vmem:[%s1995_s13 + $0x104] sm:$0xf0]  ;;  %v1516_v26 = vor.u32 %v1624_v16, %v1515_v15  ;;  %v1587_v29 = vld [vmem:[%s1995_s13 + $0x74] sm:$0xf]  ;;  %v1380_v38 = vor.u32 %v1590_v23, %v1379_v20 }
  0x81   : > { %1052 = vmatpush.bf16.msra.mxu2 %v1468_v59  ;;  %v1507_v27 = vld [vmem:[%s1995_s13 + $0x180] sm:$0xf]  ;;  %v1622_v28 = vld [vmem:[%s1995_s13 + $0x184] sm:$0xf0]  ;;  %v1373_v30 = vld [vmem:[%s1995_s13 + $0x78] sm:$0xf0]  ;;  %v1444_v39 = vor.u32 %v1606_v25, %v1443_v24 }
  0x82   : > { %1065 = vmatpush.bf16.msra.mxu3 %v1532_v63  ;;  %v1603_v31 = vld [vmem:[%s1995_s13 + $0xf4] sm:$0xf]  ;;  %v623_v32 = vld [vmem:[%s1976_s30 + $0x8] sm:$0xff]  ;;  %v1508_v43 = vor.u32 %v1622_v28, %v1507_v27  ;;  %v1376_v44 = vor.u32 %v1587_v29, %v1373_v30  ;;  %v1585_v48 = vld [vmem:[%s1995_s13 + $0x64] sm:$0xf]  ;;  %p1569_p13 = scmp.ne.s32.totalorder %s1732_s17, 8 }
  0x83   : > { %1027 = vmatpush.bf16.msra.mxu0 %v1332_v5  ;;  %v1437_v34 = vld [vmem:[%s1995_s13 + $0xf8] sm:$0xf0]  ;;  %v1619_v35 = vld [vmem:[%s1995_s13 + $0x174] sm:$0xf]  ;;  %v692_v37 = vunpack.c.l.b16 %v623_v32  ;;  %v693_v42 = vunpack.c.h.b16 %v623_v32  ;;  %v1365_v49 = vld [vmem:[%s1995_s13 + $0x68] sm:$0xf0] }
  0x84   : > { %1040 = vmatpush.bf16.msra.mxu1 %v1396_v6  ;;  %v1501_v36 = vld [vmem:[%s1995_s13 + $0x178] sm:$0xf0]  ;;  %v1635_v40 = vld [vmem:[%s1995_s13 + $0x1f4] sm:$0xf]  ;;  %v1440_v46 = vor.u32 %v1603_v31, %v1437_v34  ;;  %v1601_v50 = vld [vmem:[%s1995_s13 + $0xe4] sm:$0xf]  ;;  %v1368_v62 = vor.u32 %v1585_v48, %v1365_v49 }
  0x85   : > { %1053 = vmatpush.bf16.msra.mxu2 %v1460_v7  ;;  %v1565_v41 = vld [vmem:[%s1995_s13 + $0x1f8] sm:$0xf0]  ;;  %v622_v45 = vld [vmem:[%s1976_s30] sm:$0xff]  ;;  %v1504_v47 = vor.u32 %v1619_v35, %v1501_v36  ;;  %v1429_v54 = vld [vmem:[%s1995_s13 + $0xe8] sm:$0xf0]  ;;  %v2078_v57 = vpack.c.b16 %v692_v37, %v692_v37  ;;  %v2082_v60 = vpack.c.b16 %v693_v42, %v693_v42 }
  0x86   : > { %1066 = vmatpush.bf16.msra.mxu3 %v1524_v11  ;;  %v690_v51 = vunpack.c.l.b16 %v622_v45  ;;  %v691_v52 = vunpack.c.h.b16 %v622_v45  ;;  %v1568_v53 = vor.u32 %v1635_v40, %v1565_v41  ;;  %v1617_v55 = vld [vmem:[%s1995_s13 + $0x164] sm:$0xf]  ;;  %v1493_v56 = vld [vmem:[%s1995_s13 + $0x168] sm:$0xf0]  ;;  %v1432_v0 = vor.u32 %v1601_v50, %v1429_v54  ;;  %v1583_v2 = vld [vmem:[%s1995_s13 + $0x54] sm:$0xf] }
  0x87   : > { %1028 = vmatpush.bf16.msra.mxu0 %v1324_v17  ;;  %v1633_v58 = vld [vmem:[%s1995_s13 + $0x1e4] sm:$0xf]  ;;  %v1557_v59 = vld [vmem:[%s1995_s13 + $0x1e8] sm:$0xf0]  ;;  %v1496_v1 = vor.u32 %v1617_v55, %v1493_v56  ;;  %v1357_v3 = vld [vmem:[%s1995_s13 + $0x58] sm:$0xf0] }
  0x88   : > { %1041 = vmatpush.bf16.msra.mxu1 %v1388_v21  ;;  %v2084_v61 = vpack.c.b16 %v690_v51, %v690_v51  ;;  %v2086_v63 = vpack.c.b16 %v691_v52, %v691_v52  ;;  %v1599_v4 = vld [vmem:[%s1995_s13 + $0xd4] sm:$0xf]  ;;  %v1560_v5 = vor.u32 %v1633_v58, %v1557_v59  ;;  %v1421_v6 = vld [vmem:[%s1995_s13 + $0xd8] sm:$0xf0]  ;;  %v1360_v11 = vor.u32 %v1583_v2, %v1357_v3  ;;  %v1581_v14 = vld [vmem:[%s1995_s13 + $0x44] sm:$0xf] }
  0x89   : > { %1054 = vmatpush.bf16.msra.mxu2 %v1452_v22  ;;  %v1615_v7 = vld [vmem:[%s1995_s13 + $0x154] sm:$0xf]  ;;  %v1485_v8 = vld [vmem:[%s1995_s13 + $0x158] sm:$0xf0]  ;;  %v1424_v12 = vor.u32 %v1599_v4, %v1421_v6  ;;  %v1349_v15 = vld [vmem:[%s1995_s13 + $0x48] sm:$0xf0] }
  0x8a   : > { %1067 = vmatpush.bf16.msra.mxu3 %v1516_v26  ;;  %v1631_v9 = vld [vmem:[%s1995_s13 + $0x1d4] sm:$0xf]  ;;  %v1549_v10 = vld [vmem:[%s1995_s13 + $0x1d8] sm:$0xf0]  ;;  %v1488_v13 = vor.u32 %v1615_v7, %v1485_v8  ;;  %v1597_v16 = vld [vmem:[%s1995_s13 + $0xc4] sm:$0xf]  ;;  %v1352_v23 = vor.u32 %v1581_v14, %v1349_v15 }
  0x8b   : > { %1029 = vmatpush.bf16.msra.mxu0 %v1316_v33  ;;  %v1552_v17 = vor.u32 %v1631_v9, %v1549_v10  ;;  %v1413_v18 = vld [vmem:[%s1995_s13 + $0xc8] sm:$0xf0]  ;;  %v1613_v19 = vld [vmem:[%s1995_s13 + $0x144] sm:$0xf]  ;;  %v1579_v26 = vld [vmem:[%s1995_s13 + $0x34] sm:$0xf] }
  0x8c   : > { %1042 = vmatpush.bf16.msra.mxu1 %v1380_v38  ;;  %v1477_v20 = vld [vmem:[%s1995_s13 + $0x148] sm:$0xf0]  ;;  %v1629_v21 = vld [vmem:[%s1995_s13 + $0x1c4] sm:$0xf]  ;;  %v1416_v24 = vor.u32 %v1597_v16, %v1413_v18  ;;  %v1341_v27 = vld [vmem:[%s1995_s13 + $0x38] sm:$0xf0] }
  0x8d   : > { %1055 = vmatpush.bf16.msra.mxu2 %v1444_v39  ;;  %v1541_v22 = vld [vmem:[%s1995_s13 + $0x1c8] sm:$0xf0]  ;;  %v1480_v25 = vor.u32 %v1613_v19, %v1477_v20  ;;  %v1595_v28 = vld [vmem:[%s1995_s13 + $0xb4] sm:$0xf]  ;;  %v1405_v30 = vld [vmem:[%s1995_s13 + $0xb8] sm:$0xf0]  ;;  %v1344_v35 = vor.u32 %v1579_v26, %v1341_v27 }
  0x8e   : > { %1068 = vmatpush.bf16.msra.mxu3 %v1508_v43  ;;  %1030 = vmatmul.bf16.vlgmr.msra.gmra.mxu0 %v2084_v61  ;;  %v1544_v29 = vor.u32 %v1629_v21, %v1541_v22  ;;  %v1611_v31 = vld [vmem:[%s1995_s13 + $0x134] sm:$0xf]  ;;  %v1469_v32 = vld [vmem:[%s1995_s13 + $0x138] sm:$0xf0]  ;;  %v1408_v36 = vor.u32 %v1595_v28, %v1405_v30  ;;  %v1577_v38 = vld [vmem:[%s1995_s13 + $0x24] sm:$0xf] }
  0x8f   : > { %1074 = vmatpush.bf16.msrb.mxu0 %v1376_v44  ;;  %1043 = vmatmul.bf16.vlgmr.msra.gmra.mxu1 %v2086_v63  ;;  %v1627_v33 = vld [vmem:[%s1995_s13 + $0x1b4] sm:$0xf]  ;;  %v1533_v34 = vld [vmem:[%s1995_s13 + $0x1b8] sm:$0xf0]  ;;  %v1472_v37 = vor.u32 %v1611_v31, %v1469_v32  ;;  %v1333_v39 = vld [vmem:[%s1995_s13 + $0x28] sm:$0xf0] }
  0x90   : > { %1087 = vmatpush.bf16.msrb.mxu1 %v1440_v46  ;;  %1056 = vmatmul.bf16.vlgmr.msra.gmra.mxu2 %v2078_v57  ;;  %v1593_v40 = vld [vmem:[%s1995_s13 + $0xa4] sm:$0xf]  ;;  %v1536_v41 = vor.u32 %v1627_v33, %v1533_v34  ;;  %v1397_v42 = vld [vmem:[%s1995_s13 + $0xa8] sm:$0xf0]  ;;  %v1575_v50 = vld [vmem:[%s1995_s13 + $0x14] sm:$0xf] }
  0x91   : > { %1100 = vmatpush.bf16.msrb.mxu2 %v1504_v47  ;;  %1069 = vmatmul.bf16.vlgmr.msra.gmra.mxu3 %v2082_v60  ;;  %v1609_v43 = vld [vmem:[%s1995_s13 + $0x124] sm:$0xf]  ;;  %v1461_v44 = vld [vmem:[%s1995_s13 + $0x128] sm:$0xf0]  ;;  %v1336_v47 = vor.u32 %v1577_v38, %v1333_v39  ;;  %v1400_v48 = vor.u32 %v1593_v40, %v1397_v42  ;;  %v1325_v51 = vld [vmem:[%s1995_s13 + $0x18] sm:$0xf0] }
  0x92   : > { %1113 = vmatpush.bf16.msrb.mxu3 %v1568_v53  ;;  %v1625_v45 = vld [vmem:[%s1995_s13 + $0x1a4] sm:$0xf]  ;;  %v1525_v46 = vld [vmem:[%s1995_s13 + $0x1a8] sm:$0xf0]  ;;  %v1464_v49 = vor.u32 %v1609_v43, %v1461_v44  ;;  %v1591_v52 = vld [vmem:[%s1995_s13 + $0x94] sm:$0xf] }
  0x93   : > { %1075 = vmatpush.bf16.msrb.mxu0 %v1368_v62  ;;  %v1528_v53 = vor.u32 %v1625_v45, %v1525_v46  ;;  %v1389_v54 = vld [vmem:[%s1995_s13 + $0x98] sm:$0xf0]  ;;  %v1607_v55 = vld [vmem:[%s1995_s13 + $0x114] sm:$0xf]  ;;  %v1328_v62 = vor.u32 %v1575_v50, %v1325_v51  ;;  %v1573_v2 = vld [vmem:[%s1995_s13 + $0x4] sm:$0xf] }
  0x94   : > { %1088 = vmatpush.bf16.msrb.mxu1 %v1432_v0  ;;  %v1453_v56 = vld [vmem:[%s1995_s13 + $0x118] sm:$0xf0]  ;;  %v1623_v58 = vld [vmem:[%s1995_s13 + $0x194] sm:$0xf]  ;;  %v1392_v0 = vor.u32 %v1591_v52, %v1389_v54  ;;  %v1317_v3 = vld [vmem:[%s1995_s13 + $0x8] sm:$0xf0] }
  0x95   : > { %1101 = vmatpush.bf16.msrb.mxu2 %v1496_v1  ;;  %v1517_v59 = vld [vmem:[%s1995_s13 + $0x198] sm:$0xf0]  ;;  %v1456_v1 = vor.u32 %v1607_v55, %v1453_v56  ;;  %v1589_v4 = vld [vmem:[%s1995_s13 + $0x84] sm:$0xf]  ;;  %v1381_v6 = vld [vmem:[%s1995_s13 + $0x88] sm:$0xf0] }
  0x96   : > { %1114 = vmatpush.bf16.msrb.mxu3 %v1560_v5  ;;  %v1520_v5 = vor.u32 %v1623_v58, %v1517_v59  ;;  %v1605_v7 = vld [vmem:[%s1995_s13 + $0x104] sm:$0xf]  ;;  %v1445_v8 = vld [vmem:[%s1995_s13 + $0x108] sm:$0xf0]  ;;  %v620_v21 = vld [vmem:[#allocation2] sm:$0xff] }
  0x97   : > { %1076 = vmatpush.bf16.msrb.mxu0 %v1360_v11  ;;  %v1621_v9 = vld [vmem:[%s1995_s13 + $0x184] sm:$0xf]  ;;  %v1509_v10 = vld [vmem:[%s1995_s13 + $0x188] sm:$0xf0]  ;;  %v1320_v11 = vor.u32 %v1573_v2, %v1317_v3  ;;  %v621_v31 = vld [vmem:[#allocation2 + $0x8] sm:$0xff] }
  0x98   : > { %1089 = vmatpush.bf16.msrb.mxu1 %v1424_v12  ;;  %v1384_v12 = vor.u32 %v1589_v4, %v1381_v6  ;;  %v1512_v14 = vor.u32 %v1621_v9, %v1509_v10 }
  0x99   : > { %1102 = vmatpush.bf16.msrb.mxu2 %v1488_v13  ;;  %v1448_v13 = vor.u32 %v1605_v7, %v1445_v8 }
  0x9a   : > { %1115 = vmatpush.bf16.msrb.mxu3 %v1552_v17 }
  0x9b   : > { %1077 = vmatpush.bf16.msrb.mxu0 %v1352_v23 }
  0x9c   : > { %1090 = vmatpush.bf16.msrb.mxu1 %v1416_v24 }
  0x9d   : > { %1103 = vmatpush.bf16.msrb.mxu2 %v1480_v25 }
  0x9e   : > { %1116 = vmatpush.bf16.msrb.mxu3 %v1544_v29 }
  0x9f   : > { %1078 = vmatpush.bf16.msrb.mxu0 %v1344_v35 }
  0xa0   : > { %1091 = vmatpush.bf16.msrb.mxu1 %v1408_v36 }
  0xa1   : > { %1104 = vmatpush.bf16.msrb.mxu2 %v1472_v37 }
  0xa2   : > { %1117 = vmatpush.bf16.msrb.mxu3 %v1536_v41 }
  0xa3   : > { %1079 = vmatpush.bf16.msrb.mxu0 %v1336_v47 }
  0xa4   : > { %1092 = vmatpush.bf16.msrb.mxu1 %v1400_v48 }
  0xa5   : > { %1105 = vmatpush.bf16.msrb.mxu2 %v1464_v49 }
  0xa6   : > { %1118 = vmatpush.bf16.msrb.mxu3 %v1528_v53 }
  0xa7   : > { %1080 = vmatpush.bf16.msrb.mxu0 %v1328_v62 }
  0xa8   : > { %1093 = vmatpush.bf16.msrb.mxu1 %v1392_v0 }
  0xa9   : > { %1106 = vmatpush.bf16.msrb.mxu2 %v1456_v1 }
  0xaa   : > { %1119 = vmatpush.bf16.msrb.mxu3 %v1520_v5 }
  0xab   : > { %1081 = vmatpush.bf16.msrb.mxu0 %v1320_v11 }
  0xac   : > { %1094 = vmatpush.bf16.msrb.mxu1 %v1384_v12 }
  0xad   : > { %1107 = vmatpush.bf16.msrb.mxu2 %v1448_v13 }
  0xae   : > { %1120 = vmatpush.bf16.msrb.mxu3 %v1512_v14  ;;  %1082 = vmatmul.bf16.vlgmr.msrb.gmra.mxu0 %v2084_v61 }
  0xaf   : > { %1095 = vmatmul.bf16.vlgmr.msrb.gmra.mxu1 %v2086_v63 }
  0xb0   : > { %1108 = vmatmul.bf16.vlgmr.msrb.gmra.mxu2 %v2078_v57 }
  0xb1   : > { %1121 = vmatmul.bf16.vlgmr.msrb.gmra.mxu3 %v2082_v60 }
 0x10b   : > { %v1031_v15 = vpop.f32.mrf.mxu0 }
 0x10c   : > { %v1044_v16 = vpop.f32.mrf.mxu1 }
 0x10d   : > { %v1045_v17 = vadd.f32 %v1044_v16, %v1031_v15 }
 0x113   : > { %v1057_v18 = vpop.f32.mrf.mxu2  ;;  %v1033_v23 = vpop.f32.mrf.mxu0 }
 0x114   : > { %v1058_v19 = vadd.f32 %v1057_v18, %v1045_v17  ;;  %v1070_v20 = vpop.f32.mrf.mxu3  ;;  %v1046_v24 = vpop.f32.mrf.mxu1 }
 0x116   : > { %v1071_v22 = vadd.f32 %v1070_v20, %v1058_v19 }
 0x118   : > { %v1126_v25 = vadd.f32 %v1071_v22, %v620_v21 }
 0x11a   : > { %1128 = vst [vmem:[#allocation2] sm:$0xff] %v1126_v25 }
 0x11b   : > { %v1059_v26 = vpop.f32.mrf.mxu2 }
 0x11c   : > { %v1072_v61 = vpop.f32.mrf.mxu3 }
 0x12b   : > { %v1083_v27 = vpop.f32.mrf.mxu0 }
 0x12c   : > { %v1096_v63 = vpop.f32.mrf.mxu1 }
 0x12d   : > { %v1097_v28 = vadd.f32 %v1096_v63, %v1083_v27 }
 0x133   : > { %v1109_v57 = vpop.f32.mrf.mxu2  ;;  %v1085_v30 = vpop.f32.mrf.mxu0 }
 0x134   : > { %v1110_v29 = vadd.f32 %v1109_v57, %v1097_v28  ;;  %v1122_v60 = vpop.f32.mrf.mxu3  ;;  %v1098_v32 = vpop.f32.mrf.mxu1 }
 0x136   : > { %v1123_v33 = vadd.f32 %v1122_v60, %v1110_v29 }
 0x138   : > { %v1127_v34 = vadd.f32 %v1123_v33, %v621_v31  ;;  %1133 = sbr.rel (%p1569_p13) target bundleno = 331 (0x14b), region = 82 }
 0x13a   : > { %1129 = vst [vmem:[#allocation2 + $0x8] sm:$0xff] %v1127_v34 }
 0x13b   : > { %v1111_v35 = vpop.f32.mrf.mxu2 }
 0x13c   : > { %v1124_v36 = vpop.f32.mrf.mxu3 }
 0x13d   : > { %v1134_v37 = vld [vmem:[#allocation2] sm:$0xff] }
 0x13e   : > { %v1136_v39 = vld [vmem:[%s592_s15] sm:$0x3] }
 0x13f   : > { %v1138_v40 = vperm.slane %v1136_v39, 0  ;;  %v1139_v41 = vperm.slane %v1136_v39, 1  ;;  %v1144_v42 = vld [vmem:[%s1988_s18] sm:$0xff] }
 0x140   : > { %v1145_v43 = vunpack.c.l.bf16 %v1144_v42  ;;  %v1146_v44 = vunpack.c.h.bf16 %v1144_v42 }
 0x141   : > { %v1135_v38 = vld [vmem:[#allocation2 + $0x8] sm:$0xff]  ;;  %v1142_v45 = vadd.f32 %v1138_v40, %v1134_v37 }
 0x142   : > { %v1143_v46 = vadd.f32 %v1139_v41, %v1135_v38 }
 0x143   : > { %v1147_v47 = vadd.f32 %v1145_v43, %v1142_v45 }
 0x144   : > { %v1148_v48 = vadd.f32 %v1146_v44, %v1143_v46 }
 0x145   : > { %v1149_v49 = vmax.f32 %v1147_v47, 0.0 }
 0x146   : > { %v1150_v50 = vmax.f32 %v1148_v48, 0.0 }
 0x148   : > { %v1151_v51 = vpack.c.bf16 %v1150_v50, %v1149_v49 }
 0x14a   : > { %1152 = vst [vmem:[%s1993_s12] sm:$0xff] %v1151_v51 }
 0x14b PF: > { %s14_s21 = sadd.s32 1, %s1748_s21   ;;  %s2178_s15 = smov %s1728_s16 }
 0x14c   : > { %p11_p0 = scmp.ge.s32.totalorder %s14_s21, 20   ;;  %s2179_s16 = smov %s1827_s28 }
 0x14d   : > { %s2180_s17 = smov %s1740_s19  ;;  %s2181_s18 = smov %s1744_s20 }
 0x14e   : > { %s2182_s19 = smov %s2185_s22  ;;  %s2183_s20 = smov %s2189_s23 }
 0x14f   :  { %13 = sbr.rel (!%p11_p0) target bundleno = 4 (0x4), region = 126 }

// kernel: resnet_custom_forward.40
= control target key start
LH: loop header
LB: loop body
LE: loop exit
PB: predicated region body
PF: predicated region fallthrough
CT: control target
= control target key end

     0   :  { %s1683_s12 = smov 0   ;;  %s1685_s13 = smov 0   ;;  %s2074_s0 = inlined_call_operand.vmem [shape: bf16[8,4608], index: 0, kind: input, shape index: {}]   ;;  %s2075_s1 = inlined_call_operand.vmem [shape: bf16[4608,512], index: 1, kind: input, shape index: {}]   ;;  %s2076_s2 = inlined_call_operand.vmem [shape: f32[1,512], index: 2, kind: input, shape index: {}]   ;;  %s2077_s3 = inlined_call_operand.vmem [shape: bf16[8,512], index: 3, kind: output, shape index: {}]  }
   0x1   :  { %s1687_s14 = smov 0   ;;  %s1689_s15 = smov 0  }
   0x2   :  { %s1691_s16 = smov 0   ;;  %s1693_s17 = smov 0  }
   0x3   :  { %s1695_s18 = smov 0  }
   0x4 LB: > { %s25_s19 = sadd.s32 1, %s1652_s16  ;;  %s28_s20 = sadd.s32 1, %s1656_s17  ;;  %s1660_s18 = sphi %s1695_s18, %s13_s18   ;;  %s1656_s17 = sphi %s1693_s17, %s2083_s17   ;;  %s1652_s16 = sphi %s1691_s16, %s2082_s16   ;;  %s1648_s15 = sphi %s1689_s15, %s2081_s15   ;;  %s1644_s14 = sphi %s1687_s14, %s2080_s14   ;;  %s1640_s13 = sphi %s1685_s13, %s2079_s13   ;;  %s1636_s12 = sphi %s1683_s12, %s2078_s12  }
   0x5   : > { %p26_p0 = scmp.ge.s32.totalorder %s25_s19, 9  ;;  %p76_p1 = scmp.ne.s32.totalorder %s1640_s13, %s1636_s12 }
   0x6   : > { %p77_p2 = scmp.eq.s32.totalorder %s1660_s18, 0  ;;  %s69_s24 = sadd.s32 1, %s1640_s13 }
   0x7   : > { %s2085_s19 = smov (%p26_p0, %s25_s19), 0  ;;  %s2087_s20 = smov (!%p26_p0, %s28_s20), %s1656_s17 }
   0x8   : > { %p78_p3 = por %p77_p2, %p76_p1  ;;  %p30_p4 = scmp.ge.s32.totalorder %s2087_s20, 2 }
   0x9   : > { %s64_s21 = ssub.s32 %s1652_s16, %s2085_s19  ;;  %p1211_p6 = scmp.ge.s32.totalorder %s1660_s18, 18 }
   0xa   : > { %s2089_s20 = smov (%p30_p4, %s2087_s20), 0 }
   0xb   : > { %s65_s22 = ssub.s32 %s1656_s17, %s2089_s20  ;;  %156 = sbr.rel (%p1211_p6) target bundleno = 87 (0x57), region = 16 }
   0xc   : > { %s66_s23 = sor.u32 %s65_s22, %s64_s21 }
   0xd   : > { %p67_p5 = scmp.eq.s32.totalorder %s66_s23, 0 }
   0xf   : > { %s1734_s25 = scalar_select %p67_p5, %s1640_s13, %s69_s24  }
  0x10   : > { %172 = sbr.rel (!%p78_p3) target bundleno = 87 (0x57), region = 24  ;;  %s174_s26 = sand.u32 (%p78_p3), 1, %s1640_s13  }
  0x11   : > { %s1214_s27 = sshll.u32 (%p78_p3), %s1656_s17, 1  ;;  %s1212_s28 = sshll.u32 (%p78_p3), %s174_s26, 9 }
  0x12   : > { %s1484_s29 = sshll.u32 (%p78_p3), %s1652_s16, 8  ;;  %s1748_s8 = scalar_lea.vmem (%p78_p3), [#allocation3], %s1212_s28 }
  0x13   : > { %s180_s30 = sadd.s32 (%p78_p3), %s1484_s29, %s1214_s27 }
  0x14   : > { %s1216_s4 = sshll.u32 (%p78_p3), %s180_s30, 2 }
  0x15   : > { %s1743_s7 = scalar_lea.vmem %s2075_s1, %s1216_s4 }
  0x16   : > { %v337_v0 = vld [vmem:[%s1743_s7] sm:$0xff]  ;;  %v339_v1 = vld [vmem:[%s1743_s7 + $0x10] sm:$0xff] }
  0x17   : > { %v341_v2 = vld [vmem:[%s1743_s7 + $0x20] sm:$0xff]  ;;  %338 = vst [vmem:[%s1748_s8] sm:$0xff] %v337_v0  ;;  %v343_v3 = vld [vmem:[%s1743_s7 + $0x30] sm:$0xff] }
  0x18   : > { %340 = vst [vmem:[%s1748_s8 + $0x8] sm:$0xff] %v339_v1  ;;  %v345_v4 = vld [vmem:[%s1743_s7 + $0x40] sm:$0xff]  ;;  %v347_v5 = vld [vmem:[%s1743_s7 + $0x50] sm:$0xff] }
  0x19   : > { %342 = vst [vmem:[%s1748_s8 + $0x10] sm:$0xff] %v341_v2  ;;  %v349_v6 = vld [vmem:[%s1743_s7 + $0x60] sm:$0xff]  ;;  %v351_v7 = vld [vmem:[%s1743_s7 + $0x70] sm:$0xff] }
  0x1a   : > { %344 = vst [vmem:[%s1748_s8 + $0x18] sm:$0xff] %v343_v3  ;;  %v353_v8 = vld [vmem:[%s1743_s7 + $0x80] sm:$0xff]  ;;  %v355_v9 = vld [vmem:[%s1743_s7 + $0x90] sm:$0xff] }
  0x1b   : > { %346 = vst [vmem:[%s1748_s8 + $0x20] sm:$0xff] %v345_v4  ;;  %v357_v10 = vld [vmem:[%s1743_s7 + $0xa0] sm:$0xff]  ;;  %v359_v11 = vld [vmem:[%s1743_s7 + $0xb0] sm:$0xff] }
  0x1c   : > { %348 = vst [vmem:[%s1748_s8 + $0x28] sm:$0xff] %v347_v5  ;;  %v361_v12 = vld [vmem:[%s1743_s7 + $0xc0] sm:$0xff]  ;;  %v363_v13 = vld [vmem:[%s1743_s7 + $0xd0] sm:$0xff] }
  0x1d   : > { %350 = vst [vmem:[%s1748_s8 + $0x30] sm:$0xff] %v349_v6  ;;  %v365_v14 = vld [vmem:[%s1743_s7 + $0xe0] sm:$0xff]  ;;  %v367_v15 = vld [vmem:[%s1743_s7 + $0xf0] sm:$0xff] }
  0x1e   : > { %352 = vst [vmem:[%s1748_s8 + $0x38] sm:$0xff] %v351_v7  ;;  %v369_v16 = vld [vmem:[%s1743_s7 + $0x100] sm:$0xff]  ;;  %v371_v17 = vld [vmem:[%s1743_s7 + $0x110] sm:$0xff] }
  0x1f   : > { %354 = vst [vmem:[%s1748_s8 + $0x40] sm:$0xff] %v353_v8  ;;  %v373_v18 = vld [vmem:[%s1743_s7 + $0x120] sm:$0xff]  ;;  %v375_v19 = vld [vmem:[%s1743_s7 + $0x130] sm:$0xff] }
  0x20   : > { %356 = vst [vmem:[%s1748_s8 + $0x48] sm:$0xff] %v355_v9  ;;  %v377_v20 = vld [vmem:[%s1743_s7 + $0x140] sm:$0xff]  ;;  %v379_v21 = vld [vmem:[%s1743_s7 + $0x150] sm:$0xff] }
  0x21   : > { %358 = vst [vmem:[%s1748_s8 + $0x50] sm:$0xff] %v357_v10  ;;  %v381_v22 = vld [vmem:[%s1743_s7 + $0x160] sm:$0xff]  ;;  %v383_v23 = vld [vmem:[%s1743_s7 + $0x170] sm:$0xff] }
  0x22   : > { %360 = vst [vmem:[%s1748_s8 + $0x58] sm:$0xff] %v359_v11  ;;  %v385_v24 = vld [vmem:[%s1743_s7 + $0x180] sm:$0xff]  ;;  %v387_v25 = vld [vmem:[%s1743_s7 + $0x190] sm:$0xff] }
  0x23   : > { %362 = vst [vmem:[%s1748_s8 + $0x60] sm:$0xff] %v361_v12  ;;  %v389_v26 = vld [vmem:[%s1743_s7 + $0x1a0] sm:$0xff]  ;;  %v391_v27 = vld [vmem:[%s1743_s7 + $0x1b0] sm:$0xff] }
  0x24   : > { %364 = vst [vmem:[%s1748_s8 + $0x68] sm:$0xff] %v363_v13  ;;  %v393_v28 = vld [vmem:[%s1743_s7 + $0x1c0] sm:$0xff]  ;;  %v395_v29 = vld [vmem:[%s1743_s7 + $0x1d0] sm:$0xff] }
  0x25   : > { %366 = vst [vmem:[%s1748_s8 + $0x70] sm:$0xff] %v365_v14  ;;  %v397_v30 = vld [vmem:[%s1743_s7 + $0x1e0] sm:$0xff]  ;;  %v399_v31 = vld [vmem:[%s1743_s7 + $0x1f0] sm:$0xff] }
  0x26   : > { %368 = vst [vmem:[%s1748_s8 + $0x78] sm:$0xff] %v367_v15  ;;  %v401_v32 = vld [vmem:[%s1743_s7 + $0x200] sm:$0xff]  ;;  %v403_v33 = vld [vmem:[%s1743_s7 + $0x210] sm:$0xff] }
  0x27   : > { %370 = vst [vmem:[%s1748_s8 + $0x80] sm:$0xff] %v369_v16  ;;  %v405_v34 = vld [vmem:[%s1743_s7 + $0x220] sm:$0xff]  ;;  %v407_v35 = vld [vmem:[%s1743_s7 + $0x230] sm:$0xff] }
  0x28   : > { %372 = vst [vmem:[%s1748_s8 + $0x88] sm:$0xff] %v371_v17  ;;  %v409_v36 = vld [vmem:[%s1743_s7 + $0x240] sm:$0xff]  ;;  %v411_v37 = vld [vmem:[%s1743_s7 + $0x250] sm:$0xff] }
  0x29   : > { %374 = vst [vmem:[%s1748_s8 + $0x90] sm:$0xff] %v373_v18  ;;  %v413_v38 = vld [vmem:[%s1743_s7 + $0x260] sm:$0xff]  ;;  %v415_v39 = vld [vmem:[%s1743_s7 + $0x270] sm:$0xff] }
  0x2a   : > { %376 = vst [vmem:[%s1748_s8 + $0x98] sm:$0xff] %v375_v19  ;;  %v417_v40 = vld [vmem:[%s1743_s7 + $0x280] sm:$0xff]  ;;  %v419_v41 = vld [vmem:[%s1743_s7 + $0x290] sm:$0xff] }
  0x2b   : > { %378 = vst [vmem:[%s1748_s8 + $0xa0] sm:$0xff] %v377_v20  ;;  %v421_v42 = vld [vmem:[%s1743_s7 + $0x2a0] sm:$0xff]  ;;  %v423_v43 = vld [vmem:[%s1743_s7 + $0x2b0] sm:$0xff] }
  0x2c   : > { %380 = vst [vmem:[%s1748_s8 + $0xa8] sm:$0xff] %v379_v21  ;;  %v425_v44 = vld [vmem:[%s1743_s7 + $0x2c0] sm:$0xff]  ;;  %v427_v45 = vld [vmem:[%s1743_s7 + $0x2d0] sm:$0xff] }
  0x2d   : > { %382 = vst [vmem:[%s1748_s8 + $0xb0] sm:$0xff] %v381_v22  ;;  %v429_v46 = vld [vmem:[%s1743_s7 + $0x2e0] sm:$0xff]  ;;  %v431_v47 = vld [vmem:[%s1743_s7 + $0x2f0] sm:$0xff] }
  0x2e   : > { %384 = vst [vmem:[%s1748_s8 + $0xb8] sm:$0xff] %v383_v23  ;;  %v433_v48 = vld [vmem:[%s1743_s7 + $0x300] sm:$0xff]  ;;  %v435_v49 = vld [vmem:[%s1743_s7 + $0x310] sm:$0xff] }
  0x2f   : > { %386 = vst [vmem:[%s1748_s8 + $0xc0] sm:$0xff] %v385_v24  ;;  %v437_v50 = vld [vmem:[%s1743_s7 + $0x320] sm:$0xff]  ;;  %v439_v51 = vld [vmem:[%s1743_s7 + $0x330] sm:$0xff] }
  0x30   : > { %388 = vst [vmem:[%s1748_s8 + $0xc8] sm:$0xff] %v387_v25  ;;  %v441_v52 = vld [vmem:[%s1743_s7 + $0x340] sm:$0xff]  ;;  %v443_v53 = vld [vmem:[%s1743_s7 + $0x350] sm:$0xff] }
  0x31   : > { %390 = vst [vmem:[%s1748_s8 + $0xd0] sm:$0xff] %v389_v26  ;;  %v445_v54 = vld [vmem:[%s1743_s7 + $0x360] sm:$0xff]  ;;  %v447_v55 = vld [vmem:[%s1743_s7 + $0x370] sm:$0xff] }
  0x32   : > { %392 = vst [vmem:[%s1748_s8 + $0xd8] sm:$0xff] %v391_v27  ;;  %v449_v56 = vld [vmem:[%s1743_s7 + $0x380] sm:$0xff]  ;;  %v451_v57 = vld [vmem:[%s1743_s7 + $0x390] sm:$0xff] }
  0x33   : > { %394 = vst [vmem:[%s1748_s8 + $0xe0] sm:$0xff] %v393_v28  ;;  %v453_v58 = vld [vmem:[%s1743_s7 + $0x3a0] sm:$0xff]  ;;  %v455_v59 = vld [vmem:[%s1743_s7 + $0x3b0] sm:$0xff] }
  0x34   : > { %396 = vst [vmem:[%s1748_s8 + $0xe8] sm:$0xff] %v395_v29  ;;  %v457_v60 = vld [vmem:[%s1743_s7 + $0x3c0] sm:$0xff]  ;;  %v459_v61 = vld [vmem:[%s1743_s7 + $0x3d0] sm:$0xff] }
  0x35   : > { %398 = vst [vmem:[%s1748_s8 + $0xf0] sm:$0xff] %v397_v30  ;;  %v461_v62 = vld [vmem:[%s1743_s7 + $0x3e0] sm:$0xff]  ;;  %v463_v63 = vld [vmem:[%s1743_s7 + $0x3f0] sm:$0xff] }
  0x36   : > { %400 = vst [vmem:[%s1748_s8 + $0xf8] sm:$0xff] %v399_v31 }
  0x37   : > { %402 = vst [vmem:[%s1748_s8 + $0x100] sm:$0xff] %v401_v32 }
  0x38   : > { %404 = vst [vmem:[%s1748_s8 + $0x108] sm:$0xff] %v403_v33 }
  0x39   : > { %406 = vst [vmem:[%s1748_s8 + $0x110] sm:$0xff] %v405_v34 }
  0x3a   : > { %408 = vst [vmem:[%s1748_s8 + $0x118] sm:$0xff] %v407_v35 }
  0x3b   : > { %410 = vst [vmem:[%s1748_s8 + $0x120] sm:$0xff] %v409_v36 }
  0x3c   : > { %412 = vst [vmem:[%s1748_s8 + $0x128] sm:$0xff] %v411_v37 }
  0x3d   : > { %414 = vst [vmem:[%s1748_s8 + $0x130] sm:$0xff] %v413_v38 }
  0x3e   : > { %416 = vst [vmem:[%s1748_s8 + $0x138] sm:$0xff] %v415_v39 }
  0x3f   : > { %418 = vst [vmem:[%s1748_s8 + $0x140] sm:$0xff] %v417_v40 }
  0x40   : > { %420 = vst [vmem:[%s1748_s8 + $0x148] sm:$0xff] %v419_v41 }
  0x41   : > { %422 = vst [vmem:[%s1748_s8 + $0x150] sm:$0xff] %v421_v42 }
  0x42   : > { %424 = vst [vmem:[%s1748_s8 + $0x158] sm:$0xff] %v423_v43 }
  0x43   : > { %426 = vst [vmem:[%s1748_s8 + $0x160] sm:$0xff] %v425_v44 }
  0x44   : > { %428 = vst [vmem:[%s1748_s8 + $0x168] sm:$0xff] %v427_v45 }
  0x45   : > { %430 = vst [vmem:[%s1748_s8 + $0x170] sm:$0xff] %v429_v46 }
  0x46   : > { %432 = vst [vmem:[%s1748_s8 + $0x178] sm:$0xff] %v431_v47 }
  0x47   : > { %434 = vst [vmem:[%s1748_s8 + $0x180] sm:$0xff] %v433_v48 }
  0x48   : > { %436 = vst [vmem:[%s1748_s8 + $0x188] sm:$0xff] %v435_v49 }
  0x49   : > { %438 = vst [vmem:[%s1748_s8 + $0x190] sm:$0xff] %v437_v50 }
  0x4a   : > { %440 = vst [vmem:[%s1748_s8 + $0x198] sm:$0xff] %v439_v51 }
  0x4b   : > { %442 = vst [vmem:[%s1748_s8 + $0x1a0] sm:$0xff] %v441_v52 }
  0x4c   : > { %444 = vst [vmem:[%s1748_s8 + $0x1a8] sm:$0xff] %v443_v53 }
  0x4d   : > { %446 = vst [vmem:[%s1748_s8 + $0x1b0] sm:$0xff] %v445_v54 }
  0x4e   : > { %448 = vst [vmem:[%s1748_s8 + $0x1b8] sm:$0xff] %v447_v55 }
  0x4f   : > { %450 = vst [vmem:[%s1748_s8 + $0x1c0] sm:$0xff] %v449_v56 }
  0x50   : > { %452 = vst [vmem:[%s1748_s8 + $0x1c8] sm:$0xff] %v451_v57 }
  0x51   : > { %454 = vst [vmem:[%s1748_s8 + $0x1d0] sm:$0xff] %v453_v58 }
  0x52   : > { %456 = vst [vmem:[%s1748_s8 + $0x1d8] sm:$0xff] %v455_v59 }
  0x53   : > { %458 = vst [vmem:[%s1748_s8 + $0x1e0] sm:$0xff] %v457_v60 }
  0x54   : > { %460 = vst [vmem:[%s1748_s8 + $0x1e8] sm:$0xff] %v459_v61 }
  0x55   : > { %462 = vst [vmem:[%s1748_s8 + $0x1f0] sm:$0xff] %v461_v62 }
  0x56   : > { %464 = vst [vmem:[%s1748_s8 + $0x1f8] sm:$0xff] %v463_v63 }
  0x57 PF: > { %p1217_p7 = scmp.ge.s32.totalorder %s1660_s18, 1  ;;  %p477_p8 = scmp.lt.s32.totalorder %s1660_s18, 19 }
  0x59   : > { %p478_p9 = pnand %p1217_p7, %p477_p8 }
  0x5a   : > { %s484_s9 = sand.u32 (!%p478_p9), 1, %s1636_s12   ;;  %s1219_s10 = sshll.u32 (!%p478_p9), %s1644_s14, 2 }
  0x5b   : > { %481 = sbr.rel (%p478_p9) target bundleno = 328 (0x148), region = 66  ;;  %s1218_s11 = sshll.u32 (!%p478_p9), %s484_s9, 9 }
  0x5c   : > { %p527_p10 = scmp.lt.s32.totalorder (!%p478_p9), %s1219_s10, 35  ;;  %s1221_s21 = sshll.u32 (!%p478_p9), %s1648_s15, 1 }
  0x5d   : > { %p537_p11 = scmp.lt.s32.totalorder (!%p478_p9), %s1221_s21, 3  ;;  %s1897_s5 = scalar_lea.vmem (!%p478_p9), [#allocation3], %s1218_s11 }
  0x5e   : > { %p1224_p12 = scmp.ne.s32.totalorder (!%p478_p9), %s1644_s14, 0 }
  0x60   : > { %s2091_s10 = smov (!%p527_p10, %s1219_s10), 35  ;;  %s2093_s21 = smov (!%p537_p11, %s1221_s21), 3 }
  0x61   : > { %s1220_s22 = sshll.u32 %s2091_s10, 2  ;;  %s539_s12 = scalar_lea.vmem %s2076_s2, %s2093_s21 }
  0x62   : > { %s1883_s26 = scalar_lea.vmem %s2074_s0, %s1220_s22  ;;  %s1223_s29 = sshll.u32 %s2093_s21, 2 }
  0x63   : > { %s1895_s15 = scalar_lea.vmem %s2077_s3, %s1223_s29  ;;  %554 = sbr.rel (%p1224_p12) target bundleno = 107 (0x6b), region = 74 }
  0x68   : > { %v1662_v0 = vmov 0.0  }
  0x69   : > { %555 = vst [vmem:[#allocation2] sm:$0xff] %v1662_v0 }
  0x6a   : > { %556 = vst [vmem:[#allocation2 + $0x8] sm:$0xff] %v1662_v0 }
  0x6b PF: > { %v1283_v1 = vld [vmem:[%s1897_s5 + $0x70] sm:$0xf]  ;;  %v1500_v2 = vld [vmem:[%s1897_s5 + $0x74] sm:$0xf0]  ;;  %v1275_v12 = vld [vmem:[%s1897_s5 + $0x60] sm:$0xf] }
  0x6c   : > { %v1347_v3 = vld [vmem:[%s1897_s5 + $0xf0] sm:$0xf]  ;;  %v1284_v4 = vor.u32 %v1500_v2, %v1283_v1  ;;  %v1516_v5 = vld [vmem:[%s1897_s5 + $0xf4] sm:$0xf0]  ;;  %v1498_v14 = vld [vmem:[%s1897_s5 + $0x64] sm:$0xf0] }
  0x6d   : > { %v1411_v6 = vld [vmem:[%s1897_s5 + $0x170] sm:$0xf]  ;;  %v1532_v7 = vld [vmem:[%s1897_s5 + $0x174] sm:$0xf0]  ;;  %v1348_v8 = vor.u32 %v1516_v5, %v1347_v3  ;;  %v1339_v15 = vld [vmem:[%s1897_s5 + $0xe0] sm:$0xf]  ;;  %v1276_v17 = vor.u32 %v1498_v14, %v1275_v12 }
  0x6e   : > { %v1412_v9 = vor.u32 %v1532_v7, %v1411_v6  ;;  %v1475_v10 = vld [vmem:[%s1897_s5 + $0x1f0] sm:$0xf]  ;;  %v1548_v11 = vld [vmem:[%s1897_s5 + $0x1f4] sm:$0xf0]  ;;  %959 = vmatpush.bf16.msra.mxu0 %v1284_v4  ;;  %v1514_v16 = vld [vmem:[%s1897_s5 + $0xe4] sm:$0xf0] }
  0x6f   : > { %v1476_v13 = vor.u32 %v1548_v11, %v1475_v10  ;;  %972 = vmatpush.bf16.msra.mxu1 %v1348_v8  ;;  %v1340_v18 = vor.u32 %v1514_v16, %v1339_v15  ;;  %v1403_v19 = vld [vmem:[%s1897_s5 + $0x160] sm:$0xf]  ;;  %v1530_v20 = vld [vmem:[%s1897_s5 + $0x164] sm:$0xf0]  ;;  %v1267_v24 = vld [vmem:[%s1897_s5 + $0x50] sm:$0xf] }
  0x70   : > { %985 = vmatpush.bf16.msra.mxu2 %v1412_v9  ;;  %v1467_v21 = vld [vmem:[%s1897_s5 + $0x1e0] sm:$0xf]  ;;  %v1404_v22 = vor.u32 %v1530_v20, %v1403_v19  ;;  %v1546_v23 = vld [vmem:[%s1897_s5 + $0x1e4] sm:$0xf0]  ;;  %v1496_v25 = vld [vmem:[%s1897_s5 + $0x54] sm:$0xf0] }
  0x71   : > { %998 = vmatpush.bf16.msra.mxu3 %v1476_v13  ;;  %v1468_v26 = vor.u32 %v1546_v23, %v1467_v21  ;;  %v1331_v27 = vld [vmem:[%s1897_s5 + $0xd0] sm:$0xf]  ;;  %v1512_v28 = vld [vmem:[%s1897_s5 + $0xd4] sm:$0xf0]  ;;  %v1268_v30 = vor.u32 %v1496_v25, %v1267_v24  ;;  %v1259_v36 = vld [vmem:[%s1897_s5 + $0x40] sm:$0xf] }
  0x72   : > { %v1395_v29 = vld [vmem:[%s1897_s5 + $0x150] sm:$0xf]  ;;  %960 = vmatpush.bf16.msra.mxu0 %v1276_v17  ;;  %v1528_v31 = vld [vmem:[%s1897_s5 + $0x154] sm:$0xf0]  ;;  %v1332_v34 = vor.u32 %v1512_v28, %v1331_v27  ;;  %v1494_v37 = vld [vmem:[%s1897_s5 + $0x44] sm:$0xf0] }
  0x73   : > { %v1459_v32 = vld [vmem:[%s1897_s5 + $0x1d0] sm:$0xf]  ;;  %v1544_v33 = vld [vmem:[%s1897_s5 + $0x1d4] sm:$0xf0]  ;;  %973 = vmatpush.bf16.msra.mxu1 %v1340_v18  ;;  %v1396_v35 = vor.u32 %v1528_v31, %v1395_v29  ;;  %v1323_v38 = vld [vmem:[%s1897_s5 + $0xc0] sm:$0xf]  ;;  %v1260_v45 = vor.u32 %v1494_v37, %v1259_v36 }
  0x74   : > { %986 = vmatpush.bf16.msra.mxu2 %v1404_v22  ;;  %v1460_v39 = vor.u32 %v1544_v33, %v1459_v32  ;;  %v1510_v40 = vld [vmem:[%s1897_s5 + $0xc4] sm:$0xf0]  ;;  %v1387_v41 = vld [vmem:[%s1897_s5 + $0x140] sm:$0xf]  ;;  %v1251_v48 = vld [vmem:[%s1897_s5 + $0x30] sm:$0xf] }
  0x75   : > { %999 = vmatpush.bf16.msra.mxu3 %v1468_v26  ;;  %v1526_v42 = vld [vmem:[%s1897_s5 + $0x144] sm:$0xf0]  ;;  %v1451_v43 = vld [vmem:[%s1897_s5 + $0x1c0] sm:$0xf]  ;;  %v1324_v46 = vor.u32 %v1510_v40, %v1323_v38  ;;  %v1492_v49 = vld [vmem:[%s1897_s5 + $0x34] sm:$0xf0] }
  0x76   : > { %v1542_v44 = vld [vmem:[%s1897_s5 + $0x1c4] sm:$0xf0]  ;;  %961 = vmatpush.bf16.msra.mxu0 %v1268_v30  ;;  %v1388_v47 = vor.u32 %v1526_v42, %v1387_v41  ;;  %v1315_v50 = vld [vmem:[%s1897_s5 + $0xb0] sm:$0xf]  ;;  %v1508_v52 = vld [vmem:[%s1897_s5 + $0xb4] sm:$0xf0]  ;;  %v1252_v57 = vor.u32 %v1492_v49, %v1251_v48 }
  0x77   : > { %974 = vmatpush.bf16.msra.mxu1 %v1332_v34  ;;  %v1452_v51 = vor.u32 %v1542_v44, %v1451_v43  ;;  %v1379_v53 = vld [vmem:[%s1897_s5 + $0x130] sm:$0xf]  ;;  %v1524_v54 = vld [vmem:[%s1897_s5 + $0x134] sm:$0xf0]  ;;  %v1316_v58 = vor.u32 %v1508_v52, %v1315_v50  ;;  %v1243_v60 = vld [vmem:[%s1897_s5 + $0x20] sm:$0xf] }
  0x78   : > { %987 = vmatpush.bf16.msra.mxu2 %v1396_v35  ;;  %v1443_v55 = vld [vmem:[%s1897_s5 + $0x1b0] sm:$0xf]  ;;  %v1540_v56 = vld [vmem:[%s1897_s5 + $0x1b4] sm:$0xf0]  ;;  %v1380_v59 = vor.u32 %v1524_v54, %v1379_v53  ;;  %v1490_v61 = vld [vmem:[%s1897_s5 + $0x24] sm:$0xf0] }
  0x79   : > { %1000 = vmatpush.bf16.msra.mxu3 %v1460_v39  ;;  %v1307_v62 = vld [vmem:[%s1897_s5 + $0xa0] sm:$0xf]  ;;  %v1444_v63 = vor.u32 %v1540_v56, %v1443_v55  ;;  %v1506_v0 = vld [vmem:[%s1897_s5 + $0xa4] sm:$0xf0]  ;;  %v1244_v5 = vor.u32 %v1490_v61, %v1243_v60  ;;  %v1235_v8 = vld [vmem:[%s1897_s5 + $0x10] sm:$0xf] }
  0x7a   : > { %962 = vmatpush.bf16.msra.mxu0 %v1260_v45  ;;  %v1371_v1 = vld [vmem:[%s1897_s5 + $0x120] sm:$0xf]  ;;  %v1522_v2 = vld [vmem:[%s1897_s5 + $0x124] sm:$0xf0]  ;;  %v1308_v6 = vor.u32 %v1506_v0, %v1307_v62  ;;  %v1488_v9 = vld [vmem:[%s1897_s5 + $0x14] sm:$0xf0] }
  0x7b   : > { %975 = vmatpush.bf16.msra.mxu1 %v1324_v46  ;;  %v1435_v3 = vld [vmem:[%s1897_s5 + $0x1a0] sm:$0xf]  ;;  %v1538_v4 = vld [vmem:[%s1897_s5 + $0x1a4] sm:$0xf0]  ;;  %v1372_v7 = vor.u32 %v1522_v2, %v1371_v1  ;;  %v1299_v10 = vld [vmem:[%s1897_s5 + $0x90] sm:$0xf]  ;;  %v1236_v17 = vor.u32 %v1488_v9, %v1235_v8 }
  0x7c   : > { %988 = vmatpush.bf16.msra.mxu2 %v1388_v47  ;;  %v1436_v11 = vor.u32 %v1538_v4, %v1435_v3  ;;  %v1504_v12 = vld [vmem:[%s1897_s5 + $0x94] sm:$0xf0]  ;;  %v1363_v13 = vld [vmem:[%s1897_s5 + $0x110] sm:$0xf]  ;;  %v1227_v18 = vld [vmem:[%s1897_s5] sm:$0xf] }
  0x7d   : > { %1001 = vmatpush.bf16.msra.mxu3 %v1452_v51  ;;  %v1520_v14 = vld [vmem:[%s1897_s5 + $0x114] sm:$0xf0]  ;;  %v1427_v15 = vld [vmem:[%s1897_s5 + $0x190] sm:$0xf]  ;;  %v1486_v19 = vld [vmem:[%s1897_s5 + $0x4] sm:$0xf0]  ;;  %v1300_v21 = vor.u32 %v1504_v12, %v1299_v10 }
  0x7e   : > { %963 = vmatpush.bf16.msra.mxu0 %v1252_v57  ;;  %v1536_v16 = vld [vmem:[%s1897_s5 + $0x194] sm:$0xf0]  ;;  %v1291_v20 = vld [vmem:[%s1897_s5 + $0x80] sm:$0xf]  ;;  %v1364_v22 = vor.u32 %v1520_v14, %v1363_v13  ;;  %v1502_v23 = vld [vmem:[%s1897_s5 + $0x84] sm:$0xf0]  ;;  %v1228_v33 = vor.u32 %v1486_v19, %v1227_v18 }
  0x7f   : > { %976 = vmatpush.bf16.msra.mxu1 %v1316_v58  ;;  %v1355_v24 = vld [vmem:[%s1897_s5 + $0x100] sm:$0xf]  ;;  %v1518_v25 = vld [vmem:[%s1897_s5 + $0x104] sm:$0xf0]  ;;  %v1428_v26 = vor.u32 %v1536_v16, %v1427_v15  ;;  %v1499_v29 = vld [vmem:[%s1897_s5 + $0x74] sm:$0xf]  ;;  %v1292_v38 = vor.u32 %v1502_v23, %v1291_v20 }
  0x80   : > { %989 = vmatpush.bf16.msra.mxu2 %v1380_v59  ;;  %v1419_v27 = vld [vmem:[%s1897_s5 + $0x180] sm:$0xf]  ;;  %v1534_v28 = vld [vmem:[%s1897_s5 + $0x184] sm:$0xf0]  ;;  %v1285_v30 = vld [vmem:[%s1897_s5 + $0x78] sm:$0xf0]  ;;  %v1356_v39 = vor.u32 %v1518_v25, %v1355_v24 }
  0x81   : > { %1002 = vmatpush.bf16.msra.mxu3 %v1444_v63  ;;  %v1515_v31 = vld [vmem:[%s1897_s5 + $0xf4] sm:$0xf]  ;;  %v560_v32 = vld [vmem:[%s1883_s26 + $0x8] sm:$0xff]  ;;  %v1420_v43 = vor.u32 %v1534_v28, %v1419_v27  ;;  %v1288_v44 = vor.u32 %v1499_v29, %v1285_v30  ;;  %v1497_v48 = vld [vmem:[%s1897_s5 + $0x64] sm:$0xf]  ;;  %p1481_p13 = scmp.ne.s32.totalorder %s1644_s14, 8 }
  0x82   : > { %964 = vmatpush.bf16.msra.mxu0 %v1244_v5  ;;  %v1349_v34 = vld [vmem:[%s1897_s5 + $0xf8] sm:$0xf0]  ;;  %v1531_v35 = vld [vmem:[%s1897_s5 + $0x174] sm:$0xf]  ;;  %v629_v37 = vunpack.c.l.b16 %v560_v32  ;;  %v630_v42 = vunpack.c.h.b16 %v560_v32  ;;  %v1277_v49 = vld [vmem:[%s1897_s5 + $0x68] sm:$0xf0] }
  0x83   : > { %977 = vmatpush.bf16.msra.mxu1 %v1308_v6  ;;  %v1413_v36 = vld [vmem:[%s1897_s5 + $0x178] sm:$0xf0]  ;;  %v1547_v40 = vld [vmem:[%s1897_s5 + $0x1f4] sm:$0xf]  ;;  %v1352_v46 = vor.u32 %v1515_v31, %v1349_v34  ;;  %v1513_v50 = vld [vmem:[%s1897_s5 + $0xe4] sm:$0xf]  ;;  %v1280_v62 = vor.u32 %v1497_v48, %v1277_v49 }
  0x84   : > { %990 = vmatpush.bf16.msra.mxu2 %v1372_v7  ;;  %v1477_v41 = vld [vmem:[%s1897_s5 + $0x1f8] sm:$0xf0]  ;;  %v559_v45 = vld [vmem:[%s1883_s26] sm:$0xff]  ;;  %v1416_v47 = vor.u32 %v1531_v35, %v1413_v36  ;;  %v1341_v54 = vld [vmem:[%s1897_s5 + $0xe8] sm:$0xf0]  ;;  %v1980_v57 = vpack.c.b16 %v629_v37, %v629_v37  ;;  %v1984_v60 = vpack.c.b16 %v630_v42, %v630_v42 }
  0x85   : > { %1003 = vmatpush.bf16.msra.mxu3 %v1436_v11  ;;  %v627_v51 = vunpack.c.l.b16 %v559_v45  ;;  %v628_v52 = vunpack.c.h.b16 %v559_v45  ;;  %v1480_v53 = vor.u32 %v1547_v40, %v1477_v41  ;;  %v1529_v55 = vld [vmem:[%s1897_s5 + $0x164] sm:$0xf]  ;;  %v1405_v56 = vld [vmem:[%s1897_s5 + $0x168] sm:$0xf0]  ;;  %v1344_v0 = vor.u32 %v1513_v50, %v1341_v54  ;;  %v1495_v2 = vld [vmem:[%s1897_s5 + $0x54] sm:$0xf] }
  0x86   : > { %965 = vmatpush.bf16.msra.mxu0 %v1236_v17  ;;  %v1545_v58 = vld [vmem:[%s1897_s5 + $0x1e4] sm:$0xf]  ;;  %v1469_v59 = vld [vmem:[%s1897_s5 + $0x1e8] sm:$0xf0]  ;;  %v1408_v1 = vor.u32 %v1529_v55, %v1405_v56  ;;  %v1269_v3 = vld [vmem:[%s1897_s5 + $0x58] sm:$0xf0] }
  0x87   : > { %978 = vmatpush.bf16.msra.mxu1 %v1300_v21  ;;  %v1986_v61 = vpack.c.b16 %v627_v51, %v627_v51  ;;  %v1988_v63 = vpack.c.b16 %v628_v52, %v628_v52  ;;  %v1511_v4 = vld [vmem:[%s1897_s5 + $0xd4] sm:$0xf]  ;;  %v1472_v5 = vor.u32 %v1545_v58, %v1469_v59  ;;  %v1333_v6 = vld [vmem:[%s1897_s5 + $0xd8] sm:$0xf0]  ;;  %v1272_v11 = vor.u32 %v1495_v2, %v1269_v3  ;;  %v1493_v14 = vld [vmem:[%s1897_s5 + $0x44] sm:$0xf] }
  0x88   : > { %991 = vmatpush.bf16.msra.mxu2 %v1364_v22  ;;  %v1527_v7 = vld [vmem:[%s1897_s5 + $0x154] sm:$0xf]  ;;  %v1397_v8 = vld [vmem:[%s1897_s5 + $0x158] sm:$0xf0]  ;;  %v1336_v12 = vor.u32 %v1511_v4, %v1333_v6  ;;  %v1261_v15 = vld [vmem:[%s1897_s5 + $0x48] sm:$0xf0] }
  0x89   : > { %1004 = vmatpush.bf16.msra.mxu3 %v1428_v26  ;;  %v1543_v9 = vld [vmem:[%s1897_s5 + $0x1d4] sm:$0xf]  ;;  %v1461_v10 = vld [vmem:[%s1897_s5 + $0x1d8] sm:$0xf0]  ;;  %v1400_v13 = vor.u32 %v1527_v7, %v1397_v8  ;;  %v1509_v16 = vld [vmem:[%s1897_s5 + $0xc4] sm:$0xf]  ;;  %v1264_v23 = vor.u32 %v1493_v14, %v1261_v15 }
  0x8a   : > { %966 = vmatpush.bf16.msra.mxu0 %v1228_v33  ;;  %v1464_v17 = vor.u32 %v1543_v9, %v1461_v10  ;;  %v1325_v18 = vld [vmem:[%s1897_s5 + $0xc8] sm:$0xf0]  ;;  %v1525_v19 = vld [vmem:[%s1897_s5 + $0x144] sm:$0xf]  ;;  %v1491_v26 = vld [vmem:[%s1897_s5 + $0x34] sm:$0xf] }
  0x8b   : > { %979 = vmatpush.bf16.msra.mxu1 %v1292_v38  ;;  %v1389_v20 = vld [vmem:[%s1897_s5 + $0x148] sm:$0xf0]  ;;  %v1541_v21 = vld [vmem:[%s1897_s5 + $0x1c4] sm:$0xf]  ;;  %v1328_v24 = vor.u32 %v1509_v16, %v1325_v18  ;;  %v1253_v27 = vld [vmem:[%s1897_s5 + $0x38] sm:$0xf0] }
  0x8c   : > { %992 = vmatpush.bf16.msra.mxu2 %v1356_v39  ;;  %v1453_v22 = vld [vmem:[%s1897_s5 + $0x1c8] sm:$0xf0]  ;;  %v1392_v25 = vor.u32 %v1525_v19, %v1389_v20  ;;  %v1507_v28 = vld [vmem:[%s1897_s5 + $0xb4] sm:$0xf]  ;;  %v1317_v30 = vld [vmem:[%s1897_s5 + $0xb8] sm:$0xf0]  ;;  %v1256_v35 = vor.u32 %v1491_v26, %v1253_v27 }
  0x8d   : > { %1005 = vmatpush.bf16.msra.mxu3 %v1420_v43  ;;  %967 = vmatmul.bf16.vlgmr.msra.gmra.mxu0 %v1986_v61  ;;  %v1456_v29 = vor.u32 %v1541_v21, %v1453_v22  ;;  %v1523_v31 = vld [vmem:[%s1897_s5 + $0x134] sm:$0xf]  ;;  %v1381_v32 = vld [vmem:[%s1897_s5 + $0x138] sm:$0xf0]  ;;  %v1320_v36 = vor.u32 %v1507_v28, %v1317_v30  ;;  %v1489_v38 = vld [vmem:[%s1897_s5 + $0x24] sm:$0xf] }
  0x8e   : > { %1011 = vmatpush.bf16.msrb.mxu0 %v1288_v44  ;;  %980 = vmatmul.bf16.vlgmr.msra.gmra.mxu1 %v1988_v63  ;;  %v1539_v33 = vld [vmem:[%s1897_s5 + $0x1b4] sm:$0xf]  ;;  %v1445_v34 = vld [vmem:[%s1897_s5 + $0x1b8] sm:$0xf0]  ;;  %v1384_v37 = vor.u32 %v1523_v31, %v1381_v32  ;;  %v1245_v39 = vld [vmem:[%s1897_s5 + $0x28] sm:$0xf0] }
  0x8f   : > { %1024 = vmatpush.bf16.msrb.mxu1 %v1352_v46  ;;  %993 = vmatmul.bf16.vlgmr.msra.gmra.mxu2 %v1980_v57  ;;  %v1505_v40 = vld [vmem:[%s1897_s5 + $0xa4] sm:$0xf]  ;;  %v1448_v41 = vor.u32 %v1539_v33, %v1445_v34  ;;  %v1309_v42 = vld [vmem:[%s1897_s5 + $0xa8] sm:$0xf0]  ;;  %v1487_v50 = vld [vmem:[%s1897_s5 + $0x14] sm:$0xf] }
  0x90   : > { %1037 = vmatpush.bf16.msrb.mxu2 %v1416_v47  ;;  %1006 = vmatmul.bf16.vlgmr.msra.gmra.mxu3 %v1984_v60  ;;  %v1521_v43 = vld [vmem:[%s1897_s5 + $0x124] sm:$0xf]  ;;  %v1373_v44 = vld [vmem:[%s1897_s5 + $0x128] sm:$0xf0]  ;;  %v1248_v47 = vor.u32 %v1489_v38, %v1245_v39  ;;  %v1312_v48 = vor.u32 %v1505_v40, %v1309_v42  ;;  %v1237_v51 = vld [vmem:[%s1897_s5 + $0x18] sm:$0xf0] }
  0x91   : > { %1050 = vmatpush.bf16.msrb.mxu3 %v1480_v53  ;;  %v1537_v45 = vld [vmem:[%s1897_s5 + $0x1a4] sm:$0xf]  ;;  %v1437_v46 = vld [vmem:[%s1897_s5 + $0x1a8] sm:$0xf0]  ;;  %v1376_v49 = vor.u32 %v1521_v43, %v1373_v44  ;;  %v1503_v52 = vld [vmem:[%s1897_s5 + $0x94] sm:$0xf] }
  0x92   : > { %1012 = vmatpush.bf16.msrb.mxu0 %v1280_v62  ;;  %v1440_v53 = vor.u32 %v1537_v45, %v1437_v46  ;;  %v1301_v54 = vld [vmem:[%s1897_s5 + $0x98] sm:$0xf0]  ;;  %v1519_v55 = vld [vmem:[%s1897_s5 + $0x114] sm:$0xf]  ;;  %v1240_v62 = vor.u32 %v1487_v50, %v1237_v51  ;;  %v1485_v2 = vld [vmem:[%s1897_s5 + $0x4] sm:$0xf] }
  0x93   : > { %1025 = vmatpush.bf16.msrb.mxu1 %v1344_v0  ;;  %v1365_v56 = vld [vmem:[%s1897_s5 + $0x118] sm:$0xf0]  ;;  %v1535_v58 = vld [vmem:[%s1897_s5 + $0x194] sm:$0xf]  ;;  %v1304_v0 = vor.u32 %v1503_v52, %v1301_v54  ;;  %v1229_v3 = vld [vmem:[%s1897_s5 + $0x8] sm:$0xf0] }
  0x94   : > { %1038 = vmatpush.bf16.msrb.mxu2 %v1408_v1  ;;  %v1429_v59 = vld [vmem:[%s1897_s5 + $0x198] sm:$0xf0]  ;;  %v1368_v1 = vor.u32 %v1519_v55, %v1365_v56  ;;  %v1501_v4 = vld [vmem:[%s1897_s5 + $0x84] sm:$0xf]  ;;  %v1293_v6 = vld [vmem:[%s1897_s5 + $0x88] sm:$0xf0] }
  0x95   : > { %1051 = vmatpush.bf16.msrb.mxu3 %v1472_v5  ;;  %v1432_v5 = vor.u32 %v1535_v58, %v1429_v59  ;;  %v1517_v7 = vld [vmem:[%s1897_s5 + $0x104] sm:$0xf]  ;;  %v1357_v8 = vld [vmem:[%s1897_s5 + $0x108] sm:$0xf0]  ;;  %v557_v21 = vld [vmem:[#allocation2] sm:$0xff] }
  0x96   : > { %1013 = vmatpush.bf16.msrb.mxu0 %v1272_v11  ;;  %v1533_v9 = vld [vmem:[%s1897_s5 + $0x184] sm:$0xf]  ;;  %v1421_v10 = vld [vmem:[%s1897_s5 + $0x188] sm:$0xf0]  ;;  %v1232_v11 = vor.u32 %v1485_v2, %v1229_v3  ;;  %v558_v31 = vld [vmem:[#allocation2 + $0x8] sm:$0xff] }
  0x97   : > { %1026 = vmatpush.bf16.msrb.mxu1 %v1336_v12  ;;  %v1296_v12 = vor.u32 %v1501_v4, %v1293_v6  ;;  %v1424_v14 = vor.u32 %v1533_v9, %v1421_v10 }
  0x98   : > { %1039 = vmatpush.bf16.msrb.mxu2 %v1400_v13  ;;  %v1360_v13 = vor.u32 %v1517_v7, %v1357_v8 }
  0x99   : > { %1052 = vmatpush.bf16.msrb.mxu3 %v1464_v17 }
  0x9a   : > { %1014 = vmatpush.bf16.msrb.mxu0 %v1264_v23 }
  0x9b   : > { %1027 = vmatpush.bf16.msrb.mxu1 %v1328_v24 }
  0x9c   : > { %1040 = vmatpush.bf16.msrb.mxu2 %v1392_v25 }
  0x9d   : > { %1053 = vmatpush.bf16.msrb.mxu3 %v1456_v29 }
  0x9e   : > { %1015 = vmatpush.bf16.msrb.mxu0 %v1256_v35 }
  0x9f   : > { %1028 = vmatpush.bf16.msrb.mxu1 %v1320_v36 }
  0xa0   : > { %1041 = vmatpush.bf16.msrb.mxu2 %v1384_v37 }
  0xa1   : > { %1054 = vmatpush.bf16.msrb.mxu3 %v1448_v41 }
  0xa2   : > { %1016 = vmatpush.bf16.msrb.mxu0 %v1248_v47 }
  0xa3   : > { %1029 = vmatpush.bf16.msrb.mxu1 %v1312_v48 }
  0xa4   : > { %1042 = vmatpush.bf16.msrb.mxu2 %v1376_v49 }
  0xa5   : > { %1055 = vmatpush.bf16.msrb.mxu3 %v1440_v53 }
  0xa6   : > { %1017 = vmatpush.bf16.msrb.mxu0 %v1240_v62 }
  0xa7   : > { %1030 = vmatpush.bf16.msrb.mxu1 %v1304_v0 }
  0xa8   : > { %1043 = vmatpush.bf16.msrb.mxu2 %v1368_v1 }
  0xa9   : > { %1056 = vmatpush.bf16.msrb.mxu3 %v1432_v5 }
  0xaa   : > { %1018 = vmatpush.bf16.msrb.mxu0 %v1232_v11 }
  0xab   : > { %1031 = vmatpush.bf16.msrb.mxu1 %v1296_v12 }
  0xac   : > { %1044 = vmatpush.bf16.msrb.mxu2 %v1360_v13 }
  0xad   : > { %1057 = vmatpush.bf16.msrb.mxu3 %v1424_v14  ;;  %1019 = vmatmul.bf16.vlgmr.msrb.gmra.mxu0 %v1986_v61 }
  0xae   : > { %1032 = vmatmul.bf16.vlgmr.msrb.gmra.mxu1 %v1988_v63 }
  0xaf   : > { %1045 = vmatmul.bf16.vlgmr.msrb.gmra.mxu2 %v1980_v57 }
  0xb0   : > { %1058 = vmatmul.bf16.vlgmr.msrb.gmra.mxu3 %v1984_v60 }
 0x10a   : > { %v968_v15 = vpop.f32.mrf.mxu0 }
 0x10b   : > { %v981_v16 = vpop.f32.mrf.mxu1 }
 0x10c   : > { %v982_v17 = vadd.f32 %v981_v16, %v968_v15 }
 0x112   : > { %v994_v18 = vpop.f32.mrf.mxu2  ;;  %v970_v23 = vpop.f32.mrf.mxu0 }
 0x113   : > { %v995_v19 = vadd.f32 %v994_v18, %v982_v17  ;;  %v1007_v20 = vpop.f32.mrf.mxu3  ;;  %v983_v24 = vpop.f32.mrf.mxu1 }
 0x115   : > { %v1008_v22 = vadd.f32 %v1007_v20, %v995_v19 }
 0x117   : > { %v1063_v25 = vadd.f32 %v1008_v22, %v557_v21 }
 0x119   : > { %1065 = vst [vmem:[#allocation2] sm:$0xff] %v1063_v25 }
 0x11a   : > { %v996_v26 = vpop.f32.mrf.mxu2 }
 0x11b   : > { %v1009_v61 = vpop.f32.mrf.mxu3 }
 0x12a   : > { %v1020_v27 = vpop.f32.mrf.mxu0 }
 0x12b   : > { %v1033_v63 = vpop.f32.mrf.mxu1 }
 0x12c   : > { %v1034_v28 = vadd.f32 %v1033_v63, %v1020_v27 }
 0x132   : > { %v1046_v57 = vpop.f32.mrf.mxu2  ;;  %v1022_v30 = vpop.f32.mrf.mxu0 }
 0x133   : > { %v1047_v29 = vadd.f32 %v1046_v57, %v1034_v28  ;;  %v1059_v60 = vpop.f32.mrf.mxu3  ;;  %v1035_v32 = vpop.f32.mrf.mxu1 }
 0x135   : > { %v1060_v33 = vadd.f32 %v1059_v60, %v1047_v29 }
 0x137   : > { %v1064_v34 = vadd.f32 %v1060_v33, %v558_v31  ;;  %1070 = sbr.rel (%p1481_p13) target bundleno = 328 (0x148), region = 78 }
 0x139   : > { %1066 = vst [vmem:[#allocation2 + $0x8] sm:$0xff] %v1064_v34 }
 0x13a   : > { %v1048_v35 = vpop.f32.mrf.mxu2 }
 0x13b   : > { %v1061_v36 = vpop.f32.mrf.mxu3 }
 0x13c   : > { %v1071_v37 = vld [vmem:[#allocation2] sm:$0xff] }
 0x13d   : > { %v1073_v39 = vld [vmem:[%s539_s12] sm:$0x3] }
 0x13e   : > { %v1075_v40 = vperm.slane %v1073_v39, 0  ;;  %v1076_v41 = vperm.slane %v1073_v39, 1 }
 0x140   : > { %v1072_v38 = vld [vmem:[#allocation2 + $0x8] sm:$0xff]  ;;  %v1079_v42 = vadd.f32 %v1075_v40, %v1071_v37 }
 0x141   : > { %v1080_v43 = vadd.f32 %v1076_v41, %v1072_v38 }
 0x142   : > { %v1081_v44 = vmax.f32 %v1079_v42, 0.0 }
 0x143   : > { %v1082_v45 = vmax.f32 %v1080_v43, 0.0 }
 0x145   : > { %v1083_v46 = vpack.c.bf16 %v1082_v45, %v1081_v44 }
 0x147   : > { %1084 = vst [vmem:[%s1895_s15] sm:$0xff] %v1083_v46 }
 0x148 PF: > { %s13_s18 = sadd.s32 1, %s1660_s18   ;;  %s2078_s12 = smov %s1640_s13 }
 0x149   : > { %p10_p0 = scmp.ge.s32.totalorder %s13_s18, 20   ;;  %s2079_s13 = smov %s1734_s25 }
 0x14a   : > { %s2080_s14 = smov %s1652_s16  ;;  %s2081_s15 = smov %s1656_s17 }
 0x14b   : > { %s2082_s16 = smov %s2085_s19  ;;  %s2083_s17 = smov %s2089_s20 }
 0x14c   :  { %12 = sbr.rel (!%p10_p0) target bundleno = 4 (0x4), region = 119 }

// kernel: resnet_custom_forward.42
= control target key start
LH: loop header
LB: loop body
LE: loop exit
PB: predicated region body
PF: predicated region fallthrough
CT: control target
= control target key end

     0   :  { %s649_s1 = inlined_call_operand.vmem [shape: bf16[512,128], index: 1, kind: input, shape index: {}]   ;;  %s650_s0 = inlined_call_operand.vmem [shape: bf16[8,512], index: 0, kind: input, shape index: {}]   ;;  %s651_s2 = inlined_call_operand.vmem [shape: f32[1,128], index: 2, kind: input, shape index: {}]   ;;  %s652_s3 = inlined_call_operand.vmem [shape: f32[8,128], index: 3, kind: output, shape index: {}]  }
   0x1   :  { %v495_v0 = vld [vmem:[%s649_s1 + $0x38] sm:$0xff]  ;;  %v494_v4 = vld [vmem:[%s649_s1 + $0x30] sm:$0xff]  ;;  %v493_v8 = vld [vmem:[%s649_s1 + $0x28] sm:$0xff] }
   0x2   :  { %v503_v1 = vld [vmem:[%s649_s1 + $0x78] sm:$0xff]  ;;  %292 = vmatpush.bf16.msra.mxu0 %v495_v0  ;;  %v502_v5 = vld [vmem:[%s649_s1 + $0x70] sm:$0xff]  ;;  %v501_v9 = vld [vmem:[%s649_s1 + $0x68] sm:$0xff] }
   0x3   :  { %v511_v2 = vld [vmem:[%s649_s1 + $0xb8] sm:$0xff]  ;;  %305 = vmatpush.bf16.msra.mxu1 %v503_v1  ;;  %v510_v6 = vld [vmem:[%s649_s1 + $0xb0] sm:$0xff]  ;;  %v509_v10 = vld [vmem:[%s649_s1 + $0xa8] sm:$0xff] }
   0x4   :  { %v519_v3 = vld [vmem:[%s649_s1 + $0xf8] sm:$0xff]  ;;  %318 = vmatpush.bf16.msra.mxu2 %v511_v2  ;;  %v518_v7 = vld [vmem:[%s649_s1 + $0xf0] sm:$0xff]  ;;  %v517_v11 = vld [vmem:[%s649_s1 + $0xe8] sm:$0xff] }
   0x5   :  { %331 = vmatpush.bf16.msra.mxu3 %v519_v3  ;;  %v492_v12 = vld [vmem:[%s649_s1 + $0x20] sm:$0xff]  ;;  %v491_v16 = vld [vmem:[%s649_s1 + $0x18] sm:$0xff]  ;;  %v490_v20 = vld [vmem:[%s649_s1 + $0x10] sm:$0xff] }
   0x6   :  { %293 = vmatpush.bf16.msra.mxu0 %v494_v4  ;;  %v500_v13 = vld [vmem:[%s649_s1 + $0x60] sm:$0xff]  ;;  %v499_v17 = vld [vmem:[%s649_s1 + $0x58] sm:$0xff]  ;;  %v498_v21 = vld [vmem:[%s649_s1 + $0x50] sm:$0xff] }
   0x7   :  { %306 = vmatpush.bf16.msra.mxu1 %v502_v5  ;;  %v508_v14 = vld [vmem:[%s649_s1 + $0xa0] sm:$0xff]  ;;  %v507_v18 = vld [vmem:[%s649_s1 + $0x98] sm:$0xff]  ;;  %v506_v22 = vld [vmem:[%s649_s1 + $0x90] sm:$0xff] }
   0x8   :  { %319 = vmatpush.bf16.msra.mxu2 %v510_v6  ;;  %v516_v15 = vld [vmem:[%s649_s1 + $0xe0] sm:$0xff]  ;;  %v515_v19 = vld [vmem:[%s649_s1 + $0xd8] sm:$0xff]  ;;  %v514_v23 = vld [vmem:[%s649_s1 + $0xd0] sm:$0xff] }
   0x9   :  { %332 = vmatpush.bf16.msra.mxu3 %v518_v7  ;;  %v489_v24 = vld [vmem:[%s649_s1 + $0x8] sm:$0xff]  ;;  %v20_v26 = vld [vmem:[%s650_s0] sm:$0xff] }
   0xa   :  { %294 = vmatpush.bf16.msra.mxu0 %v493_v8  ;;  %v497_v25 = vld [vmem:[%s649_s1 + $0x48] sm:$0xff]  ;;  %v88_v30 = vunpack.c.l.b16 %v20_v26  ;;  %v89_v31 = vunpack.c.h.b16 %v20_v26  ;;  %v488_v32 = vld [vmem:[%s649_s1] sm:$0xff] }
   0xb   :  { %307 = vmatpush.bf16.msra.mxu1 %v501_v9  ;;  %v505_v27 = vld [vmem:[%s649_s1 + $0x88] sm:$0xff]  ;;  %v496_v33 = vld [vmem:[%s649_s1 + $0x40] sm:$0xff] }
   0xc   :  { %320 = vmatpush.bf16.msra.mxu2 %v509_v10  ;;  %v513_v28 = vld [vmem:[%s649_s1 + $0xc8] sm:$0xff]  ;;  %v504_v36 = vld [vmem:[%s649_s1 + $0x80] sm:$0xff]  ;;  %v92_v38 = vpack.c.b16 %v88_v30, %v88_v30  ;;  %v93_v39 = vpack.c.b16 %v89_v31, %v89_v31 }
   0xd   :  { %333 = vmatpush.bf16.msra.mxu3 %v517_v11  ;;  %v21_v29 = vld [vmem:[%s650_s0 + $0x8] sm:$0xff]  ;;  %v512_v37 = vld [vmem:[%s649_s1 + $0xc0] sm:$0xff] }
   0xe   :  { %295 = vmatpush.bf16.msra.mxu0 %v492_v12  ;;  %v90_v34 = vunpack.c.l.b16 %v21_v29  ;;  %v91_v35 = vunpack.c.h.b16 %v21_v29  ;;  %v520_v48 = vld [vmem:[%s651_s2] ss:$0 sm:$0xff] }
   0xf   :  { %308 = vmatpush.bf16.msra.mxu1 %v500_v13 }
  0x10   :  { %321 = vmatpush.bf16.msra.mxu2 %v508_v14  ;;  %v94_v40 = vpack.c.b16 %v90_v34, %v90_v34  ;;  %v95_v41 = vpack.c.b16 %v91_v35, %v91_v35 }
  0x11   :  { %334 = vmatpush.bf16.msra.mxu3 %v516_v15 }
  0x12   :  { %296 = vmatpush.bf16.msra.mxu0 %v491_v16 }
  0x13   :  { %309 = vmatpush.bf16.msra.mxu1 %v499_v17 }
  0x14   :  { %322 = vmatpush.bf16.msra.mxu2 %v507_v18 }
  0x15   :  { %335 = vmatpush.bf16.msra.mxu3 %v515_v19 }
  0x16   :  { %297 = vmatpush.bf16.msra.mxu0 %v490_v20 }
  0x17   :  { %310 = vmatpush.bf16.msra.mxu1 %v498_v21 }
  0x18   :  { %323 = vmatpush.bf16.msra.mxu2 %v506_v22 }
  0x19   :  { %336 = vmatpush.bf16.msra.mxu3 %v514_v23 }
  0x1a   :  { %298 = vmatpush.bf16.msra.mxu0 %v489_v24 }
  0x1b   :  { %311 = vmatpush.bf16.msra.mxu1 %v497_v25 }
  0x1c   :  { %324 = vmatpush.bf16.msra.mxu2 %v505_v27 }
  0x1d   :  { %337 = vmatpush.bf16.msra.mxu3 %v513_v28 }
  0x1e   :  { %299 = vmatpush.bf16.msra.mxu0 %v488_v32 }
  0x1f   :  { %312 = vmatpush.bf16.msra.mxu1 %v496_v33 }
  0x20   :  { %325 = vmatpush.bf16.msra.mxu2 %v504_v36 }
  0x21   :  { %338 = vmatpush.bf16.msra.mxu3 %v512_v37  ;;  %300 = vmatmul.bf16.vlgmr.msra.gmra.mxu0 %v92_v38 }
  0x22   :  { %313 = vmatmul.bf16.vlgmr.msra.gmra.mxu1 %v93_v39 }
  0x23   :  { %326 = vmatmul.bf16.vlgmr.msra.gmra.mxu2 %v94_v40 }
  0x24   :  { %339 = vmatmul.bf16.vlgmr.msra.gmra.mxu3 %v95_v41 }
  0x9e   :  { %v301_v42 = vpop.f32.mrf.mxu0 }
  0x9f   :  { %v314_v43 = vpop.f32.mrf.mxu1 }
  0xa0   :  { %v315_v44 = vadd.f32 %v314_v43, %v301_v42 }
  0xa6   :  { %v327_v45 = vpop.f32.mrf.mxu2  ;;  %v303_v49 = vpop.f32.mrf.mxu0 }
  0xa7   :  { %v340_v46 = vpop.f32.mrf.mxu3  ;;  %v328_v47 = vadd.f32 %v327_v45, %v315_v44  ;;  %v316_v50 = vpop.f32.mrf.mxu1 }
  0xa9   :  { %v341_v51 = vadd.f32 %v340_v46, %v328_v47 }
  0xab   :  { %v354_v52 = vadd.f32 %v520_v48, %v341_v51 }
  0xad   :  { %355 = vst [vmem:[%s652_s3] sm:$0xff] %v354_v52 }
  0xae   :  { %v329_v53 = vpop.f32.mrf.mxu2 }
  0xaf   :  { %v342_v54 = vpop.f32.mrf.mxu3 }

// kernel: resnet_custom_forward.43
= control target key start
LH: loop header
LB: loop body
LE: loop exit
PB: predicated region body
PF: predicated region fallthrough
CT: control target
= control target key end

     0   :  { %s208_s1 = inlined_call_operand.vmem [shape: bf16[128,128], index: 1, kind: input, shape index: {}]   ;;  %s209_s2 = inlined_call_operand.vmem [shape: f32[1,128], index: 2, kind: input, shape index: {}]   ;;  %s210_s0 = inlined_call_operand.vmem [shape: bf16[8,128], index: 0, kind: input, shape index: {}]   ;;  %s211_s3 = inlined_call_operand.vmem [shape: f32[8,128], index: 3, kind: output, shape index: {}]  }
   0x1   :  { %v153_v0 = vld [vmem:[%s208_s1 + $0x38] sm:$0xff]  ;;  %v152_v1 = vld [vmem:[%s208_s1 + $0x30] sm:$0xff]  ;;  %v151_v2 = vld [vmem:[%s208_s1 + $0x28] sm:$0xff] }
   0x2   :  { %85 = vmatpush.bf16.msra.mxu0 %v153_v0  ;;  %v150_v3 = vld [vmem:[%s208_s1 + $0x20] sm:$0xff]  ;;  %v149_v4 = vld [vmem:[%s208_s1 + $0x18] sm:$0xff]  ;;  %v148_v5 = vld [vmem:[%s208_s1 + $0x10] sm:$0xff] }
   0x3   :  { %v147_v6 = vld [vmem:[%s208_s1 + $0x8] sm:$0xff]  ;;  %v146_v7 = vld [vmem:[%s208_s1] sm:$0xff] }
   0x4   :  { %v20_v8 = vld [vmem:[%s210_s0] sm:$0xf] }
   0x5   :  { %v154_v9 = vld [vmem:[%s209_s2] ss:$0 sm:$0xff] }
   0x6   :  { %86 = vmatpush.bf16.msra.mxu0 %v152_v1 }
   0xa   :  { %87 = vmatpush.bf16.msra.mxu0 %v151_v2 }
   0xe   :  { %88 = vmatpush.bf16.msra.mxu0 %v150_v3 }
  0x12   :  { %89 = vmatpush.bf16.msra.mxu0 %v149_v4 }
  0x16   :  { %90 = vmatpush.bf16.msra.mxu0 %v148_v5 }
  0x1a   :  { %91 = vmatpush.bf16.msra.mxu0 %v147_v6 }
  0x1e   :  { %92 = vmatpush.bf16.msra.mxu0 %v146_v7 }
  0x21   :  { %93 = vmatmul.bf16.vlgmr.msra.gmra.mxu0 %v20_v8 }
  0x9e   :  { %v94_v10 = vpop.f32.mrf.mxu0 }
  0x9f   :  { %v108_v11 = vadd.f32 %v154_v9, %v94_v10 }
  0xa1   :  { %109 = vst [vmem:[%s211_s3] sm:$0xff] %v108_v11 }
  0xa6   :  { %v96_v12 = vpop.f32.mrf.mxu0 }

</bundles_post_ra>
